<compile_context>
chip_gen: v5e
topology: v5e:2x2
jax: 0.10.0
libtpu: 0.0.40
codegen_flags: <defaults>
</compile_context>

<pallas_src>
import functools

import jax
import jax.numpy as jnp
from jax.experimental import pallas as pl
from jax.experimental.pallas import tpu as pltpu


DEFAULT_TILE_B = 8192   # ~1 MiB f32 x tile at D=32; sweep 8192-16384 if needed.
_TILE_GRAN = 1024       # keeps out block rows (tb/128) a multiple of 8 (f32 sublane)


def _round_up(n, m):
    return ((n + m - 1) // m) * m


def _mlp_kernel(x_ref, w1_ref, b1_ref, w2_ref, b2_ref, w3r_ref, b3_ref, o_ref):
    # Layer 1: (TB, D) @ (D, 64) + (1, 64) -> ReLU   (MXU, f32 accumulation)
    w1 = w1_ref[...]
    h1 = jnp.dot(x_ref[...].astype(w1.dtype), w1,
                 preferred_element_type=jnp.float32)
    h1 = jnp.maximum(h1 + b1_ref[...], 0.0)

    # Layer 2: (TB, 64) @ (64, 32) + (1, 32) -> ReLU  (MXU, f32 accumulation)
    w2 = w2_ref[...]
    h2 = jnp.dot(h1.astype(w2.dtype), w2,
                 preferred_element_type=jnp.float32)
    h2 = jnp.maximum(h2 + b2_ref[...], 0.0)

    # Layer 3 (32 -> 1) + sigmoid, lane-dense epilogue:
    #   * VPU multiply against the (1, 32) weight row (no 1-wide MXU matmul),
    #   * tile-preserving reshape (TB, 32) -> (TB/128, 128, 32),
    #   * last-axis reduce -> (TB/128, 128)  (XLU relayout; that unit has slack),
    #   * bias + sigmoid + store on the dense form: ~128x fewer EUP pushes and
    #     unmasked full-lane stores vs. a (TB, 1) column output.
    prod = h2 * w3r_ref[...]                                  # (TB, 32) f32, VPU
    g, lanes = o_ref.shape                                    # (TB/128, 128)
    z = jnp.sum(prod.reshape(g, lanes, prod.shape[-1]), axis=-1)   # (TB/128, 128)
    o_ref[...] = jax.nn.sigmoid(z + b3_ref[...]).astype(o_ref.dtype)


def _choose_tile(batch, tile_b):
    tb = _round_up(max(1, min(tile_b, batch)), _TILE_GRAN)
    if batch > _TILE_GRAN:
        # Guarantee >= 2 grid steps so the "parallel" batch axis can shard
        # across both TensorCores on v7x; large batches get >= 8 steps at the
        # default tile size automatically.
        tb = min(tb, _round_up(-(-batch // 2), _TILE_GRAN))
    return max(tb, _TILE_GRAN)


@functools.partial(jax.jit, static_argnames=("use_bf16_matmul", "tile_b"))
def anomaly_detector_forward(x, params, *, use_bf16_matmul=True,
                             tile_b=DEFAULT_TILE_B):
    """Fused MLP forward. x: (B, input_size) float. Returns (B, 1) float32.

    x may be supplied as bfloat16 to halve HBM traffic (x is ~97% of the bytes
    of this memory-bound kernel); it is cast to the MXU dtype in-kernel.
    """
    w1, b1, w2, b2, w3, b3 = params
    B, D = x.shape
    H1 = w1.shape[1]   # 64
    H2 = w2.shape[1]   # 32

    mm_dtype = jnp.bfloat16 if use_bf16_matmul else jnp.float32
    w1c = w1.astype(mm_dtype)                       # (D, 64)
    w2c = w2.astype(mm_dtype)                       # (64, 32)
    w3_row = w3.reshape(1, H2).astype(jnp.float32)  # (1, 32) for VPU reduce
    b1f = b1.reshape(1, H1).astype(jnp.float32)
    b2f = b2.reshape(1, H2).astype(jnp.float32)
    b3f = b3.reshape(1, 1).astype(jnp.float32)

    tb = _choose_tile(B, tile_b)
    n_blocks = pl.cdiv(B, tb)
    rows_per_block = tb // 128                      # multiple of 8 by construction
    out_rows = n_blocks * rows_per_block            # >= cdiv(B, 128); padded rows sliced off

    x_spec = pl.BlockSpec((tb, D), lambda i: (i, 0))
    out_spec = pl.BlockSpec((rows_per_block, 128), lambda i: (i, 0))

    def resident(arr):
        # Same block index every grid step -> weights stay resident in VMEM.
        return pl.BlockSpec(arr.shape, lambda i: (0, 0))

    itemsize = 2 if use_bf16_matmul else 4
    weight_bytes = (w1c.size + w2c.size) * itemsize + (b1f.size + b2f.size +
                                                       w3_row.size + b3f.size) * 4
    cost = pl.CostEstimate(
        flops=2 * B * (D * H1 + H1 * H2 + H2),
        transcendentals=2 * B,                      # sigmoid ~= exp + reciprocal / row
        bytes_accessed=B * D * x.dtype.itemsize + out_rows * 128 * 4 + weight_bytes,
    )

    # VMEM budget ~1 KiB/row (double-buffered x + f32/bf16 intermediates).
    # Raise the scoped limit when a big tile needs it; cap at 64 MiB so tiles
    # tuned on v5e/v6e (128 MiB) cannot silently exceed v7x's physical VMEM.
    vmem_limit = max(32 * 1024 * 1024,
                     min(tb * 1024 + (2 << 20), 64 * 1024 * 1024))

    out_dense = pl.pallas_call(
        _mlp_kernel,
        out_shape=jax.ShapeDtypeStruct((out_rows, 128), jnp.float32),
        grid=(n_blocks,),
        in_specs=[
            x_spec,
            resident(w1c), resident(b1f),
            resident(w2c), resident(b2f),
            resident(w3_row), resident(b3f),
        ],
        out_specs=out_spec,
        compiler_params=pltpu.CompilerParams(
            dimension_semantics=("parallel",),
            vmem_limit_bytes=vmem_limit,
        ),
        cost_estimate=cost,
    )(x, w1c, b1f, w2c, b2f, w3_row, b3f)

    # Free metadata reshape + tiny slice back to the module's (B, 1) output.
    return out_dense.reshape(-1)[:B].reshape(B, 1)


def init_params(key, input_size):
    """Deterministic init mirroring torch.nn.Linear (weights stored (in, out))."""
    k1, k2, k3, k4, k5, k6 = jax.random.split(key, 6)

    def uniform(k, shape, fan_in):
        bound = 1.0 / jnp.sqrt(fan_in)
        return jax.random.uniform(k, shape, jnp.float32, -bound, bound)

    w1 = uniform(k1, (input_size, 64), input_size)
    b1 = uniform(k2, (1, 64), input_size)
    w2 = uniform(k3, (64, 32), 64)
    b2 = uniform(k4, (1, 32), 64)
    w3 = uniform(k5, (32, 1), 32)
    b3 = uniform(k6, (1, 1), 32)
    return (w1, b1, w2, b2, w3, b3)


def reference_forward(x, params):
    w1, b1, w2, b2, w3, b3 = params
    h1 = jax.nn.relu(x @ w1 + b1)
    h2 = jax.nn.relu(h1 @ w2 + b2)
    return jax.nn.sigmoid(h2 @ w3 + b3)


if __name__ == "__main__":
    input_size = 32
    batch = 8

    key = jax.random.PRNGKey(0)
    kx, kp, kx2 = jax.random.split(key, 3)
    x = jax.random.normal(kx, (batch, input_size), jnp.float32)
    params = init_params(kp, input_size)
    ref = reference_forward(x, params)

    # Exact f32 path (single grid step, lane-padded output sliced back to (B, 1)).
    out_f32 = jax.block_until_ready(
        anomaly_detector_forward(x, params, use_bf16_matmul=False))
    assert out_f32.shape == (batch, 1)
    assert jnp.allclose(out_f32, ref, atol=1e-5, rtol=1e-5), "f32 mismatch"

    # bf16-MXU path (f32 accumulation) -> looser tolerance.
    out_bf16 = jax.block_until_ready(
        anomaly_detector_forward(x, params, use_bf16_matmul=True))
    assert jnp.allclose(out_bf16, ref, atol=5e-2, rtol=5e-2), "bf16 mismatch"

    # Multi-step grid with a partial last x block and padded lane-dense output.
    x_big = jax.random.normal(kx2, (3000, input_size), jnp.float32)
    ref_big = reference_forward(x_big, params)
    out_big = jax.block_until_ready(
        anomaly_detector_forward(x_big, params, use_bf16_matmul=False,
                                 tile_b=2048))
    assert out_big.shape == (3000, 1)
    assert jnp.allclose(out_big, ref_big, atol=1e-5, rtol=1e-5), "tiled mismatch"

    print("KERNEL_OK")
</pallas_src>

<mosaic_0001>
module attributes {stable_mosaic.version = 11 : i64} {
  func.func @_mlp_kernel(%arg0: i32, %arg1: memref<1024x32xf32, #tpu.memory_space<vmem>>, %arg2: memref<32x64xf32, #tpu.memory_space<vmem>>, %arg3: memref<1x64xf32, #tpu.memory_space<vmem>>, %arg4: memref<64x32xf32, #tpu.memory_space<vmem>>, %arg5: memref<1x32xf32, #tpu.memory_space<vmem>>, %arg6: memref<1x32xf32, #tpu.memory_space<vmem>>, %arg7: memref<1x1xf32, #tpu.memory_space<vmem>>, %arg8: memref<8x128xf32, #tpu.memory_space<vmem>>) attributes {dimension_semantics = [#tpu.dimension_semantics<parallel>], iteration_bounds = array<i64: 1>, scalar_prefetch = 0 : i64, scratch_operands = 0 : i64, tpu.core_type = #tpu.core_type<tc>, window_params = [{transform_indices = @transform_0, window_bounds = array<i64: 1024, 32>}, {pipeline_mode = #tpu.pipeline_mode<synchronous>, transform_indices = @transform_1, window_bounds = array<i64: 32, 64>}, {pipeline_mode = #tpu.pipeline_mode<synchronous>, transform_indices = @transform_2, window_bounds = array<i64: 1, 64>}, {pipeline_mode = #tpu.pipeline_mode<synchronous>, transform_indices = @transform_3, window_bounds = array<i64: 64, 32>}, {pipeline_mode = #tpu.pipeline_mode<synchronous>, transform_indices = @transform_4, window_bounds = array<i64: 1, 32>}, {pipeline_mode = #tpu.pipeline_mode<synchronous>, transform_indices = @transform_5, window_bounds = array<i64: 1, 32>}, {pipeline_mode = #tpu.pipeline_mode<synchronous>, transform_indices = @transform_6, window_bounds = array<i64: 1, 1>}, {transform_indices = @transform_7, window_bounds = array<i64: 8, 128>}]} {
    %c0 = arith.constant 0 : index
    %c0_0 = arith.constant 0 : index
    %0 = vector.load %arg2[%c0, %c0_0] : memref<32x64xf32, #tpu.memory_space<vmem>>, vector<32x64xf32>
    %c0_1 = arith.constant 0 : index
    %c0_2 = arith.constant 0 : index
    %1 = vector.load %arg1[%c0_1, %c0_2] : memref<1024x32xf32, #tpu.memory_space<vmem>>, vector<1024x32xf32>
    %cst = arith.constant dense<0.000000e+00> : vector<1024x64xf32>
    %2 = tpu.matmul %1, %0, %cst {dimension_numbers = #tpu.dot_dimension_numbers<[1], [0], [0], [1], [0, 0, 1, 1], [], []>} : vector<1024x32xf32>, vector<32x64xf32>, vector<1024x64xf32> -> vector<1024x64xf32>
    %c0_3 = arith.constant 0 : index
    %c0_4 = arith.constant 0 : index
    %3 = vector.load %arg3[%c0_3, %c0_4] : memref<1x64xf32, #tpu.memory_space<vmem>>, vector<1x64xf32>
    %4 = vector.broadcast %3 : vector<1x64xf32> to vector<1024x64xf32>
    %5 = arith.addf %2, %4 : vector<1024x64xf32>
    %cst_5 = arith.constant 0.000000e+00 : f32
    %6 = vector.broadcast %cst_5 : f32 to vector<1024x64xf32>
    %7 = arith.maximumf %5, %6 : vector<1024x64xf32>
    %c0_6 = arith.constant 0 : index
    %c0_7 = arith.constant 0 : index
    %8 = vector.load %arg4[%c0_6, %c0_7] : memref<64x32xf32, #tpu.memory_space<vmem>>, vector<64x32xf32>
    %cst_8 = arith.constant dense<0.000000e+00> : vector<1024x32xf32>
    %9 = tpu.matmul %7, %8, %cst_8 {dimension_numbers = #tpu.dot_dimension_numbers<[1], [0], [0], [1], [0, 0, 1, 1], [], []>} : vector<1024x64xf32>, vector<64x32xf32>, vector<1024x32xf32> -> vector<1024x32xf32>
    %c0_9 = arith.constant 0 : index
    %c0_10 = arith.constant 0 : index
    %10 = vector.load %arg5[%c0_9, %c0_10] : memref<1x32xf32, #tpu.memory_space<vmem>>, vector<1x32xf32>
    %11 = vector.broadcast %10 : vector<1x32xf32> to vector<1024x32xf32>
    %12 = arith.addf %9, %11 : vector<1024x32xf32>
    %cst_11 = arith.constant 0.000000e+00 : f32
    %13 = vector.broadcast %cst_11 : f32 to vector<1024x32xf32>
    %14 = arith.maximumf %12, %13 : vector<1024x32xf32>
    %c0_12 = arith.constant 0 : index
    %c0_13 = arith.constant 0 : index
    %15 = vector.load %arg6[%c0_12, %c0_13] : memref<1x32xf32, #tpu.memory_space<vmem>>, vector<1x32xf32>
    %16 = vector.broadcast %15 : vector<1x32xf32> to vector<1024x32xf32>
    %17 = arith.mulf %14, %16 : vector<1024x32xf32>
    %18 = vector.shape_cast %17 : vector<1024x32xf32> to vector<8x128x32xf32>
    %cst_14 = arith.constant dense<0.000000e+00> : vector<8x128xf32>
    %19 = vector.multi_reduction <add>, %18, %cst_14 [2] : vector<8x128x32xf32> to vector<8x128xf32>
    %c0_15 = arith.constant 0 : index
    %c0_16 = arith.constant 0 : index
    %20 = vector.load %arg7[%c0_15, %c0_16] : memref<1x1xf32, #tpu.memory_space<vmem>>, vector<1x1xf32>
    %21 = vector.broadcast %20 : vector<1x1xf32> to vector<8x128xf32>
    %22 = arith.addf %19, %21 : vector<8x128xf32>
    %23 = arith.negf %22 : vector<8x128xf32>
    %24 = math.exp %23 : vector<8x128xf32>
    %cst_17 = arith.constant 1.000000e+00 : f32
    %25 = vector.broadcast %cst_17 : f32 to vector<8x128xf32>
    %26 = arith.addf %25, %24 : vector<8x128xf32>
    %27 = arith.divf %25, %26 : vector<8x128xf32>
    %c0_18 = arith.constant 0 : index
    %c0_19 = arith.constant 0 : index
    %28 = vector.load %arg8[%c0_18, %c0_19] : memref<8x128xf32, #tpu.memory_space<vmem>>, vector<8x128xf32>
    tpu.vector_store %arg8[%c0_18, %c0_19], %27 {strides = array<i32>} : memref<8x128xf32, #tpu.memory_space<vmem>>, vector<8x128xf32>,
    return
  }
  func.func @transform_0(%arg0: i32) -> (i32, i32) {
    %c0_i32 = arith.constant 0 : i32
    %c0_i32_0 = arith.constant 0 : i32
    return %arg0, %c0_i32 : i32, i32
  }
  func.func @transform_1(%arg0: i32) -> (i32, i32) {
    %c0_i32 = arith.constant 0 : i32
    %c0_i32_0 = arith.constant 0 : i32
    %c0_i32_1 = arith.constant 0 : i32
    return %c0_i32, %c0_i32_0 : i32, i32
  }
  func.func @transform_2(%arg0: i32) -> (i32, i32) {
    %c0_i32 = arith.constant 0 : i32
    %c0_i32_0 = arith.constant 0 : i32
    %c0_i32_1 = arith.constant 0 : i32
    return %c0_i32, %c0_i32_0 : i32, i32
  }
  func.func @transform_3(%arg0: i32) -> (i32, i32) {
    %c0_i32 = arith.constant 0 : i32
    %c0_i32_0 = arith.constant 0 : i32
    %c0_i32_1 = arith.constant 0 : i32
    return %c0_i32, %c0_i32_0 : i32, i32
  }
  func.func @transform_4(%arg0: i32) -> (i32, i32) {
    %c0_i32 = arith.constant 0 : i32
    %c0_i32_0 = arith.constant 0 : i32
    %c0_i32_1 = arith.constant 0 : i32
    return %c0_i32, %c0_i32_0 : i32, i32
  }
  func.func @transform_5(%arg0: i32) -> (i32, i32) {
    %c0_i32 = arith.constant 0 : i32
    %c0_i32_0 = arith.constant 0 : i32
    %c0_i32_1 = arith.constant 0 : i32
    return %c0_i32, %c0_i32_0 : i32, i32
  }
  func.func @transform_6(%arg0: i32) -> (i32, i32) {
    %c0_i32 = arith.constant 0 : i32
    %c0_i32_0 = arith.constant 0 : i32
    %c0_i32_1 = arith.constant 0 : i32
    return %c0_i32, %c0_i32_0 : i32, i32
  }
  func.func @transform_7(%arg0: i32) -> (i32, i32) {
    %c0_i32 = arith.constant 0 : i32
    %c0_i32_0 = arith.constant 0 : i32
    return %arg0, %c0_i32 : i32, i32
  }
}

</mosaic_0001>

<bundles_post_ra>
// kernel: anomaly_detector_forward.1
= control target key start
LH: loop header
LB: loop body
LE: loop exit
PB: predicated region body
PF: predicated region fallthrough
CT: control target
= control target key end

     0   :  { %vm164_vm0 = vcmask 261120   ;;  %vm1090_vm1 = vcmask 523264   ;;  %v6449_v62 = vmov 0   ;;  %vm5220_vm10 = vcmask 130112   ;;  %s9734_s1 = inlined_call_operand.vmem [shape: f32[32,64], index: 1, kind: input, shape index: {}]   ;;  %s9735_s0 = inlined_call_operand.vmem [shape: f32[8,32], index: 0, kind: input, shape index: {}]   ;;  %s9736_s2 = inlined_call_operand.vmem [shape: f32[1,64], index: 2, kind: input, shape index: {}]   ;;  %s9737_s3 = inlined_call_operand.vmem [shape: f32[64,32], index: 3, kind: input, shape index: {}]   ;;  %s9738_s4 = inlined_call_operand.vmem [shape: f32[1,32], index: 4, kind: input, shape index: {}]   ;;  %s9739_s5 = inlined_call_operand.vmem [shape: f32[1,32], index: 5, kind: input, shape index: {}]   ;;  %s9740_s6 = inlined_call_operand.<no memory space> [shape: f32[1,1], index: 6, kind: input, shape index: {}]   ;;  %s9741_s7 = inlined_call_operand.vmem [shape: f32[8,128], index: 7, kind: output, shape index: {}]  }
   0x1   :  { %v31_v0 = vld [vmem:[%s9734_s1 + $0x18] sm:$0xff]  ;;  %v30_v1 = vld [vmem:[%s9734_s1 + $0x10] sm:$0xff]  ;;  %v29_v2 = vld [vmem:[%s9734_s1 + $0x8] sm:$0xff]  ;;  %v12_v57 = vstv %s9740_s6  ;;  %5912 = vset.pattern.permute.xlu0 %v6449_v62  ;;  %vm5224_vm15 = vcmask 195712  }
   0x2   :  { %561 = vmatpush.msra.mxu0 %v31_v0  ;;  %5899 = vmatpush.msra.mxu3 %v31_v0  ;;  %v28_v3 = vld [vmem:[%s9734_s1] sm:$0xff]  ;;  %v33_v5 = vld [vmem:[%s9735_s0 + $0x8] sm:$0xff]  ;;  %v34_v6 = vld [vmem:[%s9735_s0 + $0x10] sm:$0xff]  ;;  %13 = vst [vmem:[#allocation2] sm:$0x1] %v12_v57 }
   0x3   :  { %v32_v4 = vld [vmem:[%s9735_s0] sm:$0xff]  ;;  %v35_v7 = vld [vmem:[%s9735_s0 + $0x18] sm:$0xff]  ;;  %v37_v9 = vld [vmem:[%s9735_s0 + $0x28] sm:$0xff] }
   0x4   :  { %562 = vmatpush.msra.mxu0 %v30_v1  ;;  %5900 = vmatpush.msra.mxu3 %v30_v1  ;;  %v36_v8 = vld [vmem:[%s9735_s0 + $0x20] sm:$0xff]  ;;  %v38_v10 = vld [vmem:[%s9735_s0 + $0x30] sm:$0xff]  ;;  %v39_v11 = vld [vmem:[%s9735_s0 + $0x38] sm:$0xff] }
   0x5   :  { %v40_v12 = vld [vmem:[%s9735_s0 + $0x40] sm:$0xff]  ;;  %v41_v13 = vld [vmem:[%s9735_s0 + $0x48] sm:$0xff]  ;;  %v42_v14 = vld [vmem:[%s9735_s0 + $0x50] sm:$0xff] }
   0x6   :  { %563 = vmatpush.msra.mxu0 %v29_v2  ;;  %5901 = vmatpush.msra.mxu3 %v29_v2  ;;  %v1085_v15 = vld [vmem:[%s9737_s3 + $0x38] sm:$0xff]  ;;  %v1084_v16 = vld [vmem:[%s9737_s3 + $0x30] sm:$0xff]  ;;  %v1083_v17 = vld [vmem:[%s9737_s3 + $0x28] sm:$0xff] }
   0x7   :  { %1483 = vmatpush.msra.mxu1 %v1085_v15  ;;  %5903 = vmatpush.msra.mxu2 %v1085_v15  ;;  %v43_v18 = vld [vmem:[%s9735_s0 + $0x58] sm:$0xff]  ;;  %v1082_v19 = vld [vmem:[%s9737_s3 + $0x20] sm:$0xff]  ;;  %v1080_v21 = vld [vmem:[%s9737_s3 + $0x10] sm:$0xff] }
   0x8   :  { %564 = vmatpush.msra.mxu0 %v28_v3  ;;  %5902 = vmatpush.msra.mxu3 %v28_v3  ;;  %v1081_v20 = vld [vmem:[%s9737_s3 + $0x18] sm:$0xff]  ;;  %v44_v22 = vld [vmem:[%s9735_s0 + $0x60] sm:$0xff]  ;;  %v1079_v23 = vld [vmem:[%s9737_s3 + $0x8] sm:$0xff] }
   0x9   :  { %5515 = vmatmul.msk.f32.vlgmr.msra.gmra.mxu0 %vm164_vm0, %v32_v4  ;;  %1484 = vmatpush.msra.mxu1 %v1084_v16  ;;  %v1078_v24 = vld [vmem:[%s9737_s3] sm:$0xff]  ;;  %v45_v25 = vld [vmem:[%s9735_s0 + $0x68] sm:$0xff]  ;;  %v46_v26 = vld [vmem:[%s9735_s0 + $0x70] sm:$0xff] }
   0xa   :  { %5904 = vmatpush.msra.mxu2 %v1084_v16  ;;  %v47_v27 = vld [vmem:[%s9735_s0 + $0x78] sm:$0xff]  ;;  %v6593_v28 = vld [vmem:[%s9736_s2] ss:$0 sm:$0xff]  ;;  %v49_v34 = vld [vmem:[%s9735_s0 + $0x88] sm:$0xff] }
   0xb   :  { %1485 = vmatpush.msra.mxu1 %v1083_v17  ;;  %v48_v30 = vld [vmem:[%s9735_s0 + $0x80] sm:$0xff]  ;;  %v50_v38 = vld [vmem:[%s9735_s0 + $0x90] sm:$0xff]  ;;  %v51_v42 = vld [vmem:[%s9735_s0 + $0x98] sm:$0xff] }
   0xc   :  { %5905 = vmatpush.msra.mxu2 %v1083_v17  ;;  %v52_v46 = vld [vmem:[%s9735_s0 + $0xa0] sm:$0xff]  ;;  %v53_v50 = vld [vmem:[%s9735_s0 + $0xa8] sm:$0xff]  ;;  %v54_v54 = vld [vmem:[%s9735_s0 + $0xb0] sm:$0xff] }
   0xd   :  { %1486 = vmatpush.msra.mxu1 %v1082_v19  ;;  %v55_v59 = vld [vmem:[%s9735_s0 + $0xb8] sm:$0xff]  ;;  %v5914_v63 = vld [vmem:[#allocation2] ss:$0 sm:$0xff] }
   0xe   :  { %5906 = vmatpush.msra.mxu2 %v1082_v19  ;;  %v56_v1 = vld [vmem:[%s9735_s0 + $0xc0] sm:$0xff]  ;;  %2524 = vperm.xlu0 %5912, %v5914_v63   ;;  %v67_v62 = vld [vmem:[%s9735_s0 + $0x118] sm:$0xff] }
   0xf   :  { %1487 = vmatpush.msra.mxu1 %v1081_v20  ;;  %v60_v17 = vld [vmem:[%s9735_s0 + $0xe0] sm:$0xff] }
  0x10   :  { %5907 = vmatpush.msra.mxu2 %v1081_v20 }
  0x11   :  { %5516 = vmatmul.msk.f32.gmra.mxu0 %vm164_vm0, %v33_v5  ;;  %1488 = vmatpush.msra.mxu1 %v1080_v21  ;;  %v57_v5 = vld [vmem:[%s9735_s0 + $0xc8] sm:$0xff] }
  0x12   :  { %5908 = vmatpush.msra.mxu2 %v1080_v21  ;;  %v61_v21 = vld [vmem:[%s9735_s0 + $0xe8] sm:$0xff] }
  0x13   :  { %1489 = vmatpush.msra.mxu1 %v1079_v23 }
  0x14   :  { %5909 = vmatpush.msra.mxu2 %v1079_v23 }
  0x15   :  { %1490 = vmatpush.msra.mxu1 %v1078_v24 }
  0x16   :  { %5910 = vmatpush.msra.mxu2 %v1078_v24 }
  0x19   :  { %5517 = vmatmul.msk.f32.gmra.mxu0 %vm164_vm0, %v34_v6 }
  0x21   :  { %5518 = vmatmul.msk.f32.gmra.mxu0 %vm164_vm0, %v35_v7 }
  0x29   :  { %5519 = vmatmul.msk.f32.gmra.mxu0 %vm164_vm0, %v36_v8 }
  0x31   :  { %5520 = vmatmul.msk.f32.gmra.mxu0 %vm164_vm0, %v37_v9  ;;  %v58_v9 = vld [vmem:[%s9735_s0 + $0xd0] sm:$0xff] }
  0x39   :  { %5521 = vmatmul.msk.f32.gmra.mxu0 %vm164_vm0, %v38_v10 }
  0x41   :  { %5522 = vmatmul.msk.f32.gmra.mxu0 %vm164_vm0, %v39_v11 }
  0x49   :  { %5523 = vmatmul.msk.f32.gmra.mxu0 %vm164_vm0, %v40_v12 }
  0x51   :  { %5524 = vmatmul.msk.f32.gmra.mxu0 %vm164_vm0, %v41_v13  ;;  %v59_v13 = vld [vmem:[%s9735_s0 + $0xd8] sm:$0xff] }
  0x59   :  { %5525 = vmatmul.msk.f32.gmra.mxu0 %vm164_vm0, %v42_v14 }
  0x61   :  { %5526 = vmatmul.msk.f32.gmra.mxu0 %vm164_vm0, %v43_v18 }
  0x69   :  { %5527 = vmatmul.msk.f32.gmra.mxu0 %vm164_vm0, %v44_v22 }
  0x71   :  { %5528 = vmatmul.msk.f32.gmra.mxu0 %vm164_vm0, %v45_v25  ;;  %v62_v25 = vld [vmem:[%s9735_s0 + $0xf0] sm:$0xff] }
  0x79   :  { %5529 = vmatmul.msk.f32.gmra.mxu0 %vm164_vm0, %v46_v26 }
  0x81   :  { %5530 = vmatmul.msk.f32.gmra.mxu0 %vm164_vm0, %v47_v27 }
  0x86   :  { %v566_v29 = vpop.f32.mrf.mxu0 }
  0x87   :  { %v567_v31 = vadd.f32 %v6593_v28, %v566_v29 }
  0x89   :  { %v950_v32 = vmax.f32 %v567_v31, 0.0  ;;  %5531 = vmatmul.msk.f32.gmra.mxu0 %vm164_vm0, %v48_v30  ;;  %v63_v30 = vld [vmem:[%s9735_s0 + $0xf8] sm:$0xff] }
  0x8b   :  { %5643 = vmatmul.msk.f32.vlgmr.msra.gmra.mxu1 %vm1090_vm1, %v950_v32 }
  0x8e   :  { %v569_v33 = vpop.f32.mrf.mxu0 }
  0x8f   :  { %v570_v35 = vadd.f32 %v6593_v28, %v569_v33  ;;  %v6697_v33 = vld [vmem:[%s9738_s4] ss:$0 sm:$0xff] }
  0x91   :  { %v951_v36 = vmax.f32 %v570_v35, 0.0  ;;  %5532 = vmatmul.msk.f32.gmra.mxu0 %vm164_vm0, %v49_v34  ;;  %v64_v35 = vld [vmem:[%s9735_s0 + $0x100] sm:$0xff] }
  0x93   :  { %5644 = vmatmul.msk.f32.gmra.mxu1 %vm1090_vm1, %v951_v36 }
  0x96   :  { %v572_v37 = vpop.f32.mrf.mxu0 }
  0x97   :  { %v573_v39 = vadd.f32 %v6593_v28, %v572_v37 }
  0x99   :  { %v952_v40 = vmax.f32 %v573_v39, 0.0  ;;  %5533 = vmatmul.msk.f32.gmra.mxu0 %vm164_vm0, %v50_v38 }
  0x9b   :  { %5645 = vmatmul.msk.f32.gmra.mxu1 %vm1090_vm1, %v952_v40  ;;  %v6708_v40 = vld [vmem:[%s9739_s5] ss:$0 sm:$0xff] }
  0x9e   :  { %v575_v41 = vpop.f32.mrf.mxu0 }
  0x9f   :  { %v576_v43 = vadd.f32 %v6593_v28, %v575_v41 }
  0xa1   :  { %v953_v44 = vmax.f32 %v576_v43, 0.0  ;;  %5534 = vmatmul.msk.f32.gmra.mxu0 %vm164_vm0, %v51_v42 }
  0xa3   :  { %5646 = vmatmul.msk.f32.gmra.mxu1 %vm1090_vm1, %v953_v44  ;;  %v65_v44 = vld [vmem:[%s9735_s0 + $0x108] sm:$0xff] }
  0xa6   :  { %v578_v45 = vpop.f32.mrf.mxu0 }
  0xa7   :  { %v579_v47 = vadd.f32 %v6593_v28, %v578_v45 }
  0xa9   :  { %v954_v48 = vmax.f32 %v579_v47, 0.0  ;;  %5535 = vmatmul.msk.f32.gmra.mxu0 %vm164_vm0, %v52_v46 }
  0xab   :  { %5647 = vmatmul.msk.f32.gmra.mxu1 %vm1090_vm1, %v954_v48 }
  0xae   :  { %v581_v49 = vpop.f32.mrf.mxu0 }
  0xaf   :  { %v582_v51 = vadd.f32 %v6593_v28, %v581_v49 }
  0xb1   :  { %v955_v52 = vmax.f32 %v582_v51, 0.0  ;;  %5536 = vmatmul.msk.f32.gmra.mxu0 %vm164_vm0, %v53_v50 }
  0xb3   :  { %5648 = vmatmul.msk.f32.gmra.mxu1 %vm1090_vm1, %v955_v52 }
  0xb6   :  { %v584_v53 = vpop.f32.mrf.mxu0 }
  0xb7   :  { %v585_v55 = vadd.f32 %v6593_v28, %v584_v53  ;;  %v66_v53 = vld [vmem:[%s9735_s0 + $0x110] sm:$0xff] }
  0xb9   :  { %v956_v56 = vmax.f32 %v585_v55, 0.0  ;;  %5537 = vmatmul.msk.f32.gmra.mxu0 %vm164_vm0, %v54_v54 }
  0xbb   :  { %5649 = vmatmul.msk.f32.gmra.mxu1 %vm1090_vm1, %v956_v56 }
  0xbe   :  { %v587_v58 = vpop.f32.mrf.mxu0 }
  0xbf   :  { %v588_v60 = vadd.f32 %v6593_v28, %v587_v58 }
  0xc1   :  { %v957_v61 = vmax.f32 %v588_v60, 0.0  ;;  %5538 = vmatmul.msk.f32.gmra.mxu0 %vm164_vm0, %v55_v59 }
  0xc3   :  { %5650 = vmatmul.msk.f32.gmra.mxu1 %vm1090_vm1, %v957_v61 }
  0xc6   :  { %v590_v0 = vpop.f32.mrf.mxu0 }
  0xc7   :  { %v591_v2 = vadd.f32 %v6593_v28, %v590_v0 }
  0xc9   :  { %v958_v3 = vmax.f32 %v591_v2, 0.0  ;;  %5539 = vmatmul.msk.f32.gmra.mxu0 %vm164_vm0, %v56_v1 }
  0xcb   :  { %5651 = vmatmul.msk.f32.gmra.mxu1 %vm1090_vm1, %v958_v3 }
  0xce   :  { %v593_v4 = vpop.f32.mrf.mxu0 }
  0xcf   :  { %v594_v6 = vadd.f32 %v6593_v28, %v593_v4 }
  0xd1   :  { %v959_v7 = vmax.f32 %v594_v6, 0.0  ;;  %5540 = vmatmul.msk.f32.gmra.mxu0 %vm164_vm0, %v57_v5 }
  0xd3   :  { %5652 = vmatmul.msk.f32.gmra.mxu1 %vm1090_vm1, %v959_v7  ;;  %v68_v7 = vld [vmem:[%s9735_s0 + $0x120] sm:$0xff] }
  0xd6   :  { %v596_v8 = vpop.f32.mrf.mxu0 }
  0xd7   :  { %v597_v10 = vadd.f32 %v6593_v28, %v596_v8 }
  0xd9   :  { %v960_v11 = vmax.f32 %v597_v10, 0.0  ;;  %5541 = vmatmul.msk.f32.gmra.mxu0 %vm164_vm0, %v58_v9 }
  0xdb   :  { %5653 = vmatmul.msk.f32.gmra.mxu1 %vm1090_vm1, %v960_v11 }
  0xde   :  { %v599_v12 = vpop.f32.mrf.mxu0 }
  0xdf   :  { %v600_v14 = vadd.f32 %v6593_v28, %v599_v12 }
  0xe1   :  { %v961_v15 = vmax.f32 %v600_v14, 0.0  ;;  %5542 = vmatmul.msk.f32.gmra.mxu0 %vm164_vm0, %v59_v13 }
  0xe3   :  { %5654 = vmatmul.msk.f32.gmra.mxu1 %vm1090_vm1, %v961_v15 }
  0xe6   :  { %v602_v16 = vpop.f32.mrf.mxu0 }
  0xe7   :  { %v603_v18 = vadd.f32 %v6593_v28, %v602_v16  ;;  %v69_v16 = vld [vmem:[%s9735_s0 + $0x128] sm:$0xff] }
  0xe9   :  { %v962_v19 = vmax.f32 %v603_v18, 0.0  ;;  %5543 = vmatmul.msk.f32.gmra.mxu0 %vm164_vm0, %v60_v17 }
  0xeb   :  { %5655 = vmatmul.msk.f32.gmra.mxu1 %vm1090_vm1, %v962_v19 }
  0xee   :  { %v605_v20 = vpop.f32.mrf.mxu0 }
  0xef   :  { %v606_v22 = vadd.f32 %v6593_v28, %v605_v20 }
  0xf1   :  { %v963_v23 = vmax.f32 %v606_v22, 0.0  ;;  %5544 = vmatmul.msk.f32.gmra.mxu0 %vm164_vm0, %v61_v21 }
  0xf3   :  { %5656 = vmatmul.msk.f32.gmra.mxu1 %vm1090_vm1, %v963_v23 }
  0xf6   :  { %v608_v24 = vpop.f32.mrf.mxu0 }
  0xf7   :  { %v609_v26 = vadd.f32 %v6593_v28, %v608_v24 }
  0xf9   :  { %v964_v27 = vmax.f32 %v609_v26, 0.0  ;;  %5545 = vmatmul.msk.f32.gmra.mxu0 %vm164_vm0, %v62_v25  ;;  %v70_v25 = vld [vmem:[%s9735_s0 + $0x130] sm:$0xff] }
  0xfb   :  { %5657 = vmatmul.msk.f32.gmra.mxu1 %vm1090_vm1, %v964_v27 }
  0xfe   :  { %v611_v29 = vpop.f32.mrf.mxu0 }
  0xff   :  { %v612_v31 = vadd.f32 %v6593_v28, %v611_v29 }
 0x101   :  { %v965_v32 = vmax.f32 %v612_v31, 0.0  ;;  %5546 = vmatmul.msk.f32.gmra.mxu0 %vm164_vm0, %v63_v30 }
 0x103   :  { %5658 = vmatmul.msk.f32.gmra.mxu1 %vm1090_vm1, %v965_v32 }
 0x106   :  { %v614_v34 = vpop.f32.mrf.mxu0 }
 0x107   :  { %v615_v36 = vadd.f32 %v6593_v28, %v614_v34 }
 0x108   :  { %v1492_v37 = vpop.f32.mrf.mxu1 }
 0x109   :  { %v966_v38 = vmax.f32 %v615_v36, 0.0  ;;  %v1493_v39 = vadd.f32 %v6697_v33, %v1492_v37  ;;  %5547 = vmatmul.msk.f32.gmra.mxu0 %vm164_vm0, %v64_v35  ;;  %v71_v36 = vld [vmem:[%s9735_s0 + $0x138] sm:$0xff] }
 0x10b   :  { %v1876_v41 = vmax.f32 %v1493_v39, 0.0  ;;  %5659 = vmatmul.msk.f32.gmra.mxu1 %vm1090_vm1, %v966_v38 }
 0x10d   :  { %v2008_v42 = vmul.f32 %v6708_v40, %v1876_v41 }
 0x10e   :  { %v617_v43 = vpop.f32.mrf.mxu0 }
 0x10f   :  { %v618_v45 = vadd.f32 %v6593_v28, %v617_v43  ;;  %v2136_v46 = vsel %vm164_vm0, %v2008_v42, 0.0 }
 0x110   :  { %v1495_v47 = vpop.f32.mrf.mxu1  ;;  %2137 = vadd.xlane.f32.xlu0 %v2136_v46  ;;  %v72_v46 = vld [vmem:[%s9735_s0 + $0x140] sm:$0xff] }
 0x111   :  { %v967_v48 = vmax.f32 %v618_v45, 0.0  ;;  %v1496_v49 = vadd.f32 %v6697_v33, %v1495_v47  ;;  %5548 = vmatmul.msk.f32.gmra.mxu0 %vm164_vm0, %v65_v44 }
 0x113   :  { %v1877_v50 = vmax.f32 %v1496_v49, 0.0  ;;  %5660 = vmatmul.msk.f32.gmra.mxu1 %vm1090_vm1, %v967_v48 }
 0x115   :  { %v2009_v51 = vmul.f32 %v6708_v40, %v1877_v50 }
 0x116   :  { %v620_v52 = vpop.f32.mrf.mxu0 }
 0x117   :  { %v621_v54 = vadd.f32 %v6593_v28, %v620_v52  ;;  %v2139_v55 = vsel %vm164_vm0, %v2009_v51, 0.0 }
 0x118   :  { %v1498_v56 = vpop.f32.mrf.mxu1  ;;  %2140 = vadd.xlane.f32.xlu0 %v2139_v55  ;;  %v73_v55 = vld [vmem:[%s9735_s0 + $0x148] sm:$0xff] }
 0x119   :  { %v968_v57 = vmax.f32 %v621_v54, 0.0  ;;  %v1499_v58 = vadd.f32 %v6697_v33, %v1498_v56  ;;  %5549 = vmatmul.msk.f32.gmra.mxu0 %vm164_vm0, %v66_v53 }
 0x11b   :  { %v1878_v59 = vmax.f32 %v1499_v58, 0.0  ;;  %5661 = vmatmul.msk.f32.gmra.mxu1 %vm1090_vm1, %v968_v57 }
 0x11d   :  { %v2010_v60 = vmul.f32 %v6708_v40, %v1878_v59 }
 0x11e   :  { %v623_v61 = vpop.f32.mrf.mxu0 }
 0x11f   :  { %v624_v63 = vadd.f32 %v6593_v28, %v623_v61  ;;  %v2142_v0 = vsel %vm164_vm0, %v2010_v60, 0.0 }
 0x120   :  { %v1501_v1 = vpop.f32.mrf.mxu1  ;;  %2143 = vadd.xlane.f32.xlu1 %v2142_v0  ;;  %v74_v0 = vld [vmem:[%s9735_s0 + $0x150] sm:$0xff] }
 0x121   :  { %v969_v2 = vmax.f32 %v624_v63, 0.0  ;;  %v1502_v3 = vadd.f32 %v6697_v33, %v1501_v1  ;;  %5550 = vmatmul.msk.f32.gmra.mxu0 %vm164_vm0, %v67_v62 }
 0x123   :  { %v1879_v4 = vmax.f32 %v1502_v3, 0.0  ;;  %5662 = vmatmul.msk.f32.gmra.mxu1 %vm1090_vm1, %v969_v2 }
 0x125   :  { %v2011_v5 = vmul.f32 %v6708_v40, %v1879_v4 }
 0x126   :  { %v626_v6 = vpop.f32.mrf.mxu0 }
 0x127   :  { %v627_v8 = vadd.f32 %v6593_v28, %v626_v6  ;;  %v2145_v9 = vsel %vm164_vm0, %v2011_v5, 0.0 }
 0x128   :  { %v1504_v10 = vpop.f32.mrf.mxu1  ;;  %2146 = vadd.xlane.f32.xlu1 %v2145_v9  ;;  %v75_v9 = vld [vmem:[%s9735_s0 + $0x158] sm:$0xff] }
 0x129   :  { %v970_v11 = vmax.f32 %v627_v8, 0.0  ;;  %v1505_v12 = vadd.f32 %v6697_v33, %v1504_v10  ;;  %5551 = vmatmul.msk.f32.gmra.mxu0 %vm164_vm0, %v68_v7 }
 0x12b   :  { %v1880_v13 = vmax.f32 %v1505_v12, 0.0  ;;  %5663 = vmatmul.msk.f32.gmra.mxu1 %vm1090_vm1, %v970_v11 }
 0x12d   :  { %v2012_v14 = vmul.f32 %v6708_v40, %v1880_v13 }
 0x12e   :  { %v629_v15 = vpop.f32.mrf.mxu0 }
 0x12f   :  { %v630_v17 = vadd.f32 %v6593_v28, %v629_v15  ;;  %v2148_v18 = vsel %vm164_vm0, %v2012_v14, 0.0 }
 0x130   :  { %v1507_v19 = vpop.f32.mrf.mxu1  ;;  %2149 = vadd.xlane.f32.xlu2 %v2148_v18  ;;  %v76_v18 = vld [vmem:[%s9735_s0 + $0x160] sm:$0xff] }
 0x131   :  { %v971_v20 = vmax.f32 %v630_v17, 0.0  ;;  %v1508_v21 = vadd.f32 %v6697_v33, %v1507_v19  ;;  %5552 = vmatmul.msk.f32.gmra.mxu0 %vm164_vm0, %v69_v16 }
 0x133   :  { %v1881_v22 = vmax.f32 %v1508_v21, 0.0  ;;  %5664 = vmatmul.msk.f32.gmra.mxu1 %vm1090_vm1, %v971_v20 }
 0x135   :  { %v2013_v23 = vmul.f32 %v6708_v40, %v1881_v22 }
 0x136   :  { %v632_v24 = vpop.f32.mrf.mxu0 }
 0x137   :  { %v633_v26 = vadd.f32 %v6593_v28, %v632_v24  ;;  %v2151_v27 = vsel %vm164_vm0, %v2013_v23, 0.0 }
 0x138   :  { %v1510_v29 = vpop.f32.mrf.mxu1  ;;  %2152 = vadd.xlane.f32.xlu2 %v2151_v27  ;;  %v77_v27 = vld [vmem:[%s9735_s0 + $0x168] sm:$0xff] }
 0x139   :  { %v972_v30 = vmax.f32 %v633_v26, 0.0  ;;  %v1511_v31 = vadd.f32 %v6697_v33, %v1510_v29  ;;  %5553 = vmatmul.msk.f32.gmra.mxu0 %vm164_vm0, %v70_v25 }
 0x13b   :  { %v1882_v32 = vmax.f32 %v1511_v31, 0.0  ;;  %5665 = vmatmul.msk.f32.gmra.mxu1 %vm1090_vm1, %v972_v30 }
 0x13d   :  { %v2014_v34 = vmul.f32 %v6708_v40, %v1882_v32 }
 0x13e   :  { %v635_v35 = vpop.f32.mrf.mxu0 }
 0x13f   :  { %v636_v37 = vadd.f32 %v6593_v28, %v635_v35  ;;  %v2154_v38 = vsel %vm164_vm0, %v2014_v34, 0.0 }
 0x140   :  { %v1513_v39 = vpop.f32.mrf.mxu1  ;;  %2155 = vadd.xlane.f32.xlu0 %v2154_v38  ;;  %v78_v38 = vld [vmem:[%s9735_s0 + $0x170] sm:$0xff] }
 0x141   :  { %v973_v41 = vmax.f32 %v636_v37, 0.0  ;;  %v1514_v42 = vadd.f32 %v6697_v33, %v1513_v39  ;;  %5554 = vmatmul.msk.f32.gmra.mxu0 %vm164_vm0, %v71_v36 }
 0x143   :  { %v1883_v43 = vmax.f32 %v1514_v42, 0.0  ;;  %5666 = vmatmul.msk.f32.gmra.mxu1 %vm1090_vm1, %v973_v41 }
 0x145   :  { %v2015_v44 = vmul.f32 %v6708_v40, %v1883_v43 }
 0x146   :  { %v638_v45 = vpop.f32.mrf.mxu0 }
 0x147   :  { %v639_v47 = vadd.f32 %v6593_v28, %v638_v45  ;;  %v2157_v48 = vsel %vm164_vm0, %v2015_v44, 0.0  ;;  %v6836_v45 = vpop.permute.xlu0 %2524 }
 0x148   :  { %v1516_v49 = vpop.f32.mrf.mxu1  ;;  %2158 = vadd.xlane.f32.xlu1 %v2157_v48 }
 0x149   :  { %v974_v50 = vmax.f32 %v639_v47, 0.0  ;;  %v1517_v51 = vadd.f32 %v6697_v33, %v1516_v49  ;;  %5555 = vmatmul.msk.f32.gmra.mxu0 %vm164_vm0, %v72_v46  ;;  %v79_v49 = vld [vmem:[%s9735_s0 + $0x178] sm:$0xff] }
 0x14b   :  { %v1884_v52 = vmax.f32 %v1517_v51, 0.0  ;;  %5667 = vmatmul.msk.f32.gmra.mxu1 %vm1090_vm1, %v974_v50 }
 0x14d   :  { %v2016_v53 = vmul.f32 %v6708_v40, %v1884_v52 }
 0x14e   :  { %v641_v54 = vpop.f32.mrf.mxu0 }
 0x14f   :  { %v642_v56 = vadd.f32 %v6593_v28, %v641_v54  ;;  %v2160_v57 = vsel %vm164_vm0, %v2016_v53, 0.0 }
 0x150   :  { %v1519_v58 = vpop.f32.mrf.mxu1  ;;  %2161 = vadd.xlane.f32.xlu2 %v2160_v57 }
 0x151   :  { %v975_v59 = vmax.f32 %v642_v56, 0.0  ;;  %v1520_v60 = vadd.f32 %v6697_v33, %v1519_v58  ;;  %5556 = vmatmul.msk.f32.gmra.mxu0 %vm164_vm0, %v73_v55 }
 0x153   :  { %v1885_v61 = vmax.f32 %v1520_v60, 0.0  ;;  %5668 = vmatmul.msk.f32.gmra.mxu1 %vm1090_vm1, %v975_v59 }
 0x155   :  { %v2017_v62 = vmul.f32 %v6708_v40, %v1885_v61  ;;  %v80_v61 = vld [vmem:[%s9735_s0 + $0x180] sm:$0xff] }
 0x156   :  { %v644_v63 = vpop.f32.mrf.mxu0 }
 0x157   :  { %v645_v1 = vadd.f32 %v6593_v28, %v644_v63  ;;  %v2163_v2 = vsel %vm164_vm0, %v2017_v62, 0.0 }
 0x158   :  { %v1522_v3 = vpop.f32.mrf.mxu1  ;;  %2164 = vadd.xlane.f32.xlu0 %v2163_v2 }
 0x159   :  { %v976_v4 = vmax.f32 %v645_v1, 0.0  ;;  %v1523_v5 = vadd.f32 %v6697_v33, %v1522_v3  ;;  %5557 = vmatmul.msk.f32.gmra.mxu0 %vm164_vm0, %v74_v0 }
 0x15b   :  { %v1886_v6 = vmax.f32 %v1523_v5, 0.0  ;;  %5669 = vmatmul.msk.f32.gmra.mxu1 %vm1090_vm1, %v976_v4 }
 0x15d   :  { %v2018_v7 = vmul.f32 %v6708_v40, %v1886_v6 }
 0x15e   :  { %v647_v8 = vpop.f32.mrf.mxu0 }
 0x15f   :  { %v648_v10 = vadd.f32 %v6593_v28, %v647_v8  ;;  %v2166_v11 = vsel %vm164_vm0, %v2018_v7, 0.0 }
 0x160   :  { %v1525_v12 = vpop.f32.mrf.mxu1  ;;  %2167 = vadd.xlane.f32.xlu1 %v2166_v11 }
 0x161   :  { %v977_v13 = vmax.f32 %v648_v10, 0.0  ;;  %v1526_v14 = vadd.f32 %v6697_v33, %v1525_v12  ;;  %5558 = vmatmul.msk.f32.gmra.mxu0 %vm164_vm0, %v75_v9  ;;  %v81_v10 = vld [vmem:[%s9735_s0 + $0x188] sm:$0xff] }
 0x163   :  { %v1887_v15 = vmax.f32 %v1526_v14, 0.0  ;;  %5670 = vmatmul.msk.f32.gmra.mxu1 %vm1090_vm1, %v977_v13 }
 0x165   :  { %v2019_v16 = vmul.f32 %v6708_v40, %v1887_v15 }
 0x166   :  { %v650_v17 = vpop.f32.mrf.mxu0 }
 0x167   :  { %v651_v19 = vadd.f32 %v6593_v28, %v650_v17  ;;  %v2169_v20 = vsel %vm164_vm0, %v2019_v16, 0.0 }
 0x168   :  { %v1528_v21 = vpop.f32.mrf.mxu1  ;;  %2170 = vadd.xlane.f32.xlu2 %v2169_v20 }
 0x169   :  { %v978_v22 = vmax.f32 %v651_v19, 0.0  ;;  %v1529_v23 = vadd.f32 %v6697_v33, %v1528_v21  ;;  %5559 = vmatmul.msk.f32.gmra.mxu0 %vm164_vm0, %v76_v18 }
 0x16b   :  { %v1888_v24 = vmax.f32 %v1529_v23, 0.0  ;;  %5671 = vmatmul.msk.f32.gmra.mxu1 %vm1090_vm1, %v978_v22 }
 0x16d   :  { %v2020_v25 = vmul.f32 %v6708_v40, %v1888_v24  ;;  %v82_v24 = vld [vmem:[%s9735_s0 + $0x190] sm:$0xff] }
 0x16e   :  { %v653_v26 = vpop.f32.mrf.mxu0 }
 0x16f   :  { %v654_v29 = vadd.f32 %v6593_v28, %v653_v26  ;;  %v2172_v30 = vsel %vm164_vm0, %v2020_v25, 0.0 }
 0x170   :  { %v1531_v31 = vpop.f32.mrf.mxu1  ;;  %2173 = vadd.xlane.f32.xlu0 %v2172_v30 }
 0x171   :  { %v979_v32 = vmax.f32 %v654_v29, 0.0  ;;  %v1532_v34 = vadd.f32 %v6697_v33, %v1531_v31  ;;  %5560 = vmatmul.msk.f32.gmra.mxu0 %vm164_vm0, %v77_v27 }
 0x173   :  { %v1889_v35 = vmax.f32 %v1532_v34, 0.0  ;;  %5672 = vmatmul.msk.f32.gmra.mxu1 %vm1090_vm1, %v979_v32 }
 0x175   :  { %v2021_v36 = vmul.f32 %v6708_v40, %v1889_v35 }
 0x176   :  { %v656_v37 = vpop.f32.mrf.mxu0 }
 0x177   :  { %v657_v39 = vadd.f32 %v6593_v28, %v656_v37  ;;  %v2175_v41 = vsel %vm164_vm0, %v2021_v36, 0.0 }
 0x178   :  { %v1534_v42 = vpop.f32.mrf.mxu1  ;;  %2176 = vadd.xlane.f32.xlu1 %v2175_v41 }
 0x179   :  { %v980_v43 = vmax.f32 %v657_v39, 0.0  ;;  %v1535_v44 = vadd.f32 %v6697_v33, %v1534_v42  ;;  %5561 = vmatmul.msk.f32.gmra.mxu0 %vm164_vm0, %v78_v38 }
 0x17b   :  { %v1890_v46 = vmax.f32 %v1535_v44, 0.0  ;;  %5673 = vmatmul.msk.f32.gmra.mxu1 %vm1090_vm1, %v980_v43  ;;  %v83_v44 = vld [vmem:[%s9735_s0 + $0x198] sm:$0xff] }
 0x17d   :  { %v2022_v47 = vmul.f32 %v6708_v40, %v1890_v46 }
 0x17e   :  { %v659_v48 = vpop.f32.mrf.mxu0 }
 0x17f   :  { %v660_v50 = vadd.f32 %v6593_v28, %v659_v48  ;;  %v2178_v51 = vsel %vm164_vm0, %v2022_v47, 0.0  ;;  %v5215_v47 = vlaneseq }
 0x180   :  { %v1537_v52 = vpop.f32.mrf.mxu1  ;;  %2179 = vadd.xlane.f32.xlu2 %v2178_v51 }
 0x181   :  { %v981_v53 = vmax.f32 %v660_v50, 0.0  ;;  %v1538_v54 = vadd.f32 %v6697_v33, %v1537_v52  ;;  %5562 = vmatmul.msk.f32.gmra.mxu0 %vm164_vm0, %v79_v49 }
 0x183   :  { %v1891_v55 = vmax.f32 %v1538_v54, 0.0  ;;  %5674 = vmatmul.msk.f32.gmra.mxu1 %vm1090_vm1, %v981_v53  ;;  %v2138_v56 = vpop.xlane.xlu0 %2137 }
 0x184   :  { %v2527_v57 = vadd.f32 %v6836_v45, %v2138_v56 }
 0x185   :  { %v2023_v58 = vmul.f32 %v6708_v40, %v1891_v55 }
 0x186   :  { %v5771_v59 = vmul.f32 -1.442695, %v2527_v57  ;;  %v662_v60 = vpop.f32.mrf.mxu0 }
 0x187   :  { %v663_v62 = vadd.f32 %v6593_v28, %v662_v60  ;;  %v2181_v63 = vsel %vm164_vm0, %v2023_v58, 0.0 }
 0x188   :  { %5917 = vpow2.f32 %v5771_v59  ;;  %v1540_v0 = vpop.f32.mrf.mxu1  ;;  %2182 = vadd.xlane.f32.xlu0 %v2181_v63  ;;  %v6906_v59 = vand.u32 127, %v5215_v47 }
 0x189   :  { %v982_v1 = vmax.f32 %v663_v62, 0.0  ;;  %v1541_v2 = vadd.f32 %v6697_v33, %v1540_v0  ;;  %5563 = vmatmul.msk.f32.gmra.mxu0 %vm164_vm0, %v80_v61 }
 0x18b   :  { %v1892_v3 = vmax.f32 %v1541_v2, 0.0  ;;  %5675 = vmatmul.msk.f32.gmra.mxu1 %vm1090_vm1, %v982_v1  ;;  %v2141_v4 = vpop.xlane.xlu0 %2140 }
 0x18c   :  { %v2528_v5 = vadd.f32 %v6836_v45, %v2141_v4 }
 0x18d   :  { %v2024_v6 = vmul.f32 %v6708_v40, %v1892_v3 }
 0x18e   :  { %v5918_v7 = vpop.eup %5917  ;;  %v5772_v8 = vmul.f32 -1.442695, %v2528_v5  ;;  %v665_v9 = vpop.f32.mrf.mxu0  ;;  %v6921_v5 = vadd.s32 4294967288, %v6906_v59 }
 0x18f   :  { %v6863_v11 = vadd.f32 1.0, %v5918_v7  ;;  %v666_v12 = vadd.f32 %v6593_v28, %v665_v9  ;;  %v2184_v13 = vsel %vm164_vm0, %v2024_v6, 0.0 }
 0x190   :  { %5919 = vpow2.f32 %v5772_v8  ;;  %v1543_v14 = vpop.f32.mrf.mxu1  ;;  %2185 = vadd.xlane.f32.xlu1 %v2184_v13 }
 0x191   :  { %5921 = vrcp.f32 %v6863_v11  ;;  %5564 = vmatmul.msk.f32.gmra.mxu0 %vm164_vm0, %v81_v10  ;;  %v983_v15 = vmax.f32 %v666_v12, 0.0  ;;  %v1544_v16 = vadd.f32 %v6697_v33, %v1543_v14  ;;  %v3176_v54 = vand.u32 2147483647, %v6863_v11  ;;  %v84_v12 = vld [vmem:[%s9735_s0 + $0x1a0] sm:$0xff] }
 0x192   :  { %v3178_v55 = vand.u32 2147483648, %v6863_v11  ;;  %vm3172_vm3 = vweird.f32 %v6863_v11 }
 0x193   :  { %v2144_v17 = vpop.xlane.xlu1 %2143  ;;  %v1893_v18 = vmax.f32 %v1544_v16, 0.0  ;;  %5676 = vmatmul.msk.f32.gmra.mxu1 %vm1090_vm1, %v983_v15  ;;  %vm3177_vm6 = vcmp.eq.f32.partialorder %v3176_v54, 8.507059e+37 }
 0x194   :  { %v2529_v19 = vadd.f32 %v6836_v45, %v2144_v17  ;;  %v3179_v4 = vor.u32 1.1754944e-38, %v3178_v55 }
 0x195   :  { %v2025_v23 = vmul.f32 %v6708_v40, %v1893_v18 }
 0x196   :  { %v5920_v20 = vpop.eup %5919  ;;  %v5773_v21 = vmul.f32 -1.442695, %v2529_v19  ;;  %v668_v22 = vpop.f32.mrf.mxu0 }
 0x197   :  { %v6876_v25 = vpop.eup %5921  ;;  %v6878_v26 = vadd.f32 1.0, %v5920_v20  ;;  %v669_v27 = vadd.f32 %v6593_v28, %v668_v22  ;;  %v2187_v31 = vsel %vm164_vm0, %v2025_v23, 0.0 }
 0x198   :  { %v3168_v29 = vmul.f32 %v6876_v25, %v6863_v11  ;;  %5923 = vpow2.f32 %v5773_v21  ;;  %v1546_v30 = vpop.f32.mrf.mxu1  ;;  %2188 = vadd.xlane.f32.xlu2 %v2187_v31  ;;  %vm3173_vm2 = vweird.f32 %v6876_v25 }
 0x199   :  { %5925 = vrcp.f32 %v6878_v26  ;;  %5565 = vmatmul.msk.f32.gmra.mxu0 %vm164_vm0, %v82_v24  ;;  %v984_v34 = vmax.f32 %v669_v27, 0.0  ;;  %v1547_v35 = vadd.f32 %v6697_v33, %v1546_v30  ;;  %v3193_v57 = vand.u32 2147483648, %v6878_v26  ;;  %vm6908_vm4 = vmor %vm3172_vm3, %vm3173_vm2 }
 0x19a   :  { %v3169_v32 = vsub.f32 1.0, %v3168_v29  ;;  %v3191_v61 = vand.u32 2147483647, %v6878_v26  ;;  %vm3187_vm7 = vweird.f32 %v6878_v26 }
 0x19b   :  { %v2147_v36 = vpop.xlane.xlu1 %2146  ;;  %v1894_v38 = vmax.f32 %v1547_v35, 0.0  ;;  %5677 = vmatmul.msk.f32.gmra.mxu1 %vm1090_vm1, %v984_v34  ;;  %v3194_v9 = vor.u32 1.1754944e-38, %v3193_v57 }
 0x19c   :  { %v3170_v37 = vmul.f32 %v6876_v25, %v3169_v32  ;;  %v2530_v39 = vadd.f32 %v6836_v45, %v2147_v36  ;;  %vm3192_vm9 = vcmp.eq.f32.partialorder %v3191_v61, 8.507059e+37 }
 0x19d   :  { %v2026_v50 = vmul.f32 %v6708_v40, %v1894_v38  ;;  %v6945_v38 = vadd.s32 4294967280, %v6906_v59 }
 0x19e   :  { %v5924_v41 = vpop.eup %5923  ;;  %v5774_v42 = vmul.f32 -1.442695, %v2530_v39  ;;  %v671_v43 = vpop.f32.mrf.mxu0  ;;  %v3171_v51 = vadd.f32 %v6876_v25, %v3170_v37 }
 0x19f   :  { %v5926_v46 = vpop.eup %5925  ;;  %v6893_v48 = vadd.f32 1.0, %v5924_v41  ;;  %v672_v49 = vadd.f32 %v6593_v28, %v671_v43  ;;  %v2190_v63 = vsel %vm164_vm0, %v2026_v50, 0.0  ;;  %v85_v43 = vld [vmem:[%s9735_s0 + $0x1a8] sm:$0xff] }
 0x1a0   :  { %v3183_v52 = vmul.f32 %v5926_v46, %v6878_v26  ;;  %5927 = vpow2.f32 %v5774_v42  ;;  %v1549_v53 = vpop.f32.mrf.mxu1  ;;  %v3175_v1 = vsel %vm6908_vm4, %v6876_v25, %v3171_v51  ;;  %vm3188_vm5 = vweird.f32 %v5926_v46  ;;  %2191 = vadd.xlane.f32.xlu0 %v2190_v63 }
 0x1a1   :  { %5929 = vrcp.f32 %v6893_v48  ;;  %5566 = vmatmul.msk.f32.gmra.mxu0 %vm164_vm0, %v83_v44  ;;  %v985_v58 = vmax.f32 %v672_v49, 0.0  ;;  %v1550_v62 = vadd.f32 %v6697_v33, %v1549_v53  ;;  %v3180_v14 = vsel %vm3177_vm6, %v3179_v4, %v3175_v1  ;;  %vm3189_vm8 = vmor %vm3187_vm7, %vm3188_vm5 }
 0x1a2   :  { %v3184_v56 = vsub.f32 1.0, %v3183_v52  ;;  %v5217_v22 = vperm.slane %v3180_v14, %v6906_v59  ;;  %v3206_v26 = vand.u32 2147483647, %v6893_v48  ;;  %v3208_v27 = vand.u32 2147483648, %v6893_v48 }
 0x1a3   :  { %v2150_v0 = vpop.xlane.xlu2 %2149  ;;  %5678 = vmatmul.msk.f32.gmra.mxu1 %vm1090_vm1, %v985_v58  ;;  %v1895_v6 = vmax.f32 %v1550_v62, 0.0  ;;  %vm3202_vm12 = vweird.f32 %v6893_v48  ;;  %v6967_v4 = vadd.s32 4294967272, %v6906_v59  ;;  %vm9748_vm6 = vcmask 261312  }
 0x1a4   :  { %v3185_v2 = vmul.f32 %v5926_v46, %v3184_v56  ;;  %v2531_v3 = vadd.f32 %v6836_v45, %v2150_v0  ;;  %vm3207_vm14 = vcmp.eq.f32.partialorder %v3206_v26, 8.507059e+37 }
 0x1a5   :  { %v2027_v17 = vmul.f32 %v6708_v40, %v1895_v6 }
 0x1a6   :  { %v5928_v7 = vpop.eup %5927  ;;  %v3186_v8 = vadd.f32 %v5926_v46, %v3185_v2  ;;  %v5775_v10 = vmul.f32 -1.442695, %v2531_v3  ;;  %v674_v11 = vpop.f32.mrf.mxu0 }
 0x1a7   :  { %v5930_v13 = vpop.eup %5929  ;;  %v6928_v15 = vadd.f32 1.0, %v5928_v7  ;;  %v675_v16 = vadd.f32 %v6593_v28, %v674_v11  ;;  %v2193_v30 = vsel %vm164_vm0, %v2027_v17, 0.0 }
 0x1a8   :  { %v3190_v18 = vsel %vm3189_vm8, %v5926_v46, %v3186_v8  ;;  %v3198_v19 = vmul.f32 %v5930_v13, %v6893_v48  ;;  %5931 = vpow2.f32 %v5775_v10  ;;  %v1552_v20 = vpop.f32.mrf.mxu1  ;;  %vm3203_vm11 = vweird.f32 %v5930_v13  ;;  %2194 = vadd.xlane.f32.xlu1 %v2193_v30 }
 0x1a9   :  { %v3195_v21 = vsel %vm3192_vm9, %v3194_v9, %v3190_v18  ;;  %5933 = vrcp.f32 %v6928_v15  ;;  %5567 = vmatmul.msk.f32.gmra.mxu0 %vm164_vm0, %v84_v12  ;;  %v986_v25 = vmax.f32 %v675_v16, 0.0  ;;  %v1553_v29 = vadd.f32 %v6697_v33, %v1552_v20  ;;  %vm3204_vm13 = vmor %vm3202_vm12, %vm3203_vm11  ;;  %v86_v9 = vld [vmem:[%s9735_s0 + $0x1b0] sm:$0xff] }
 0x1aa   :  { %v5219_v23 = vperm.slane %v3195_v21, %v6921_v5  ;;  %v3199_v24 = vsub.f32 1.0, %v3198_v19  ;;  %v3209_v46 = vor.u32 1.1754944e-38, %v3208_v27  ;;  %v3221_v57 = vand.u32 2147483647, %v6928_v15 }
 0x1ab   :  { %v2153_v31 = vpop.xlane.xlu2 %2152  ;;  %5679 = vmatmul.msk.f32.gmra.mxu1 %vm1090_vm1, %v986_v25  ;;  %v1896_v36 = vmax.f32 %v1553_v29, 0.0  ;;  %v3223_v58 = vand.u32 2147483648, %v6928_v15  ;;  %vm3217_vm3 = vweird.f32 %v6928_v15  ;;  %vm5232_vm12 = vcmask 326912  }
 0x1ac   :  { %v5221_v32 = vsel %vm5220_vm10, %v5219_v23, %v5217_v22  ;;  %v3200_v34 = vmul.f32 %v5930_v13, %v3199_v24  ;;  %v2532_v35 = vadd.f32 %v6836_v45, %v2153_v31  ;;  %vm3222_vm5 = vcmp.eq.f32.partialorder %v3221_v57, 8.507059e+37 }
 0x1ad   :  { %v2028_v50 = vmul.f32 %v6708_v40, %v1896_v36  ;;  %v3224_v11 = vor.u32 1.1754944e-38, %v3223_v58 }
 0x1ae   :  { %v5932_v37 = vpop.eup %5931  ;;  %v3201_v39 = vadd.f32 %v5930_v13, %v3200_v34  ;;  %v5776_v41 = vmul.f32 -1.442695, %v2532_v35  ;;  %v677_v42 = vpop.f32.mrf.mxu0 }
 0x1af   :  { %v5934_v44 = vpop.eup %5933  ;;  %v6951_v47 = vadd.f32 1.0, %v5932_v37  ;;  %v678_v49 = vadd.f32 %v6593_v28, %v677_v42  ;;  %v2196_v61 = vsel %vm164_vm0, %v2028_v50, 0.0  ;;  %v87_v37 = vld [vmem:[%s9735_s0 + $0x1b8] sm:$0xff] }
 0x1b0   :  { %v3205_v51 = vsel %vm3204_vm13, %v5930_v13, %v3201_v39  ;;  %v3213_v52 = vmul.f32 %v5934_v44, %v6928_v15  ;;  %5935 = vpow2.f32 %v5776_v41  ;;  %v1555_v48 = vpop.f32.mrf.mxu1  ;;  %vm3218_vm2 = vweird.f32 %v5934_v44  ;;  %2197 = vadd.xlane.f32.xlu2 %v2196_v61 }
 0x1b1   :  { %v3210_v53 = vsel %vm3207_vm14, %v3209_v46, %v3205_v51  ;;  %5937 = vrcp.f32 %v6951_v47  ;;  %5568 = vmatmul.msk.f32.gmra.mxu0 %vm164_vm0, %v85_v43  ;;  %v987_v56 = vmax.f32 %v678_v49, 0.0  ;;  %v1556_v60 = vadd.f32 %v6697_v33, %v1555_v48  ;;  %vm3219_vm4 = vmor %vm3217_vm3, %vm3218_vm2  ;;  %v7000_v43 = vld [vmem:[%s9736_s2] ss:$0 sm:$0xff] }
 0x1b2   :  { %v5223_v54 = vperm.slane %v3210_v53, %v6945_v38  ;;  %v3214_v55 = vsub.f32 1.0, %v3213_v52  ;;  %v3238_v22 = vand.u32 2147483648, %v6951_v47  ;;  %vm3232_vm8 = vweird.f32 %v6951_v47 }
 0x1b3   :  { %v2156_v62 = vpop.xlane.xlu0 %2155  ;;  %5680 = vmatmul.msk.f32.gmra.mxu1 %vm1090_vm1, %v987_v56  ;;  %v1897_v2 = vmax.f32 %v1556_v60, 0.0 }
 0x1b4   :  { %v5225_v63 = vsel %vm5224_vm15, %v5223_v54, %v5221_v32  ;;  %v3215_v0 = vmul.f32 %v5934_v44, %v3214_v55  ;;  %v2533_v1 = vadd.f32 %v6836_v45, %v2156_v62  ;;  %v6989_v32 = vadd.s32 4294967264, %v6906_v59 }
 0x1b5   :  { %v2029_v14 = vmul.f32 %v6708_v40, %v1897_v2  ;;  %v3239_v41 = vor.u32 1.1754944e-38, %v3238_v22 }
 0x1b6   :  { %v5936_v3 = vpop.eup %5935  ;;  %v3216_v6 = vadd.f32 %v5934_v44, %v3215_v0  ;;  %v5777_v7 = vmul.f32 -1.442695, %v2533_v1  ;;  %v680_v8 = vpop.f32.mrf.mxu0  ;;  %v7016_v1 = vadd.s32 4294967256, %v6906_v59 }
 0x1b7   :  { %v5938_v10 = vpop.eup %5937  ;;  %v6973_v12 = vadd.f32 1.0, %v5936_v3  ;;  %v681_v13 = vadd.f32 %v6593_v28, %v680_v8  ;;  %v3236_v28 = vand.u32 2147483647, %v6951_v47  ;;  %v2199_v24 = vsel %vm164_vm0, %v2029_v14, 0.0 }
 0x1b8   :  { %v3220_v16 = vsel %vm3219_vm4, %v5934_v44, %v3216_v6  ;;  %v3228_v17 = vmul.f32 %v5938_v10, %v6951_v47  ;;  %5939 = vpow2.f32 %v5777_v7  ;;  %v1558_v15 = vpop.f32.mrf.mxu1  ;;  %vm3233_vm7 = vweird.f32 %v5938_v10  ;;  %2200 = vadd.xlane.f32.xlu0 %v2199_v24  ;;  %v88_v7 = vld [vmem:[%s9735_s0 + $0x1c0] sm:$0xff] }
 0x1b9   :  { %v3225_v18 = vsel %vm3222_vm5, %v3224_v11, %v3220_v16  ;;  %5941 = vrcp.f32 %v6973_v12  ;;  %5569 = vmatmul.msk.f32.gmra.mxu0 %vm164_vm0, %v86_v9  ;;  %v988_v21 = vmax.f32 %v681_v13, 0.0  ;;  %v1559_v23 = vadd.f32 %v6697_v33, %v1558_v15  ;;  %vm3234_vm9 = vmor %vm3232_vm8, %vm3233_vm7 }
 0x1ba   :  { %v5227_v19 = vperm.slane %v3225_v18, %v6967_v4  ;;  %v3229_v20 = vsub.f32 1.0, %v3228_v17  ;;  %vm3237_vm11 = vcmp.eq.f32.partialorder %v3236_v28, 8.507059e+37  ;;  %v3251_v54 = vand.u32 2147483647, %v6973_v12 }
 0x1bb   :  { %v2159_v25 = vpop.xlane.xlu1 %2158  ;;  %5681 = vmatmul.msk.f32.gmra.mxu1 %vm1090_vm1, %v988_v21  ;;  %v1898_v30 = vmax.f32 %v1559_v23, 0.0  ;;  %v3253_v55 = vand.u32 2147483648, %v6973_v12  ;;  %vm3247_vm14 = vweird.f32 %v6973_v12  ;;  %vm5236_vm4 = vcmask 392512  }
 0x1bc   :  { %v5229_v26 = vsel %vm9748_vm6, %v5227_v19, %v5225_v63  ;;  %v3230_v27 = vmul.f32 %v5938_v10, %v3229_v20  ;;  %v2534_v29 = vadd.f32 %v6836_v45, %v2159_v25  ;;  %vm3252_vm3 = vcmp.eq.f32.partialorder %v3251_v54, 8.507059e+37 }
 0x1bd   :  { %v2030_v46 = vmul.f32 %v6708_v40, %v1898_v30  ;;  %v3254_v9 = vor.u32 1.1754944e-38, %v3253_v55  ;;  %v7038_v30 = vadd.s32 4294967248, %v6906_v59 }
 0x1be   :  { %v5940_v31 = vpop.eup %5939  ;;  %v3231_v34 = vadd.f32 %v5938_v10, %v3230_v27  ;;  %v5778_v35 = vmul.f32 -1.442695, %v2534_v29  ;;  %v683_v36 = vpop.f32.mrf.mxu0 }
 0x1bf   :  { %v5942_v39 = vpop.eup %5941  ;;  %v6995_v42 = vadd.f32 1.0, %v5940_v31  ;;  %v684_v44 = vadd.f32 %v7000_v43, %v683_v36  ;;  %v2202_v57 = vsel %vm164_vm0, %v2030_v46, 0.0  ;;  %v89_v36 = vld [vmem:[%s9735_s0 + $0x1c8] sm:$0xff] }
 0x1c0   :  { %v3235_v47 = vsel %vm3234_vm9, %v5938_v10, %v3231_v34  ;;  %v3243_v49 = vmul.f32 %v5942_v39, %v6973_v12  ;;  %5943 = vpow2.f32 %v5778_v35  ;;  %v1561_v50 = vpop.f32.mrf.mxu1  ;;  %vm3248_vm13 = vweird.f32 %v5942_v39  ;;  %2203 = vadd.xlane.f32.xlu1 %v2202_v57 }
 0x1c1   :  { %v3240_v51 = vsel %vm3237_vm11, %v3239_v41, %v3235_v47  ;;  %5945 = vrcp.f32 %v6995_v42  ;;  %5570 = vmatmul.msk.f32.gmra.mxu0 %vm164_vm0, %v87_v37  ;;  %v989_v53 = vmax.f32 %v684_v44, 0.0  ;;  %v1562_v56 = vadd.f32 %v6697_v33, %v1561_v50  ;;  %vm3249_vm2 = vmor %vm3247_vm14, %vm3248_vm13 }
 0x1c2   :  { %v5231_v52 = vperm.slane %v3240_v51, %v6989_v32  ;;  %v3244_v48 = vsub.f32 1.0, %v3243_v49  ;;  %v3266_v20 = vand.u32 2147483647, %v6995_v42  ;;  %v3268_v21 = vand.u32 2147483648, %v6995_v42 }
 0x1c3   :  { %v2162_v58 = vpop.xlane.xlu2 %2161  ;;  %5682 = vmatmul.msk.f32.gmra.mxu1 %vm1090_vm1, %v989_v53  ;;  %v1899_v63 = vmax.f32 %v1562_v56, 0.0  ;;  %vm3262_vm7 = vweird.f32 %v6995_v42  ;;  %vm5240_vm11 = vcmask 458112  }
 0x1c4   :  { %v5233_v60 = vsel %vm5232_vm12, %v5231_v52, %v5229_v26  ;;  %v3245_v61 = vmul.f32 %v5942_v39, %v3244_v48  ;;  %v2535_v62 = vadd.f32 %v6836_v45, %v2162_v58  ;;  %vm3267_vm9 = vcmp.eq.f32.partialorder %v3266_v20, 8.507059e+37 }
 0x1c5   :  { %v2031_v13 = vmul.f32 %v6708_v40, %v1899_v63  ;;  %v7060_v63 = vadd.s32 4294967240, %v6906_v59 }
 0x1c6   :  { %v5944_v0 = vpop.eup %5943  ;;  %v3246_v2 = vadd.f32 %v5942_v39, %v3245_v61  ;;  %v5779_v3 = vmul.f32 -1.442695, %v2535_v62  ;;  %v686_v6 = vpop.f32.mrf.mxu0 }
 0x1c7   :  { %v5946_v8 = vpop.eup %5945  ;;  %v7022_v10 = vadd.f32 1.0, %v5944_v0  ;;  %v687_v11 = vadd.f32 %v7000_v43, %v686_v6  ;;  %v2205_v22 = vsel %vm164_vm0, %v2031_v13, 0.0 }
 0x1c8   :  { %v3250_v14 = vsel %vm3249_vm2, %v5942_v39, %v3246_v2  ;;  %v3258_v16 = vmul.f32 %v5946_v8, %v6995_v42  ;;  %5947 = vpow2.f32 %v5779_v3  ;;  %v1564_v12 = vpop.f32.mrf.mxu1  ;;  %vm3263_vm5 = vweird.f32 %v5946_v8  ;;  %2206 = vadd.xlane.f32.xlu2 %v2205_v22  ;;  %v90_v3 = vld [vmem:[%s9735_s0 + $0x1d0] sm:$0xff] }
 0x1c9   :  { %v3255_v17 = vsel %vm3252_vm3, %v3254_v9, %v3250_v14  ;;  %5949 = vrcp.f32 %v7022_v10  ;;  %5571 = vmatmul.msk.f32.gmra.mxu0 %vm164_vm0, %v88_v7  ;;  %v990_v19 = vmax.f32 %v687_v11, 0.0  ;;  %v1565_v28 = vadd.f32 %v6697_v33, %v1564_v12  ;;  %vm3264_vm8 = vmor %vm3262_vm7, %vm3263_vm5  ;;  %v7072_v11 = vld [vmem:[%s9739_s5] ss:$0 sm:$0xff] }
 0x1ca   :  { %v5235_v15 = vperm.slane %v3255_v17, %v7016_v1  ;;  %v3259_v18 = vsub.f32 1.0, %v3258_v16  ;;  %v3269_v39 = vor.u32 1.1754944e-38, %v3268_v21  ;;  %v3281_v53 = vand.u32 2147483647, %v7022_v10  ;;  %v7084_v21 = vld [vmem:[%s9738_s4] ss:$0 sm:$0xff] }
 0x1cb   :  { %v2165_v23 = vpop.xlane.xlu0 %2164  ;;  %5683 = vmatmul.msk.f32.gmra.mxu1 %vm1090_vm1, %v990_v19  ;;  %v1900_v27 = vmax.f32 %v1565_v28, 0.0  ;;  %vm3277_vm14 = vweird.f32 %v7022_v10  ;;  %vm5244_vm5 = vcmask 523712  }
 0x1cc   :  { %v5237_v24 = vsel %vm5236_vm4, %v5235_v15, %v5233_v60  ;;  %v3260_v25 = vmul.f32 %v5946_v8, %v3259_v18  ;;  %v2536_v26 = vadd.f32 %v6836_v45, %v2165_v23  ;;  %vm3282_vm3 = vcmp.eq.f32.partialorder %v3281_v53, 8.507059e+37 }
 0x1cd   :  { %v2032_v46 = vmul.f32 %v6708_v40, %v1900_v27  ;;  %v3283_v40 = vand.u32 2147483648, %v7022_v10 }
 0x1ce   :  { %v5948_v29 = vpop.eup %5947  ;;  %v3261_v31 = vadd.f32 %v5946_v8, %v3260_v25  ;;  %v5780_v34 = vmul.f32 -1.442695, %v2536_v26  ;;  %v689_v35 = vpop.f32.mrf.mxu0 }
 0x1cf   :  { %v5950_v37 = vpop.eup %5949  ;;  %v7044_v41 = vadd.f32 1.0, %v5948_v29  ;;  %v690_v44 = vadd.f32 %v7000_v43, %v689_v35  ;;  %v2208_v55 = vsel %vm164_vm0, %v2032_v46, 0.0  ;;  %v3284_v7 = vor.u32 1.1754944e-38, %v3283_v40 }
 0x1d0   :  { %v3265_v47 = vsel %vm3264_vm8, %v5946_v8, %v3261_v31  ;;  %v3273_v49 = vmul.f32 %v5950_v37, %v7022_v10  ;;  %5951 = vpow2.f32 %v5780_v34  ;;  %v1567_v42 = vpop.f32.mrf.mxu1  ;;  %vm3278_vm13 = vweird.f32 %v5950_v37  ;;  %2209 = vadd.xlane.f32.xlu0 %v2208_v55 }
 0x1d1   :  { %v3270_v50 = vsel %vm3267_vm9, %v3269_v39, %v3265_v47  ;;  %5953 = vrcp.f32 %v7044_v41  ;;  %5572 = vmatmul.msk.f32.gmra.mxu0 %vm164_vm0, %v89_v36  ;;  %v991_v48 = vmax.f32 %v690_v44, 0.0  ;;  %v1568_v54 = vadd.f32 %v6697_v33, %v1567_v42  ;;  %vm3279_vm2 = vmor %vm3277_vm14, %vm3278_vm13 }
 0x1d2   :  { %v5239_v51 = vperm.slane %v3270_v50, %v7038_v30  ;;  %v3274_v52 = vsub.f32 1.0, %v3273_v49  ;;  %v3296_v19 = vand.u32 2147483647, %v7044_v41  ;;  %v3298_v20 = vand.u32 2147483648, %v7044_v41 }
 0x1d3   :  { %v2168_v56 = vpop.xlane.xlu1 %2167  ;;  %5684 = vmatmul.msk.f32.gmra.mxu1 %vm1090_vm1, %v991_v48  ;;  %v1901_v61 = vmax.f32 %v1568_v54, 0.0  ;;  %v7092_v31 = vadd.s32 4294967232, %v6906_v59  ;;  %vm3292_vm8 = vweird.f32 %v7044_v41  ;;  %vm9750_vm14 = vcmask 589312  }
 0x1d4   :  { %v5241_v57 = vsel %vm5240_vm11, %v5239_v51, %v5237_v24  ;;  %v3275_v58 = vmul.f32 %v5950_v37, %v3274_v52  ;;  %v2537_v60 = vadd.f32 %v6836_v45, %v2168_v56  ;;  %v3299_v44 = vor.u32 1.1754944e-38, %v3298_v20 }
 0x1d5   :  { %v2033_v10 = vmul.f32 %v7072_v11, %v1901_v61  ;;  %vm3297_vm13 = vcmp.eq.f32.partialorder %v3296_v19, 8.507059e+37 }
 0x1d6   :  { %v5952_v62 = vpop.eup %5951  ;;  %v3276_v0 = vadd.f32 %v5950_v37, %v3275_v58  ;;  %v5781_v33 = vmul.f32 -1.442695, %v2537_v60  ;;  %v692_v2 = vpop.f32.mrf.mxu0 }
 0x1d7   :  { %v5954_v6 = vpop.eup %5953  ;;  %v7066_v8 = vadd.f32 1.0, %v5952_v62  ;;  %v693_v9 = vadd.f32 %v7000_v43, %v692_v2  ;;  %v2211_v22 = vsel %vm164_vm0, %v2033_v10, 0.0 }
 0x1d8   :  { %v3280_v13 = vsel %vm3279_vm2, %v5950_v37, %v3276_v0  ;;  %v3288_v14 = vmul.f32 %v5954_v6, %v7044_v41  ;;  %5955 = vpow2.f32 %v5781_v33  ;;  %v1570_v16 = vpop.f32.mrf.mxu1  ;;  %vm3293_vm7 = vweird.f32 %v5954_v6  ;;  %2212 = vadd.xlane.f32.xlu1 %v2211_v22  ;;  %v91_v37 = vld [vmem:[%s9735_s0 + $0x1d8] sm:$0xff] }
 0x1d9   :  { %v3285_v12 = vsel %vm3282_vm3, %v3284_v7, %v3280_v13  ;;  %5957 = vrcp.f32 %v7066_v8  ;;  %5573 = vmatmul.msk.f32.gmra.mxu0 %vm164_vm0, %v90_v3  ;;  %v992_v18 = vmax.f32 %v693_v9, 0.0  ;;  %v1571_v28 = vadd.f32 %v7084_v21, %v1570_v16  ;;  %vm3294_vm9 = vmor %vm3292_vm8, %vm3293_vm7  ;;  %v92_v7 = vld [vmem:[%s9735_s0 + $0x1e0] sm:$0xff] }
 0x1da   :  { %v5243_v17 = vperm.slane %v3285_v12, %v7060_v63  ;;  %v3289_v15 = vsub.f32 1.0, %v3288_v14  ;;  %v3311_v40 = vand.u32 2147483647, %v7066_v8  ;;  %v3313_v54 = vand.u32 2147483648, %v7066_v8 }
 0x1db   :  { %v2171_v23 = vpop.xlane.xlu2 %2170  ;;  %5685 = vmatmul.msk.f32.gmra.mxu1 %vm1090_vm1, %v992_v18  ;;  %v1902_v27 = vmax.f32 %v1571_v28, 0.0  ;;  %v7114_v33 = vadd.s32 4294967224, %v6906_v59  ;;  %vm3307_vm3 = vweird.f32 %v7066_v8 }
 0x1dc   :  { %v5245_v24 = vsel %vm5244_vm5, %v5243_v17, %v5241_v57  ;;  %v3290_v25 = vmul.f32 %v5954_v6, %v3289_v15  ;;  %v2538_v26 = vadd.f32 %v6836_v45, %v2171_v23  ;;  %v3314_v10 = vor.u32 1.1754944e-38, %v3313_v54 }
 0x1dd   :  { %v2034_v49 = vmul.f32 %v7072_v11, %v1902_v27  ;;  %vm3312_vm8 = vcmp.eq.f32.partialorder %v3311_v40, 8.507059e+37 }
 0x1de   :  { %v5956_v29 = vpop.eup %5955  ;;  %v3291_v34 = vadd.f32 %v5954_v6, %v3290_v25  ;;  %v5782_v35 = vmul.f32 -1.442695, %v2538_v26  ;;  %v695_v36 = vpop.f32.mrf.mxu0 }
 0x1df   :  { %v5958_v39 = vpop.eup %5957  ;;  %v7098_v46 = vadd.f32 1.0, %v5956_v29  ;;  %v696_v47 = vadd.f32 %v7000_v43, %v695_v36  ;;  %v2214_v56 = vsel %vm164_vm0, %v2034_v49, 0.0  ;;  %v7136_v36 = vadd.s32 4294967216, %v6906_v59  ;;  %v97_v49 = vld [vmem:[%s9735_s0 + $0x208] sm:$0xff] }
 0x1e0   :  { %v3295_v42 = vsel %vm3294_vm9, %v5954_v6, %v3291_v34  ;;  %v3303_v50 = vmul.f32 %v5958_v39, %v7066_v8  ;;  %5959 = vpow2.f32 %v5782_v35  ;;  %v1573_v41 = vpop.f32.mrf.mxu1  ;;  %vm3308_vm2 = vweird.f32 %v5958_v39  ;;  %2215 = vadd.xlane.f32.xlu2 %v2214_v56  ;;  %5580 = vmatmul.msk.f32.vlgmr.msra.gmra.mxu3 %vm164_vm0, %v97_v49 }
 0x1e1   :  { %v3300_v51 = vsel %vm3297_vm13, %v3299_v44, %v3295_v42  ;;  %5961 = vrcp.f32 %v7098_v46  ;;  %5574 = vmatmul.msk.f32.gmra.mxu0 %vm164_vm0, %v91_v37  ;;  %v993_v53 = vmax.f32 %v696_v47, 0.0  ;;  %v1574_v55 = vadd.f32 %v7084_v21, %v1573_v41  ;;  %vm3309_vm7 = vmor %vm3307_vm3, %vm3308_vm2  ;;  %v93_v47 = vld [vmem:[%s9735_s0 + $0x1e8] sm:$0xff] }
 0x1e2   :  { %v5247_v52 = vperm.slane %v3300_v51, %v7092_v31  ;;  %v3304_v48 = vsub.f32 1.0, %v3303_v50  ;;  %vm9749_vm9 = vcmask 654912   ;;  %v3326_v28 = vand.u32 2147483647, %v7098_v46 }
 0x1e3   :  { %v2174_v57 = vpop.xlane.xlu0 %2173  ;;  %5686 = vmatmul.msk.f32.gmra.mxu1 %vm1090_vm1, %v993_v53  ;;  %v1903_v62 = vmax.f32 %v1574_v55, 0.0  ;;  %v3328_v22 = vand.u32 2147483648, %v7098_v46  ;;  %vm3322_vm2 = vweird.f32 %v7098_v46 }
 0x1e4   :  { %v5249_v58 = vsel %vm9750_vm14, %v5247_v52, %v5245_v24  ;;  %v3305_v60 = vmul.f32 %v5958_v39, %v3304_v48  ;;  %v2539_v61 = vadd.f32 %v6836_v45, %v2174_v57 }
 0x1e5   :  { %v2035_v16 = vmul.f32 %v7072_v11, %v1903_v62  ;;  %v3329_v50 = vor.u32 1.1754944e-38, %v3328_v22 }
 0x1e6   :  { %v5960_v0 = vpop.eup %5959  ;;  %v3306_v2 = vadd.f32 %v5958_v39, %v3305_v60  ;;  %v5783_v3 = vmul.f32 -1.442695, %v2539_v61  ;;  %v698_v6 = vpop.f32.mrf.mxu0 }
 0x1e7   :  { %v5962_v9 = vpop.eup %5961  ;;  %v7120_v13 = vadd.f32 1.0, %v5960_v0  ;;  %v699_v14 = vadd.f32 %v7000_v43, %v698_v6  ;;  %v2217_v24 = vsel %vm164_vm0, %v2035_v16, 0.0 }
 0x1e8   :  { %v3310_v12 = vsel %vm3309_vm7, %v5958_v39, %v3306_v2  ;;  %v3318_v17 = vmul.f32 %v5962_v9, %v7098_v46  ;;  %5963 = vpow2.f32 %v5783_v3  ;;  %v1576_v8 = vpop.f32.mrf.mxu1  ;;  %vm3323_vm13 = vweird.f32 %v5962_v9  ;;  %2218 = vadd.xlane.f32.xlu0 %v2217_v24 }
 0x1e9   :  { %v3315_v15 = vsel %vm3312_vm8, %v3314_v10, %v3310_v12  ;;  %5965 = vrcp.f32 %v7120_v13  ;;  %5575 = vmatmul.msk.f32.gmra.mxu0 %vm164_vm0, %v92_v7  ;;  %v994_v20 = vmax.f32 %v699_v14, 0.0  ;;  %v1577_v23 = vadd.f32 %v7084_v21, %v1576_v8  ;;  %vm3324_vm3 = vmor %vm3322_vm2, %vm3323_vm13  ;;  %v94_v12 = vld [vmem:[%s9735_s0 + $0x1f0] sm:$0xff] }
 0x1ea   :  { %v5251_v18 = vperm.slane %v3315_v15, %v7114_v33  ;;  %v3319_v19 = vsub.f32 1.0, %v3318_v17  ;;  %vm3327_vm7 = vcmp.eq.f32.partialorder %v3326_v28, 8.507059e+37  ;;  %vm9742_vm8 = vcmask 720512   ;;  %v98_v17 = vld [vmem:[%s9735_s0 + $0x210] sm:$0xff] }
 0x1eb   :  { %v2177_v25 = vpop.xlane.xlu1 %2176  ;;  %5687 = vmatmul.msk.f32.gmra.mxu1 %vm1090_vm1, %v994_v20  ;;  %v1904_v34 = vmax.f32 %v1577_v23, 0.0  ;;  %v3341_v57 = vand.u32 2147483647, %v7120_v13  ;;  %vm3337_vm2 = vweird.f32 %v7120_v13  ;;  %5581 = vmatmul.msk.f32.gmra.mxu3 %vm164_vm0, %v98_v17 }
 0x1ec   :  { %v5253_v26 = vsel %vm9749_vm9, %v5251_v18, %v5249_v58  ;;  %v3320_v27 = vmul.f32 %v5962_v9, %v3319_v19  ;;  %v2540_v29 = vadd.f32 %v6836_v45, %v2177_v25  ;;  %v3343_v58 = vand.u32 2147483648, %v7120_v13 }
 0x1ed   :  { %v2036_v52 = vmul.f32 %v7072_v11, %v1904_v34 }
 0x1ee   :  { %v5964_v35 = vpop.eup %5963  ;;  %v3321_v37 = vadd.f32 %v5962_v9, %v3320_v27  ;;  %v5784_v39 = vmul.f32 -1.442695, %v2540_v29  ;;  %v701_v44 = vpop.f32.mrf.mxu0  ;;  %v3344_v15 = vor.u32 1.1754944e-38, %v3343_v58 }
 0x1ef   :  { %v5966_v42 = vpop.eup %5965  ;;  %v7145_v41 = vadd.f32 1.0, %v5964_v35  ;;  %v702_v51 = vadd.f32 %v7000_v43, %v701_v44  ;;  %v2220_v61 = vsel %vm164_vm0, %v2036_v52, 0.0 }
 0x1f0   :  { %v3325_v46 = vsel %vm3324_vm3, %v5962_v9, %v3321_v37  ;;  %v3333_v48 = vmul.f32 %v5966_v42, %v7120_v13  ;;  %5967 = vpow2.f32 %v5784_v39  ;;  %v1579_v53 = vpop.f32.mrf.mxu1  ;;  %vm3338_vm13 = vweird.f32 %v5966_v42  ;;  %2221 = vadd.xlane.f32.xlu1 %v2220_v61 }
 0x1f1   :  { %v3330_v40 = vsel %vm3327_vm7, %v3329_v50, %v3325_v46  ;;  %5969 = vrcp.f32 %v7145_v41  ;;  %5576 = vmatmul.msk.f32.gmra.mxu0 %vm164_vm0, %v93_v47  ;;  %v995_v56 = vmax.f32 %v702_v51, 0.0  ;;  %v1580_v60 = vadd.f32 %v7084_v21, %v1579_v53  ;;  %vm3339_vm3 = vmor %vm3337_vm2, %vm3338_vm13  ;;  %v99_v53 = vld [vmem:[%s9735_s0 + $0x218] sm:$0xff] }
 0x1f2   :  { %v5255_v54 = vperm.slane %v3330_v40, %v7136_v36  ;;  %v3334_v55 = vsub.f32 1.0, %v3333_v48  ;;  %v7162_v9 = vadd.s32 4294967208, %v6906_v59  ;;  %vm3342_vm7 = vcmp.eq.f32.partialorder %v3341_v57, 8.507059e+37  ;;  %v95_v48 = vld [vmem:[%s9735_s0 + $0x1f8] sm:$0xff] }
 0x1f3   :  { %v2180_v62 = vpop.xlane.xlu2 %2179  ;;  %5688 = vmatmul.msk.f32.gmra.mxu1 %vm1090_vm1, %v995_v56  ;;  %v1905_v6 = vmax.f32 %v1580_v60, 0.0  ;;  %v3356_v27 = vand.u32 2147483647, %v7145_v41  ;;  %v3358_v29 = vand.u32 2147483648, %v7145_v41  ;;  %v7188_v50 = vadd.s32 4294967200, %v6906_v59  ;;  %5582 = vmatmul.msk.f32.gmra.mxu3 %vm164_vm0, %v99_v53 }
 0x1f4   :  { %v5257_v0 = vsel %vm9742_vm8, %v5255_v54, %v5253_v26  ;;  %v3335_v2 = vmul.f32 %v5966_v42, %v3334_v55  ;;  %v2541_v3 = vadd.f32 %v6836_v45, %v2180_v62  ;;  %vm9743_vm8 = vcmask 786112  }
 0x1f5   :  { %v2037_v20 = vmul.f32 %v7072_v11, %v1905_v6  ;;  %vm3352_vm2 = vweird.f32 %v7145_v41  ;;  %v3359_v54 = vor.u32 1.1754944e-38, %v3358_v29 }
 0x1f6   :  { %v5968_v7 = vpop.eup %5967  ;;  %v3336_v10 = vadd.f32 %v5966_v42, %v3335_v2  ;;  %v5785_v14 = vmul.f32 -1.442695, %v2541_v3  ;;  %v704_v16 = vpop.f32.mrf.mxu0 }
 0x1f7   :  { %v5970_v8 = vpop.eup %5969  ;;  %v7171_v18 = vadd.f32 1.0, %v5968_v7  ;;  %v705_v19 = vadd.f32 %v7000_v43, %v704_v16  ;;  %v2223_v35 = vsel %vm164_vm0, %v2037_v20, 0.0 }
 0x1f8   :  { %v3340_v13 = vsel %vm3339_vm3, %v5966_v42, %v3336_v10  ;;  %v3348_v28 = vmul.f32 %v5970_v8, %v7145_v41  ;;  %5971 = vpow2.f32 %v5785_v14  ;;  %v1582_v22 = vpop.f32.mrf.mxu1  ;;  %vm3353_vm13 = vweird.f32 %v5970_v8  ;;  %2224 = vadd.xlane.f32.xlu2 %v2223_v35 }
 0x1f9   :  { %v3345_v23 = vsel %vm3342_vm7, %v3344_v15, %v3340_v13  ;;  %5973 = vrcp.f32 %v7171_v18  ;;  %5577 = vmatmul.msk.f32.gmra.mxu0 %vm164_vm0, %v94_v12  ;;  %v996_v26 = vmax.f32 %v705_v19, 0.0  ;;  %v1583_v34 = vadd.f32 %v7084_v21, %v1582_v22  ;;  %vm3354_vm3 = vmor %vm3352_vm2, %vm3353_vm13  ;;  %v96_v22 = vld [vmem:[%s9735_s0 + $0x200] sm:$0xff] }
 0x1fa   :  { %v5259_v24 = vperm.slane %v3345_v23, %v7162_v9  ;;  %v3349_v25 = vsub.f32 1.0, %v3348_v28  ;;  %vm3357_vm7 = vcmp.eq.f32.partialorder %v3356_v27, 8.507059e+37  ;;  %v3371_v3 = vand.u32 2147483647, %v7171_v18  ;;  %v100_v23 = vld [vmem:[%s9735_s0 + $0x220] sm:$0xff] }
 0x1fb   :  { %v2183_v37 = vpop.xlane.xlu0 %2182  ;;  %5689 = vmatmul.msk.f32.gmra.mxu1 %vm1090_vm1, %v996_v26  ;;  %v1906_v49 = vmax.f32 %v1583_v34, 0.0  ;;  %v3373_v6 = vand.u32 2147483648, %v7171_v18  ;;  %v7214_v19 = vadd.s32 4294967192, %v6906_v59  ;;  %vm3367_vm2 = vweird.f32 %v7171_v18  ;;  %5583 = vmatmul.msk.f32.gmra.mxu3 %vm164_vm0, %v100_v23 }
 0x1fc   :  { %v5261_v39 = vsel %vm9743_vm8, %v5259_v24, %v5257_v0  ;;  %v3350_v44 = vmul.f32 %v5970_v8, %v3349_v25  ;;  %v2542_v47 = vadd.f32 %v6836_v45, %v2183_v37  ;;  %vm9744_vm8 = vcmask 851712  }
 0x1fd   :  { %v2038_v57 = vmul.f32 %v7072_v11, %v1906_v49  ;;  %v3374_v25 = vor.u32 1.1754944e-38, %v3373_v6  ;;  %v101_v6 = vld [vmem:[%s9735_s0 + $0x228] sm:$0xff] }
 0x1fe   :  { %v5972_v42 = vpop.eup %5971  ;;  %v3351_v51 = vadd.f32 %v5970_v8, %v3350_v44  ;;  %v5786_v52 = vmul.f32 -1.442695, %v2542_v47  ;;  %v707_v46 = vpop.f32.mrf.mxu0 }
 0x1ff   :  { %v5974_v40 = vpop.eup %5973  ;;  %v7197_v55 = vadd.f32 1.0, %v5972_v42  ;;  %v708_v56 = vadd.f32 %v7000_v43, %v707_v46  ;;  %v2226_v10 = vsel %vm164_vm0, %v2038_v57, 0.0  ;;  %v7240_v57 = vadd.s32 4294967184, %v6906_v59 }
 0x200   :  { %v3355_v41 = vsel %vm3354_vm3, %v5970_v8, %v3351_v51  ;;  %v3363_v58 = vmul.f32 %v5974_v40, %v7171_v18  ;;  %5975 = vpow2.f32 %v5786_v52  ;;  %v1585_v60 = vpop.f32.mrf.mxu1  ;;  %vm3368_vm13 = vweird.f32 %v5974_v40  ;;  %2227 = vadd.xlane.f32.xlu0 %v2226_v10 }
 0x201   :  { %v3360_v61 = vsel %vm3357_vm7, %v3359_v54, %v3355_v41  ;;  %5977 = vrcp.f32 %v7197_v55  ;;  %5578 = vmatmul.msk.f32.gmra.mxu0 %vm164_vm0, %v95_v48  ;;  %v997_v2 = vmax.f32 %v708_v56, 0.0  ;;  %v1586_v7 = vadd.f32 %v7084_v21, %v1585_v60  ;;  %vm3369_vm3 = vmor %vm3367_vm2, %vm3368_vm13 }
 0x202   :  { %v5263_v62 = vperm.slane %v3360_v61, %v7188_v50  ;;  %v3364_v0 = vsub.f32 1.0, %v3363_v58  ;;  %vm3372_vm7 = vcmp.eq.f32.partialorder %v3371_v3, 8.507059e+37  ;;  %v3388_v47 = vand.u32 2147483648, %v7197_v55 }
 0x203   :  { %v2186_v14 = vpop.xlane.xlu1 %2185  ;;  %5690 = vmatmul.msk.f32.gmra.mxu1 %vm1090_vm1, %v997_v2  ;;  %v1907_v8 = vmax.f32 %v1586_v7, 0.0  ;;  %v3386_v48 = vand.u32 2147483647, %v7197_v55  ;;  %vm3382_vm2 = vweird.f32 %v7197_v55  ;;  %5584 = vmatmul.msk.f32.gmra.mxu3 %vm164_vm0, %v101_v6  ;;  %v103_v6 = vld [vmem:[%s9735_s0 + $0x238] sm:$0xff] }
 0x204   :  { %v5265_v16 = vsel %vm9744_vm8, %v5263_v62, %v5261_v39  ;;  %v3365_v12 = vmul.f32 %v5974_v40, %v3364_v0  ;;  %v2543_v17 = vadd.f32 %v6836_v45, %v2186_v14  ;;  %vm9745_vm8 = vcmask 917312  }
 0x205   :  { %v2039_v29 = vmul.f32 %v7072_v11, %v1907_v8  ;;  %v3389_v58 = vor.u32 1.1754944e-38, %v3388_v47 }
 0x206   :  { %v5976_v15 = vpop.eup %5975  ;;  %v3366_v20 = vadd.f32 %v5974_v40, %v3365_v12  ;;  %v5787_v13 = vmul.f32 -1.442695, %v2543_v17  ;;  %v710_v28 = vpop.f32.mrf.mxu0 }
 0x207   :  { %v5978_v24 = vpop.eup %5977  ;;  %v7223_v26 = vadd.f32 1.0, %v5976_v15  ;;  %v711_v27 = vadd.f32 %v7000_v43, %v710_v28  ;;  %v2229_v51 = vsel %vm164_vm0, %v2039_v29, 0.0 }
 0x208   :  { %v3370_v18 = vsel %vm3369_vm3, %v5974_v40, %v3366_v20  ;;  %v3378_v34 = vmul.f32 %v5978_v24, %v7197_v55  ;;  %5979 = vpow2.f32 %v5787_v13  ;;  %v1588_v35 = vpop.f32.mrf.mxu1  ;;  %vm3383_vm13 = vweird.f32 %v5978_v24  ;;  %2230 = vadd.xlane.f32.xlu1 %v2229_v51 }
 0x209   :  { %v3375_v37 = vsel %vm3372_vm7, %v3374_v25, %v3370_v18  ;;  %5981 = vrcp.f32 %v7223_v26  ;;  %5579 = vmatmul.msk.f32.gmra.mxu0 %vm164_vm0, %v96_v22  ;;  %v998_v49 = vmax.f32 %v711_v27, 0.0  ;;  %v1589_v42 = vadd.f32 %v7084_v21, %v1588_v35  ;;  %vm3384_vm3 = vmor %vm3382_vm2, %vm3383_vm13 }
 0x20a   :  { %v5267_v39 = vperm.slane %v3375_v37, %v7214_v19  ;;  %v3379_v44 = vsub.f32 1.0, %v3378_v34  ;;  %vm3387_vm7 = vcmp.eq.f32.partialorder %v3386_v48, 8.507059e+37  ;;  %v3403_v17 = vand.u32 2147483648, %v7223_v26 }
 0x20b   :  { %5691 = vmatmul.msk.f32.gmra.mxu1 %vm1090_vm1, %v998_v49  ;;  %v2189_v53 = vpop.xlane.xlu2 %2188  ;;  %v1908_v40 = vmax.f32 %v1589_v42, 0.0  ;;  %v3401_v22 = vand.u32 2147483647, %v7223_v26  ;;  %vm3397_vm2 = vweird.f32 %v7223_v26 }
 0x20c   :  { %v5269_v52 = vsel %vm9745_vm8, %v5267_v39, %v5265_v16  ;;  %v3380_v46 = vmul.f32 %v5978_v24, %v3379_v44  ;;  %v2544_v54 = vadd.f32 %v6836_v45, %v2189_v53  ;;  %vm9746_vm8 = vcmask 982912   ;;  %v102_v39 = vld [vmem:[%s9735_s0 + $0x230] sm:$0xff] }
 0x20d   :  { %v2040_v3 = vmul.f32 %v7072_v11, %v1908_v40  ;;  %v3404_v18 = vor.u32 1.1754944e-38, %v3403_v17  ;;  %5585 = vmatmul.msk.f32.gmra.mxu3 %vm164_vm0, %v102_v39 }
 0x20e   :  { %v5980_v56 = vpop.eup %5979  ;;  %v3381_v41 = vadd.f32 %v5978_v24, %v3380_v46  ;;  %v713_v60 = vpop.f32.mrf.mxu0  ;;  %v5788_v0 = vmul.f32 -1.442695, %v2544_v54 }
 0x20f   :  { %v5982_v61 = vpop.eup %5981  ;;  %v7243_v62 = vadd.f32 1.0, %v5980_v56  ;;  %v714_v2 = vadd.f32 %v7000_v43, %v713_v60  ;;  %v2232_v20 = vsel %vm164_vm0, %v2040_v3, 0.0 }
 0x210   :  { %v3385_v7 = vsel %vm3384_vm3, %v5978_v24, %v3381_v41  ;;  %v3393_v10 = vmul.f32 %v5982_v61, %v7223_v26  ;;  %v1591_v14 = vpop.f32.mrf.mxu1  ;;  %vm3398_vm13 = vweird.f32 %v5982_v61  ;;  %2233 = vadd.xlane.f32.xlu2 %v2232_v20  ;;  %v7261_v24 = vadd.s32 4294967176, %v6906_v59 }
 0x211   :  { %v3390_v55 = vsel %vm3387_vm7, %v3389_v58, %v3385_v7  ;;  %5983 = vrcp.f32 %v7243_v62  ;;  %v999_v8 = vmax.f32 %v714_v2, 0.0  ;;  %v1592_v15 = vadd.f32 %v7084_v21, %v1591_v14  ;;  %vm3399_vm7 = vmor %vm3397_vm2, %vm3398_vm13 }
 0x212   :  { %v5271_v16 = vperm.slane %v3390_v55, %v7240_v57  ;;  %v3394_v12 = vsub.f32 1.0, %v3393_v10  ;;  %5985 = vpow2.f32 %v5788_v0  ;;  %vm9747_vm3 = vcmask 1048512  }
 0x213   :  { %v1909_v23 = vmax.f32 %v1592_v15, 0.0  ;;  %5692 = vmatmul.msk.f32.gmra.mxu1 %vm1090_vm1, %v999_v8  ;;  %v2192_v34 = vpop.xlane.xlu0 %2191  ;;  %v3416_v20 = vand.u32 2147483647, %v7243_v62  ;;  %vm3412_vm13 = vweird.f32 %v7243_v62 }
 0x214   :  { %v5273_v13 = vsel %vm9746_vm8, %v5271_v16, %v5269_v52  ;;  %v3395_v28 = vmul.f32 %v5982_v61, %v3394_v12  ;;  %vm3402_vm8 = vcmp.eq.f32.partialorder %v3401_v22, 8.507059e+37  ;;  %v2545_v49 = vadd.f32 %v6836_v45, %v2192_v34 }
 0x215   :  { %v2041_v37 = vmul.f32 %v7072_v11, %v1909_v23  ;;  %5586 = vmatmul.msk.f32.gmra.mxu3 %vm164_vm0, %v103_v6 }
 0x216   :  { %v3396_v25 = vadd.f32 %v5982_v61, %v3395_v28  ;;  %v716_v27 = vpop.f32.mrf.mxu0  ;;  %v5789_v54 = vmul.f32 -1.442695, %v2545_v49 }
 0x217   :  { %v7264_v29 = vpop.eup %5983  ;;  %v717_v35 = vadd.f32 %v7000_v43, %v716_v27  ;;  %v2235_v48 = vsel %vm164_vm0, %v2041_v37, 0.0 }
 0x218   :  { %v5986_v44 = vpop.eup %5985  ;;  %v3400_v47 = vsel %vm3399_vm7, %v5982_v61, %v3396_v25  ;;  %v3408_v26 = vmul.f32 %v7264_v29, %v7243_v62  ;;  %v1594_v46 = vpop.f32.mrf.mxu1  ;;  %2236 = vadd.xlane.f32.xlu0 %v2235_v48 }
 0x219   :  { %v3405_v42 = vsel %vm3402_vm8, %v3404_v18, %v3400_v47  ;;  %v3056_v51 = vadd.f32 1.0, %v5986_v44  ;;  %v1000_v52 = vmax.f32 %v717_v35, 0.0  ;;  %v1595_v56 = vadd.f32 %v7084_v21, %v1594_v46 }
 0x21a   :  { %v5275_v53 = vperm.slane %v3405_v42, %v7261_v24  ;;  %v3409_v40 = vsub.f32 1.0, %v3408_v26  ;;  %vm3413_vm8 = vweird.f32 %v7264_v29  ;;  %v104_v26 = vld [vmem:[%s9735_s0 + $0x240] sm:$0xff] }
 0x21b   :  { %5987 = vrcp.f32 %v3056_v51  ;;  %v1910_v58 = vmax.f32 %v1595_v56, 0.0  ;;  %5693 = vmatmul.msk.f32.gmra.mxu1 %vm1090_vm1, %v1000_v52  ;;  %v2195_v2 = vpop.xlane.xlu1 %2194  ;;  %vm7299_vm2 = vmor %vm3412_vm13, %vm3413_vm8  ;;  %v3431_v27 = vand.u32 2147483647, %v3056_v51  ;;  %v3433_v18 = vand.u32 2147483648, %v3056_v51 }
 0x21c   :  { %v7279_v41 = vsel %vm9747_vm3, %v5275_v53, %v5273_v13  ;;  %5989 = vpow2.f32 %v5789_v54  ;;  %v3410_v60 = vmul.f32 %v7264_v29, %v3409_v40  ;;  %v2546_v7 = vadd.f32 %v6836_v45, %v2195_v2 }
 0x21d   :  { %v2042_v0 = vmul.f32 %v7072_v11, %v1910_v58  ;;  %v3418_v13 = vand.u32 2147483648, %v7243_v62  ;;  %vm3417_vm3 = vcmp.eq.f32.partialorder %v3416_v20, 8.507059e+37  ;;  %vm3427_vm8 = vweird.f32 %v3056_v51  ;;  %5587 = vmatmul.msk.f32.gmra.mxu3 %vm164_vm0, %v104_v26 }
 0x21e   :  { %v719_v61 = vpop.f32.mrf.mxu0  ;;  %v3411_v17 = vadd.f32 %v7264_v29, %v3410_v60  ;;  %v5790_v15 = vmul.f32 -1.442695, %v2546_v7  ;;  %v3434_v46 = vor.u32 1.1754944e-38, %v3433_v18 }
 0x21f   :  { %v720_v3 = vadd.f32 %v7000_v43, %v719_v61  ;;  %v2238_v10 = vsel %vm164_vm0, %v2042_v0, 0.0  ;;  %v3419_v39 = vor.u32 1.1754944e-38, %v3418_v13 }
 0x220   :  { %v1597_v16 = vpop.f32.mrf.mxu1  ;;  %2239 = vadd.xlane.f32.xlu1 %v2238_v10  ;;  %5991 = vpow2.f32 %v5790_v15  ;;  %v3415_v34 = vsel %vm7299_vm2, %v7264_v29, %v3411_v17  ;;  %vm3432_vm2 = vcmp.eq.f32.partialorder %v3431_v27, 8.507059e+37  ;;  %v105_v15 = vld [vmem:[%s9735_s0 + $0x248] sm:$0xff] }
 0x221   :  { %v5988_v55 = vpop.eup %5987  ;;  %v1001_v14 = vmax.f32 %v720_v3, 0.0  ;;  %v1598_v22 = vadd.f32 %v7084_v21, %v1597_v16  ;;  %v3420_v29 = vsel %vm3417_vm3, %v3419_v39, %v3415_v34 }
 0x222   :  { %v5990_v12 = vpop.eup %5989  ;;  %v3423_v8 = vmul.f32 %v5988_v55, %v3056_v51  ;;  %vm3428_vm7 = vweird.f32 %v5988_v55  ;;  %v5278_v2 = vperm.slane %v3420_v29, %v6906_v59 }
 0x223   :  { %v7295_v28 = vadd.f32 1.0, %v5990_v12  ;;  %5694 = vmatmul.msk.f32.gmra.mxu1 %vm1090_vm1, %v1001_v14  ;;  %v1911_v37 = vmax.f32 %v1598_v22, 0.0  ;;  %v2198_v44 = vpop.xlane.xlu2 %2197  ;;  %vm3429_vm13 = vmor %vm3427_vm8, %vm3428_vm7 }
 0x224   :  { %v3424_v23 = vsub.f32 1.0, %v3423_v8  ;;  %v2547_v42 = vadd.f32 %v6836_v45, %v2198_v44 }
 0x225   :  { %5993 = vrcp.f32 %v7295_v28  ;;  %v2043_v52 = vmul.f32 %v7072_v11, %v1911_v37  ;;  %v3446_v16 = vand.u32 2147483647, %v7295_v28  ;;  %v3448_v12 = vand.u32 2147483648, %v7295_v28  ;;  %5588 = vmatmul.msk.f32.gmra.mxu3 %vm164_vm0, %v105_v15 }
 0x226   :  { %v3425_v35 = vmul.f32 %v5988_v55, %v3424_v23  ;;  %v722_v62 = vpop.f32.mrf.mxu0  ;;  %v5992_v40 = vpop.eup %5991  ;;  %v5791_v56 = vmul.f32 -1.442695, %v2547_v42  ;;  %vm3442_vm7 = vweird.f32 %v7295_v28 }
 0x227   :  { %v723_v47 = vadd.f32 %v7000_v43, %v722_v62  ;;  %v2241_v60 = vsel %vm164_vm0, %v2043_v52, 0.0  ;;  %v7317_v0 = vadd.f32 1.0, %v5992_v40  ;;  %v3449_v62 = vor.u32 1.1754944e-38, %v3448_v12 }
 0x228   :  { %v3426_v49 = vadd.f32 %v5988_v55, %v3425_v35  ;;  %v1600_v53 = vpop.f32.mrf.mxu1  ;;  %2242 = vadd.xlane.f32.xlu2 %v2241_v60  ;;  %5995 = vpow2.f32 %v5791_v56 }
 0x229   :  { %v1002_v48 = vmax.f32 %v723_v47, 0.0  ;;  %v1601_v58 = vadd.f32 %v7084_v21, %v1600_v53  ;;  %5997 = vrcp.f32 %v7317_v0  ;;  %v3461_v29 = vand.u32 2147483647, %v7317_v0  ;;  %v7348_v53 = vld [vmem:[%s9736_s2] ss:$0 sm:$0xff] }
 0x22a   :  { %v3430_v54 = vsel %vm3429_vm13, %v5988_v55, %v3426_v49  ;;  %vm3447_vm13 = vcmp.eq.f32.partialorder %v3446_v16, 8.507059e+37 }
 0x22b   :  { %v5994_v51 = vpop.eup %5993  ;;  %v3435_v61 = vsel %vm3432_vm2, %v3434_v46, %v3430_v54  ;;  %5695 = vmatmul.msk.f32.gmra.mxu1 %vm1090_vm1, %v1002_v48  ;;  %v1912_v55 = vmax.f32 %v1601_v58, 0.0  ;;  %v2201_v17 = vpop.xlane.xlu0 %2200  ;;  %v3463_v46 = vand.u32 2147483648, %v7317_v0  ;;  %v106_v54 = vld [vmem:[%s9735_s0 + $0x250] sm:$0xff] }
 0x22c   :  { %v5279_v3 = vperm.slane %v3435_v61, %v6921_v5  ;;  %v3438_v6 = vmul.f32 %v5994_v51, %v7295_v28  ;;  %vm3443_vm3 = vweird.f32 %v5994_v51  ;;  %v2548_v13 = vadd.f32 %v6836_v45, %v2201_v17 }
 0x22d   :  { %v2044_v22 = vmul.f32 %v7072_v11, %v1912_v55  ;;  %vm3444_vm8 = vmor %vm3442_vm7, %vm3443_vm3  ;;  %5589 = vmatmul.msk.f32.gmra.mxu3 %vm164_vm0, %v106_v54  ;;  %vm3457_vm3 = vweird.f32 %v7317_v0 }
 0x22e   :  { %v5280_v7 = vsel %vm5220_vm10, %v5279_v3, %v5278_v2  ;;  %v3439_v10 = vsub.f32 1.0, %v3438_v6  ;;  %v725_v14 = vpop.f32.mrf.mxu0  ;;  %v5996_v27 = vpop.eup %5995  ;;  %v5792_v34 = vmul.f32 -1.442695, %v2548_v13 }
 0x22f   :  { %v726_v8 = vadd.f32 %v7000_v43, %v725_v14  ;;  %v2244_v35 = vsel %vm164_vm0, %v2044_v22, 0.0  ;;  %v5998_v37 = vpop.eup %5997  ;;  %v7337_v39 = vadd.f32 1.0, %v5996_v27 }
 0x230   :  { %v3440_v20 = vmul.f32 %v5994_v51, %v3439_v10  ;;  %v1603_v25 = vpop.f32.mrf.mxu1  ;;  %2245 = vadd.xlane.f32.xlu0 %v2244_v35  ;;  %v3453_v47 = vmul.f32 %v5998_v37, %v7317_v0  ;;  %5999 = vpow2.f32 %v5792_v34  ;;  %vm3458_vm2 = vweird.f32 %v5998_v37  ;;  %v107_v34 = vld [vmem:[%s9735_s0 + $0x258] sm:$0xff] }
 0x231   :  { %v1003_v23 = vmax.f32 %v726_v8, 0.0  ;;  %v1604_v43 = vadd.f32 %v7084_v21, %v1603_v25  ;;  %6001 = vrcp.f32 %v7337_v39  ;;  %vm3459_vm7 = vmor %vm3457_vm3, %vm3458_vm2  ;;  %v3478_v25 = vand.u32 2147483648, %v7337_v39 }
 0x232   :  { %v3441_v18 = vadd.f32 %v5994_v51, %v3440_v20  ;;  %v3454_v49 = vsub.f32 1.0, %v3453_v47  ;;  %vm3472_vm2 = vweird.f32 %v7337_v39 }
 0x233   :  { %5696 = vmatmul.msk.f32.gmra.mxu1 %vm1090_vm1, %v1003_v23  ;;  %v1913_v42 = vmax.f32 %v1604_v43, 0.0  ;;  %v2204_v48 = vpop.xlane.xlu1 %2203  ;;  %v3476_v23 = vand.u32 2147483647, %v7337_v39 }
 0x234   :  { %v3445_v44 = vsel %vm3444_vm8, %v5994_v51, %v3441_v18  ;;  %v3455_v58 = vmul.f32 %v5998_v37, %v3454_v49  ;;  %v2549_v60 = vadd.f32 %v6836_v45, %v2204_v48  ;;  %vm3462_vm8 = vcmp.eq.f32.partialorder %v3461_v29, 8.507059e+37 }
 0x235   :  { %v3450_v28 = vsel %vm3447_vm13, %v3449_v62, %v3445_v44  ;;  %v2045_v2 = vmul.f32 %v7072_v11, %v1913_v42  ;;  %5590 = vmatmul.msk.f32.gmra.mxu3 %vm164_vm0, %v107_v34  ;;  %v3479_v29 = vor.u32 1.1754944e-38, %v3478_v25 }
 0x236   :  { %v5281_v26 = vperm.slane %v3450_v28, %v6945_v38  ;;  %v728_v52 = vpop.f32.mrf.mxu0  ;;  %v6000_v3 = vpop.eup %5999  ;;  %v3456_v6 = vadd.f32 %v5998_v37, %v3455_v58  ;;  %v5793_v10 = vmul.f32 -1.442695, %v2549_v60 }
 0x237   :  { %v729_v40 = vadd.f32 %v7348_v53, %v728_v52  ;;  %v6002_v14 = vpop.eup %6001  ;;  %v7360_v16 = vadd.f32 1.0, %v6000_v3  ;;  %v2247_v12 = vsel %vm164_vm0, %v2045_v2, 0.0 }
 0x238   :  { %v5282_v56 = vsel %vm5224_vm15, %v5281_v26, %v5280_v7  ;;  %v1606_v61 = vpop.f32.mrf.mxu1  ;;  %v3464_v7 = vor.u32 1.1754944e-38, %v3463_v46  ;;  %v3460_v17 = vsel %vm3459_vm7, %v5998_v37, %v3456_v6  ;;  %v3468_v8 = vmul.f32 %v6002_v14, %v7337_v39  ;;  %2248 = vadd.xlane.f32.xlu1 %v2247_v12 }
 0x239   :  { %v1004_v51 = vmax.f32 %v729_v40, 0.0  ;;  %v1607_v55 = vadd.f32 %v7084_v21, %v1606_v61  ;;  %6003 = vpow2.f32 %v5793_v10  ;;  %vm3473_vm13 = vweird.f32 %v6002_v14  ;;  %v108_v10 = vld [vmem:[%s9735_s0 + $0x260] sm:$0xff] }
 0x23a   :  { %v3465_v15 = vsel %vm3462_vm8, %v3464_v7, %v3460_v17  ;;  %6005 = vrcp.f32 %v7360_v16  ;;  %v3469_v20 = vsub.f32 1.0, %v3468_v8  ;;  %vm3474_vm3 = vmor %vm3472_vm2, %vm3473_vm13  ;;  %vm3477_vm7 = vcmp.eq.f32.partialorder %v3476_v23, 8.507059e+37 }
 0x23b   :  { %5697 = vmatmul.msk.f32.gmra.mxu1 %vm1090_vm1, %v1004_v51  ;;  %v5283_v0 = vperm.slane %v3465_v15, %v6967_v4  ;;  %v1914_v13 = vmax.f32 %v1607_v55, 0.0  ;;  %v2207_v27 = vpop.xlane.xlu2 %2206  ;;  %v3491_v61 = vand.u32 2147483647, %v7360_v16  ;;  %v3493_v2 = vand.u32 2147483648, %v7360_v16 }
 0x23c   :  { %v3470_v35 = vmul.f32 %v6002_v14, %v3469_v20  ;;  %v2550_v37 = vadd.f32 %v6836_v45, %v2207_v27  ;;  %vm3487_vm13 = vweird.f32 %v7360_v16 }
 0x23d   :  { %v5284_v43 = vsel %vm9748_vm6, %v5283_v0, %v5282_v56  ;;  %v2046_v47 = vmul.f32 %v7072_v11, %v1914_v13  ;;  %5591 = vmatmul.msk.f32.gmra.mxu3 %vm164_vm0, %v108_v10  ;;  %v3494_v23 = vor.u32 1.1754944e-38, %v3493_v2 }
 0x23e   :  { %v731_v22 = vpop.f32.mrf.mxu0  ;;  %v3471_v26 = vadd.f32 %v6002_v14, %v3470_v35  ;;  %v5794_v49 = vmul.f32 -1.442695, %v2550_v37 }
 0x23f   :  { %v732_v18 = vadd.f32 %v7348_v53, %v731_v22  ;;  %v6004_v28 = vpop.eup %6003  ;;  %v2250_v48 = vsel %vm164_vm0, %v2046_v47, 0.0 }
 0x240   :  { %v1609_v44 = vpop.f32.mrf.mxu1  ;;  %v6006_v52 = vpop.eup %6005  ;;  %v7379_v46 = vadd.f32 1.0, %v6004_v28  ;;  %v3475_v40 = vsel %vm3474_vm3, %v6002_v14, %v3471_v26  ;;  %6007 = vpow2.f32 %v5794_v49  ;;  %2251 = vadd.xlane.f32.xlu2 %v2250_v48  ;;  %vm3492_vm3 = vcmp.eq.f32.partialorder %v3491_v61, 8.507059e+37  ;;  %v109_v28 = vld [vmem:[%s9735_s0 + $0x268] sm:$0xff]  ;;  %v7417_v48 = vld [vmem:[%s9739_s5] ss:$0 sm:$0xff] }
 0x241   :  { %v1005_v62 = vmax.f32 %v732_v18, 0.0  ;;  %v1610_v42 = vadd.f32 %v7084_v21, %v1609_v44  ;;  %v3483_v54 = vmul.f32 %v6006_v52, %v7360_v16  ;;  %v3480_v56 = vsel %vm3477_vm7, %v3479_v29, %v3475_v40 }
 0x242   :  { %6009 = vrcp.f32 %v7379_v46  ;;  %v5285_v39 = vperm.slane %v3480_v56, %v6989_v32  ;;  %vm3488_vm8 = vweird.f32 %v6006_v52  ;;  %v3506_v37 = vand.u32 2147483647, %v7379_v46 }
 0x243   :  { %5698 = vmatmul.msk.f32.gmra.mxu1 %vm1090_vm1, %v1005_v62  ;;  %v3484_v58 = vsub.f32 1.0, %v3483_v54  ;;  %v1915_v60 = vmax.f32 %v1610_v42, 0.0  ;;  %v2210_v3 = vpop.xlane.xlu0 %2209  ;;  %vm3489_vm2 = vmor %vm3487_vm13, %vm3488_vm8  ;;  %v3508_v62 = vand.u32 2147483648, %v7379_v46  ;;  %vm3502_vm8 = vweird.f32 %v7379_v46 }
 0x244   :  { %v5286_v55 = vsel %vm5232_vm12, %v5285_v39, %v5284_v43  ;;  %v2551_v7 = vadd.f32 %v6836_v45, %v2210_v3 }
 0x245   :  { %v3485_v14 = vmul.f32 %v6006_v52, %v3484_v58  ;;  %v2047_v8 = vmul.f32 %v7072_v11, %v1915_v60  ;;  %5592 = vmatmul.msk.f32.gmra.mxu3 %vm164_vm0, %v109_v28  ;;  %v7424_v58 = vld [vmem:[%s9738_s4] ss:$0 sm:$0xff]  ;;  %v3509_v61 = vor.u32 1.1754944e-38, %v3508_v62 }
 0x246   :  { %v734_v51 = vpop.f32.mrf.mxu0  ;;  %v6008_v15 = vpop.eup %6007  ;;  %v5795_v20 = vmul.f32 -1.442695, %v2551_v7 }
 0x247   :  { %v735_v6 = vadd.f32 %v7348_v53, %v734_v51  ;;  %v3486_v0 = vadd.f32 %v6006_v52, %v3485_v14  ;;  %v7398_v25 = vadd.f32 1.0, %v6008_v15  ;;  %v2253_v27 = vsel %vm164_vm0, %v2047_v8, 0.0 }
 0x248   :  { %v1612_v17 = vpop.f32.mrf.mxu1  ;;  %v6010_v22 = vpop.eup %6009  ;;  %6011 = vpow2.f32 %v5795_v20  ;;  %2254 = vadd.xlane.f32.xlu0 %v2253_v27  ;;  %v110_v20 = vld [vmem:[%s9735_s0 + $0x270] sm:$0xff] }
 0x249   :  { %v1006_v12 = vmax.f32 %v735_v6, 0.0  ;;  %v1613_v13 = vadd.f32 %v7084_v21, %v1612_v17  ;;  %v3490_v18 = vsel %vm3489_vm2, %v6006_v52, %v3486_v0  ;;  %v3498_v34 = vmul.f32 %v6010_v22, %v7379_v46 }
 0x24a   :  { %v3495_v11 = vsel %vm3492_vm3, %v3494_v23, %v3490_v18  ;;  %6013 = vrcp.f32 %v7398_v25  ;;  %vm3503_vm7 = vweird.f32 %v6010_v22  ;;  %vm3507_vm2 = vcmp.eq.f32.partialorder %v3506_v37, 8.507059e+37 }
 0x24b   :  { %5699 = vmatmul.msk.f32.gmra.mxu1 %vm1090_vm1, %v1006_v12  ;;  %v5287_v21 = vperm.slane %v3495_v11, %v7016_v1  ;;  %v3499_v16 = vsub.f32 1.0, %v3498_v34  ;;  %v1916_v43 = vmax.f32 %v1613_v13, 0.0  ;;  %v2213_v44 = vpop.xlane.xlu1 %2212  ;;  %vm3504_vm13 = vmor %vm3502_vm8, %vm3503_vm7  ;;  %v3521_v17 = vand.u32 2147483647, %v7398_v25 }
 0x24c   :  { %v2552_v42 = vadd.f32 %v6836_v45, %v2213_v44  ;;  %v3523_v8 = vand.u32 2147483648, %v7398_v25  ;;  %vm3517_vm7 = vweird.f32 %v7398_v25 }
 0x24d   :  { %v5288_v26 = vsel %vm5236_vm4, %v5287_v21, %v5286_v55  ;;  %v3500_v49 = vmul.f32 %v6010_v22, %v3499_v16  ;;  %v2048_v40 = vmul.f32 %v7417_v48, %v1916_v43  ;;  %5593 = vmatmul.msk.f32.gmra.mxu3 %vm164_vm0, %v110_v20 }
 0x24e   :  { %v737_v35 = vpop.f32.mrf.mxu0  ;;  %v6012_v54 = vpop.eup %6011  ;;  %v5796_v39 = vmul.f32 -1.442695, %v2552_v42  ;;  %v3524_v37 = vor.u32 1.1754944e-38, %v3523_v8 }
 0x24f   :  { %v738_v47 = vadd.f32 %v7348_v53, %v737_v35  ;;  %v3501_v56 = vadd.f32 %v6010_v22, %v3500_v49  ;;  %v7427_v2 = vadd.f32 1.0, %v6012_v54  ;;  %v2256_v3 = vsel %vm164_vm0, %v2048_v40, 0.0 }
 0x250   :  { %v1615_v29 = vpop.f32.mrf.mxu1  ;;  %v6014_v51 = vpop.eup %6013  ;;  %6015 = vpow2.f32 %v5796_v39  ;;  %2257 = vadd.xlane.f32.xlu1 %v2256_v3  ;;  %v111_v39 = vld [vmem:[%s9735_s0 + $0x278] sm:$0xff] }
 0x251   :  { %v1007_v52 = vmax.f32 %v738_v47, 0.0  ;;  %v1616_v60 = vadd.f32 %v7424_v58, %v1615_v29  ;;  %v3505_v6 = vsel %vm3504_vm13, %v6010_v22, %v3501_v56  ;;  %v3513_v10 = vmul.f32 %v6014_v51, %v7398_v25 }
 0x252   :  { %v3510_v46 = vsel %vm3507_vm2, %v3509_v61, %v3505_v6  ;;  %6017 = vrcp.f32 %v7427_v2  ;;  %vm3518_vm3 = vweird.f32 %v6014_v51  ;;  %vm3522_vm13 = vcmp.eq.f32.partialorder %v3521_v17, 8.507059e+37 }
 0x253   :  { %5700 = vmatmul.msk.f32.gmra.mxu1 %vm1090_vm1, %v1007_v52  ;;  %v5289_v55 = vperm.slane %v3510_v46, %v7038_v30  ;;  %v3514_v14 = vsub.f32 1.0, %v3513_v10  ;;  %v1917_v7 = vmax.f32 %v1616_v60, 0.0  ;;  %v2216_v15 = vpop.xlane.xlu2 %2215  ;;  %vm3519_vm8 = vmor %vm3517_vm7, %vm3518_vm3  ;;  %v3536_v29 = vand.u32 2147483647, %v7427_v2 }
 0x254   :  { %v2553_v23 = vadd.f32 %v6836_v45, %v2216_v15  ;;  %v3538_v40 = vand.u32 2147483648, %v7427_v2  ;;  %vm3532_vm3 = vweird.f32 %v7427_v2 }
 0x255   :  { %v5290_v13 = vsel %vm5240_vm11, %v5289_v55, %v5288_v26  ;;  %v3515_v22 = vmul.f32 %v6014_v51, %v3514_v14  ;;  %v2049_v34 = vmul.f32 %v7417_v48, %v1917_v7  ;;  %5594 = vmatmul.msk.f32.gmra.mxu3 %vm164_vm0, %v111_v39 }
 0x256   :  { %v740_v12 = vpop.f32.mrf.mxu0  ;;  %v6016_v11 = vpop.eup %6015  ;;  %v5797_v16 = vmul.f32 -1.442695, %v2553_v23  ;;  %v3539_v17 = vor.u32 1.1754944e-38, %v3538_v40 }
 0x257   :  { %v741_v0 = vadd.f32 %v7348_v53, %v740_v12  ;;  %v3516_v21 = vadd.f32 %v6014_v51, %v3515_v22  ;;  %v7446_v62 = vadd.f32 1.0, %v6016_v11  ;;  %v2259_v44 = vsel %vm164_vm0, %v2049_v34, 0.0 }
 0x258   :  { %v1618_v18 = vpop.f32.mrf.mxu1  ;;  %v6018_v35 = vpop.eup %6017  ;;  %6019 = vpow2.f32 %v5797_v16  ;;  %2260 = vadd.xlane.f32.xlu2 %v2259_v44  ;;  %v112_v16 = vld [vmem:[%s9735_s0 + $0x280] sm:$0xff] }
 0x259   :  { %v1008_v27 = vmax.f32 %v741_v0, 0.0  ;;  %v1619_v43 = vadd.f32 %v7424_v58, %v1618_v18  ;;  %v3520_v47 = vsel %vm3519_vm8, %v6014_v51, %v3516_v21  ;;  %v3528_v28 = vmul.f32 %v6018_v35, %v7427_v2 }
 0x25a   :  { %v3525_v26 = vsel %vm3522_vm13, %v3524_v37, %v3520_v47  ;;  %6021 = vrcp.f32 %v7446_v62  ;;  %vm3533_vm2 = vweird.f32 %v6018_v35  ;;  %vm3537_vm8 = vcmp.eq.f32.partialorder %v3536_v29, 8.507059e+37 }
 0x25b   :  { %5701 = vmatmul.msk.f32.gmra.mxu1 %vm1090_vm1, %v1008_v27  ;;  %v5291_v25 = vperm.slane %v3525_v26, %v7060_v63  ;;  %v3529_v49 = vsub.f32 1.0, %v3528_v28  ;;  %v1918_v42 = vmax.f32 %v1619_v43, 0.0  ;;  %v2219_v54 = vpop.xlane.xlu0 %2218  ;;  %vm3534_vm7 = vmor %vm3532_vm3, %vm3533_vm2  ;;  %v3551_v18 = vand.u32 2147483647, %v7446_v62 }
 0x25c   :  { %v2554_v61 = vadd.f32 %v6836_v45, %v2219_v54  ;;  %v3553_v34 = vand.u32 2147483648, %v7446_v62  ;;  %vm3547_vm2 = vweird.f32 %v7446_v62 }
 0x25d   :  { %v5292_v60 = vsel %vm5244_vm5, %v5291_v25, %v5290_v13  ;;  %v3530_v51 = vmul.f32 %v6018_v35, %v3529_v49  ;;  %v2050_v10 = vmul.f32 %v7417_v48, %v1918_v42  ;;  %5595 = vmatmul.msk.f32.gmra.mxu3 %vm164_vm0, %v112_v16 }
 0x25e   :  { %v743_v52 = vpop.f32.mrf.mxu0  ;;  %v6020_v46 = vpop.eup %6019  ;;  %v5798_v14 = vmul.f32 -1.442695, %v2554_v61  ;;  %v3554_v29 = vor.u32 1.1754944e-38, %v3553_v34 }
 0x25f   :  { %v744_v56 = vadd.f32 %v7348_v53, %v743_v52  ;;  %v3531_v55 = vadd.f32 %v6018_v35, %v3530_v51  ;;  %v7465_v8 = vadd.f32 1.0, %v6020_v46  ;;  %v2262_v15 = vsel %vm164_vm0, %v2050_v10, 0.0 }
 0x260   :  { %v1621_v6 = vpop.f32.mrf.mxu1  ;;  %v6022_v12 = vpop.eup %6021  ;;  %6023 = vpow2.f32 %v5798_v14  ;;  %2263 = vadd.xlane.f32.xlu0 %v2262_v15  ;;  %v113_v14 = vld [vmem:[%s9735_s0 + $0x288] sm:$0xff] }
 0x261   :  { %v1009_v3 = vmax.f32 %v744_v56, 0.0  ;;  %v1622_v7 = vadd.f32 %v7424_v58, %v1621_v6  ;;  %v3535_v0 = vsel %vm3534_vm7, %v6018_v35, %v3531_v55  ;;  %v3543_v20 = vmul.f32 %v6022_v12, %v7446_v62 }
 0x262   :  { %v3540_v13 = vsel %vm3537_vm8, %v3539_v17, %v3535_v0  ;;  %6025 = vrcp.f32 %v7465_v8  ;;  %vm3548_vm13 = vweird.f32 %v6022_v12  ;;  %vm3552_vm7 = vcmp.eq.f32.partialorder %v3551_v18, 8.507059e+37 }
 0x263   :  { %5702 = vmatmul.msk.f32.gmra.mxu1 %vm1090_vm1, %v1009_v3  ;;  %v5293_v2 = vperm.slane %v3540_v13, %v7092_v31  ;;  %v3544_v22 = vsub.f32 1.0, %v3543_v20  ;;  %v1919_v23 = vmax.f32 %v1622_v7, 0.0  ;;  %v2222_v11 = vpop.xlane.xlu1 %2221  ;;  %vm3549_vm3 = vmor %vm3547_vm2, %vm3548_vm13  ;;  %v3566_v6 = vand.u32 2147483647, %v7465_v8 }
 0x264   :  { %v2555_v37 = vadd.f32 %v6836_v45, %v2222_v11  ;;  %v3568_v10 = vand.u32 2147483648, %v7465_v8  ;;  %vm3562_vm13 = vweird.f32 %v7465_v8 }
 0x265   :  { %v5294_v43 = vsel %vm9750_vm14, %v5293_v2, %v5292_v60  ;;  %v3545_v35 = vmul.f32 %v6022_v12, %v3544_v22  ;;  %v2051_v28 = vmul.f32 %v7417_v48, %v1919_v23  ;;  %5596 = vmatmul.msk.f32.gmra.mxu3 %vm164_vm0, %v113_v14 }
 0x266   :  { %v746_v27 = vpop.f32.mrf.mxu0  ;;  %v6024_v26 = vpop.eup %6023  ;;  %v5799_v49 = vmul.f32 -1.442695, %v2555_v37  ;;  %v3569_v18 = vor.u32 1.1754944e-38, %v3568_v10 }
 0x267   :  { %v747_v21 = vadd.f32 %v7348_v53, %v746_v27  ;;  %v3546_v25 = vadd.f32 %v6022_v12, %v3545_v35  ;;  %v7484_v40 = vadd.f32 1.0, %v6024_v26  ;;  %v2265_v54 = vsel %vm164_vm0, %v2051_v28, 0.0 }
 0x268   :  { %v1624_v47 = vpop.f32.mrf.mxu1  ;;  %v6026_v52 = vpop.eup %6025  ;;  %6027 = vpow2.f32 %v5799_v49  ;;  %2266 = vadd.xlane.f32.xlu1 %v2265_v54 }
 0x269   :  { %v1010_v44 = vmax.f32 %v747_v21, 0.0  ;;  %v1625_v42 = vadd.f32 %v7424_v58, %v1624_v47  ;;  %v3550_v56 = vsel %vm3549_vm3, %v6022_v12, %v3546_v25  ;;  %v3558_v39 = vmul.f32 %v6026_v52, %v7465_v8  ;;  %v7506_v21 = vpop.f32.mrf.mxu3 }
 0x26a   :  { %v3555_v60 = vsel %vm3552_vm7, %v3554_v29, %v3550_v56  ;;  %6029 = vrcp.f32 %v7484_v40  ;;  %vm3563_vm8 = vweird.f32 %v6026_v52  ;;  %vm3567_vm3 = vcmp.eq.f32.partialorder %v3566_v6, 8.507059e+37 }
 0x26b   :  { %5703 = vmatmul.msk.f32.gmra.mxu1 %vm1090_vm1, %v1010_v44  ;;  %v5295_v62 = vperm.slane %v3555_v60, %v7114_v33  ;;  %v3559_v51 = vsub.f32 1.0, %v3558_v39  ;;  %v1920_v61 = vmax.f32 %v1625_v42, 0.0  ;;  %v2225_v46 = vpop.xlane.xlu2 %2224  ;;  %vm3564_vm2 = vmor %vm3562_vm13, %vm3563_vm8  ;;  %v3581_v28 = vand.u32 2147483647, %v7484_v40  ;;  %v114_v42 = vld [vmem:[%s9735_s0 + $0x290] sm:$0xff] }
 0x26c   :  { %v2556_v17 = vadd.f32 %v6836_v45, %v2225_v46  ;;  %v3583_v26 = vand.u32 2147483648, %v7484_v40  ;;  %vm9755_vm7 = vcmask 720512   ;;  %vm3577_vm13 = vweird.f32 %v7484_v40 }
 0x26d   :  { %v5296_v7 = vsel %vm9749_vm9, %v5295_v62, %v5294_v43  ;;  %v3560_v12 = vmul.f32 %v6026_v52, %v3559_v51  ;;  %v2052_v20 = vmul.f32 %v7417_v48, %v1920_v61  ;;  %5597 = vmatmul.msk.f32.gmra.mxu3 %vm164_vm0, %v114_v42 }
 0x26e   :  { %v749_v3 = vpop.f32.mrf.mxu0  ;;  %v6028_v13 = vpop.eup %6027  ;;  %v5800_v22 = vmul.f32 -1.442695, %v2556_v17  ;;  %v3584_v10 = vor.u32 1.1754944e-38, %v3583_v26 }
 0x26f   :  { %v750_v55 = vadd.f32 %v7348_v53, %v749_v3  ;;  %v3561_v2 = vadd.f32 %v6026_v52, %v3560_v12  ;;  %v7503_v34 = vadd.f32 1.0, %v6028_v13  ;;  %v2268_v11 = vsel %vm164_vm0, %v2052_v20, 0.0 }
 0x270   :  { %v1627_v0 = vpop.f32.mrf.mxu1  ;;  %v6030_v27 = vpop.eup %6029  ;;  %6031 = vpow2.f32 %v5800_v22  ;;  %2269 = vadd.xlane.f32.xlu2 %v2268_v11 }
 0x271   :  { %v1011_v15 = vmax.f32 %v750_v55, 0.0  ;;  %v1628_v23 = vadd.f32 %v7424_v58, %v1627_v0  ;;  %v3565_v16 = vsel %vm3564_vm2, %v6026_v52, %v3561_v2  ;;  %v3573_v43 = vmul.f32 %v6030_v27, %v7484_v40  ;;  %v7527_v14 = vpop.f32.mrf.mxu3 }
 0x272   :  { %v3570_v35 = vsel %vm3567_vm3, %v3569_v18, %v3565_v16  ;;  %6033 = vrcp.f32 %v7503_v34  ;;  %vm3578_vm8 = vweird.f32 %v6030_v27  ;;  %vm3582_vm3 = vcmp.eq.f32.partialorder %v3581_v28, 8.507059e+37 }
 0x273   :  { %5704 = vmatmul.msk.f32.gmra.mxu1 %vm1090_vm1, %v1011_v15  ;;  %v5297_v8 = vperm.slane %v3570_v35, %v7136_v36  ;;  %v3574_v37 = vsub.f32 1.0, %v3573_v43  ;;  %v1921_v44 = vmax.f32 %v1628_v23, 0.0  ;;  %v2228_v25 = vpop.xlane.xlu0 %2227  ;;  %vm3579_vm2 = vmor %vm3577_vm13, %vm3578_vm8  ;;  %v3596_v13 = vand.u32 2147483647, %v7503_v34 }
 0x274   :  { %v2557_v54 = vadd.f32 %v6836_v45, %v2228_v25  ;;  %v3598_v2 = vand.u32 2147483648, %v7503_v34  ;;  %vm3592_vm13 = vweird.f32 %v7503_v34 }
 0x275   :  { %v5298_v52 = vsel %vm9755_vm7, %v5297_v8, %v5296_v7  ;;  %v3575_v29 = vmul.f32 %v6030_v27, %v3574_v37  ;;  %v2053_v60 = vmul.f32 %v7417_v48, %v1921_v44  ;;  %vm9756_vm7 = vcmask 786112  }
 0x276   :  { %v752_v47 = vpop.f32.mrf.mxu0  ;;  %v6032_v62 = vpop.eup %6031  ;;  %v5801_v61 = vmul.f32 -1.442695, %v2557_v54  ;;  %v3599_v25 = vor.u32 1.1754944e-38, %v3598_v2 }
 0x277   :  { %v753_v49 = vadd.f32 %v7348_v53, %v752_v47  ;;  %v3576_v51 = vadd.f32 %v6030_v27, %v3575_v29  ;;  %v7524_v46 = vadd.f32 1.0, %v6032_v62  ;;  %v2271_v55 = vsel %vm164_vm0, %v2053_v60, 0.0 }
 0x278   :  { %v1630_v39 = vpop.f32.mrf.mxu1  ;;  %v6034_v6 = vpop.eup %6033  ;;  %6035 = vpow2.f32 %v5801_v61  ;;  %2272 = vadd.xlane.f32.xlu0 %v2271_v55 }
 0x279   :  { %v1012_v56 = vmax.f32 %v753_v49, 0.0  ;;  %v1631_v3 = vadd.f32 %v7424_v58, %v1630_v39  ;;  %v3580_v7 = vsel %vm3579_vm2, %v6030_v27, %v3576_v51  ;;  %v3588_v12 = vmul.f32 %v6034_v6, %v7503_v34  ;;  %v115_v27 = vld [vmem:[%s9735_s0 + $0x298] sm:$0xff] }
 0x27a   :  { %v3585_v17 = vsel %vm3582_vm3, %v3584_v10, %v3580_v7  ;;  %6037 = vrcp.f32 %v7524_v46  ;;  %vm3593_vm8 = vweird.f32 %v6034_v6  ;;  %5598 = vmatmul.msk.f32.gmra.mxu3 %vm164_vm0, %v115_v27  ;;  %vm3597_vm3 = vcmp.eq.f32.partialorder %v3596_v13, 8.507059e+37  ;;  %v116_v10 = vld [vmem:[%s9735_s0 + $0x2a0] sm:$0xff] }
 0x27b   :  { %5705 = vmatmul.msk.f32.gmra.mxu1 %vm1090_vm1, %v1012_v56  ;;  %v5299_v40 = vperm.slane %v3585_v17, %v7162_v9  ;;  %v3589_v15 = vsub.f32 1.0, %v3588_v12  ;;  %v1922_v0 = vmax.f32 %v1631_v3, 0.0  ;;  %v2231_v22 = vpop.xlane.xlu1 %2230  ;;  %vm3594_vm2 = vmor %vm3592_vm13, %vm3593_vm8  ;;  %v3611_v51 = vand.u32 2147483647, %v7524_v46 }
 0x27c   :  { %v2558_v16 = vadd.f32 %v6836_v45, %v2231_v22  ;;  %v3613_v61 = vand.u32 2147483648, %v7524_v46  ;;  %vm3607_vm13 = vweird.f32 %v7524_v46 }
 0x27d   :  { %v5300_v18 = vsel %vm9756_vm7, %v5299_v40, %v5298_v52  ;;  %v3590_v11 = vmul.f32 %v6034_v6, %v3589_v15  ;;  %v2054_v8 = vmul.f32 %v7417_v48, %v1922_v0  ;;  %v7548_v52 = vpop.f32.mrf.mxu3  ;;  %vm9757_vm7 = vcmask 851712  }
 0x27e   :  { %v755_v20 = vpop.f32.mrf.mxu0  ;;  %v6036_v37 = vpop.eup %6035  ;;  %v5802_v47 = vmul.f32 -1.442695, %v2558_v16 }
 0x27f   :  { %v756_v23 = vadd.f32 %v7348_v53, %v755_v20  ;;  %v3591_v44 = vadd.f32 %v6034_v6, %v3590_v11  ;;  %v7545_v49 = vadd.f32 1.0, %v6036_v37  ;;  %v2274_v42 = vsel %vm164_vm0, %v2054_v8, 0.0 }
 0x280   :  { %v1633_v35 = vpop.f32.mrf.mxu1  ;;  %v6038_v26 = vpop.eup %6037  ;;  %6039 = vpow2.f32 %v5802_v47  ;;  %2275 = vadd.xlane.f32.xlu1 %v2274_v42  ;;  %v762_v11 = vadd.f32 %v7348_v53, %v7506_v21  ;;  %v117_v42 = vld [vmem:[%s9735_s0 + $0x2a8] sm:$0xff] }
 0x281   :  { %v1013_v43 = vmax.f32 %v756_v23, 0.0  ;;  %v1634_v28 = vadd.f32 %v7424_v58, %v1633_v35  ;;  %v3595_v29 = vsel %vm3594_vm2, %v6034_v6, %v3591_v44  ;;  %v3603_v54 = vmul.f32 %v6038_v26, %v7524_v46 }
 0x282   :  { %v3600_v56 = vsel %vm3597_vm3, %v3599_v25, %v3595_v29  ;;  %6041 = vrcp.f32 %v7545_v49  ;;  %vm3608_vm8 = vweird.f32 %v6038_v26  ;;  %5599 = vmatmul.msk.f32.gmra.mxu3 %vm164_vm0, %v116_v10  ;;  %v3614_v23 = vor.u32 1.1754944e-38, %v3613_v61 }
 0x283   :  { %5706 = vmatmul.msk.f32.gmra.mxu1 %vm1090_vm1, %v1013_v43  ;;  %v5301_v34 = vperm.slane %v3600_v56, %v7188_v50  ;;  %v3604_v39 = vsub.f32 1.0, %v3603_v54  ;;  %v1923_v60 = vmax.f32 %v1634_v28, 0.0  ;;  %v2234_v3 = vpop.xlane.xlu2 %2233  ;;  %vm3609_vm2 = vmor %vm3607_vm13, %vm3608_vm8  ;;  %vm3612_vm3 = vcmp.eq.f32.partialorder %v3611_v51, 8.507059e+37 }
 0x284   :  { %v2559_v12 = vadd.f32 %v6836_v45, %v2234_v3  ;;  %v3626_v28 = vand.u32 2147483647, %v7545_v49  ;;  %v3628_v21 = vand.u32 2147483648, %v7545_v49  ;;  %vm3622_vm13 = vweird.f32 %v7545_v49 }
 0x285   :  { %v5302_v55 = vsel %vm9757_vm7, %v5301_v34, %v5300_v18  ;;  %v3605_v7 = vmul.f32 %v6038_v26, %v3604_v39  ;;  %v2055_v15 = vmul.f32 %v7417_v48, %v1923_v60  ;;  %v7572_v16 = vpop.f32.mrf.mxu3  ;;  %vm9758_vm7 = vcmask 917312  }
 0x286   :  { %v758_v62 = vpop.f32.mrf.mxu0  ;;  %v6040_v0 = vpop.eup %6039  ;;  %v5803_v13 = vmul.f32 -1.442695, %v2559_v12  ;;  %v765_v61 = vadd.f32 %v7348_v53, %v7527_v14 }
 0x287   :  { %v759_v6 = vadd.f32 %v7348_v53, %v758_v62  ;;  %v3606_v20 = vadd.f32 %v6038_v26, %v3605_v7  ;;  %v7566_v27 = vadd.f32 1.0, %v6040_v0  ;;  %v2277_v18 = vsel %vm164_vm0, %v2055_v15, 0.0 }
 0x288   :  { %v1636_v40 = vpop.f32.mrf.mxu1  ;;  %v6042_v22 = vpop.eup %6041  ;;  %6043 = vpow2.f32 %v5803_v13  ;;  %2278 = vadd.xlane.f32.xlu2 %v2277_v18 }
 0x289   :  { %v1014_v17 = vmax.f32 %v759_v6, 0.0  ;;  %v1637_v2 = vadd.f32 %v7424_v58, %v1636_v40  ;;  %v3610_v43 = vsel %vm3609_vm2, %v6038_v26, %v3606_v20  ;;  %v3618_v46 = vmul.f32 %v6042_v22, %v7545_v49 }
 0x28a   :  { %v3615_v35 = vsel %vm3612_vm3, %v3614_v23, %v3610_v43  ;;  %6045 = vrcp.f32 %v7566_v27  ;;  %v1015_v26 = vmax.f32 %v762_v11, 0.0  ;;  %vm3623_vm8 = vweird.f32 %v6042_v22  ;;  %5600 = vmatmul.msk.f32.gmra.mxu3 %vm164_vm0, %v117_v42 }
 0x28b   :  { %5707 = vmatmul.msk.f32.vlgmr.msra.gmra.mxu2 %vm1090_vm1, %v1014_v17  ;;  %v2237_v8 = vpop.xlane.xlu0 %2236  ;;  %v5303_v37 = vperm.slane %v3615_v35, %v7214_v19  ;;  %v3619_v44 = vsub.f32 1.0, %v3618_v46  ;;  %v1924_v47 = vmax.f32 %v1637_v2, 0.0  ;;  %vm3624_vm2 = vmor %vm3622_vm13, %vm3623_vm8  ;;  %v3629_v6 = vor.u32 1.1754944e-38, %v3628_v21  ;;  %v118_v35 = vld [vmem:[%s9735_s0 + $0x2b0] sm:$0xff] }
 0x28c   :  { %v2560_v25 = vadd.f32 %v6836_v45, %v2237_v8  ;;  %vm3627_vm3 = vcmp.eq.f32.partialorder %v3626_v28, 8.507059e+37  ;;  %v3641_v20 = vand.u32 2147483647, %v7566_v27  ;;  %v3643_v13 = vand.u32 2147483648, %v7566_v27 }
 0x28d   :  { %v5304_v29 = vsel %vm9758_vm7, %v5303_v37, %v5302_v55  ;;  %v3620_v54 = vmul.f32 %v6042_v22, %v3619_v44  ;;  %v2056_v56 = vmul.f32 %v7417_v48, %v1924_v47  ;;  %v7594_v7 = vpop.f32.mrf.mxu3  ;;  %v1016_v23 = vmax.f32 %v765_v61, 0.0 }
 0x28e   :  { %v5804_v34 = vmul.f32 -1.442695, %v2560_v25  ;;  %v6044_v39 = vpop.eup %6043  ;;  %vm9759_vm7 = vcmask 982912   ;;  %vm3637_vm13 = vweird.f32 %v7566_v27  ;;  %v3644_v21 = vor.u32 1.1754944e-38, %v3643_v13 }
 0x28f   :  { %v3621_v60 = vadd.f32 %v6042_v22, %v3620_v54  ;;  %v2280_v51 = vsel %vm164_vm0, %v2056_v56, 0.0  ;;  %v7590_v10 = vadd.f32 1.0, %v6044_v39 }
 0x290   :  { %v1639_v62 = vpop.f32.mrf.mxu1  ;;  %v6046_v3 = vpop.eup %6045  ;;  %6047 = vpow2.f32 %v5804_v34  ;;  %2281 = vadd.xlane.f32.xlu0 %v2280_v51 }
 0x291   :  { %v1640_v55 = vadd.f32 %v7424_v58, %v1639_v62  ;;  %v3625_v49 = vsel %vm3624_vm2, %v6042_v22, %v3621_v60  ;;  %v3633_v12 = vmul.f32 %v6046_v3, %v7566_v27  ;;  %6049 = vrcp.f32 %v7590_v10 }
 0x292   :  { %v3630_v40 = vsel %vm3627_vm3, %v3629_v6, %v3625_v49  ;;  %vm3638_vm8 = vweird.f32 %v6046_v3  ;;  %5601 = vmatmul.msk.f32.gmra.mxu3 %vm164_vm0, %v118_v35  ;;  %v768_v27 = vadd.f32 %v7348_v53, %v7548_v52  ;;  %vm3642_vm3 = vcmp.eq.f32.partialorder %v3641_v20, 8.507059e+37 }
 0x293   :  { %5708 = vmatmul.msk.f32.gmra.mxu2 %vm1090_vm1, %v1015_v26  ;;  %v2240_v17 = vpop.xlane.xlu1 %2239  ;;  %v5305_v14 = vperm.slane %v3630_v40, %v7240_v57  ;;  %v3634_v15 = vsub.f32 1.0, %v3633_v12  ;;  %v1925_v0 = vmax.f32 %v1640_v55, 0.0  ;;  %vm3639_vm2 = vmor %vm3637_vm13, %vm3638_vm8  ;;  %vm9760_vm8 = vcmask 1048512   ;;  %v119_v12 = vld [vmem:[%s9735_s0 + $0x2b8] sm:$0xff] }
 0x294   :  { %v2561_v2 = vadd.f32 %v6836_v45, %v2240_v17  ;;  %v1017_v51 = vmax.f32 %v768_v27, 0.0 }
 0x295   :  { %v5306_v22 = vsel %vm9759_vm7, %v5305_v14, %v5304_v29  ;;  %v3635_v18 = vmul.f32 %v6046_v3, %v3634_v15  ;;  %v2057_v11 = vmul.f32 %v7417_v48, %v1925_v0  ;;  %v7621_v54 = vpop.f32.mrf.mxu3  ;;  %vm5495_vm7 = vcmask 1041409  }
 0x296   :  { %v6048_v43 = vpop.eup %6047  ;;  %v5805_v46 = vmul.f32 -1.442695, %v2561_v2  ;;  %v771_v0 = vadd.f32 %v7348_v53, %v7572_v16  ;;  %v3656_v2 = vand.u32 2147483647, %v7590_v10 }
 0x297   :  { %v3636_v8 = vadd.f32 %v6046_v3, %v3635_v18  ;;  %v7608_v37 = vadd.f32 1.0, %v6048_v43  ;;  %v2283_v47 = vsel %vm164_vm0, %v2057_v11, 0.0  ;;  %v7612_v28 = vpop.eup %6049  ;;  %v121_v18 = vld [vmem:[%s9735_s0 + $0x2c8] sm:$0xff] }
 0x298   :  { %v1642_v44 = vpop.f32.mrf.mxu1  ;;  %6051 = vpow2.f32 %v5805_v46  ;;  %2284 = vadd.xlane.f32.xlu1 %v2283_v47  ;;  %v3648_v42 = vmul.f32 %v7612_v28, %v7590_v10  ;;  %vm3653_vm13 = vweird.f32 %v7612_v28  ;;  %v1018_v35 = vmax.f32 %v771_v0, 0.0 }
 0x299   :  { %v1643_v25 = vadd.f32 %v7424_v58, %v1642_v44  ;;  %v3640_v26 = vsel %vm3639_vm2, %v6046_v3, %v3636_v8  ;;  %6053 = vrcp.f32 %v7608_v37  ;;  %vm3652_vm2 = vweird.f32 %v7590_v10 }
 0x29a   :  { %v3645_v29 = vsel %vm3642_vm3, %v3644_v21, %v3640_v26  ;;  %v3649_v34 = vsub.f32 1.0, %v3648_v42  ;;  %5602 = vmatmul.msk.f32.gmra.mxu3 %vm164_vm0, %v119_v12  ;;  %vm7653_vm3 = vmor %vm3652_vm2, %vm3653_vm13  ;;  %v3671_v11 = vand.u32 2147483647, %v7608_v37  ;;  %v3673_v43 = vand.u32 2147483648, %v7608_v37 }
 0x29b   :  { %5709 = vmatmul.msk.f32.gmra.mxu2 %vm1090_vm1, %v1016_v23  ;;  %v5307_v56 = vperm.slane %v3645_v29, %v7261_v24  ;;  %v1926_v39 = vmax.f32 %v1643_v25, 0.0  ;;  %v2243_v60 = vpop.xlane.xlu2 %2242  ;;  %v3658_v23 = vand.u32 2147483648, %v7590_v10  ;;  %vm3667_vm13 = vweird.f32 %v7608_v37  ;;  %v120_v29 = vld [vmem:[%s9735_s0 + $0x2c0] sm:$0xff] }
 0x29c   :  { %v2562_v62 = vadd.f32 %v6836_v45, %v2243_v60  ;;  %v3650_v61 = vmul.f32 %v7612_v28, %v3649_v34  ;;  %v3674_v34 = vor.u32 1.1754944e-38, %v3673_v43 }
 0x29d   :  { %v5308_v52 = vsel %vm9760_vm8, %v5307_v56, %v5306_v22  ;;  %v2058_v3 = vmul.f32 %v7417_v48, %v1926_v39  ;;  %v7649_v22 = vpop.f32.mrf.mxu3  ;;  %vm3657_vm8 = vcmp.eq.f32.partialorder %v3656_v2, 8.507059e+37  ;;  %v3659_v21 = vor.u32 1.1754944e-38, %v3658_v23 }
 0x29e   :  { %v6052_v6 = vpop.eup %6051  ;;  %v7629_v55 = vsel %vm5495_vm7, %v5308_v52, %v7279_v41  ;;  %v5806_v49 = vmul.f32 -1.442695, %v2562_v62  ;;  %v3651_v41 = vadd.f32 %v7612_v28, %v3650_v61 }
 0x29f   :  { %v6054_v17 = vpop.eup %6053  ;;  %v7635_v40 = vadd.f32 1.0, %v6052_v6  ;;  %v2286_v15 = vsel %vm164_vm0, %v2058_v3, 0.0 }
 0x2a0   :  { %v1645_v14 = vpop.f32.mrf.mxu1  ;;  %v3663_v20 = vmul.f32 %v6054_v17, %v7608_v37  ;;  %6055 = vpow2.f32 %v5806_v49  ;;  %2287 = vadd.xlane.f32.xlu2 %v2286_v15  ;;  %vm3668_vm7 = vweird.f32 %v6054_v17  ;;  %v3655_v10 = vsel %vm7653_vm3, %v7612_v28, %v3651_v41  ;;  %v7675_v37 = vld [vmem:[%s9736_s2] ss:$0 sm:$0xff] }
 0x2a1   :  { %v1646_v13 = vadd.f32 %v7424_v58, %v1645_v14  ;;  %6057 = vrcp.f32 %v7635_v40  ;;  %v3660_v28 = vsel %vm3657_vm8, %v3659_v21, %v3655_v10  ;;  %vm3669_vm2 = vmor %vm3667_vm13, %vm3668_vm7  ;;  %v774_v62 = vadd.f32 %v7675_v37, %v7594_v7 }
 0x2a2   :  { %v3664_v53 = vsub.f32 1.0, %v3663_v20  ;;  %5603 = vmatmul.msk.f32.gmra.mxu3 %vm164_vm0, %v120_v29  ;;  %vm3672_vm3 = vcmp.eq.f32.partialorder %v3671_v11, 8.507059e+37  ;;  %v5309_v3 = vperm.slane %v3660_v28, %v6906_v59  ;;  %v3688_v14 = vand.u32 2147483648, %v7635_v40 }
 0x2a3   :  { %5710 = vmatmul.msk.f32.gmra.mxu2 %vm1090_vm1, %v1017_v51  ;;  %v1927_v16 = vmax.f32 %v1646_v13, 0.0  ;;  %v2246_v46 = vpop.xlane.xlu0 %2245  ;;  %v1019_v15 = vmax.f32 %v774_v62, 0.0  ;;  %vm3682_vm8 = vweird.f32 %v7635_v40 }
 0x2a4   :  { %v3665_v8 = vmul.f32 %v6054_v17, %v3664_v53  ;;  %v2563_v44 = vadd.f32 %v6836_v45, %v2246_v46  ;;  %v3689_v43 = vor.u32 1.1754944e-38, %v3688_v14 }
 0x2a5   :  { %v2059_v47 = vmul.f32 %v7417_v48, %v1927_v16  ;;  %v7686_v7 = vpop.f32.mrf.mxu3  ;;  %v777_v16 = vadd.f32 %v7675_v37, %v7621_v54 }
 0x2a6   :  { %v6056_v25 = vpop.eup %6055  ;;  %v3666_v27 = vadd.f32 %v6054_v17, %v3665_v8  ;;  %v5807_v26 = vmul.f32 -1.442695, %v2563_v44 }
 0x2a7   :  { %v2289_v42 = vsel %vm164_vm0, %v2059_v47, 0.0  ;;  %v6058_v56 = vpop.eup %6057  ;;  %v7670_v39 = vadd.f32 1.0, %v6056_v25 }
 0x2a8   :  { %v1648_v60 = vpop.f32.mrf.mxu1  ;;  %2290 = vadd.xlane.f32.xlu0 %v2289_v42  ;;  %v3670_v51 = vsel %vm3669_vm2, %v6054_v17, %v3666_v27  ;;  %v3678_v52 = vmul.f32 %v6058_v56, %v7635_v40  ;;  %6059 = vpow2.f32 %v5807_v26  ;;  %v3686_v17 = vand.u32 2147483647, %v7635_v40 }
 0x2a9   :  { %v3675_v61 = vsel %vm3672_vm3, %v3674_v34, %v3670_v51  ;;  %6061 = vrcp.f32 %v7670_v39  ;;  %v1649_v12 = vadd.f32 %v7424_v58, %v1648_v60  ;;  %vm3683_vm7 = vweird.f32 %v6058_v56 }
 0x2aa   :  { %v5310_v6 = vperm.slane %v3675_v61, %v6921_v5  ;;  %v3679_v49 = vsub.f32 1.0, %v3678_v52  ;;  %vm3684_vm13 = vmor %vm3682_vm8, %vm3683_vm7  ;;  %5604 = vmatmul.msk.f32.gmra.mxu3 %vm164_vm0, %v121_v18  ;;  %vm3687_vm2 = vcmp.eq.f32.partialorder %v3686_v17, 8.507059e+37  ;;  %v3703_v26 = vand.u32 2147483648, %v7670_v39 }
 0x2ab   :  { %5711 = vmatmul.msk.f32.gmra.mxu2 %vm1090_vm1, %v1018_v35  ;;  %v1928_v20 = vmax.f32 %v1649_v12, 0.0  ;;  %v2249_v13 = vpop.xlane.xlu1 %2248  ;;  %v3701_v60 = vand.u32 2147483647, %v7670_v39  ;;  %vm3697_vm7 = vweird.f32 %v7670_v39 }
 0x2ac   :  { %v5311_v0 = vsel %vm5220_vm10, %v5310_v6, %v5309_v3  ;;  %v3680_v41 = vmul.f32 %v6058_v56, %v3679_v49  ;;  %v2564_v2 = vadd.f32 %v6836_v45, %v2249_v13  ;;  %v122_v3 = vld [vmem:[%s9735_s0 + $0x2d0] sm:$0xff]  ;;  %v3704_v49 = vor.u32 1.1754944e-38, %v3703_v26 }
 0x2ad   :  { %v2060_v8 = vmul.f32 %v7417_v48, %v1928_v20  ;;  %v7707_v27 = vpop.f32.mrf.mxu3 }
 0x2ae   :  { %v6060_v23 = vpop.eup %6059  ;;  %v3681_v53 = vadd.f32 %v6058_v56, %v3680_v41  ;;  %v5808_v35 = vmul.f32 -1.442695, %v2564_v2 }
 0x2af   :  { %v6062_v11 = vpop.eup %6061  ;;  %v7698_v46 = vadd.f32 1.0, %v6060_v23  ;;  %v2292_v29 = vsel %vm164_vm0, %v2060_v8, 0.0 }
 0x2b0   :  { %v1651_v10 = vpop.f32.mrf.mxu1  ;;  %v3685_v44 = vsel %vm3684_vm13, %v6058_v56, %v3681_v53  ;;  %v3693_v40 = vmul.f32 %v6062_v11, %v7670_v39  ;;  %v1020_v56 = vmax.f32 %v777_v16, 0.0  ;;  %vm3698_vm3 = vweird.f32 %v6062_v11  ;;  %2293 = vadd.xlane.f32.xlu1 %v2292_v29 }
 0x2b1   :  { %v1652_v54 = vadd.f32 %v7424_v58, %v1651_v10  ;;  %v3690_v47 = vsel %vm3687_vm2, %v3689_v43, %v3685_v44  ;;  %6063 = vrcp.f32 %v7698_v46  ;;  %vm3699_vm8 = vmor %vm3697_vm7, %vm3698_vm3  ;;  %vm3702_vm13 = vcmp.eq.f32.partialorder %v3701_v60, 8.507059e+37 }
 0x2b2   :  { %v5312_v21 = vperm.slane %v3690_v47, %v6945_v38  ;;  %v3694_v25 = vsub.f32 1.0, %v3693_v40  ;;  %6065 = vpow2.f32 %v5808_v35  ;;  %5605 = vmatmul.msk.f32.gmra.mxu3 %vm164_vm0, %v122_v3  ;;  %v3716_v18 = vand.u32 2147483647, %v7698_v46 }
 0x2b3   :  { %5712 = vmatmul.msk.f32.gmra.mxu2 %vm1090_vm1, %v1019_v15  ;;  %v1929_v42 = vmax.f32 %v1652_v54, 0.0  ;;  %v2252_v62 = vpop.xlane.xlu2 %2251  ;;  %v780_v15 = vadd.f32 %v7675_v37, %v7649_v22  ;;  %vm3712_vm3 = vweird.f32 %v7698_v46 }
 0x2b4   :  { %v5313_v28 = vsel %vm5224_vm15, %v5312_v21, %v5311_v0  ;;  %v3695_v34 = vmul.f32 %v6062_v11, %v3694_v25  ;;  %v2565_v51 = vadd.f32 %v6836_v45, %v2252_v62  ;;  %v123_v21 = vld [vmem:[%s9735_s0 + $0x2d8] sm:$0xff] }
 0x2b5   :  { %v2061_v52 = vmul.f32 %v7417_v48, %v1929_v42  ;;  %v7729_v16 = vpop.f32.mrf.mxu3  ;;  %v1021_v43 = vmax.f32 %v780_v15, 0.0 }
 0x2b6   :  { %v3696_v61 = vadd.f32 %v6062_v11, %v3695_v34  ;;  %v5809_v12 = vmul.f32 -1.442695, %v2565_v51 }
 0x2b7   :  { %v6064_v6 = vpop.eup %6063  ;;  %v2295_v14 = vsel %vm164_vm0, %v2061_v52, 0.0 }
 0x2b8   :  { %v1654_v17 = vpop.f32.mrf.mxu1  ;;  %v6066_v0 = vpop.eup %6065  ;;  %v3700_v41 = vsel %vm3699_vm8, %v6062_v11, %v3696_v61  ;;  %v3708_v39 = vmul.f32 %v6064_v6, %v7698_v46  ;;  %2296 = vadd.xlane.f32.xlu2 %v2295_v14  ;;  %6067 = vpow2.f32 %v5809_v12  ;;  %v3718_v11 = vand.u32 2147483648, %v7698_v46 }
 0x2b9   :  { %v1655_v20 = vadd.f32 %v7424_v58, %v1654_v17  ;;  %v3705_v13 = vsel %vm3702_vm13, %v3704_v49, %v3700_v41  ;;  %v7726_v2 = vadd.f32 1.0, %v6066_v0  ;;  %vm3713_vm2 = vweird.f32 %v6064_v6  ;;  %v7760_v17 = vld [vmem:[%s9739_s5] ss:$0 sm:$0xff] }
 0x2ba   :  { %v5314_v23 = vperm.slane %v3705_v13, %v6967_v4  ;;  %v3709_v53 = vsub.f32 1.0, %v3708_v39  ;;  %vm3714_vm7 = vmor %vm3712_vm3, %vm3713_vm2  ;;  %v3719_v26 = vor.u32 1.1754944e-38, %v3718_v11  ;;  %5606 = vmatmul.msk.f32.gmra.mxu3 %vm164_vm0, %v123_v21  ;;  %vm3717_vm8 = vcmp.eq.f32.partialorder %v3716_v18, 8.507059e+37  ;;  %v124_v41 = vld [vmem:[%s9735_s0 + $0x2e0] sm:$0xff] }
 0x2bb   :  { %5713 = vmatmul.msk.f32.gmra.mxu2 %vm1090_vm1, %v1020_v56  ;;  %v1930_v22 = vmax.f32 %v1655_v20, 0.0  ;;  %6069 = vrcp.f32 %v7726_v2  ;;  %v2255_v8 = vpop.xlane.xlu0 %2254  ;;  %v3731_v0 = vand.u32 2147483647, %v7726_v2  ;;  %vm3727_vm2 = vweird.f32 %v7726_v2 }
 0x2bc   :  { %v5315_v35 = vsel %vm9748_vm6, %v5314_v23, %v5313_v28  ;;  %v3710_v10 = vmul.f32 %v6064_v6, %v3709_v53  ;;  %v2566_v40 = vadd.f32 %v6836_v45, %v2255_v8  ;;  %v786_v53 = vadd.f32 %v7675_v37, %v7707_v27 }
 0x2bd   :  { %v2062_v44 = vmul.f32 %v7417_v48, %v1930_v22  ;;  %v783_v48 = vadd.f32 %v7675_v37, %v7686_v7  ;;  %v7752_v7 = vpop.f32.mrf.mxu3 }
 0x2be   :  { %v3711_v54 = vadd.f32 %v6064_v6, %v3710_v10  ;;  %v6068_v25 = vpop.eup %6067  ;;  %v5810_v42 = vmul.f32 -1.442695, %v2566_v40 }
 0x2bf   :  { %v2298_v47 = vsel %vm164_vm0, %v2062_v44, 0.0  ;;  %v7745_v46 = vadd.f32 1.0, %v6068_v25  ;;  %v1022_v49 = vmax.f32 %v783_v48, 0.0 }
 0x2c0   :  { %v1657_v29 = vpop.f32.mrf.mxu1  ;;  %2299 = vadd.xlane.f32.xlu0 %v2298_v47  ;;  %v3715_v56 = vsel %vm3714_vm7, %v6064_v6, %v3711_v54  ;;  %6071 = vpow2.f32 %v5810_v42  ;;  %vm3732_vm7 = vcmp.eq.f32.partialorder %v3731_v0, 8.507059e+37  ;;  %v1023_v42 = vmax.f32 %v786_v53, 0.0 }
 0x2c1   :  { %v1658_v28 = vadd.f32 %v7424_v58, %v1657_v29  ;;  %v6070_v34 = vpop.eup %6069  ;;  %v3720_v60 = vsel %vm3717_vm8, %v3719_v26, %v3715_v56  ;;  %6073 = vrcp.f32 %v7745_v46  ;;  %v3733_v58 = vand.u32 2147483648, %v7726_v2 }
 0x2c2   :  { %v5316_v62 = vperm.slane %v3720_v60, %v6989_v32  ;;  %v3723_v51 = vmul.f32 %v6070_v34, %v7726_v2  ;;  %vm3728_vm13 = vweird.f32 %v6070_v34  ;;  %5607 = vmatmul.msk.f32.gmra.mxu3 %vm164_vm0, %v124_v41  ;;  %v3746_v21 = vand.u32 2147483647, %v7745_v46 }
 0x2c3   :  { %5714 = vmatmul.msk.f32.gmra.mxu2 %vm1090_vm1, %v1021_v43  ;;  %v1931_v52 = vmax.f32 %v1658_v28, 0.0  ;;  %v2258_v6 = vpop.xlane.xlu1 %2257  ;;  %v7777_v43 = vld [vmem:[%s9738_s4] ss:$0 sm:$0xff]  ;;  %vm3729_vm3 = vmor %vm3727_vm2, %vm3728_vm13  ;;  %v3734_v27 = vor.u32 1.1754944e-38, %v3733_v58  ;;  %v3748_v25 = vand.u32 2147483648, %v7745_v46  ;;  %vm3742_vm13 = vweird.f32 %v7745_v46 }
 0x2c4   :  { %v5317_v61 = vsel %vm5232_vm12, %v5316_v62, %v5315_v35  ;;  %v3724_v3 = vsub.f32 1.0, %v3723_v51  ;;  %v2567_v12 = vadd.f32 %v6836_v45, %v2258_v6 }
 0x2c5   :  { %v2063_v14 = vmul.f32 %v7760_v17, %v1931_v52  ;;  %v7784_v2 = vpop.f32.mrf.mxu3 }
 0x2c6   :  { %v3725_v15 = vmul.f32 %v6070_v34, %v3724_v3  ;;  %v6072_v39 = vpop.eup %6071  ;;  %v5811_v20 = vmul.f32 -1.442695, %v2567_v12  ;;  %v789_v12 = vadd.f32 %v7675_v37, %v7729_v16 }
 0x2c7   :  { %v2301_v23 = vsel %vm164_vm0, %v2063_v14, 0.0  ;;  %v6074_v22 = vpop.eup %6073  ;;  %v7772_v11 = vadd.f32 1.0, %v6072_v39 }
 0x2c8   :  { %v1660_v13 = vpop.f32.mrf.mxu1  ;;  %v3726_v18 = vadd.f32 %v6070_v34, %v3725_v15  ;;  %2302 = vadd.xlane.f32.xlu1 %v2301_v23  ;;  %v3738_v10 = vmul.f32 %v6074_v22, %v7745_v46  ;;  %6075 = vpow2.f32 %v5811_v20  ;;  %vm3743_vm8 = vweird.f32 %v6074_v22 }
 0x2c9   :  { %v1661_v35 = vadd.f32 %v7777_v43, %v1660_v13  ;;  %6077 = vrcp.f32 %v7772_v11  ;;  %vm3744_vm2 = vmor %vm3742_vm13, %vm3743_vm8  ;;  %v3761_v13 = vand.u32 2147483647, %v7772_v11  ;;  %v3763_v23 = vand.u32 2147483648, %v7772_v11 }
 0x2ca   :  { %v3730_v8 = vsel %vm3729_vm3, %v6070_v34, %v3726_v18  ;;  %v3739_v40 = vsub.f32 1.0, %v3738_v10  ;;  %v125_v34 = vld [vmem:[%s9735_s0 + $0x2e8] sm:$0xff]  ;;  %vm3747_vm3 = vcmp.eq.f32.partialorder %v3746_v21, 8.507059e+37  ;;  %v1024_v16 = vmax.f32 %v789_v12, 0.0  ;;  %v126_v10 = vld [vmem:[%s9735_s0 + $0x2f0] sm:$0xff] }
 0x2cb   :  { %5715 = vmatmul.msk.f32.gmra.mxu2 %vm1090_vm1, %v1022_v49  ;;  %v3735_v44 = vsel %vm3732_vm7, %v3734_v27, %v3730_v8  ;;  %v1932_v54 = vmax.f32 %v1661_v35, 0.0  ;;  %v2261_v26 = vpop.xlane.xlu2 %2260  ;;  %5608 = vmatmul.msk.f32.gmra.mxu3 %vm164_vm0, %v125_v34  ;;  %v3749_v49 = vor.u32 1.1754944e-38, %v3748_v25  ;;  %vm3757_vm8 = vweird.f32 %v7772_v11 }
 0x2cc   :  { %v5318_v47 = vperm.slane %v3735_v44, %v7016_v1  ;;  %v3740_v29 = vmul.f32 %v6074_v22, %v3739_v40  ;;  %v2568_v48 = vadd.f32 %v6836_v45, %v2261_v26  ;;  %v3764_v25 = vor.u32 1.1754944e-38, %v3763_v23 }
 0x2cd   :  { %v2064_v56 = vmul.f32 %v7760_v17, %v1932_v54  ;;  %v7806_v0 = vpop.f32.mrf.mxu3 }
 0x2ce   :  { %v5319_v28 = vsel %vm5236_vm4, %v5318_v47, %v5317_v61  ;;  %v6076_v60 = vpop.eup %6075  ;;  %v3741_v62 = vadd.f32 %v6074_v22, %v3740_v29  ;;  %v5812_v51 = vmul.f32 -1.442695, %v2568_v48  ;;  %v792_v47 = vadd.f32 %v7675_v37, %v7752_v7 }
 0x2cf   :  { %v2304_v3 = vsel %vm164_vm0, %v2064_v56, 0.0  ;;  %v6078_v6 = vpop.eup %6077  ;;  %v7798_v58 = vadd.f32 1.0, %v6076_v60 }
 0x2d0   :  { %v1663_v52 = vpop.f32.mrf.mxu1  ;;  %2305 = vadd.xlane.f32.xlu2 %v2304_v3  ;;  %v3745_v46 = vsel %vm3744_vm2, %v6074_v22, %v3741_v62  ;;  %v3753_v14 = vmul.f32 %v6078_v6, %v7772_v11  ;;  %6079 = vpow2.f32 %v5812_v51  ;;  %vm3758_vm7 = vweird.f32 %v6078_v6 }
 0x2d1   :  { %v1664_v61 = vadd.f32 %v7777_v43, %v1663_v52  ;;  %v3750_v15 = vsel %vm3747_vm3, %v3749_v49, %v3745_v46  ;;  %6081 = vrcp.f32 %v7798_v58  ;;  %vm3759_vm13 = vmor %vm3757_vm8, %vm3758_vm7  ;;  %vm3762_vm2 = vcmp.eq.f32.partialorder %v3761_v13, 8.507059e+37  ;;  %v127_v46 = vld [vmem:[%s9735_s0 + $0x2f8] sm:$0xff] }
 0x2d2   :  { %v5320_v41 = vperm.slane %v3750_v15, %v7038_v30  ;;  %v3754_v39 = vsub.f32 1.0, %v3753_v14  ;;  %v3776_v62 = vand.u32 2147483647, %v7798_v58  ;;  %v3778_v51 = vand.u32 2147483648, %v7798_v58 }
 0x2d3   :  { %5716 = vmatmul.msk.f32.gmra.mxu2 %vm1090_vm1, %v1023_v42  ;;  %v1933_v20 = vmax.f32 %v1664_v61, 0.0  ;;  %v2264_v53 = vpop.xlane.xlu0 %2263  ;;  %5609 = vmatmul.msk.f32.gmra.mxu3 %vm164_vm0, %v126_v10  ;;  %v1025_v3 = vmax.f32 %v792_v47, 0.0  ;;  %vm3772_vm7 = vweird.f32 %v7798_v58 }
 0x2d4   :  { %v5321_v22 = vsel %vm5240_vm11, %v5320_v41, %v5319_v28  ;;  %v3755_v18 = vmul.f32 %v6078_v6, %v3754_v39  ;;  %v2569_v35 = vadd.f32 %v6836_v45, %v2264_v53  ;;  %v3779_v23 = vor.u32 1.1754944e-38, %v3778_v51 }
 0x2d5   :  { %v2065_v27 = vmul.f32 %v7760_v17, %v1933_v20  ;;  %v7828_v56 = vpop.f32.mrf.mxu3  ;;  %v795_v20 = vadd.f32 %v7675_v37, %v7784_v2 }
 0x2d6   :  { %v6080_v8 = vpop.eup %6079  ;;  %v3756_v44 = vadd.f32 %v6078_v6, %v3755_v18  ;;  %v5813_v40 = vmul.f32 -1.442695, %v2569_v35 }
 0x2d7   :  { %v6082_v21 = vpop.eup %6081  ;;  %v7821_v26 = vadd.f32 1.0, %v6080_v8  ;;  %v2307_v29 = vsel %vm164_vm0, %v2065_v27, 0.0  ;;  %v1026_v47 = vmax.f32 %v795_v20, 0.0 }
 0x2d8   :  { %v1666_v54 = vpop.f32.mrf.mxu1  ;;  %v3760_v48 = vsel %vm3759_vm13, %v6078_v6, %v3756_v44  ;;  %v3768_v11 = vmul.f32 %v6082_v21, %v7798_v58  ;;  %6083 = vpow2.f32 %v5813_v40  ;;  %2308 = vadd.xlane.f32.xlu0 %v2307_v29  ;;  %vm3773_vm3 = vweird.f32 %v6082_v21 }
 0x2d9   :  { %v1667_v42 = vadd.f32 %v7777_v43, %v1666_v54  ;;  %v3765_v7 = vsel %vm3762_vm2, %v3764_v25, %v3760_v48  ;;  %6085 = vrcp.f32 %v7821_v26  ;;  %vm3774_vm8 = vmor %vm3772_vm7, %vm3773_vm3  ;;  %vm3777_vm13 = vcmp.eq.f32.partialorder %v3776_v62, 8.507059e+37  ;;  %v128_v48 = vld [vmem:[%s9735_s0 + $0x300] sm:$0xff] }
 0x2da   :  { %v5322_v28 = vperm.slane %v3765_v7, %v7060_v63  ;;  %v3769_v34 = vsub.f32 1.0, %v3768_v11  ;;  %v3791_v44 = vand.u32 2147483647, %v7821_v26  ;;  %v3793_v40 = vand.u32 2147483648, %v7821_v26 }
 0x2db   :  { %5717 = vmatmul.msk.f32.gmra.mxu2 %vm1090_vm1, %v1024_v16  ;;  %v1934_v60 = vmax.f32 %v1667_v42, 0.0  ;;  %v2267_v52 = vpop.xlane.xlu1 %2266  ;;  %5610 = vmatmul.msk.f32.gmra.mxu3 %vm164_vm0, %v127_v46  ;;  %vm3787_vm3 = vweird.f32 %v7821_v26 }
 0x2dc   :  { %v5323_v6 = vsel %vm5244_vm5, %v5322_v28, %v5321_v22  ;;  %v3770_v49 = vmul.f32 %v6082_v21, %v3769_v34  ;;  %v2570_v61 = vadd.f32 %v6836_v45, %v2267_v52  ;;  %v3794_v51 = vor.u32 1.1754944e-38, %v3793_v40 }
 0x2dd   :  { %v2066_v12 = vmul.f32 %v7760_v17, %v1934_v60  ;;  %v7850_v35 = vpop.f32.mrf.mxu3  ;;  %v798_v60 = vadd.f32 %v7675_v37, %v7806_v0 }
 0x2de   :  { %v6084_v14 = vpop.eup %6083  ;;  %v3771_v15 = vadd.f32 %v6082_v21, %v3770_v49  ;;  %v5814_v41 = vmul.f32 -1.442695, %v2570_v61 }
 0x2df   :  { %v6086_v13 = vpop.eup %6085  ;;  %v7843_v53 = vadd.f32 1.0, %v6084_v14  ;;  %v2310_v22 = vsel %vm164_vm0, %v2066_v12, 0.0  ;;  %v1027_v20 = vmax.f32 %v798_v60, 0.0 }
 0x2e0   :  { %v1669_v39 = vpop.f32.mrf.mxu1  ;;  %v3775_v18 = vsel %vm3774_vm8, %v6082_v21, %v3771_v15  ;;  %v3783_v58 = vmul.f32 %v6086_v13, %v7821_v26  ;;  %6087 = vpow2.f32 %v5814_v41  ;;  %2311 = vadd.xlane.f32.xlu1 %v2310_v22  ;;  %vm3788_vm2 = vweird.f32 %v6086_v13 }
 0x2e1   :  { %v1670_v16 = vadd.f32 %v7777_v43, %v1669_v39  ;;  %v3780_v2 = vsel %vm3777_vm13, %v3779_v23, %v3775_v18  ;;  %6089 = vrcp.f32 %v7843_v53  ;;  %vm3789_vm7 = vmor %vm3787_vm3, %vm3788_vm2  ;;  %vm3792_vm8 = vcmp.eq.f32.partialorder %v3791_v44, 8.507059e+37  ;;  %v129_v18 = vld [vmem:[%s9735_s0 + $0x308] sm:$0xff] }
 0x2e2   :  { %v5324_v27 = vperm.slane %v3780_v2, %v7092_v31  ;;  %v3784_v10 = vsub.f32 1.0, %v3783_v58  ;;  %v3806_v15 = vand.u32 2147483647, %v7843_v53  ;;  %v3808_v41 = vand.u32 2147483648, %v7843_v53 }
 0x2e3   :  { %5718 = vmatmul.msk.f32.gmra.mxu2 %vm1090_vm1, %v1025_v3  ;;  %v1935_v8 = vmax.f32 %v1670_v16, 0.0  ;;  %v2270_v54 = vpop.xlane.xlu2 %2269  ;;  %5611 = vmatmul.msk.f32.gmra.mxu3 %vm164_vm0, %v128_v48  ;;  %vm3802_vm2 = vweird.f32 %v7843_v53 }
 0x2e4   :  { %v5325_v21 = vsel %vm9750_vm14, %v5324_v27, %v5323_v6  ;;  %v3785_v25 = vmul.f32 %v6086_v13, %v3784_v10  ;;  %v2571_v42 = vadd.f32 %v6836_v45, %v2270_v54  ;;  %v3809_v40 = vor.u32 1.1754944e-38, %v3808_v41 }
 0x2e5   :  { %v2067_v29 = vmul.f32 %v7760_v17, %v1935_v8  ;;  %v7872_v61 = vpop.f32.mrf.mxu3  ;;  %v801_v8 = vadd.f32 %v7675_v37, %v7828_v56 }
 0x2e6   :  { %v6088_v11 = vpop.eup %6087  ;;  %v3786_v7 = vadd.f32 %v6086_v13, %v3785_v25  ;;  %v5815_v28 = vmul.f32 -1.442695, %v2571_v42 }
 0x2e7   :  { %v6090_v62 = vpop.eup %6089  ;;  %v7865_v52 = vadd.f32 1.0, %v6088_v11  ;;  %v2313_v6 = vsel %vm164_vm0, %v2067_v29, 0.0  ;;  %v1028_v60 = vmax.f32 %v801_v8, 0.0 }
 0x2e8   :  { %v1672_v34 = vpop.f32.mrf.mxu1  ;;  %v3790_v49 = vsel %vm3789_vm7, %v6086_v13, %v3786_v7  ;;  %v3798_v26 = vmul.f32 %v6090_v62, %v7843_v53  ;;  %6091 = vpow2.f32 %v5815_v28  ;;  %2314 = vadd.xlane.f32.xlu2 %v2313_v6  ;;  %vm3803_vm13 = vweird.f32 %v6090_v62 }
 0x2e9   :  { %v1673_v3 = vadd.f32 %v7777_v43, %v1672_v34  ;;  %v3795_v0 = vsel %vm3792_vm8, %v3794_v51, %v3790_v49  ;;  %6093 = vrcp.f32 %v7865_v52  ;;  %vm3804_vm3 = vmor %vm3802_vm2, %vm3803_vm13  ;;  %vm3807_vm7 = vcmp.eq.f32.partialorder %v3806_v15, 8.507059e+37  ;;  %v130_v49 = vld [vmem:[%s9735_s0 + $0x310] sm:$0xff] }
 0x2ea   :  { %v5326_v12 = vperm.slane %v3795_v0, %v7114_v33  ;;  %v3799_v46 = vsub.f32 1.0, %v3798_v26  ;;  %v3821_v7 = vand.u32 2147483647, %v7865_v52  ;;  %v3823_v28 = vand.u32 2147483648, %v7865_v52 }
 0x2eb   :  { %5719 = vmatmul.msk.f32.gmra.mxu2 %vm1090_vm1, %v1026_v47  ;;  %v1936_v14 = vmax.f32 %v1673_v3, 0.0  ;;  %v2273_v39 = vpop.xlane.xlu0 %2272  ;;  %5612 = vmatmul.msk.f32.gmra.mxu3 %vm164_vm0, %v129_v18  ;;  %vm9763_vm8 = vcmask 720512   ;;  %vm3817_vm2 = vweird.f32 %v7865_v52 }
 0x2ec   :  { %v5327_v13 = vsel %vm9749_vm9, %v5326_v12, %v5325_v21  ;;  %v3800_v23 = vmul.f32 %v6090_v62, %v3799_v46  ;;  %v2572_v16 = vadd.f32 %v6836_v45, %v2273_v39  ;;  %v3824_v41 = vor.u32 1.1754944e-38, %v3823_v28 }
 0x2ed   :  { %v2068_v22 = vmul.f32 %v7760_v17, %v1936_v14  ;;  %v7894_v42 = vpop.f32.mrf.mxu3  ;;  %v804_v14 = vadd.f32 %v7675_v37, %v7850_v35 }
 0x2ee   :  { %v6092_v58 = vpop.eup %6091  ;;  %v3801_v2 = vadd.f32 %v6090_v62, %v3800_v23  ;;  %v5816_v27 = vmul.f32 -1.442695, %v2572_v16 }
 0x2ef   :  { %v6094_v44 = vpop.eup %6093  ;;  %v7887_v54 = vadd.f32 1.0, %v6092_v58  ;;  %v2316_v21 = vsel %vm164_vm0, %v2068_v22, 0.0  ;;  %v1029_v8 = vmax.f32 %v804_v14, 0.0 }
 0x2f0   :  { %v1675_v10 = vpop.f32.mrf.mxu1  ;;  %v3805_v25 = vsel %vm3804_vm3, %v6090_v62, %v3801_v2  ;;  %v3813_v53 = vmul.f32 %v6094_v44, %v7865_v52  ;;  %6095 = vpow2.f32 %v5816_v27  ;;  %2317 = vadd.xlane.f32.xlu0 %v2316_v21  ;;  %vm3818_vm13 = vweird.f32 %v6094_v44 }
 0x2f1   :  { %v1676_v47 = vadd.f32 %v7777_v43, %v1675_v10  ;;  %v3810_v56 = vsel %vm3807_vm7, %v3809_v40, %v3805_v25  ;;  %6097 = vrcp.f32 %v7887_v54  ;;  %vm3819_vm3 = vmor %vm3817_vm2, %vm3818_vm13  ;;  %vm3822_vm7 = vcmp.eq.f32.partialorder %v3821_v7, 8.507059e+37  ;;  %v131_v25 = vld [vmem:[%s9735_s0 + $0x318] sm:$0xff] }
 0x2f2   :  { %v5328_v29 = vperm.slane %v3810_v56, %v7136_v36  ;;  %v3814_v48 = vsub.f32 1.0, %v3813_v53  ;;  %v3836_v2 = vand.u32 2147483647, %v7887_v54  ;;  %v3838_v27 = vand.u32 2147483648, %v7887_v54 }
 0x2f3   :  { %5720 = vmatmul.msk.f32.gmra.mxu2 %vm1090_vm1, %v1027_v20  ;;  %v1937_v11 = vmax.f32 %v1676_v47, 0.0  ;;  %v2276_v34 = vpop.xlane.xlu1 %2275  ;;  %5613 = vmatmul.msk.f32.gmra.mxu3 %vm164_vm0, %v130_v49  ;;  %vm3832_vm2 = vweird.f32 %v7887_v54 }
 0x2f4   :  { %v5329_v62 = vsel %vm9763_vm8, %v5328_v29, %v5327_v13  ;;  %v3815_v51 = vmul.f32 %v6094_v44, %v3814_v48  ;;  %v2573_v3 = vadd.f32 %v6836_v45, %v2276_v34  ;;  %vm9764_vm8 = vcmask 786112  }
 0x2f5   :  { %v2069_v6 = vmul.f32 %v7760_v17, %v1937_v11  ;;  %v7916_v16 = vpop.f32.mrf.mxu3  ;;  %v807_v11 = vadd.f32 %v7675_v37, %v7872_v61  ;;  %v3839_v28 = vor.u32 1.1754944e-38, %v3838_v27 }
 0x2f6   :  { %v6096_v26 = vpop.eup %6095  ;;  %v3816_v0 = vadd.f32 %v6094_v44, %v3815_v51  ;;  %v5817_v12 = vmul.f32 -1.442695, %v2573_v3 }
 0x2f7   :  { %v6098_v15 = vpop.eup %6097  ;;  %v7909_v39 = vadd.f32 1.0, %v6096_v26  ;;  %v2319_v13 = vsel %vm164_vm0, %v2069_v6, 0.0 }
 0x2f8   :  { %v1678_v46 = vpop.f32.mrf.mxu1  ;;  %v3820_v23 = vsel %vm3819_vm3, %v6094_v44, %v3816_v0  ;;  %v3828_v52 = vmul.f32 %v6098_v15, %v7887_v54  ;;  %6099 = vpow2.f32 %v5817_v12  ;;  %2320 = vadd.xlane.f32.xlu1 %v2319_v13  ;;  %vm3833_vm13 = vweird.f32 %v6098_v15 }
 0x2f9   :  { %v1679_v20 = vadd.f32 %v7777_v43, %v1678_v46  ;;  %v3825_v35 = vsel %vm3822_vm7, %v3824_v41, %v3820_v23  ;;  %6101 = vrcp.f32 %v7909_v39  ;;  %vm3834_vm3 = vmor %vm3832_vm2, %vm3833_vm13  ;;  %vm3837_vm7 = vcmp.eq.f32.partialorder %v3836_v2, 8.507059e+37 }
 0x2fa   :  { %v5330_v22 = vperm.slane %v3825_v35, %v7162_v9  ;;  %v3829_v18 = vsub.f32 1.0, %v3828_v52  ;;  %v3851_v12 = vand.u32 2147483647, %v7909_v39  ;;  %v3853_v46 = vand.u32 2147483648, %v7909_v39  ;;  %v132_v52 = vld [vmem:[%s9735_s0 + $0x320] sm:$0xff] }
 0x2fb   :  { %5721 = vmatmul.msk.f32.gmra.mxu2 %vm1090_vm1, %v1028_v60  ;;  %v1938_v58 = vmax.f32 %v1679_v20, 0.0  ;;  %v2279_v10 = vpop.xlane.xlu2 %2278  ;;  %5614 = vmatmul.msk.f32.gmra.mxu3 %vm164_vm0, %v131_v25  ;;  %vm3847_vm2 = vweird.f32 %v7909_v39 }
 0x2fc   :  { %v5331_v44 = vsel %vm9764_vm8, %v5330_v22, %v5329_v62  ;;  %v3830_v40 = vmul.f32 %v6098_v15, %v3829_v18  ;;  %v2574_v47 = vadd.f32 %v6836_v45, %v2279_v10  ;;  %vm9765_vm8 = vcmask 851712  }
 0x2fd   :  { %v2070_v21 = vmul.f32 %v7760_v17, %v1938_v58  ;;  %v7939_v0 = vpop.f32.mrf.mxu3  ;;  %v3854_v2 = vor.u32 1.1754944e-38, %v3853_v46  ;;  %v810_v10 = vadd.f32 %v7675_v37, %v7894_v42 }
 0x2fe   :  { %v6100_v53 = vpop.eup %6099  ;;  %v3831_v56 = vadd.f32 %v6098_v15, %v3830_v40  ;;  %v5818_v29 = vmul.f32 -1.442695, %v2574_v47 }
 0x2ff   :  { %v6102_v7 = vpop.eup %6101  ;;  %v7931_v34 = vadd.f32 1.0, %v6100_v53  ;;  %v2322_v62 = vsel %vm164_vm0, %v2070_v21, 0.0 }
 0x300   :  { %v1681_v48 = vpop.f32.mrf.mxu1  ;;  %v3835_v51 = vsel %vm3834_vm3, %v6098_v15, %v3831_v56  ;;  %v3843_v54 = vmul.f32 %v6102_v7, %v7909_v39  ;;  %6103 = vpow2.f32 %v5818_v29  ;;  %2323 = vadd.xlane.f32.xlu2 %v2322_v62  ;;  %v1030_v15 = vmax.f32 %v807_v11, 0.0 }
 0x301   :  { %v1682_v60 = vadd.f32 %v7777_v43, %v1681_v48  ;;  %v3840_v61 = vsel %vm3837_vm7, %v3839_v28, %v3835_v51  ;;  %6105 = vrcp.f32 %v7931_v34  ;;  %vm3848_vm13 = vweird.f32 %v6102_v7 }
 0x302   :  { %v5332_v3 = vperm.slane %v3840_v61, %v7188_v50  ;;  %v3844_v6 = vsub.f32 1.0, %v3843_v54  ;;  %vm3849_vm3 = vmor %vm3847_vm2, %vm3848_vm13  ;;  %vm3852_vm7 = vcmp.eq.f32.partialorder %v3851_v12, 8.507059e+37  ;;  %v3868_v53 = vand.u32 2147483648, %v7931_v34 }
 0x303   :  { %5722 = vmatmul.msk.f32.gmra.mxu2 %vm1090_vm1, %v1029_v8  ;;  %v1939_v49 = vmax.f32 %v1682_v60, 0.0  ;;  %v2282_v26 = vpop.xlane.xlu0 %2281  ;;  %5615 = vmatmul.msk.f32.gmra.mxu3 %vm164_vm0, %v132_v52  ;;  %v1031_v29 = vmax.f32 %v810_v10, 0.0  ;;  %vm3862_vm2 = vweird.f32 %v7931_v34 }
 0x304   :  { %v2575_v14 = vadd.f32 %v6836_v45, %v2282_v26  ;;  %v5333_v41 = vsel %vm9765_vm8, %v5332_v3, %v5331_v44  ;;  %v3845_v20 = vmul.f32 %v6102_v7, %v3844_v6  ;;  %vm9766_vm8 = vcmask 917312  }
 0x305   :  { %v2071_v13 = vmul.f32 %v7760_v17, %v1939_v49  ;;  %v7965_v28 = vpop.f32.mrf.mxu3  ;;  %v3869_v6 = vor.u32 1.1754944e-38, %v3868_v53  ;;  %v813_v49 = vadd.f32 %v7675_v37, %v7916_v16 }
 0x306   :  { %v5819_v23 = vmul.f32 -1.442695, %v2575_v14  ;;  %v6104_v35 = vpop.eup %6103  ;;  %v3846_v22 = vadd.f32 %v6102_v7, %v3845_v20 }
 0x307   :  { %v2325_v18 = vsel %vm164_vm0, %v2071_v13, 0.0  ;;  %v6106_v58 = vpop.eup %6105  ;;  %v7952_v27 = vadd.f32 1.0, %v6104_v35  ;;  %v1032_v35 = vmax.f32 %v813_v49, 0.0 }
 0x308   :  { %6107 = vpow2.f32 %v5819_v23  ;;  %2326 = vadd.xlane.f32.xlu0 %v2325_v18  ;;  %v3850_v8 = vsel %vm3849_vm3, %v6102_v7, %v3846_v22  ;;  %v3858_v39 = vmul.f32 %v6106_v58, %v7931_v34  ;;  %vm3863_vm13 = vweird.f32 %v6106_v58 }
 0x309   :  { %v3855_v44 = vsel %vm3852_vm7, %v3854_v2, %v3850_v8  ;;  %6109 = vrcp.f32 %v7952_v27  ;;  %v3866_v7 = vand.u32 2147483647, %v7931_v34  ;;  %vm3864_vm3 = vmor %vm3862_vm2, %vm3863_vm13  ;;  %v133_v34 = vld [vmem:[%s9735_s0 + $0x328] sm:$0xff]  ;;  %v3883_v23 = vand.u32 2147483648, %v7952_v27 }
 0x30a   :  { %v5334_v40 = vperm.slane %v3855_v44, %v7214_v19  ;;  %v3859_v47 = vsub.f32 1.0, %v3858_v39  ;;  %v3881_v2 = vand.u32 2147483647, %v7952_v27  ;;  %vm3877_vm2 = vweird.f32 %v7952_v27 }
 0x30b   :  { %5723 = vmatmul.msk.f32.gmra.mxu2 %vm1090_vm1, %v1030_v15  ;;  %v2285_v21 = vpop.xlane.xlu1 %2284  ;;  %vm3867_vm7 = vcmp.eq.f32.partialorder %v3866_v7, 8.507059e+37  ;;  %5616 = vmatmul.msk.f32.gmra.mxu3 %vm164_vm0, %v133_v34  ;;  %v3884_v53 = vor.u32 1.1754944e-38, %v3883_v23 }
 0x30c   :  { %v2576_v56 = vadd.f32 %v6836_v45, %v2285_v21  ;;  %v5335_v42 = vsel %vm9766_vm8, %v5334_v40, %v5333_v41  ;;  %v3860_v11 = vmul.f32 %v6106_v58, %v3859_v47  ;;  %vm9767_vm8 = vcmask 982912  }
 0x30d   :  { %v7987_v10 = vpop.f32.mrf.mxu3 }
 0x30e   :  { %v1684_v25 = vpop.f32.mrf.mxu2  ;;  %v6108_v60 = vpop.eup %6107  ;;  %v5820_v62 = vmul.f32 -1.442695, %v2576_v56  ;;  %v3861_v54 = vadd.f32 %v6106_v58, %v3860_v11 }
 0x30f   :  { %v1685_v48 = vadd.f32 %v7777_v43, %v1684_v25  ;;  %v7968_v61 = vadd.f32 1.0, %v6108_v60  ;;  %v6110_v3 = vpop.eup %6109  ;;  %v816_v25 = vadd.f32 %v7675_v37, %v7939_v0 }
 0x310   :  { %6111 = vpow2.f32 %v5820_v62  ;;  %v3865_v12 = vsel %vm3864_vm3, %v6106_v58, %v3861_v54  ;;  %v3873_v46 = vmul.f32 %v6110_v3, %v7952_v27  ;;  %vm3878_vm13 = vweird.f32 %v6110_v3  ;;  %v134_v27 = vld [vmem:[%s9735_s0 + $0x330] sm:$0xff] }
 0x311   :  { %v1940_v51 = vmax.f32 %v1685_v48, 0.0  ;;  %6113 = vrcp.f32 %v7968_v61  ;;  %v3870_v14 = vsel %vm3867_vm7, %v3869_v6, %v3865_v12  ;;  %vm3879_vm3 = vmor %vm3877_vm2, %vm3878_vm13  ;;  %vm3882_vm7 = vcmp.eq.f32.partialorder %v3881_v2, 8.507059e+37 }
 0x312   :  { %v5336_v15 = vperm.slane %v3870_v14, %v7240_v57  ;;  %v3874_v41 = vsub.f32 1.0, %v3873_v46  ;;  %v1033_v54 = vmax.f32 %v816_v25, 0.0  ;;  %vm9768_vm13 = vcmask 1048512  }
 0x313   :  { %5724 = vmatmul.msk.f32.gmra.mxu2 %vm1090_vm1, %v1031_v29  ;;  %v2072_v26 = vmul.f32 %v7760_v17, %v1940_v51  ;;  %v2288_v20 = vpop.xlane.xlu2 %2287  ;;  %5617 = vmatmul.msk.f32.gmra.mxu3 %vm164_vm0, %v134_v27  ;;  %v3898_v34 = vand.u32 2147483648, %v7968_v61 }
 0x314   :  { %v2577_v52 = vadd.f32 %v6836_v45, %v2288_v20  ;;  %v5337_v18 = vsel %vm9767_vm8, %v5336_v15, %v5335_v42  ;;  %v3875_v58 = vmul.f32 %v6110_v3, %v3874_v41  ;;  %vm5497_vm8 = vcmask 1042434   ;;  %v8020_v15 = vld [vmem:[%s9736_s2] ss:$0 sm:$0xff] }
 0x315   :  { %v2328_v13 = vsel %vm164_vm0, %v2072_v26, 0.0  ;;  %v8011_v26 = vpop.f32.mrf.mxu3  ;;  %v819_v41 = vadd.f32 %v8020_v15, %v7965_v28  ;;  %v135_v28 = vld [vmem:[%s9735_s0 + $0x338] sm:$0xff] }
 0x316   :  { %v1687_v16 = vpop.f32.mrf.mxu2  ;;  %2329 = vadd.xlane.f32.xlu1 %v2328_v13  ;;  %v6112_v8 = vpop.eup %6111  ;;  %v5821_v39 = vmul.f32 -1.442695, %v2577_v52  ;;  %v3876_v47 = vadd.f32 %v6110_v3, %v3875_v58  ;;  %v3896_v52 = vand.u32 2147483647, %v7968_v61 }
 0x317   :  { %v1688_v22 = vadd.f32 %v7777_v43, %v1687_v16  ;;  %v7989_v40 = vpop.eup %6113  ;;  %v7992_v21 = vadd.f32 1.0, %v6112_v8  ;;  %v1034_v8 = vmax.f32 %v819_v41, 0.0 }
 0x318   :  { %v3888_v56 = vmul.f32 %v7989_v40, %v7968_v61  ;;  %6115 = vpow2.f32 %v5821_v39  ;;  %v3880_v48 = vsel %vm3879_vm3, %v6110_v3, %v3876_v47  ;;  %vm3893_vm2 = vweird.f32 %v7989_v40 }
 0x319   :  { %v1941_v44 = vmax.f32 %v1688_v22, 0.0  ;;  %6117 = vrcp.f32 %v7992_v21  ;;  %v3885_v42 = vsel %vm3882_vm7, %v3884_v53, %v3880_v48  ;;  %vm3892_vm3 = vweird.f32 %v7968_v61 }
 0x31a   :  { %v3889_v37 = vsub.f32 1.0, %v3888_v56  ;;  %v5338_v7 = vperm.slane %v3885_v42, %v7261_v24  ;;  %vm8037_vm7 = vmor %vm3892_vm3, %vm3893_vm2  ;;  %v3899_v61 = vor.u32 1.1754944e-38, %v3898_v34  ;;  %v3913_v2 = vand.u32 2147483648, %v7992_v21 }
 0x31b   :  { %5725 = vmatmul.msk.f32.gmra.mxu2 %vm1090_vm1, %v1032_v35  ;;  %v2073_v29 = vmul.f32 %v7760_v17, %v1941_v44  ;;  %v2291_v0 = vpop.xlane.xlu0 %2290  ;;  %5618 = vmatmul.msk.f32.gmra.mxu3 %vm164_vm0, %v135_v28  ;;  %v3911_v47 = vand.u32 2147483647, %v7992_v21  ;;  %vm3907_vm2 = vweird.f32 %v7992_v21 }
 0x31c   :  { %v2578_v60 = vadd.f32 %v6836_v45, %v2291_v0  ;;  %v3890_v51 = vmul.f32 %v7989_v40, %v3889_v37  ;;  %v5339_v6 = vsel %vm9768_vm13, %v5338_v7, %v5337_v18  ;;  %vm3897_vm13 = vcmp.eq.f32.partialorder %v3896_v52, 8.507059e+37 }
 0x31d   :  { %v2331_v11 = vsel %vm164_vm0, %v2073_v29, 0.0  ;;  %v8014_v46 = vsel %vm5497_vm8, %v5339_v6, %v7629_v55  ;;  %v8050_v56 = vpop.f32.mrf.mxu3  ;;  %v3914_v37 = vor.u32 1.1754944e-38, %v3913_v2 }
 0x31e   :  { %v1690_v62 = vpop.f32.mrf.mxu2  ;;  %2332 = vadd.xlane.f32.xlu2 %v2331_v11  ;;  %v5822_v49 = vmul.f32 -1.442695, %v2578_v60  ;;  %v6116_v12 = vpop.eup %6115  ;;  %v3891_v16 = vadd.f32 %v7989_v40, %v3890_v51  ;;  %v822_v11 = vadd.f32 %v8020_v15, %v7987_v10  ;;  %v136_v51 = vld [vmem:[%s9735_s0 + $0x340] sm:$0xff] }
 0x31f   :  { %v1691_v3 = vadd.f32 %v7777_v43, %v1690_v62  ;;  %v6118_v20 = vpop.eup %6117  ;;  %v8026_v13 = vadd.f32 1.0, %v6116_v12 }
 0x320   :  { %6119 = vpow2.f32 %v5822_v49  ;;  %v3903_v55 = vmul.f32 %v6118_v20, %v7992_v21  ;;  %v3895_v58 = vsel %vm8037_vm7, %v7989_v40, %v3891_v16  ;;  %vm3908_vm8 = vweird.f32 %v6118_v20 }
 0x321   :  { %v1942_v14 = vmax.f32 %v1691_v3, 0.0  ;;  %6121 = vrcp.f32 %v8026_v13  ;;  %v3900_v29 = vsel %vm3897_vm13, %v3899_v61, %v3895_v58  ;;  %vm3909_vm3 = vmor %vm3907_vm2, %vm3908_vm8  ;;  %vm3912_vm7 = vcmp.eq.f32.partialorder %v3911_v47, 8.507059e+37 }
 0x322   :  { %v3904_v22 = vsub.f32 1.0, %v3903_v55  ;;  %v5340_v21 = vperm.slane %v3900_v29, %v6906_v59  ;;  %v3926_v49 = vand.u32 2147483647, %v8026_v13  ;;  %v3928_v12 = vand.u32 2147483648, %v8026_v13 }
 0x323   :  { %5726 = vmatmul.msk.f32.gmra.mxu2 %vm1090_vm1, %v1033_v54  ;;  %v2074_v23 = vmul.f32 %v7760_v17, %v1942_v14  ;;  %v2294_v0 = vpop.xlane.xlu1 %2293  ;;  %5619 = vmatmul.msk.f32.gmra.mxu3 %vm164_vm0, %v136_v51  ;;  %v1035_v14 = vmax.f32 %v822_v11, 0.0  ;;  %vm3922_vm13 = vweird.f32 %v8026_v13 }
 0x324   :  { %v3905_v44 = vmul.f32 %v6118_v20, %v3904_v22  ;;  %v2579_v10 = vadd.f32 %v6836_v45, %v2294_v0  ;;  %v3929_v61 = vor.u32 1.1754944e-38, %v3928_v12 }
 0x325   :  { %v2334_v18 = vsel %vm164_vm0, %v2074_v23, 0.0  ;;  %v8073_v35 = vpop.f32.mrf.mxu3 }
 0x326   :  { %v1693_v39 = vpop.f32.mrf.mxu2  ;;  %2335 = vadd.xlane.f32.xlu0 %v2334_v18  ;;  %v6120_v53 = vpop.eup %6119  ;;  %v3906_v40 = vadd.f32 %v6118_v20, %v3905_v44  ;;  %v5823_v55 = vmul.f32 -1.442695, %v2579_v10  ;;  %v825_v44 = vadd.f32 %v8020_v15, %v8011_v26 }
 0x327   :  { %v1694_v25 = vadd.f32 %v7777_v43, %v1693_v39  ;;  %v8052_v48 = vadd.f32 1.0, %v6120_v53  ;;  %v6122_v42 = vpop.eup %6121  ;;  %v137_v53 = vld [vmem:[%s9735_s0 + $0x348] sm:$0xff] }
 0x328   :  { %v3910_v7 = vsel %vm3909_vm3, %v6118_v20, %v3906_v40  ;;  %v3918_v60 = vmul.f32 %v6122_v42, %v8026_v13  ;;  %vm3923_vm8 = vweird.f32 %v6122_v42  ;;  %vm3927_vm3 = vcmp.eq.f32.partialorder %v3926_v49, 8.507059e+37 }
 0x329   :  { %v1943_v27 = vmax.f32 %v1694_v25, 0.0  ;;  %6123 = vrcp.f32 %v8052_v48  ;;  %v3915_v62 = vsel %vm3912_vm7, %v3914_v37, %v3910_v7  ;;  %vm3924_vm2 = vmor %vm3922_vm13, %vm3923_vm8  ;;  %v3941_v40 = vand.u32 2147483647, %v8052_v48 }
 0x32a   :  { %v5341_v54 = vperm.slane %v3915_v62, %v6921_v5  ;;  %v3919_v3 = vsub.f32 1.0, %v3918_v60  ;;  %6125 = vpow2.f32 %v5823_v55  ;;  %vm3937_vm8 = vweird.f32 %v8052_v48  ;;  %v138_v55 = vld [vmem:[%s9735_s0 + $0x350] sm:$0xff] }
 0x32b   :  { %5727 = vmatmul.msk.f32.gmra.mxu2 %vm1090_vm1, %v1034_v8  ;;  %v2075_v6 = vmul.f32 %v7760_v17, %v1943_v27  ;;  %v2297_v34 = vpop.xlane.xlu2 %2296  ;;  %v3943_v27 = vand.u32 2147483648, %v8052_v48  ;;  %5620 = vmatmul.msk.f32.gmra.mxu3 %vm164_vm0, %v137_v53 }
 0x32c   :  { %v5342_v20 = vsel %vm5220_vm10, %v5341_v54, %v5340_v21  ;;  %v3920_v16 = vmul.f32 %v6122_v42, %v3919_v3  ;;  %v2580_v23 = vadd.f32 %v6836_v45, %v2297_v34  ;;  %v1036_v21 = vmax.f32 %v825_v44, 0.0 }
 0x32d   :  { %v2337_v28 = vsel %vm164_vm0, %v2075_v6, 0.0  ;;  %v833_v10 = vpop.f32.mrf.mxu3  ;;  %v3944_v49 = vor.u32 1.1754944e-38, %v3943_v27 }
 0x32e   :  { %v1696_v41 = vpop.f32.mrf.mxu2  ;;  %v3921_v18 = vadd.f32 %v6122_v42, %v3920_v16  ;;  %v5824_v58 = vmul.f32 -1.442695, %v2580_v23  ;;  %2338 = vadd.xlane.f32.xlu1 %v2337_v28 }
 0x32f   :  { %v1697_v52 = vadd.f32 %v7777_v43, %v1696_v41  ;;  %v6124_v22 = vpop.eup %6123 }
 0x330   :  { %v3933_v2 = vmul.f32 %v6124_v22, %v8052_v48  ;;  %v3925_v39 = vsel %vm3924_vm2, %v6122_v42, %v3921_v18  ;;  %6127 = vpow2.f32 %v5824_v58  ;;  %vm3938_vm7 = vweird.f32 %v6124_v22  ;;  %v6126_v7 = vpop.eup %6125 }
 0x331   :  { %v1944_v8 = vmax.f32 %v1697_v52, 0.0  ;;  %v3930_v47 = vsel %vm3927_vm3, %v3929_v61, %v3925_v39  ;;  %v8094_v54 = vadd.f32 1.0, %v6126_v7  ;;  %vm3939_vm13 = vmor %vm3937_vm8, %vm3938_vm7  ;;  %vm3942_vm2 = vcmp.eq.f32.partialorder %v3941_v40, 8.507059e+37 }
 0x332   :  { %v3934_v25 = vsub.f32 1.0, %v3933_v2  ;;  %v5343_v29 = vperm.slane %v3930_v47, %v6945_v38  ;;  %v828_v48 = vadd.f32 %v8020_v15, %v8050_v56 }
 0x333   :  { %5728 = vmatmul.msk.f32.gmra.mxu2 %vm1090_vm1, %v1035_v14  ;;  %v2076_v13 = vmul.f32 %v7760_v17, %v1944_v8  ;;  %v2300_v42 = vpop.xlane.xlu0 %2299  ;;  %6129 = vrcp.f32 %v8094_v54  ;;  %5621 = vmatmul.msk.f32.gmra.mxu3 %vm164_vm0, %v138_v55  ;;  %vm3952_vm7 = vweird.f32 %v8094_v54 }
 0x334   :  { %v3935_v37 = vmul.f32 %v6124_v22, %v3934_v25  ;;  %v2581_v26 = vadd.f32 %v6836_v45, %v2300_v42  ;;  %v5344_v60 = vsel %vm5224_vm15, %v5343_v29, %v5342_v20  ;;  %v1037_v18 = vmax.f32 %v828_v48, 0.0 }
 0x335   :  { %v2340_v11 = vsel %vm164_vm0, %v2076_v13, 0.0  ;;  %v8116_v61 = vpop.f32.mrf.mxu3  ;;  %v831_v25 = vadd.f32 %v8020_v15, %v8073_v35  ;;  %v3958_v29 = vand.u32 2147483648, %v8094_v54  ;;  %v139_v35 = vld [vmem:[%s9735_s0 + $0x358] sm:$0xff] }
 0x336   :  { %v1699_v0 = vpop.f32.mrf.mxu2  ;;  %2341 = vadd.xlane.f32.xlu2 %v2340_v11  ;;  %v3936_v51 = vadd.f32 %v6124_v22, %v3935_v37  ;;  %v5825_v3 = vmul.f32 -1.442695, %v2581_v26  ;;  %v6128_v6 = vpop.eup %6127  ;;  %v3956_v37 = vand.u32 2147483647, %v8094_v54 }
 0x337   :  { %v1700_v62 = vadd.f32 %v7777_v43, %v1699_v0  ;;  %v8098_v41 = vadd.f32 1.0, %v6128_v6  ;;  %v1038_v7 = vmax.f32 %v831_v25, 0.0 }
 0x338   :  { %v3940_v34 = vsel %vm3939_vm13, %v6124_v22, %v3936_v51  ;;  %6131 = vpow2.f32 %v5825_v3  ;;  %v3959_v51 = vor.u32 1.1754944e-38, %v3958_v29 }
 0x339   :  { %v1945_v12 = vmax.f32 %v1700_v62, 0.0  ;;  %v3945_v14 = vsel %vm3942_vm2, %v3944_v49, %v3940_v34  ;;  %6133 = vrcp.f32 %v8098_v41  ;;  %v6130_v58 = vpop.eup %6129  ;;  %v3973_v3 = vand.u32 2147483648, %v8098_v41 }
 0x33a   :  { %v5345_v20 = vperm.slane %v3945_v14, %v6967_v4  ;;  %v3948_v8 = vmul.f32 %v6130_v58, %v8094_v54  ;;  %vm3953_vm3 = vweird.f32 %v6130_v58  ;;  %v3971_v54 = vand.u32 2147483647, %v8098_v41 }
 0x33b   :  { %5729 = vmatmul.msk.f32.gmra.mxu2 %vm1090_vm1, %v1036_v21  ;;  %v2077_v16 = vmul.f32 %v7760_v17, %v1945_v12  ;;  %v2303_v52 = vpop.xlane.xlu1 %2302  ;;  %5622 = vmatmul.msk.f32.gmra.mxu3 %vm164_vm0, %v139_v35  ;;  %v8141_v21 = vadd.f32 %v8020_v15, %v833_v10  ;;  %vm3954_vm8 = vmor %vm3952_vm7, %vm3953_vm3  ;;  %v8150_v12 = vld [vmem:[%s9738_s4] ss:$0 sm:$0xff]  ;;  %vm3957_vm2 = vcmp.eq.f32.partialorder %v3956_v37, 8.507059e+37 }
 0x33c   :  { %v8111_v23 = vsel %vm9748_vm6, %v5345_v20, %v5344_v60  ;;  %v2582_v56 = vadd.f32 %v6836_v45, %v2303_v52  ;;  %v3949_v53 = vsub.f32 1.0, %v3948_v8  ;;  %vm3967_vm6 = vweird.f32 %v8098_v41 }
 0x33d   :  { %v2343_v22 = vsel %vm164_vm0, %v2077_v16, 0.0  ;;  %v8153_v34 = vpop.f32.mrf.mxu3  ;;  %vm3972_vm7 = vcmp.eq.f32.partialorder %v3971_v54, 8.507059e+37 }
 0x33e   :  { %v1702_v28 = vpop.f32.mrf.mxu2  ;;  %2344 = vadd.xlane.f32.xlu0 %v2343_v22  ;;  %v6132_v2 = vpop.eup %6131  ;;  %v5826_v39 = vmul.f32 -1.442695, %v2582_v56  ;;  %v3950_v42 = vmul.f32 %v6130_v58, %v3949_v53 }
 0x33f   :  { %v1703_v17 = vadd.f32 %v7777_v43, %v1702_v28  ;;  %v8119_v47 = vadd.f32 1.0, %v6132_v2  ;;  %v6134_v13 = vpop.eup %6133  ;;  %v8128_v43 = vld [vmem:[%s9739_s5] ss:$0 sm:$0xff] }
 0x340   :  { %6135 = vpow2.f32 %v5826_v39  ;;  %v3963_v27 = vmul.f32 %v6134_v13, %v8098_v41  ;;  %v3951_v62 = vadd.f32 %v6130_v58, %v3950_v42  ;;  %vm3968_vm13 = vweird.f32 %v6134_v13  ;;  %v140_v41 = vld [vmem:[%s9735_s0 + $0x360] sm:$0xff] }
 0x341   :  { %v1946_v44 = vmax.f32 %v1703_v17, 0.0  ;;  %6137 = vrcp.f32 %v8119_v47  ;;  %vm3969_vm3 = vmor %vm3967_vm6, %vm3968_vm13  ;;  %v3988_v25 = vand.u32 2147483648, %v8119_v47 }
 0x342   :  { %v3964_v0 = vsub.f32 1.0, %v3963_v27  ;;  %v3955_v48 = vsel %vm3954_vm8, %v6130_v58, %v3951_v62  ;;  %v3986_v27 = vand.u32 2147483647, %v8119_v47  ;;  %vm3982_vm8 = vweird.f32 %v8119_v47 }
 0x343   :  { %5730 = vmatmul.msk.f32.gmra.mxu2 %vm1090_vm1, %v1037_v18  ;;  %v2078_v40 = vmul.f32 %v8128_v43, %v1946_v44  ;;  %v2306_v11 = vpop.xlane.xlu2 %2305  ;;  %v3960_v55 = vsel %vm3957_vm2, %v3959_v51, %v3955_v48  ;;  %v3974_v18 = vor.u32 1.1754944e-38, %v3973_v3  ;;  %5623 = vmatmul.msk.f32.gmra.mxu3 %vm164_vm0, %v140_v41  ;;  %v3989_v62 = vor.u32 1.1754944e-38, %v3988_v25 }
 0x344   :  { %v2583_v6 = vadd.f32 %v6836_v45, %v2306_v11  ;;  %v3965_v49 = vmul.f32 %v6134_v13, %v3964_v0  ;;  %v5347_v56 = vperm.slane %v3960_v55, %v6989_v32  ;;  %vm3987_vm2 = vcmp.eq.f32.partialorder %v3986_v27, 8.507059e+37 }
 0x345   :  { %v2346_v26 = vsel %vm164_vm0, %v2078_v40, 0.0  ;;  %v8178_v0 = vpop.f32.mrf.mxu3 }
 0x346   :  { %v1705_v60 = vpop.f32.mrf.mxu2  ;;  %2347 = vadd.xlane.f32.xlu1 %v2346_v26  ;;  %v6136_v14 = vpop.eup %6135  ;;  %v5827_v20 = vmul.f32 -1.442695, %v2583_v6  ;;  %v3966_v52 = vadd.f32 %v6134_v13, %v3965_v49  ;;  %v5348_v2 = vsel %vm5232_vm12, %v5347_v56, %v8111_v23  ;;  %v837_v6 = vadd.f32 %v8020_v15, %v8116_v61 }
 0x347   :  { %v1706_v10 = vadd.f32 %v8150_v12, %v1705_v60  ;;  %v6138_v16 = vpop.eup %6137  ;;  %v8156_v28 = vadd.f32 1.0, %v6136_v14  ;;  %v141_v14 = vld [vmem:[%s9735_s0 + $0x368] sm:$0xff] }
 0x348   :  { %v3978_v17 = vmul.f32 %v6138_v16, %v8119_v47  ;;  %6139 = vpow2.f32 %v5827_v20  ;;  %v3970_v58 = vsel %vm3969_vm3, %v6134_v13, %v3966_v52  ;;  %v1039_v13 = vmax.f32 %v8141_v21, 0.0 }
 0x349   :  { %v1947_v22 = vmax.f32 %v1706_v10, 0.0  ;;  %6141 = vrcp.f32 %v8156_v28  ;;  %v3975_v8 = vsel %vm3972_vm7, %v3974_v18, %v3970_v58  ;;  %vm3983_vm6 = vweird.f32 %v6138_v16 }
 0x34a   :  { %v3979_v39 = vsub.f32 1.0, %v3978_v17  ;;  %v5349_v44 = vperm.slane %v3975_v8, %v7016_v1  ;;  %vm3984_vm13 = vmor %vm3982_vm8, %vm3983_vm6  ;;  %v4001_v61 = vand.u32 2147483647, %v8156_v28  ;;  %v1040_v55 = vmax.f32 %v837_v6, 0.0 }
 0x34b   :  { %5731 = vmatmul.msk.f32.gmra.mxu2 %vm1090_vm1, %v1038_v7  ;;  %v2079_v29 = vmul.f32 %v8128_v43, %v1947_v22  ;;  %v2309_v35 = vpop.xlane.xlu0 %2308  ;;  %5624 = vmatmul.msk.f32.gmra.mxu3 %vm164_vm0, %v141_v14  ;;  %vm3997_vm7 = vweird.f32 %v8156_v28 }
 0x34c   :  { %v3980_v40 = vmul.f32 %v6138_v16, %v3979_v39  ;;  %v5350_v42 = vsel %vm5236_vm4, %v5349_v44, %v5348_v2  ;;  %v2584_v37 = vadd.f32 %v6836_v45, %v2309_v35  ;;  %vm4002_vm8 = vcmp.eq.f32.partialorder %v4001_v61, 8.507059e+37 }
 0x34d   :  { %v2349_v26 = vsel %vm164_vm0, %v2079_v29, 0.0 }
 0x34e   :  { %v1708_v53 = vpop.f32.mrf.mxu2  ;;  %v6140_v11 = vpop.eup %6139  ;;  %v3981_v7 = vadd.f32 %v6138_v16, %v3980_v40  ;;  %2350 = vadd.xlane.f32.xlu2 %v2349_v26  ;;  %v5828_v3 = vmul.f32 -1.442695, %v2584_v37 }
 0x34f   :  { %v1709_v23 = vadd.f32 %v8150_v12, %v1708_v53  ;;  %v6142_v21 = vpop.eup %6141  ;;  %v8181_v51 = vadd.f32 1.0, %v6140_v11  ;;  %v8200_v2 = vpop.f32.mrf.mxu3  ;;  %v840_v53 = vadd.f32 %v8020_v15, %v8153_v34 }
 0x350   :  { %v3985_v49 = vsel %vm3984_vm13, %v6138_v16, %v3981_v7  ;;  %v3993_v54 = vmul.f32 %v6142_v21, %v8156_v28  ;;  %v4003_v16 = vand.u32 2147483648, %v8156_v28  ;;  %vm3998_vm3 = vweird.f32 %v6142_v21  ;;  %v142_v28 = vld [vmem:[%s9735_s0 + $0x370] sm:$0xff] }
 0x351   :  { %v1948_v60 = vmax.f32 %v1709_v23, 0.0  ;;  %v3990_v47 = vsel %vm3987_vm2, %v3989_v62, %v3985_v49  ;;  %6143 = vrcp.f32 %v8181_v51  ;;  %vm3999_vm6 = vmor %vm3997_vm7, %vm3998_vm3  ;;  %v4016_v11 = vand.u32 2147483647, %v8181_v51 }
 0x352   :  { %v5351_v48 = vperm.slane %v3990_v47, %v7038_v30  ;;  %v3994_v20 = vsub.f32 1.0, %v3993_v54  ;;  %6145 = vpow2.f32 %v5828_v3  ;;  %v4004_v25 = vor.u32 1.1754944e-38, %v4003_v16 }
 0x353   :  { %5732 = vmatmul.msk.f32.gmra.mxu2 %vm1090_vm1, %v1039_v13  ;;  %v2080_v10 = vmul.f32 %v8128_v43, %v1948_v60  ;;  %v2312_v17 = vpop.xlane.xlu1 %2311  ;;  %5625 = vmatmul.msk.f32.gmra.mxu3 %vm164_vm0, %v142_v28  ;;  %v4018_v7 = vand.u32 2147483648, %v8181_v51  ;;  %v1041_v60 = vmax.f32 %v840_v53, 0.0  ;;  %vm4012_vm2 = vweird.f32 %v8181_v51 }
 0x354   :  { %v5352_v56 = vsel %vm5240_vm11, %v5351_v48, %v5350_v42  ;;  %v3995_v18 = vmul.f32 %v6142_v21, %v3994_v20  ;;  %v2585_v41 = vadd.f32 %v6836_v45, %v2312_v17  ;;  %v843_v16 = vadd.f32 %v8020_v15, %v8178_v0 }
 0x355   :  { %v2352_v22 = vsel %vm164_vm0, %v2080_v10, 0.0  ;;  %v4019_v20 = vor.u32 1.1754944e-38, %v4018_v7  ;;  %vm4017_vm7 = vcmp.eq.f32.partialorder %v4016_v11, 8.507059e+37 }
 0x356   :  { %v1711_v52 = vpop.f32.mrf.mxu2  ;;  %2353 = vadd.xlane.f32.xlu0 %v2352_v22  ;;  %v3996_v8 = vadd.f32 %v6142_v21, %v3995_v18  ;;  %v5829_v13 = vmul.f32 -1.442695, %v2585_v41 }
 0x357   :  { %v1712_v58 = vadd.f32 %v8150_v12, %v1711_v52  ;;  %v6144_v44 = vpop.eup %6143  ;;  %v8222_v10 = vpop.f32.mrf.mxu3 }
 0x358   :  { %v6146_v29 = vpop.eup %6145  ;;  %v4000_v40 = vsel %vm3999_vm6, %v6142_v21, %v3996_v8  ;;  %v4008_v27 = vmul.f32 %v6144_v44, %v8181_v51  ;;  %6147 = vpow2.f32 %v5829_v13  ;;  %vm4013_vm13 = vweird.f32 %v6144_v44  ;;  %v143_v51 = vld [vmem:[%s9735_s0 + $0x378] sm:$0xff] }
 0x359   :  { %v1949_v39 = vmax.f32 %v1712_v58, 0.0  ;;  %v4005_v23 = vsel %vm4002_vm8, %v4004_v25, %v4000_v40  ;;  %v8208_v42 = vadd.f32 1.0, %v6146_v29  ;;  %vm4014_vm3 = vmor %vm4012_vm2, %vm4013_vm13  ;;  %v1042_v25 = vmax.f32 %v843_v16, 0.0 }
 0x35a   :  { %v5353_v37 = vperm.slane %v4005_v23, %v7060_v63  ;;  %v4009_v34 = vsub.f32 1.0, %v4008_v27 }
 0x35b   :  { %5733 = vmatmul.msk.f32.gmra.mxu2 %vm1090_vm1, %v1040_v55  ;;  %v2081_v35 = vmul.f32 %v8128_v43, %v1949_v39  ;;  %6149 = vrcp.f32 %v8208_v42  ;;  %v2315_v6 = vpop.xlane.xlu2 %2314  ;;  %5626 = vmatmul.msk.f32.gmra.mxu3 %vm164_vm0, %v143_v51  ;;  %v4033_v53 = vand.u32 2147483648, %v8208_v42  ;;  %vm4027_vm8 = vweird.f32 %v8208_v42 }
 0x35c   :  { %v5354_v62 = vsel %vm5244_vm5, %v5353_v37, %v5352_v56  ;;  %v4010_v3 = vmul.f32 %v6144_v44, %v4009_v34  ;;  %v2586_v54 = vadd.f32 %v6836_v45, %v2315_v6  ;;  %v846_v34 = vadd.f32 %v8020_v15, %v8200_v2 }
 0x35d   :  { %v2355_v26 = vsel %vm164_vm0, %v2081_v35, 0.0  ;;  %v4031_v35 = vand.u32 2147483647, %v8208_v42 }
 0x35e   :  { %v1714_v21 = vpop.f32.mrf.mxu2  ;;  %2356 = vadd.xlane.f32.xlu1 %v2355_v26  ;;  %v4011_v47 = vadd.f32 %v6144_v44, %v4010_v3  ;;  %v6148_v48 = vpop.eup %6147  ;;  %v5830_v61 = vmul.f32 -1.442695, %v2586_v54  ;;  %v144_v3 = vld [vmem:[%s9735_s0 + $0x380] sm:$0xff] }
 0x35f   :  { %v1715_v49 = vadd.f32 %v8150_v12, %v1714_v21  ;;  %v8227_v52 = vadd.f32 1.0, %v6148_v48  ;;  %v8243_v40 = vpop.f32.mrf.mxu3  ;;  %v4034_v21 = vor.u32 1.1754944e-38, %v4033_v53  ;;  %vm4032_vm2 = vcmp.eq.f32.partialorder %v4031_v35, 8.507059e+37 }
 0x360   :  { %v4015_v55 = vsel %vm4014_vm3, %v6144_v44, %v4011_v47  ;;  %6151 = vpow2.f32 %v5830_v61 }
 0x361   :  { %v1950_v14 = vmax.f32 %v1715_v49, 0.0  ;;  %v6150_v56 = vpop.eup %6149  ;;  %v4020_v18 = vsel %vm4017_vm7, %v4019_v20, %v4015_v55  ;;  %6153 = vrcp.f32 %v8227_v52  ;;  %v1043_v20 = vmax.f32 %v846_v34, 0.0 }
 0x362   :  { %v5355_v17 = vperm.slane %v4020_v18, %v7092_v31  ;;  %v4023_v58 = vmul.f32 %v6150_v56, %v8208_v42  ;;  %vm4028_vm6 = vweird.f32 %v6150_v56  ;;  %v4046_v55 = vand.u32 2147483647, %v8227_v52 }
 0x363   :  { %5734 = vmatmul.msk.f32.gmra.mxu2 %vm1090_vm1, %v1041_v60  ;;  %v2082_v22 = vmul.f32 %v8128_v43, %v1950_v14  ;;  %v2318_v44 = vpop.xlane.xlu0 %2317  ;;  %vm4029_vm13 = vmor %vm4027_vm8, %vm4028_vm6  ;;  %5627 = vmatmul.msk.f32.gmra.mxu3 %vm164_vm0, %v144_v3  ;;  %v4048_v14 = vand.u32 2147483648, %v8227_v52  ;;  %vm4042_vm7 = vweird.f32 %v8227_v52 }
 0x364   :  { %v5356_v8 = vsel %vm9750_vm14, %v5355_v17, %v5354_v62  ;;  %v4024_v39 = vsub.f32 1.0, %v4023_v58  ;;  %v2587_v29 = vadd.f32 %v6836_v45, %v2318_v44  ;;  %vm4047_vm8 = vcmp.eq.f32.partialorder %v4046_v55, 8.507059e+37 }
 0x365   :  { %v2358_v41 = vsel %vm164_vm0, %v2082_v22, 0.0 }
 0x366   :  { %v1717_v0 = vpop.f32.mrf.mxu2  ;;  %2359 = vadd.xlane.f32.xlu2 %v2358_v41  ;;  %v4025_v27 = vmul.f32 %v6150_v56, %v4024_v39  ;;  %v6152_v28 = vpop.eup %6151  ;;  %v5831_v37 = vmul.f32 -1.442695, %v2587_v29  ;;  %v4049_v39 = vor.u32 1.1754944e-38, %v4048_v14 }
 0x367   :  { %v1718_v13 = vadd.f32 %v8150_v12, %v1717_v0  ;;  %v6154_v26 = vpop.eup %6153  ;;  %v8249_v7 = vadd.f32 1.0, %v6152_v28 }
 0x368   :  { %v4026_v11 = vadd.f32 %v6150_v56, %v4025_v27  ;;  %v4038_v62 = vmul.f32 %v6154_v26, %v8227_v52  ;;  %6155 = vpow2.f32 %v5831_v37  ;;  %vm4043_vm3 = vweird.f32 %v6154_v26  ;;  %v145_v52 = vld [vmem:[%s9735_s0 + $0x388] sm:$0xff] }
 0x369   :  { %v1951_v23 = vmax.f32 %v1718_v13, 0.0  ;;  %6157 = vrcp.f32 %v8249_v7  ;;  %vm4044_vm6 = vmor %vm4042_vm7, %vm4043_vm3  ;;  %v4061_v28 = vand.u32 2147483647, %v8249_v7  ;;  %v4063_v37 = vand.u32 2147483648, %v8249_v7 }
 0x36a   :  { %v4030_v2 = vsel %vm4029_vm13, %v6150_v56, %v4026_v11  ;;  %v4039_v6 = vsub.f32 1.0, %v4038_v62  ;;  %v8265_v56 = vpop.f32.mrf.mxu3  ;;  %vm9771_vm13 = vcmask 720512   ;;  %vm4057_vm3 = vweird.f32 %v8249_v7 }
 0x36b   :  { %5735 = vmatmul.msk.f32.gmra.mxu2 %vm1090_vm1, %v1042_v25  ;;  %v2083_v60 = vmul.f32 %v8128_v43, %v1951_v23  ;;  %v4035_v42 = vsel %vm4032_vm2, %v4034_v21, %v4030_v2  ;;  %v2321_v48 = vpop.xlane.xlu1 %2320  ;;  %v849_v25 = vadd.f32 %v8020_v15, %v8222_v10  ;;  %5628 = vmatmul.msk.f32.gmra.mxu3 %vm164_vm0, %v145_v52 }
 0x36c   :  { %v5357_v47 = vperm.slane %v4035_v42, %v7114_v33  ;;  %v4040_v16 = vmul.f32 %v6154_v26, %v4039_v6  ;;  %v2588_v22 = vadd.f32 %v6836_v45, %v2321_v48  ;;  %v852_v48 = vadd.f32 %v8020_v15, %v8243_v40 }
 0x36d   :  { %v2361_v54 = vsel %vm164_vm0, %v2083_v60, 0.0 }
 0x36e   :  { %v1720_v49 = vpop.f32.mrf.mxu2  ;;  %2362 = vadd.xlane.f32.xlu0 %v2361_v54  ;;  %v5358_v18 = vsel %vm9749_vm9, %v5357_v47, %v5356_v8  ;;  %v6156_v17 = vpop.eup %6155  ;;  %v4041_v58 = vadd.f32 %v6154_v26, %v4040_v16  ;;  %v5832_v0 = vmul.f32 -1.442695, %v2588_v22  ;;  %v4064_v47 = vor.u32 1.1754944e-38, %v4063_v37 }
 0x36f   :  { %v1721_v61 = vadd.f32 %v8150_v12, %v1720_v49  ;;  %v6158_v41 = vpop.eup %6157  ;;  %v8269_v44 = vadd.f32 1.0, %v6156_v17 }
 0x370   :  { %v4045_v53 = vsel %vm4044_vm6, %v6154_v26, %v4041_v58  ;;  %v4053_v8 = vmul.f32 %v6158_v41, %v8249_v7  ;;  %6159 = vpow2.f32 %v5832_v0  ;;  %v1044_v26 = vmax.f32 %v849_v25, 0.0  ;;  %v146_v7 = vld [vmem:[%s9735_s0 + $0x390] sm:$0xff] }
 0x371   :  { %v1952_v51 = vmax.f32 %v1721_v61, 0.0  ;;  %v4050_v29 = vsel %vm4047_vm8, %v4049_v39, %v4045_v53  ;;  %6161 = vrcp.f32 %v8269_v44  ;;  %vm4058_vm2 = vweird.f32 %v6158_v41 }
 0x372   :  { %v5359_v27 = vperm.slane %v4050_v29, %v7136_v36  ;;  %v4054_v35 = vsub.f32 1.0, %v4053_v8  ;;  %v8288_v3 = vpop.f32.mrf.mxu3  ;;  %vm4059_vm7 = vmor %vm4057_vm3, %vm4058_vm2  ;;  %vm4062_vm6 = vcmp.eq.f32.partialorder %v4061_v28, 8.507059e+37  ;;  %v4078_v58 = vand.u32 2147483648, %v8269_v44 }
 0x373   :  { %5736 = vmatmul.msk.f32.gmra.mxu2 %vm1090_vm1, %v1043_v20  ;;  %v2084_v13 = vmul.f32 %v8128_v43, %v1952_v51  ;;  %v2324_v34 = vpop.xlane.xlu2 %2323  ;;  %5629 = vmatmul.msk.f32.gmra.mxu3 %vm164_vm0, %v146_v7  ;;  %vm9772_vm8 = vcmask 786112   ;;  %v4076_v53 = vand.u32 2147483647, %v8269_v44  ;;  %vm4072_vm2 = vweird.f32 %v8269_v44 }
 0x374   :  { %v5360_v60 = vsel %vm9771_vm13, %v5359_v27, %v5358_v18  ;;  %v4055_v21 = vmul.f32 %v6158_v41, %v4054_v35  ;;  %v2589_v62 = vadd.f32 %v6836_v45, %v2324_v34  ;;  %v4079_v28 = vor.u32 1.1754944e-38, %v4078_v58 }
 0x375   :  { %v2364_v23 = vsel %vm164_vm0, %v2084_v13, 0.0 }
 0x376   :  { %v1723_v10 = vpop.f32.mrf.mxu2  ;;  %2365 = vadd.xlane.f32.xlu1 %v2364_v23  ;;  %v6160_v42 = vpop.eup %6159  ;;  %v4056_v6 = vadd.f32 %v6158_v41, %v4055_v21  ;;  %v5833_v49 = vmul.f32 -1.442695, %v2589_v62 }
 0x377   :  { %v1724_v11 = vadd.f32 %v8150_v12, %v1723_v10  ;;  %v6162_v54 = vpop.eup %6161  ;;  %v8291_v14 = vadd.f32 1.0, %v6160_v42  ;;  %v855_v10 = vadd.f32 %v8020_v15, %v8265_v56 }
 0x378   :  { %v4060_v61 = vsel %vm4059_vm7, %v6158_v41, %v4056_v6  ;;  %v4068_v16 = vmul.f32 %v6162_v54, %v8269_v44  ;;  %6163 = vpow2.f32 %v5833_v49  ;;  %v1045_v41 = vmax.f32 %v852_v48, 0.0  ;;  %v147_v44 = vld [vmem:[%s9735_s0 + $0x398] sm:$0xff] }
 0x379   :  { %v1953_v2 = vmax.f32 %v1724_v11, 0.0  ;;  %v4065_v55 = vsel %vm4062_vm6, %v4064_v47, %v4060_v61  ;;  %6165 = vrcp.f32 %v8291_v14  ;;  %vm4073_vm13 = vweird.f32 %v6162_v54 }
 0x37a   :  { %v5361_v22 = vperm.slane %v4065_v55, %v7162_v9  ;;  %v4069_v18 = vsub.f32 1.0, %v4068_v16  ;;  %v8310_v8 = vpop.f32.mrf.mxu3  ;;  %vm4074_vm3 = vmor %vm4072_vm2, %vm4073_vm13  ;;  %vm4077_vm7 = vcmp.eq.f32.partialorder %v4076_v53, 8.507059e+37  ;;  %v4093_v42 = vand.u32 2147483648, %v8291_v14 }
 0x37b   :  { %5737 = vmatmul.msk.f32.gmra.mxu2 %vm1090_vm1, %v1044_v26  ;;  %v2085_v20 = vmul.f32 %v8128_v43, %v1953_v2  ;;  %v2327_v40 = vpop.xlane.xlu0 %2326  ;;  %5630 = vmatmul.msk.f32.gmra.mxu3 %vm164_vm0, %v147_v44  ;;  %v1046_v6 = vmax.f32 %v855_v10, 0.0  ;;  %vm9773_vm6 = vcmask 851712   ;;  %v4091_v48 = vand.u32 2147483647, %v8291_v14 }
 0x37c   :  { %v2590_v0 = vadd.f32 %v6836_v45, %v2327_v40  ;;  %v5362_v25 = vsel %vm9772_vm8, %v5361_v22, %v5360_v60  ;;  %v4070_v13 = vmul.f32 %v6162_v54, %v4069_v18  ;;  %vm4087_vm13 = vweird.f32 %v8291_v14 }
 0x37d   :  { %v2367_v17 = vsel %vm164_vm0, %v2085_v20, 0.0  ;;  %v4094_v40 = vor.u32 1.1754944e-38, %v4093_v42  ;;  %v861_v44 = vadd.f32 %v8020_v15, %v8310_v8 }
 0x37e   :  { %v1726_v51 = vpop.f32.mrf.mxu2  ;;  %2368 = vadd.xlane.f32.xlu2 %v2367_v17  ;;  %v5834_v52 = vmul.f32 -1.442695, %v2590_v0  ;;  %v6164_v27 = vpop.eup %6163  ;;  %v4071_v35 = vadd.f32 %v6162_v54, %v4070_v13  ;;  %v858_v17 = vadd.f32 %v8020_v15, %v8288_v3  ;;  %v149_v15 = vld [vmem:[%s9735_s0 + $0x3a8] sm:$0xff] }
 0x37f   :  { %v1727_v39 = vadd.f32 %v8150_v12, %v1726_v51  ;;  %v6166_v23 = vpop.eup %6165  ;;  %v8315_v37 = vadd.f32 1.0, %v6164_v27 }
 0x380   :  { %6167 = vpow2.f32 %v5834_v52  ;;  %v4075_v26 = vsel %vm4074_vm3, %v6162_v54, %v4071_v35  ;;  %v4083_v11 = vmul.f32 %v6166_v23, %v8291_v14  ;;  %vm4088_vm8 = vweird.f32 %v6166_v23  ;;  %v148_v14 = vld [vmem:[%s9735_s0 + $0x3a0] sm:$0xff] }
 0x381   :  { %v1954_v29 = vmax.f32 %v1727_v39, 0.0  ;;  %v4080_v60 = vsel %vm4077_vm7, %v4079_v28, %v4075_v26  ;;  %6169 = vrcp.f32 %v8315_v37  ;;  %vm4089_vm2 = vmor %vm4087_vm13, %vm4088_vm8  ;;  %vm4092_vm3 = vcmp.eq.f32.partialorder %v4091_v48, 8.507059e+37 }
 0x382   :  { %v5363_v56 = vperm.slane %v4080_v60, %v7188_v50  ;;  %v4084_v21 = vsub.f32 1.0, %v4083_v11  ;;  %v8331_v20 = vpop.f32.mrf.mxu3  ;;  %v4108_v27 = vand.u32 2147483648, %v8315_v37  ;;  %v1047_v35 = vmax.f32 %v858_v17, 0.0 }
 0x383   :  { %5738 = vmatmul.msk.f32.gmra.mxu2 %vm1090_vm1, %v1045_v41  ;;  %v2086_v34 = vmul.f32 %v8128_v43, %v1954_v29  ;;  %5631 = vmatmul.msk.f32.gmra.mxu3 %vm164_vm0, %v148_v14  ;;  %v4106_v29 = vand.u32 2147483647, %v8315_v37  ;;  %vm9774_vm7 = vcmask 917312   ;;  %vm4102_vm8 = vweird.f32 %v8315_v37 }
 0x384   :  { %v5364_v54 = vsel %vm9773_vm6, %v5363_v56, %v5362_v25  ;;  %v4085_v47 = vmul.f32 %v6166_v23, %v4084_v21 }
 0x385   :  { %v2370_v2 = vsel %vm164_vm0, %v2086_v34, 0.0 }
 0x386   :  { %v1729_v62 = vpop.f32.mrf.mxu2  ;;  %2371 = vadd.xlane.f32.xlu0 %v2370_v2  ;;  %v6168_v61 = vpop.eup %6167  ;;  %v4086_v7 = vadd.f32 %v6166_v23, %v4085_v47 }
 0x387   :  { %v1730_v49 = vadd.f32 %v8150_v12, %v1729_v62  ;;  %v8334_v55 = vadd.f32 1.0, %v6168_v61  ;;  %v6170_v18 = vpop.eup %6169  ;;  %v4109_v62 = vor.u32 1.1754944e-38, %v4108_v27 }
 0x388   :  { %v4090_v0 = vsel %vm4089_vm2, %v6166_v23, %v4086_v7  ;;  %v4098_v41 = vmul.f32 %v6170_v18, %v8315_v37  ;;  %vm4103_vm6 = vweird.f32 %v6170_v18  ;;  %vm4107_vm2 = vcmp.eq.f32.partialorder %v4106_v29, 8.507059e+37 }
 0x389   :  { %v1955_v16 = vmax.f32 %v1730_v49, 0.0  ;;  %v2330_v22 = vpop.xlane.xlu1 %2329  ;;  %6171 = vrcp.f32 %v8334_v55  ;;  %v4095_v39 = vsel %vm4092_vm3, %v4094_v40, %v4090_v0  ;;  %vm4104_vm13 = vmor %vm4102_vm8, %vm4103_vm6  ;;  %v1048_v37 = vmax.f32 %v861_v44, 0.0 }
 0x38a   :  { %v2591_v51 = vadd.f32 %v6836_v45, %v2330_v22  ;;  %v5365_v25 = vperm.slane %v4095_v39, %v7214_v19  ;;  %v4099_v13 = vsub.f32 1.0, %v4098_v41  ;;  %v8353_v34 = vpop.f32.mrf.mxu3  ;;  %v4123_v7 = vand.u32 2147483648, %v8334_v55 }
 0x38b   :  { %5739 = vmatmul.msk.f32.gmra.mxu2 %vm1090_vm1, %v1046_v6  ;;  %v2087_v58 = vmul.f32 %v8128_v43, %v1955_v16  ;;  %5632 = vmatmul.msk.f32.gmra.mxu3 %vm164_vm0, %v149_v15  ;;  %v4121_v16 = vand.u32 2147483647, %v8334_v55  ;;  %vm4117_vm6 = vweird.f32 %v8334_v55 }
 0x38c   :  { %v5835_v53 = vmul.f32 -1.442695, %v2591_v51  ;;  %v5366_v23 = vsel %vm9774_vm7, %v5365_v25, %v5364_v54  ;;  %v4100_v28 = vmul.f32 %v6170_v18, %v4099_v13  ;;  %vm9775_vm7 = vcmask 982912  }
 0x38d   :  { %v2373_v52 = vsel %vm164_vm0, %v2087_v58, 0.0  ;;  %v4124_v14 = vor.u32 1.1754944e-38, %v4123_v7 }
 0x38e   :  { %v1732_v3 = vpop.f32.mrf.mxu2  ;;  %2374 = vadd.xlane.f32.xlu1 %v2373_v52  ;;  %6173 = vpow2.f32 %v5835_v53  ;;  %v4101_v56 = vadd.f32 %v6170_v18, %v4100_v28  ;;  %v8383_v53 = vld [vmem:[%s9736_s2] ss:$0 sm:$0xff] }
 0x38f   :  { %v1733_v10 = vadd.f32 %v8150_v12, %v1732_v3  ;;  %v6172_v60 = vpop.eup %6171 }
 0x390   :  { %v4113_v2 = vmul.f32 %v6172_v60, %v8334_v55  ;;  %v4105_v6 = vsel %vm4104_vm13, %v6170_v18, %v4101_v56  ;;  %vm4118_vm3 = vweird.f32 %v6172_v60  ;;  %vm4122_vm13 = vcmp.eq.f32.partialorder %v4121_v16, 8.507059e+37 }
 0x391   :  { %v1956_v26 = vmax.f32 %v1733_v10, 0.0  ;;  %v2333_v11 = vpop.xlane.xlu2 %2332  ;;  %v4110_v8 = vsel %vm4107_vm2, %v4109_v62, %v4105_v6  ;;  %vm4119_vm8 = vmor %vm4117_vm6, %vm4118_vm3  ;;  %v864_v55 = vadd.f32 %v8383_v53, %v8331_v20  ;;  %vm5499_vm2 = vcmask 1043459  }
 0x392   :  { %v2592_v21 = vadd.f32 %v6836_v45, %v2333_v11  ;;  %v4114_v54 = vsub.f32 1.0, %v4113_v2  ;;  %v5367_v61 = vperm.slane %v4110_v8, %v7240_v57  ;;  %v8374_v58 = vpop.f32.mrf.mxu3  ;;  %vm9776_vm3 = vcmask 1048512  }
 0x393   :  { %5740 = vmatmul.msk.f32.gmra.mxu2 %vm1090_vm1, %v1047_v35  ;;  %v2088_v42 = vmul.f32 %v8128_v43, %v1956_v26  ;;  %v150_v35 = vld [vmem:[%s9735_s0 + $0x3b0] sm:$0xff]  ;;  %v1049_v44 = vmax.f32 %v864_v55, 0.0  ;;  %v867_v6 = vadd.f32 %v8383_v53, %v8353_v34 }
 0x394   :  { %v5836_v49 = vmul.f32 -1.442695, %v2592_v21  ;;  %v6174_v48 = vpop.eup %6173  ;;  %v4115_v18 = vmul.f32 %v6172_v60, %v4114_v54  ;;  %v5368_v17 = vsel %vm9775_vm7, %v5367_v61, %v5366_v23  ;;  %5633 = vmatmul.msk.f32.gmra.mxu3 %vm164_vm0, %v150_v35  ;;  %v870_v35 = vadd.f32 %v8383_v53, %v8374_v58 }
 0x395   :  { %v2376_v47 = vsel %vm164_vm0, %v2088_v42, 0.0  ;;  %v8370_v40 = vadd.f32 1.0, %v6174_v48 }
 0x396   :  { %6175 = vpow2.f32 %v5836_v49  ;;  %v1735_v22 = vpop.f32.mrf.mxu2  ;;  %2377 = vadd.xlane.f32.xlu2 %v2376_v47  ;;  %v4116_v0 = vadd.f32 %v6172_v60, %v4115_v18 }
 0x397   :  { %v1736_v51 = vadd.f32 %v8150_v12, %v1735_v22  ;;  %6177 = vrcp.f32 %v8370_v40  ;;  %vm4132_vm6 = vweird.f32 %v8370_v40  ;;  %v4138_v7 = vand.u32 2147483648, %v8370_v40 }
 0x398   :  { %v4120_v13 = vsel %vm4119_vm8, %v6172_v60, %v4116_v0  ;;  %v1050_v22 = vmax.f32 %v867_v6, 0.0  ;;  %v4136_v18 = vand.u32 2147483647, %v8370_v40  ;;  %v1051_v6 = vmax.f32 %v870_v35, 0.0 }
 0x399   :  { %v2336_v41 = vpop.xlane.xlu0 %2335  ;;  %v1957_v39 = vmax.f32 %v1736_v51, 0.0  ;;  %v4125_v52 = vsel %vm4122_vm13, %v4124_v14, %v4120_v13 }
 0x39a   :  { %v2593_v25 = vadd.f32 %v6836_v45, %v2336_v41  ;;  %v5369_v10 = vperm.slane %v4125_v52, %v7261_v24  ;;  %v8402_v21 = vpop.f32.mrf.mxu3 }
 0x39b   :  { %5741 = vmatmul.msk.f32.gmra.mxu2 %vm1090_vm1, %v1048_v37  ;;  %v2089_v27 = vmul.f32 %v8128_v43, %v1957_v39 }
 0x39c   :  { %v6176_v3 = vpop.eup %6175  ;;  %v5837_v29 = vmul.f32 -1.442695, %v2593_v25  ;;  %v5370_v11 = vsel %vm9776_vm3, %v5369_v10, %v5368_v17 }
 0x39d   :  { %v8392_v23 = vadd.f32 1.0, %v6176_v3  ;;  %v2379_v20 = vsel %vm164_vm0, %v2089_v27, 0.0  ;;  %v6178_v26 = vpop.eup %6177  ;;  %v8399_v60 = vsel %vm5499_vm2, %v5370_v11, %v8014_v46  ;;  %v151_v46 = vld [vmem:[%s9735_s0 + $0x3b8] sm:$0xff]  ;;  %vm4137_vm2 = vcmp.eq.f32.partialorder %v4136_v18, 8.507059e+37 }
 0x39e   :  { %6179 = vpow2.f32 %v5837_v29  ;;  %v1738_v28 = vpop.f32.mrf.mxu2  ;;  %2380 = vadd.xlane.f32.xlu0 %v2379_v20  ;;  %v4128_v56 = vmul.f32 %v6178_v26, %v8370_v40  ;;  %5634 = vmatmul.msk.f32.gmra.mxu3 %vm164_vm0, %v151_v46  ;;  %vm4133_vm7 = vweird.f32 %v6178_v26  ;;  %v4139_v29 = vor.u32 1.1754944e-38, %v4138_v7  ;;  %v152_v20 = vld [vmem:[%s9735_s0 + $0x3c0] sm:$0xff] }
 0x39f   :  { %6181 = vrcp.f32 %v8392_v23  ;;  %v1739_v62 = vadd.f32 %v8150_v12, %v1738_v28  ;;  %vm8424_vm8 = vmor %vm4132_vm6, %vm4133_vm7  ;;  %v4151_v39 = vand.u32 2147483647, %v8392_v23  ;;  %v4153_v25 = vand.u32 2147483648, %v8392_v23 }
 0x3a0   :  { %v4129_v2 = vsub.f32 1.0, %v4128_v56  ;;  %vm4147_vm3 = vweird.f32 %v8392_v23 }
 0x3a1   :  { %v1958_v42 = vmax.f32 %v1739_v62, 0.0  ;;  %v2339_v8 = vpop.xlane.xlu1 %2338  ;;  %vm4152_vm6 = vcmp.eq.f32.partialorder %v4151_v39, 8.507059e+37  ;;  %v153_v39 = vld [vmem:[%s9735_s0 + $0x3c8] sm:$0xff] }
 0x3a2   :  { %v4130_v15 = vmul.f32 %v6178_v26, %v4129_v2  ;;  %v2594_v47 = vadd.f32 %v6836_v45, %v2339_v8  ;;  %v8422_v41 = vpop.f32.mrf.mxu3 }
 0x3a3   :  { %5742 = vmatmul.msk.f32.gmra.mxu2 %vm1090_vm1, %v1049_v44  ;;  %v2090_v48 = vmul.f32 %v8128_v43, %v1958_v42  ;;  %v4154_v44 = vor.u32 1.1754944e-38, %v4153_v25 }
 0x3a4   :  { %v6180_v49 = vpop.eup %6179  ;;  %v4131_v61 = vadd.f32 %v6178_v26, %v4130_v15  ;;  %v5838_v17 = vmul.f32 -1.442695, %v2594_v47 }
 0x3a5   :  { %v6182_v54 = vpop.eup %6181  ;;  %v8411_v37 = vadd.f32 1.0, %v6180_v49  ;;  %v2382_v13 = vsel %vm164_vm0, %v2090_v48, 0.0 }
 0x3a6   :  { %v4143_v34 = vmul.f32 %v6182_v54, %v8392_v23  ;;  %v1741_v16 = vpop.f32.mrf.mxu2  ;;  %vm4148_vm13 = vweird.f32 %v6182_v54  ;;  %v4135_v40 = vsel %vm8424_vm8, %v6178_v26, %v4131_v61  ;;  %2383 = vadd.xlane.f32.xlu1 %v2382_v13  ;;  %5635 = vmatmul.msk.f32.gmra.mxu3 %vm164_vm0, %v152_v20 }
 0x3a7   :  { %6183 = vrcp.f32 %v8411_v37  ;;  %v1742_v0 = vadd.f32 %v8150_v12, %v1741_v16  ;;  %v4140_v11 = vsel %vm4137_vm2, %v4139_v29, %v4135_v40  ;;  %vm4149_vm7 = vmor %vm4147_vm3, %vm4148_vm13  ;;  %v4168_v61 = vand.u32 2147483648, %v8411_v37 }
 0x3a8   :  { %v4144_v51 = vsub.f32 1.0, %v4143_v34  ;;  %6185 = vpow2.f32 %v5838_v17  ;;  %v5371_v8 = vperm.slane %v4140_v11, %v6906_v59  ;;  %vm4162_vm13 = vweird.f32 %v8411_v37 }
 0x3a9   :  { %v1959_v3 = vmax.f32 %v1742_v0, 0.0  ;;  %v2342_v52 = vpop.xlane.xlu2 %2341  ;;  %v4169_v13 = vor.u32 1.1754944e-38, %v4168_v61  ;;  %v8498_v61 = vld [vmem:[%s9738_s4] ss:$0 sm:$0xff] }
 0x3aa   :  { %v4145_v55 = vmul.f32 %v6182_v54, %v4144_v51  ;;  %v2595_v27 = vadd.f32 %v6836_v45, %v2342_v52  ;;  %v8449_v48 = vpop.f32.mrf.mxu3  ;;  %v873_v51 = vadd.f32 %v8383_v53, %v8402_v21 }
 0x3ab   :  { %5743 = vmatmul.msk.f32.gmra.mxu2 %vm1090_vm1, %v1050_v22  ;;  %v2091_v28 = vmul.f32 %v8128_v43, %v1959_v3 }
 0x3ac   :  { %v4146_v10 = vadd.f32 %v6182_v54, %v4145_v55  ;;  %v5839_v56 = vmul.f32 -1.442695, %v2595_v27  ;;  %v1052_v29 = vmax.f32 %v873_v51, 0.0 }
 0x3ad   :  { %v6184_v26 = vpop.eup %6183  ;;  %v2385_v23 = vsel %vm164_vm0, %v2091_v28, 0.0 }
 0x3ae   :  { %v4150_v62 = vsel %vm4149_vm7, %v6182_v54, %v4146_v10  ;;  %v4158_v58 = vmul.f32 %v6184_v26, %v8411_v37  ;;  %v1744_v2 = vpop.f32.mrf.mxu2  ;;  %6187 = vpow2.f32 %v5839_v56  ;;  %2386 = vadd.xlane.f32.xlu2 %v2385_v23  ;;  %v6186_v15 = vpop.eup %6185  ;;  %v4166_v54 = vand.u32 2147483647, %v8411_v37  ;;  %5636 = vmatmul.msk.f32.gmra.mxu3 %vm164_vm0, %v153_v39  ;;  %v8484_v56 = vld [vmem:[%s9739_s5] ss:$0 sm:$0xff] }
 0x3af   :  { %v4155_v42 = vsel %vm4152_vm6, %v4154_v44, %v4150_v62  ;;  %v1745_v49 = vadd.f32 %v8150_v12, %v1744_v2  ;;  %v8453_v34 = vadd.f32 1.0, %v6186_v15  ;;  %vm4163_vm8 = vweird.f32 %v6184_v26  ;;  %v154_v2 = vld [vmem:[%s9735_s0 + $0x3d0] sm:$0xff] }
 0x3b0   :  { %v5372_v46 = vperm.slane %v4155_v42, %v6921_v5  ;;  %v4159_v47 = vsub.f32 1.0, %v4158_v58  ;;  %vm4164_vm2 = vmor %vm4162_vm13, %vm4163_vm8  ;;  %vm4167_vm3 = vcmp.eq.f32.partialorder %v4166_v54, 8.507059e+37 }
 0x3b1   :  { %v1960_v16 = vmax.f32 %v1745_v49, 0.0  ;;  %v2345_v18 = vpop.xlane.xlu0 %2344  ;;  %6189 = vrcp.f32 %v8453_v34  ;;  %v4181_v23 = vand.u32 2147483647, %v8453_v34  ;;  %v4183_v42 = vand.u32 2147483648, %v8453_v34 }
 0x3b2   :  { %v5373_v7 = vsel %vm5220_vm10, %v5372_v46, %v5371_v8  ;;  %v4160_v22 = vmul.f32 %v6184_v26, %v4159_v47  ;;  %v2596_v0 = vadd.f32 %v6836_v45, %v2345_v18  ;;  %v8473_v35 = vpop.f32.mrf.mxu3  ;;  %vm4177_vm6 = vweird.f32 %v8453_v34 }
 0x3b3   :  { %5744 = vmatmul.msk.f32.gmra.mxu2 %vm1090_vm1, %v1051_v6  ;;  %v2092_v14 = vmul.f32 %v8128_v43, %v1960_v16  ;;  %v879_v18 = vadd.f32 %v8383_v53, %v8449_v48  ;;  %vm4182_vm13 = vcmp.eq.f32.partialorder %v4181_v23, 8.507059e+37 }
 0x3b4   :  { %v4161_v17 = vadd.f32 %v6184_v26, %v4160_v22  ;;  %v6188_v25 = vpop.eup %6187  ;;  %v5840_v21 = vmul.f32 -1.442695, %v2596_v0 }
 0x3b5   :  { %v8467_v55 = vadd.f32 1.0, %v6188_v25  ;;  %v2388_v37 = vsel %vm164_vm0, %v2092_v14, 0.0 }
 0x3b6   :  { %v4165_v40 = vsel %vm4164_vm2, %v6184_v26, %v4161_v17  ;;  %v1747_v3 = vpop.f32.mrf.mxu2  ;;  %2389 = vadd.xlane.f32.xlu0 %v2388_v37  ;;  %5637 = vmatmul.msk.f32.gmra.mxu3 %vm164_vm0, %v154_v2  ;;  %v4184_v17 = vor.u32 1.1754944e-38, %v4183_v42  ;;  %v155_v37 = vld [vmem:[%s9735_s0 + $0x3d8] sm:$0xff] }
 0x3b7   :  { %v4170_v52 = vsel %vm4167_vm3, %v4169_v13, %v4165_v40  ;;  %v1748_v43 = vadd.f32 %v8150_v12, %v1747_v3  ;;  %6191 = vrcp.f32 %v8467_v55  ;;  %v6190_v10 = vpop.eup %6189  ;;  %v876_v12 = vadd.f32 %v8383_v53, %v8422_v41 }
 0x3b8   :  { %v5374_v27 = vperm.slane %v4170_v52, %v6945_v38  ;;  %6193 = vpow2.f32 %v5840_v21  ;;  %v4173_v11 = vmul.f32 %v6190_v10, %v8453_v34  ;;  %vm4178_vm7 = vweird.f32 %v6190_v10 }
 0x3b9   :  { %v1961_v28 = vmax.f32 %v1748_v43, 0.0  ;;  %v2348_v20 = vpop.xlane.xlu1 %2347  ;;  %v1053_v54 = vmax.f32 %v876_v12, 0.0  ;;  %vm4179_vm8 = vmor %vm4177_vm6, %vm4178_vm7  ;;  %v4196_v25 = vand.u32 2147483647, %v8467_v55  ;;  %v4198_v13 = vand.u32 2147483648, %v8467_v55 }
 0x3ba   :  { %v5375_v26 = vsel %vm5224_vm15, %v5374_v27, %v5373_v7  ;;  %v2597_v44 = vadd.f32 %v6836_v45, %v2348_v20  ;;  %v4174_v58 = vsub.f32 1.0, %v4173_v11  ;;  %v8506_v51 = vpop.f32.mrf.mxu3  ;;  %vm4192_vm3 = vweird.f32 %v8467_v55 }
 0x3bb   :  { %5745 = vmatmul.msk.f32.gmra.mxu2 %vm1090_vm1, %v1052_v29  ;;  %v2093_v62 = vmul.f32 %v8484_v56, %v1961_v28  ;;  %vm9779_vm7 = vcmask 261312   ;;  %v4199_v28 = vor.u32 1.1754944e-38, %v4198_v13  ;;  %v1054_v11 = vmax.f32 %v879_v18, 0.0 }
 0x3bc   :  { %v5841_v6 = vmul.f32 -1.442695, %v2597_v44  ;;  %v4175_v15 = vmul.f32 %v6190_v10, %v4174_v58 }
 0x3bd   :  { %v2391_v49 = vsel %vm164_vm0, %v2093_v62, 0.0  ;;  %v6192_v41 = vpop.eup %6191 }
 0x3be   :  { %v1750_v8 = vpop.f32.mrf.mxu2  ;;  %2392 = vadd.xlane.f32.xlu1 %v2391_v49  ;;  %v6194_v46 = vpop.eup %6193  ;;  %v4188_v47 = vmul.f32 %v6192_v41, %v8467_v55  ;;  %6195 = vpow2.f32 %v5841_v6  ;;  %v4176_v7 = vadd.f32 %v6190_v10, %v4175_v15  ;;  %vm4193_vm2 = vweird.f32 %v6192_v41  ;;  %5638 = vmatmul.msk.f32.gmra.mxu3 %vm164_vm0, %v155_v37 }
 0x3bf   :  { %v1751_v16 = vadd.f32 %v8498_v61, %v1750_v8  ;;  %v8502_v22 = vadd.f32 1.0, %v6194_v46  ;;  %vm4194_vm6 = vmor %vm4192_vm3, %vm4193_vm2 }
 0x3c0   :  { %v4189_v0 = vsub.f32 1.0, %v4188_v47  ;;  %v4180_v39 = vsel %vm4179_vm8, %v6190_v10, %v4176_v7  ;;  %vm4197_vm8 = vcmp.eq.f32.partialorder %v4196_v25, 8.507059e+37  ;;  %v156_v7 = vld [vmem:[%s9735_s0 + $0x3e0] sm:$0xff] }
 0x3c1   :  { %v1962_v14 = vmax.f32 %v1751_v16, 0.0  ;;  %6197 = vrcp.f32 %v8502_v22  ;;  %v4185_v34 = vsel %vm4182_vm13, %v4184_v17, %v4180_v39  ;;  %v2351_v3 = vpop.xlane.xlu2 %2350  ;;  %v4211_v47 = vand.u32 2147483647, %v8502_v22 }
 0x3c2   :  { %v4190_v40 = vmul.f32 %v6192_v41, %v4189_v0  ;;  %v5376_v21 = vperm.slane %v4185_v34, %v6967_v4  ;;  %v2598_v43 = vadd.f32 %v6836_v45, %v2351_v3  ;;  %v8526_v23 = vpop.f32.mrf.mxu3  ;;  %vm4207_vm2 = vweird.f32 %v8502_v22 }
 0x3c3   :  { %5746 = vmatmul.msk.f32.gmra.mxu2 %vm1090_vm1, %v1053_v54  ;;  %v2094_v48 = vmul.f32 %v8484_v56, %v1962_v14  ;;  %v4213_v54 = vand.u32 2147483648, %v8502_v22 }
 0x3c4   :  { %v6196_v52 = vpop.eup %6195  ;;  %v4191_v29 = vadd.f32 %v6192_v41, %v4190_v40  ;;  %v5377_v10 = vsel %vm9779_vm7, %v5376_v21, %v5375_v26  ;;  %v5842_v62 = vmul.f32 -1.442695, %v2598_v43  ;;  %vm4212_vm7 = vcmp.eq.f32.partialorder %v4211_v47, 8.507059e+37 }
 0x3c5   :  { %v2394_v27 = vsel %vm164_vm0, %v2094_v48, 0.0  ;;  %v8522_v20 = vadd.f32 1.0, %v6196_v52  ;;  %v4214_v40 = vor.u32 1.1754944e-38, %v4213_v54  ;;  %v885_v21 = vadd.f32 %v8383_v53, %v8506_v51 }
 0x3c6   :  { %v1753_v44 = vpop.f32.mrf.mxu2  ;;  %2395 = vadd.xlane.f32.xlu2 %v2394_v27  ;;  %v4195_v12 = vsel %vm4194_vm6, %v6192_v41, %v4191_v29  ;;  %v882_v41 = vadd.f32 %v8383_v53, %v8473_v35  ;;  %5639 = vmatmul.msk.f32.gmra.mxu3 %vm164_vm0, %v156_v7 }
 0x3c7   :  { %v1754_v55 = vadd.f32 %v8498_v61, %v1753_v44  ;;  %v6198_v58 = vpop.eup %6197  ;;  %v4200_v2 = vsel %vm4197_vm8, %v4199_v28, %v4195_v12  ;;  %6199 = vrcp.f32 %v8522_v20  ;;  %v4226_v29 = vand.u32 2147483647, %v8522_v20 }
 0x3c8   :  { %v5378_v26 = vperm.slane %v4200_v2, %v6989_v32  ;;  %v4203_v42 = vmul.f32 %v6198_v58, %v8502_v22  ;;  %6201 = vpow2.f32 %v5842_v62  ;;  %vm4208_vm13 = vweird.f32 %v6198_v58 }
 0x3c9   :  { %v1963_v6 = vmax.f32 %v1754_v55, 0.0  ;;  %v2354_v49 = vpop.xlane.xlu0 %2353  ;;  %v1055_v0 = vmax.f32 %v882_v41, 0.0  ;;  %vm4209_vm3 = vmor %vm4207_vm2, %vm4208_vm13  ;;  %v157_v55 = vld [vmem:[%s9735_s0 + $0x3e8] sm:$0xff]  ;;  %vm4222_vm8 = vweird.f32 %v8522_v20  ;;  %vm4227_vm2 = vcmp.eq.f32.partialorder %v4226_v29, 8.507059e+37 }
 0x3ca   :  { %v5379_v15 = vsel %vm5232_vm12, %v5378_v26, %v5377_v10  ;;  %v4204_v8 = vsub.f32 1.0, %v4203_v42  ;;  %v2599_v46 = vadd.f32 %v6836_v45, %v2354_v49  ;;  %v8548_v3 = vpop.f32.mrf.mxu3  ;;  %v4228_v10 = vand.u32 2147483648, %v8522_v20 }
 0x3cb   :  { %5747 = vmatmul.msk.f32.gmra.mxu2 %vm1090_vm1, %v1054_v11  ;;  %v2095_v16 = vmul.f32 %v8484_v56, %v1963_v6  ;;  %v1056_v49 = vmax.f32 %v885_v21, 0.0 }
 0x3cc   :  { %v4205_v18 = vmul.f32 %v6198_v58, %v4204_v8  ;;  %v5843_v35 = vmul.f32 -1.442695, %v2599_v46  ;;  %v4229_v42 = vor.u32 1.1754944e-38, %v4228_v10 }
 0x3cd   :  { %v6200_v17 = vpop.eup %6199  ;;  %v2397_v39 = vsel %vm164_vm0, %v2095_v16, 0.0 }
 0x3ce   :  { %v1756_v14 = vpop.f32.mrf.mxu2  ;;  %v4206_v25 = vadd.f32 %v6198_v58, %v4205_v18  ;;  %v4218_v13 = vmul.f32 %v6200_v17, %v8522_v20  ;;  %6203 = vpow2.f32 %v5843_v35  ;;  %2398 = vadd.xlane.f32.xlu0 %v2397_v39  ;;  %v6202_v34 = vpop.eup %6201  ;;  %vm4223_vm6 = vweird.f32 %v6200_v17  ;;  %5640 = vmatmul.msk.f32.gmra.mxu3 %vm164_vm0, %v157_v55 }
 0x3cf   :  { %v1757_v48 = vadd.f32 %v8498_v61, %v1756_v14  ;;  %v8551_v22 = vadd.f32 1.0, %v6202_v34  ;;  %vm4224_vm13 = vmor %vm4222_vm8, %vm4223_vm6  ;;  %v888_v14 = vadd.f32 %v8383_v53, %v8526_v23 }
 0x3d0   :  { %v4210_v37 = vsel %vm4209_vm3, %v6198_v58, %v4206_v25  ;;  %v4219_v52 = vsub.f32 1.0, %v4218_v13 }
 0x3d1   :  { %v2357_v43 = vpop.xlane.xlu1 %2356  ;;  %v4215_v27 = vsel %vm4212_vm7, %v4214_v40, %v4210_v37  ;;  %v1964_v28 = vmax.f32 %v1757_v48, 0.0  ;;  %6205 = vrcp.f32 %v8551_v22  ;;  %v4241_v34 = vand.u32 2147483647, %v8551_v22  ;;  %v158_v40 = vld [vmem:[%s9735_s0 + $0x3f0] sm:$0xff] }
 0x3d2   :  { %v2600_v11 = vadd.f32 %v6836_v45, %v2357_v43  ;;  %v5380_v44 = vperm.slane %v4215_v27, %v7016_v1  ;;  %v4220_v12 = vmul.f32 %v6200_v17, %v4219_v52  ;;  %v8570_v20 = vpop.f32.mrf.mxu3  ;;  %v4243_v48 = vand.u32 2147483648, %v8551_v22 }
 0x3d3   :  { %5748 = vmatmul.msk.f32.gmra.mxu2 %vm1090_vm1, %v1055_v0  ;;  %v2096_v62 = vmul.f32 %v8484_v56, %v1964_v28  ;;  %v1057_v10 = vmax.f32 %v888_v14, 0.0  ;;  %vm4237_vm7 = vweird.f32 %v8551_v22  ;;  %vm4242_vm8 = vcmp.eq.f32.partialorder %v4241_v34, 8.507059e+37 }
 0x3d4   :  { %v5844_v51 = vmul.f32 -1.442695, %v2600_v11  ;;  %v6204_v58 = vpop.eup %6203  ;;  %v5381_v2 = vsel %vm5236_vm4, %v5380_v44, %v5379_v15  ;;  %v4221_v26 = vadd.f32 %v6200_v17, %v4220_v12  ;;  %v891_v11 = vadd.f32 %v8383_v53, %v8548_v3 }
 0x3d5   :  { %v8565_v6 = vadd.f32 1.0, %v6204_v58  ;;  %v2400_v47 = vsel %vm164_vm0, %v2096_v62, 0.0  ;;  %v4244_v12 = vor.u32 1.1754944e-38, %v4243_v48 }
 0x3d6   :  { %6207 = vpow2.f32 %v5844_v51  ;;  %v1759_v41 = vpop.f32.mrf.mxu2  ;;  %v4225_v8 = vsel %vm4224_vm13, %v6200_v17, %v4221_v26  ;;  %2401 = vadd.xlane.f32.xlu1 %v2400_v47  ;;  %5641 = vmatmul.msk.f32.gmra.mxu3 %vm164_vm0, %v158_v40 }
 0x3d7   :  { %v1760_v46 = vadd.f32 %v8498_v61, %v1759_v41  ;;  %v4230_v54 = vsel %vm4227_vm2, %v4229_v42, %v4225_v8  ;;  %6209 = vrcp.f32 %v8565_v6  ;;  %v6206_v15 = vpop.eup %6205  ;;  %v4256_v58 = vand.u32 2147483647, %v8565_v6 }
 0x3d8   :  { %v5382_v16 = vperm.slane %v4230_v54, %v7038_v30  ;;  %v4233_v18 = vmul.f32 %v6206_v15, %v8551_v22  ;;  %vm4238_vm3 = vweird.f32 %v6206_v15  ;;  %v1058_v8 = vmax.f32 %v891_v11, 0.0 }
 0x3d9   :  { %v1965_v7 = vmax.f32 %v1760_v46, 0.0  ;;  %v2360_v35 = vpop.xlane.xlu2 %2359  ;;  %vm4239_vm6 = vmor %vm4237_vm7, %vm4238_vm3  ;;  %v159_v46 = vld [vmem:[%s9735_s0 + $0x3f8] sm:$0xff]  ;;  %vm4252_vm2 = vweird.f32 %v8565_v6  ;;  %vm4257_vm7 = vcmp.eq.f32.partialorder %v4256_v58, 8.507059e+37 }
 0x3da   :  { %v5383_v17 = vsel %vm5240_vm11, %v5382_v16, %v5381_v2  ;;  %v2601_v0 = vadd.f32 %v6836_v45, %v2360_v35  ;;  %v4234_v13 = vsub.f32 1.0, %v4233_v18  ;;  %v8594_v44 = vpop.f32.mrf.mxu3  ;;  %v4258_v2 = vand.u32 2147483648, %v8565_v6 }
 0x3db   :  { %5749 = vmatmul.msk.f32.gmra.mxu2 %vm1090_vm1, %v1056_v49  ;;  %v2097_v39 = vmul.f32 %v8484_v56, %v1965_v7 }
 0x3dc   :  { %v6208_v25 = vpop.eup %6207  ;;  %v5845_v37 = vmul.f32 -1.442695, %v2601_v0  ;;  %v4235_v29 = vmul.f32 %v6206_v15, %v4234_v13  ;;  %v4259_v35 = vor.u32 1.1754944e-38, %v4258_v2 }
 0x3dd   :  { %v8585_v21 = vadd.f32 1.0, %v6208_v25  ;;  %v2403_v52 = vsel %vm164_vm0, %v2097_v39, 0.0  ;;  %v6210_v23 = vpop.eup %6209 }
 0x3de   :  { %v1762_v43 = vpop.f32.mrf.mxu2  ;;  %2404 = vadd.xlane.f32.xlu2 %v2403_v52  ;;  %v4248_v27 = vmul.f32 %v6210_v23, %v8565_v6  ;;  %v4236_v28 = vadd.f32 %v6206_v15, %v4235_v29  ;;  %vm4253_vm13 = vweird.f32 %v6210_v23  ;;  %5642 = vmatmul.msk.f32.gmra.mxu3 %vm164_vm0, %v159_v46 }
 0x3df   :  { %6211 = vrcp.f32 %v8585_v21  ;;  %v1763_v62 = vadd.f32 %v8498_v61, %v1762_v43  ;;  %vm4254_vm3 = vmor %vm4252_vm2, %vm4253_vm13 }
 0x3e0   :  { %6213 = vpow2.f32 %v5845_v37  ;;  %v4249_v51 = vsub.f32 1.0, %v4248_v27  ;;  %v4240_v55 = vsel %vm4239_vm6, %v6206_v15, %v4236_v28  ;;  %v4273_v37 = vand.u32 2147483648, %v8585_v21 }
 0x3e1   :  { %v2363_v26 = vpop.xlane.xlu0 %2362  ;;  %v4245_v22 = vsel %vm4242_vm8, %v4244_v12, %v4240_v55  ;;  %v1966_v49 = vmax.f32 %v1763_v62, 0.0  ;;  %v894_v28 = vadd.f32 %v8383_v53, %v8570_v20  ;;  %vm4267_vm8 = vweird.f32 %v8585_v21 }
 0x3e2   :  { %v4250_v42 = vmul.f32 %v6210_v23, %v4249_v51  ;;  %v2602_v3 = vadd.f32 %v6836_v45, %v2363_v26  ;;  %v5384_v41 = vperm.slane %v4245_v22, %v7060_v63  ;;  %v8615_v48 = vpop.f32.mrf.mxu3  ;;  %v4274_v62 = vor.u32 1.1754944e-38, %v4273_v37 }
 0x3e3   :  { %5750 = vmatmul.msk.f32.gmra.mxu2 %vm1090_vm1, %v1057_v10  ;;  %v2098_v16 = vmul.f32 %v8484_v56, %v1966_v49  ;;  %v1059_v20 = vmax.f32 %v894_v28, 0.0 }
 0x3e4   :  { %v4251_v54 = vadd.f32 %v6210_v23, %v4250_v42  ;;  %v5846_v15 = vmul.f32 -1.442695, %v2602_v3  ;;  %v5385_v18 = vsel %vm5244_vm5, %v5384_v41, %v5383_v17 }
 0x3e5   :  { %v6212_v47 = vpop.eup %6211  ;;  %v2406_v40 = vsel %vm164_vm0, %v2098_v16, 0.0  ;;  %v897_v16 = vadd.f32 %v8383_v53, %v8594_v44 }
 0x3e6   :  { %v6214_v7 = vpop.eup %6213  ;;  %v4263_v0 = vmul.f32 %v6212_v47, %v8585_v21  ;;  %v1765_v14 = vpop.f32.mrf.mxu2  ;;  %v4255_v39 = vsel %vm4254_vm3, %v6210_v23, %v4251_v54  ;;  %6215 = vpow2.f32 %v5846_v15  ;;  %2407 = vadd.xlane.f32.xlu0 %v2406_v40  ;;  %vm4268_vm6 = vweird.f32 %v6212_v47 }
 0x3e7   :  { %v8611_v25 = vadd.f32 1.0, %v6214_v7  ;;  %v1766_v6 = vadd.f32 %v8498_v61, %v1765_v14  ;;  %v4260_v13 = vsel %vm4257_vm7, %v4259_v35, %v4255_v39  ;;  %v4271_v23 = vand.u32 2147483647, %v8585_v21  ;;  %vm4269_vm13 = vmor %vm4267_vm8, %vm4268_vm6 }
 0x3e8   :  { %v4264_v34 = vsub.f32 1.0, %v4263_v0  ;;  %v5386_v17 = vperm.slane %v4260_v13, %v7092_v31 }
 0x3e9   :  { %6217 = vrcp.f32 %v8611_v25  ;;  %v1967_v29 = vmax.f32 %v1766_v6, 0.0  ;;  %v2366_v43 = vpop.xlane.xlu1 %2365  ;;  %vm4272_vm2 = vcmp.eq.f32.partialorder %v4271_v23, 8.507059e+37  ;;  %v4288_v7 = vand.u32 2147483648, %v8611_v25 }
 0x3ea   :  { %v4265_v52 = vmul.f32 %v6212_v47, %v4264_v34  ;;  %v5387_v27 = vsel %vm9750_vm14, %v5386_v17, %v5385_v18  ;;  %v2603_v10 = vadd.f32 %v6836_v45, %v2366_v43  ;;  %v4286_v14 = vand.u32 2147483647, %v8611_v25 }
 0x3eb   :  { %5751 = vmatmul.msk.f32.gmra.mxu2 %vm1090_vm1, %v1058_v8  ;;  %v2099_v12 = vmul.f32 %v8484_v56, %v1967_v29  ;;  %v8635_v8 = vpop.f32.mrf.mxu3  ;;  %vm4282_vm7 = vweird.f32 %v8611_v25  ;;  %v1060_v17 = vmax.f32 %v897_v16, 0.0 }
 0x3ec   :  { %v4266_v11 = vadd.f32 %v6212_v47, %v4265_v52  ;;  %v6216_v51 = vpop.eup %6215  ;;  %v5847_v55 = vmul.f32 -1.442695, %v2603_v10  ;;  %v4289_v52 = vor.u32 1.1754944e-38, %v4288_v7  ;;  %vm4287_vm8 = vcmp.eq.f32.partialorder %v4286_v14, 8.507059e+37 }
 0x3ed   :  { %v8628_v2 = vadd.f32 1.0, %v6216_v51  ;;  %v2409_v22 = vsel %vm164_vm0, %v2099_v12, 0.0  ;;  %v903_v14 = vadd.f32 %v8383_v53, %v8635_v8 }
 0x3ee   :  { %v4270_v58 = vsel %vm4269_vm13, %v6212_v47, %v4266_v11  ;;  %v1768_v26 = vpop.f32.mrf.mxu2  ;;  %6219 = vpow2.f32 %v5847_v55  ;;  %2410 = vadd.xlane.f32.xlu1 %v2409_v22  ;;  %v900_v55 = vadd.f32 %v8383_v53, %v8615_v48 }
 0x3ef   :  { %v6218_v42 = vpop.eup %6217  ;;  %v4275_v49 = vsel %vm4272_vm2, %v4274_v62, %v4270_v58  ;;  %v1769_v3 = vadd.f32 %v8498_v61, %v1768_v26  ;;  %6221 = vrcp.f32 %v8628_v2  ;;  %v4301_v12 = vand.u32 2147483647, %v8628_v2 }
 0x3f0   :  { %v5388_v21 = vperm.slane %v4275_v49, %v7114_v33  ;;  %v4278_v41 = vmul.f32 %v6218_v42, %v8611_v25  ;;  %vm4283_vm3 = vweird.f32 %v6218_v42  ;;  %v4303_v51 = vand.u32 2147483648, %v8628_v2 }
 0x3f1   :  { %v1968_v46 = vmax.f32 %v1769_v3, 0.0  ;;  %v2369_v15 = vpop.xlane.xlu2 %2368  ;;  %vm4284_vm6 = vmor %vm4282_vm7, %vm4283_vm3  ;;  %vm9780_vm2 = vcmask 720512   ;;  %vm4297_vm3 = vweird.f32 %v8628_v2 }
 0x3f2   :  { %v5389_v47 = vsel %vm9749_vm9, %v5388_v21, %v5387_v27  ;;  %v4279_v54 = vsub.f32 1.0, %v4278_v41  ;;  %v2604_v18 = vadd.f32 %v6836_v45, %v2369_v15  ;;  %v4304_v48 = vor.u32 1.1754944e-38, %v4303_v51 }
 0x3f3   :  { %5752 = vmatmul.msk.f32.gmra.mxu2 %vm1090_vm1, %v1059_v20  ;;  %v2100_v35 = vmul.f32 %v8484_v56, %v1968_v46  ;;  %v8652_v27 = vpop.f32.mrf.mxu3 }
 0x3f4   :  { %v4280_v0 = vmul.f32 %v6218_v42, %v4279_v54  ;;  %v6220_v39 = vpop.eup %6219  ;;  %v5848_v6 = vmul.f32 -1.442695, %v2604_v18  ;;  %v1061_v54 = vmax.f32 %v900_v55, 0.0 }
 0x3f5   :  { %v2412_v13 = vsel %vm164_vm0, %v2100_v35, 0.0  ;;  %v6222_v34 = vpop.eup %6221  ;;  %v8647_v44 = vadd.f32 1.0, %v6220_v39 }
 0x3f6   :  { %v4281_v40 = vadd.f32 %v6218_v42, %v4280_v0  ;;  %v1771_v37 = vpop.f32.mrf.mxu2  ;;  %2413 = vadd.xlane.f32.xlu2 %v2412_v13  ;;  %v4293_v23 = vmul.f32 %v6222_v34, %v8628_v2  ;;  %6223 = vpow2.f32 %v5848_v6  ;;  %vm4298_vm13 = vweird.f32 %v6222_v34 }
 0x3f7   :  { %v1772_v29 = vadd.f32 %v8498_v61, %v1771_v37  ;;  %6225 = vrcp.f32 %v8647_v44  ;;  %vm4299_vm7 = vmor %vm4297_vm3, %vm4298_vm13  ;;  %v4316_v39 = vand.u32 2147483647, %v8647_v44  ;;  %v4318_v6 = vand.u32 2147483648, %v8647_v44 }
 0x3f8   :  { %v4285_v43 = vsel %vm4284_vm6, %v6218_v42, %v4281_v40  ;;  %v4294_v25 = vsub.f32 1.0, %v4293_v23  ;;  %vm4302_vm6 = vcmp.eq.f32.partialorder %v4301_v12, 8.507059e+37 }
 0x3f9   :  { %v4290_v10 = vsel %vm4287_vm8, %v4289_v52, %v4285_v43  ;;  %v1969_v28 = vmax.f32 %v1772_v29, 0.0  ;;  %v2372_v62 = vpop.xlane.xlu0 %2371  ;;  %vm9781_vm8 = vcmask 786112   ;;  %v1062_v29 = vmax.f32 %v903_v14, 0.0 }
 0x3fa   :  { %v5390_v11 = vperm.slane %v4290_v10, %v7136_v36  ;;  %v4295_v58 = vmul.f32 %v6222_v34, %v4294_v25  ;;  %v2605_v26 = vadd.f32 %v6836_v45, %v2372_v62  ;;  %v4319_v43 = vor.u32 1.1754944e-38, %v4318_v6 }
 0x3fb   :  { %5753 = vmatmul.msk.f32.gmra.mxu2 %vm1090_vm1, %v1060_v17  ;;  %v2101_v22 = vmul.f32 %v8484_v56, %v1969_v28  ;;  %v8669_v2 = vpop.f32.mrf.mxu3 }
 0x3fc   :  { %v5391_v42 = vsel %vm9780_vm2, %v5390_v11, %v5389_v47  ;;  %v6224_v49 = vpop.eup %6223  ;;  %v4296_v20 = vadd.f32 %v6222_v34, %v4295_v58  ;;  %v5849_v3 = vmul.f32 -1.442695, %v2605_v26  ;;  %vm4312_vm2 = vweird.f32 %v8647_v44 }
 0x3fd   :  { %v2415_v21 = vsel %vm164_vm0, %v2101_v22, 0.0  ;;  %v6226_v41 = vpop.eup %6225  ;;  %v8665_v46 = vadd.f32 1.0, %v6224_v49 }
 0x3fe   :  { %v1774_v15 = vpop.f32.mrf.mxu2  ;;  %2416 = vadd.xlane.f32.xlu0 %v2415_v21  ;;  %v4300_v16 = vsel %vm4299_vm7, %v6222_v34, %v4296_v20  ;;  %v4308_v7 = vmul.f32 %v6226_v41, %v8647_v44  ;;  %6227 = vpow2.f32 %v5849_v3  ;;  %vm4313_vm13 = vweird.f32 %v6226_v41 }
 0x3ff   :  { %v4305_v47 = vsel %vm4302_vm6, %v4304_v48, %v4300_v16  ;;  %6229 = vrcp.f32 %v8665_v46  ;;  %v1775_v0 = vadd.f32 %v8498_v61, %v1774_v15  ;;  %vm4314_vm3 = vmor %vm4312_vm2, %vm4313_vm13  ;;  %vm4317_vm7 = vcmp.eq.f32.partialorder %v4316_v39, 8.507059e+37 }
 0x400   :  { %v5392_v18 = vperm.slane %v4305_v47, %v7162_v9  ;;  %v4309_v35 = vsub.f32 1.0, %v4308_v7  ;;  %v4333_v49 = vand.u32 2147483648, %v8665_v46  ;;  %vm9782_vm6 = vcmask 851712  }
 0x401   :  { %v2375_v13 = vpop.xlane.xlu1 %2374  ;;  %v1970_v17 = vmax.f32 %v1775_v0, 0.0  ;;  %vm4327_vm13 = vweird.f32 %v8665_v46 }
 0x402   :  { %v5393_v34 = vsel %vm9781_vm8, %v5392_v18, %v5391_v42  ;;  %v4310_v40 = vmul.f32 %v6226_v41, %v4309_v35  ;;  %v2606_v37 = vadd.f32 %v6836_v45, %v2375_v13  ;;  %v906_v42 = vadd.f32 %v8383_v53, %v8652_v27 }
 0x403   :  { %5754 = vmatmul.msk.f32.gmra.mxu2 %vm1090_vm1, %v1061_v54  ;;  %v2102_v11 = vmul.f32 %v8484_v56, %v1970_v17  ;;  %v8687_v44 = vpop.f32.mrf.mxu3  ;;  %v4331_v54 = vand.u32 2147483647, %v8665_v46  ;;  %v4334_v47 = vor.u32 1.1754944e-38, %v4333_v49 }
 0x404   :  { %v6228_v52 = vpop.eup %6227  ;;  %v4311_v23 = vadd.f32 %v6226_v41, %v4310_v40  ;;  %v5850_v25 = vmul.f32 -1.442695, %v2606_v37  ;;  %v1063_v18 = vmax.f32 %v906_v42, 0.0 }
 0x405   :  { %v6230_v8 = vpop.eup %6229  ;;  %v8681_v10 = vadd.f32 1.0, %v6228_v52  ;;  %v2418_v3 = vsel %vm164_vm0, %v2102_v11, 0.0 }
 0x406   :  { %v1777_v28 = vpop.f32.mrf.mxu2  ;;  %v4315_v12 = vsel %vm4314_vm3, %v6226_v41, %v4311_v23  ;;  %v4323_v51 = vmul.f32 %v6230_v8, %v8665_v46  ;;  %vm4328_vm8 = vweird.f32 %v6230_v8  ;;  %2419 = vadd.xlane.f32.xlu1 %v2418_v3  ;;  %vm4332_vm3 = vcmp.eq.f32.partialorder %v4331_v54, 8.507059e+37  ;;  %v8731_v54 = vld [vmem:[%s9736_s2] ss:$0 sm:$0xff] }
 0x407   :  { %v1778_v62 = vadd.f32 %v8498_v61, %v1777_v28  ;;  %v4320_v55 = vsel %vm4317_vm7, %v4319_v43, %v4315_v12  ;;  %6231 = vrcp.f32 %v8681_v10  ;;  %vm4329_vm2 = vmor %vm4327_vm13, %vm4328_vm8  ;;  %v909_v23 = vadd.f32 %v8383_v53, %v8669_v2 }
 0x408   :  { %v5394_v58 = vperm.slane %v4320_v55, %v7188_v50  ;;  %v4324_v26 = vsub.f32 1.0, %v4323_v51  ;;  %6233 = vpow2.f32 %v5850_v25  ;;  %vm4342_vm8 = vweird.f32 %v8681_v10 }
 0x409   :  { %v2378_v22 = vpop.xlane.xlu2 %2377  ;;  %v1971_v20 = vmax.f32 %v1778_v62, 0.0  ;;  %v1064_v42 = vmax.f32 %v909_v23, 0.0 }
 0x40a   :  { %v2607_v21 = vadd.f32 %v6836_v45, %v2378_v22  ;;  %v5395_v41 = vsel %vm9782_vm6, %v5394_v58, %v5393_v34  ;;  %v4325_v48 = vmul.f32 %v6230_v8, %v4324_v26  ;;  %vm9783_vm6 = vcmask 917312  }
 0x40b   :  { %5755 = vmatmul.msk.f32.gmra.mxu2 %vm1090_vm1, %v1062_v29  ;;  %v2103_v16 = vmul.f32 %v8484_v56, %v1971_v20  ;;  %v8705_v46 = vpop.f32.mrf.mxu3  ;;  %v4346_v29 = vand.u32 2147483647, %v8681_v10 }
 0x40c   :  { %v5851_v15 = vmul.f32 -1.442695, %v2607_v21  ;;  %v4326_v27 = vadd.f32 %v6230_v8, %v4325_v48 }
 0x40d   :  { %v6232_v7 = vpop.eup %6231  ;;  %v2421_v0 = vsel %vm164_vm0, %v2103_v16, 0.0 }
 0x40e   :  { %6235 = vpow2.f32 %v5851_v15  ;;  %v1780_v35 = vpop.f32.mrf.mxu2  ;;  %v6234_v14 = vpop.eup %6233  ;;  %v4330_v39 = vsel %vm4329_vm2, %v6230_v8, %v4326_v27  ;;  %v4338_v6 = vmul.f32 %v6232_v7, %v8681_v10  ;;  %2422 = vadd.xlane.f32.xlu2 %v2421_v0  ;;  %vm4343_vm7 = vweird.f32 %v6232_v7 }
 0x40f   :  { %v1781_v13 = vadd.f32 %v8498_v61, %v1780_v35  ;;  %v4335_v34 = vsel %vm4332_vm3, %v4334_v47, %v4330_v39  ;;  %v8703_v40 = vadd.f32 1.0, %v6234_v14  ;;  %v4348_v8 = vand.u32 2147483648, %v8681_v10  ;;  %vm4344_vm13 = vmor %vm4342_vm8, %vm4343_vm7 }
 0x410   :  { %v5396_v17 = vperm.slane %v4335_v34, %v7214_v19  ;;  %v4339_v37 = vsub.f32 1.0, %v4338_v6  ;;  %vm4347_vm2 = vcmp.eq.f32.partialorder %v4346_v29, 8.507059e+37  ;;  %v912_v15 = vadd.f32 %v8731_v54, %v8687_v44 }
 0x411   :  { %v1972_v52 = vmax.f32 %v1781_v13, 0.0  ;;  %6237 = vrcp.f32 %v8703_v40  ;;  %v2381_v43 = vpop.xlane.xlu0 %2380  ;;  %v4349_v58 = vor.u32 1.1754944e-38, %v4348_v8  ;;  %vm9784_vm3 = vcmask 982912  }
 0x412   :  { %v5397_v25 = vsel %vm9783_vm6, %v5396_v17, %v5395_v41  ;;  %v4340_v28 = vmul.f32 %v6232_v7, %v4339_v37  ;;  %v2608_v11 = vadd.f32 %v6836_v45, %v2381_v43  ;;  %v4361_v0 = vand.u32 2147483647, %v8703_v40 }
 0x413   :  { %5756 = vmatmul.msk.f32.gmra.mxu2 %vm1090_vm1, %v1063_v18  ;;  %v2104_v12 = vmul.f32 %v8484_v56, %v1972_v52  ;;  %v8724_v3 = vpop.f32.mrf.mxu3  ;;  %v1065_v44 = vmax.f32 %v912_v15, 0.0  ;;  %vm4357_vm6 = vweird.f32 %v8703_v40 }
 0x414   :  { %v6236_v51 = vpop.eup %6235  ;;  %v4341_v53 = vadd.f32 %v6232_v7, %v4340_v28  ;;  %v5852_v62 = vmul.f32 -1.442695, %v2608_v11 }
 0x415   :  { %v8718_v2 = vadd.f32 1.0, %v6236_v51  ;;  %v2424_v55 = vsel %vm164_vm0, %v2104_v12, 0.0 }
 0x416   :  { %v1783_v26 = vpop.f32.mrf.mxu2  ;;  %2425 = vadd.xlane.f32.xlu0 %v2424_v55  ;;  %v4345_v22 = vsel %vm4344_vm13, %v6232_v7, %v4341_v53  ;;  %v4363_v7 = vand.u32 2147483648, %v8703_v40  ;;  %vm4362_vm13 = vcmp.eq.f32.partialorder %v4361_v0, 8.507059e+37  ;;  %v915_v53 = vadd.f32 %v8731_v54, %v8705_v46 }
 0x417   :  { %6239 = vrcp.f32 %v8718_v2  ;;  %v6238_v49 = vpop.eup %6237  ;;  %v4350_v20 = vsel %vm4347_vm2, %v4349_v58, %v4345_v22  ;;  %v1784_v10 = vadd.f32 %v8498_v61, %v1783_v26  ;;  %vm5501_vm2 = vcmask 1044484  }
 0x418   :  { %6241 = vpow2.f32 %v5852_v62  ;;  %v5398_v21 = vperm.slane %v4350_v20, %v7240_v57  ;;  %v4353_v41 = vmul.f32 %v6238_v49, %v8703_v40  ;;  %vm4358_vm7 = vweird.f32 %v6238_v49 }
 0x419   :  { %v1973_v48 = vmax.f32 %v1784_v10, 0.0  ;;  %v2384_v14 = vpop.xlane.xlu1 %2383  ;;  %vm4359_vm8 = vmor %vm4357_vm6, %vm4358_vm7  ;;  %v4364_v23 = vor.u32 1.1754944e-38, %v4363_v7  ;;  %v1066_v20 = vmax.f32 %v915_v53, 0.0  ;;  %vm4372_vm6 = vweird.f32 %v8718_v2 }
 0x41a   :  { %v5399_v16 = vsel %vm9784_vm3, %v5398_v21, %v5397_v25  ;;  %v4354_v27 = vsub.f32 1.0, %v4353_v41  ;;  %v2609_v6 = vadd.f32 %v6836_v45, %v2384_v14  ;;  %vm9785_vm3 = vcmask 1048512  }
 0x41b   :  { %5757 = vmatmul.msk.f32.gmra.mxu2 %vm1090_vm1, %v1064_v42  ;;  %v2105_v47 = vmul.f32 %v8484_v56, %v1973_v48  ;;  %v8750_v43 = vpop.f32.mrf.mxu3 }
 0x41c   :  { %v4355_v35 = vmul.f32 %v6238_v49, %v4354_v27  ;;  %v5853_v8 = vmul.f32 -1.442695, %v2609_v6  ;;  %v4378_v27 = vand.u32 2147483648, %v8718_v2 }
 0x41d   :  { %v8739_v18 = vpop.eup %6239  ;;  %v2427_v34 = vsel %vm164_vm0, %v2105_v47, 0.0 }
 0x41e   :  { %v6242_v39 = vpop.eup %6241  ;;  %v1786_v13 = vpop.f32.mrf.mxu2  ;;  %v4356_v17 = vadd.f32 %v6238_v49, %v4355_v35  ;;  %2428 = vadd.xlane.f32.xlu1 %v2427_v34  ;;  %v4368_v29 = vmul.f32 %v8739_v18, %v8718_v2  ;;  %vm4373_vm7 = vweird.f32 %v8739_v18  ;;  %v918_v35 = vadd.f32 %v8731_v54, %v8724_v3 }
 0x41f   :  { %v8745_v37 = vadd.f32 1.0, %v6242_v39  ;;  %v1787_v52 = vadd.f32 %v8498_v61, %v1786_v13  ;;  %v4376_v13 = vand.u32 2147483647, %v8718_v2  ;;  %v4379_v34 = vor.u32 1.1754944e-38, %v4378_v27 }
 0x420   :  { %v4360_v25 = vsel %vm4359_vm8, %v6238_v49, %v4356_v17  ;;  %v4369_v62 = vsub.f32 1.0, %v4368_v29  ;;  %vm8791_vm8 = vmor %vm4372_vm6, %vm4373_vm7 }
 0x421   :  { %6243 = vrcp.f32 %v8745_v37  ;;  %v4365_v28 = vsel %vm4362_vm13, %v4364_v23, %v4360_v25  ;;  %v2387_v40 = vpop.xlane.xlu2 %2386  ;;  %v1974_v12 = vmax.f32 %v1787_v52, 0.0  ;;  %v1067_v25 = vmax.f32 %v918_v35, 0.0 }
 0x422   :  { %6245 = vpow2.f32 %v5853_v8  ;;  %v5400_v11 = vperm.slane %v4365_v28, %v7261_v24  ;;  %v2610_v51 = vadd.f32 %v6836_v45, %v2387_v40  ;;  %v4370_v46 = vmul.f32 %v8739_v18, %v4369_v62 }
 0x423   :  { %5758 = vmatmul.msk.f32.gmra.mxu2 %vm1090_vm1, %v1065_v44  ;;  %v2106_v26 = vmul.f32 %v8484_v56, %v1974_v12  ;;  %v8770_v15 = vpop.f32.mrf.mxu3  ;;  %v4391_v40 = vand.u32 2147483647, %v8745_v37 }
 0x424   :  { %v5401_v55 = vsel %vm9785_vm3, %v5400_v11, %v5399_v16  ;;  %v5854_v58 = vmul.f32 -1.442695, %v2610_v51  ;;  %v4371_v0 = vadd.f32 %v8739_v18, %v4370_v46  ;;  %v4393_v11 = vand.u32 2147483648, %v8745_v37 }
 0x425   :  { %v8761_v22 = vsel %vm5501_vm2, %v5401_v55, %v8399_v60  ;;  %v2430_v21 = vsel %vm164_vm0, %v2106_v26, 0.0  ;;  %vm4387_vm2 = vweird.f32 %v8745_v37  ;;  %v921_v55 = vadd.f32 %v8731_v54, %v8750_v43 }
 0x426   :  { %v1789_v42 = vpop.f32.mrf.mxu2  ;;  %6247 = vpow2.f32 %v5854_v58  ;;  %2431 = vadd.xlane.f32.xlu2 %v2430_v21  ;;  %v4375_v28 = vsel %vm8791_vm8, %v8739_v18, %v4371_v0  ;;  %vm4377_vm3 = vcmp.eq.f32.partialorder %v4376_v13, 8.507059e+37  ;;  %vm4392_vm6 = vcmp.eq.f32.partialorder %v4391_v40, 8.507059e+37 }
 0x427   :  { %v8763_v49 = vpop.eup %6243  ;;  %v1790_v10 = vadd.f32 %v8498_v61, %v1789_v42  ;;  %v4380_v26 = vsel %vm4377_vm3, %v4379_v34, %v4375_v28 }
 0x428   :  { %v6246_v41 = vpop.eup %6245  ;;  %v4383_v48 = vmul.f32 %v8763_v49, %v8745_v37  ;;  %vm4388_vm13 = vweird.f32 %v8763_v49 }
 0x429   :  { %v8772_v60 = vadd.f32 1.0, %v6246_v41  ;;  %v1975_v16 = vmax.f32 %v1790_v10, 0.0  ;;  %v2390_v47 = vpop.xlane.xlu0 %2389  ;;  %vm8811_vm7 = vmor %vm4387_vm2, %vm4388_vm13 }
 0x42a   :  { %v4384_v7 = vsub.f32 1.0, %v4383_v48  ;;  %v2611_v39 = vadd.f32 %v6836_v45, %v2390_v47  ;;  %v1068_v48 = vmax.f32 %v921_v55, 0.0 }
 0x42b   :  { %6249 = vrcp.f32 %v8772_v60  ;;  %5759 = vmatmul.msk.f32.gmra.mxu2 %vm1090_vm1, %v1066_v20  ;;  %v2107_v6 = vmul.f32 %v8484_v56, %v1975_v16  ;;  %v8804_v12 = vpop.f32.mrf.mxu3  ;;  %v4394_v20 = vor.u32 1.1754944e-38, %v4393_v11  ;;  %v4406_v21 = vand.u32 2147483647, %v8772_v60  ;;  %v8843_v11 = vld [vmem:[%s9739_s5] ss:$0 sm:$0xff] }
 0x42c   :  { %v4385_v14 = vmul.f32 %v8763_v49, %v4384_v7  ;;  %v6248_v44 = vpop.eup %6247  ;;  %v5855_v52 = vmul.f32 -1.442695, %v2611_v39  ;;  %v4408_v41 = vand.u32 2147483648, %v8772_v60  ;;  %v924_v39 = vadd.f32 %v8731_v54, %v8770_v15 }
 0x42d   :  { %v8786_v17 = vadd.f32 1.0, %v6248_v44  ;;  %v2433_v3 = vsel %vm164_vm0, %v2107_v6, 0.0  ;;  %vm4402_vm13 = vweird.f32 %v8772_v60  ;;  %vm4407_vm2 = vcmp.eq.f32.partialorder %v4406_v21, 8.507059e+37 }
 0x42e   :  { %v1792_v23 = vpop.f32.mrf.mxu2  ;;  %v4386_v8 = vadd.f32 %v8763_v49, %v4385_v14  ;;  %2434 = vadd.xlane.f32.xlu0 %v2433_v3  ;;  %v4409_v34 = vor.u32 1.1754944e-38, %v4408_v41  ;;  %v1069_v40 = vmax.f32 %v924_v39, 0.0 }
 0x42f   :  { %v1793_v2 = vadd.f32 %v8498_v61, %v1792_v23  ;;  %6251 = vrcp.f32 %v8786_v17 }
 0x430   :  { %6253 = vpow2.f32 %v5855_v52  ;;  %v4390_v37 = vsel %vm8811_vm7, %v8763_v49, %v4386_v8  ;;  %v5402_v49 = vperm.slane %v4380_v26, %v6906_v59  ;;  %v4421_v8 = vand.u32 2147483647, %v8786_v17 }
 0x431   :  { %v6250_v51 = vpop.eup %6249  ;;  %v1976_v53 = vmax.f32 %v1793_v2, 0.0  ;;  %v2393_v62 = vpop.xlane.xlu1 %2392  ;;  %v4395_v7 = vsel %vm4392_vm6, %v4394_v20, %v4390_v37  ;;  %vm4417_vm6 = vweird.f32 %v8786_v17 }
 0x432   :  { %v4398_v58 = vmul.f32 %v6250_v51, %v8772_v60  ;;  %v2612_v42 = vadd.f32 %v6836_v45, %v2393_v62  ;;  %vm4403_vm8 = vweird.f32 %v6250_v51  ;;  %v5403_v13 = vperm.slane %v4395_v7, %v6921_v5 }
 0x433   :  { %5760 = vmatmul.msk.f32.gmra.mxu2 %vm1090_vm1, %v1067_v25  ;;  %v2108_v43 = vmul.f32 %v8484_v56, %v1976_v53  ;;  %vm4404_vm3 = vmor %vm4402_vm13, %vm4403_vm8  ;;  %v929_v15 = vpop.f32.mrf.mxu3  ;;  %vm4422_vm13 = vcmp.eq.f32.partialorder %v4421_v8, 8.507059e+37 }
 0x434   :  { %v4399_v10 = vsub.f32 1.0, %v4398_v58  ;;  %v5856_v46 = vmul.f32 -1.442695, %v2612_v42  ;;  %v5404_v62 = vsel %vm5220_vm10, %v5403_v13, %v5402_v49  ;;  %v927_v49 = vadd.f32 %v8731_v54, %v8804_v12 }
 0x435   :  { %v2436_v16 = vsel %vm164_vm0, %v2108_v43, 0.0  ;;  %v6252_v27 = vpop.eup %6251 }
 0x436   :  { %v4400_v47 = vmul.f32 %v6250_v51, %v4399_v10  ;;  %v1795_v35 = vpop.f32.mrf.mxu2  ;;  %2437 = vadd.xlane.f32.xlu1 %v2436_v16  ;;  %v6254_v56 = vpop.eup %6253  ;;  %v4413_v0 = vmul.f32 %v6252_v27, %v8786_v17  ;;  %6255 = vpow2.f32 %v5856_v46  ;;  %vm4418_vm7 = vweird.f32 %v6252_v27  ;;  %v8855_v10 = vld [vmem:[%s9738_s4] ss:$0 sm:$0xff] }
 0x437   :  { %v1796_v14 = vadd.f32 %v8498_v61, %v1795_v35  ;;  %v8831_v44 = vadd.f32 1.0, %v6254_v56  ;;  %v4423_v61 = vand.u32 2147483648, %v8786_v17  ;;  %vm4419_vm8 = vmor %vm4417_vm6, %vm4418_vm7 }
 0x438   :  { %v4401_v6 = vadd.f32 %v6250_v51, %v4400_v47  ;;  %v4414_v52 = vsub.f32 1.0, %v4413_v0 }
 0x439   :  { %v1977_v23 = vmax.f32 %v1796_v14, 0.0  ;;  %v2396_v3 = vpop.xlane.xlu2 %2395  ;;  %6257 = vrcp.f32 %v8831_v44  ;;  %v4424_v26 = vor.u32 1.1754944e-38, %v4423_v61  ;;  %v4438_v56 = vand.u32 2147483648, %v8831_v44 }
 0x43a   :  { %v4405_v29 = vsel %vm4404_vm3, %v6250_v51, %v4401_v6  ;;  %v4415_v60 = vmul.f32 %v6252_v27, %v4414_v52  ;;  %v2613_v2 = vadd.f32 %v6836_v45, %v2396_v3  ;;  %v4436_v12 = vand.u32 2147483647, %v8831_v44 }
 0x43b   :  { %v4410_v25 = vsel %vm4407_vm2, %v4409_v34, %v4405_v29  ;;  %5761 = vmatmul.msk.f32.gmra.mxu2 %vm1090_vm1, %v1068_v48  ;;  %v2109_v51 = vmul.f32 %v8843_v11, %v1977_v23  ;;  %vm9790_vm2 = vcmask 261312   ;;  %v932_v14 = vpop.f32.mrf.mxu3  ;;  %v1070_v23 = vmax.f32 %v927_v49, 0.0 }
 0x43c   :  { %v5405_v28 = vperm.slane %v4410_v25, %v6945_v38  ;;  %v6256_v53 = vpop.eup %6255  ;;  %v4416_v55 = vadd.f32 %v6252_v27, %v4415_v60  ;;  %v5857_v18 = vmul.f32 -1.442695, %v2613_v2  ;;  %vm4432_vm7 = vweird.f32 %v8831_v44 }
 0x43d   :  { %v8849_v37 = vadd.f32 1.0, %v6256_v53  ;;  %v2439_v43 = vsel %vm164_vm0, %v2109_v51, 0.0  ;;  %v4439_v25 = vor.u32 1.1754944e-38, %v4438_v56  ;;  %v930_v60 = vadd.f32 %v8731_v54, %v929_v15 }
 0x43e   :  { %v5406_v58 = vsel %vm5224_vm15, %v5405_v28, %v5404_v62  ;;  %v1798_v42 = vpop.f32.mrf.mxu2  ;;  %v4420_v20 = vsel %vm4419_vm8, %v6252_v27, %v4416_v55  ;;  %6259 = vpow2.f32 %v5857_v18  ;;  %2440 = vadd.xlane.f32.xlu2 %v2439_v43  ;;  %vm4437_vm8 = vcmp.eq.f32.partialorder %v4436_v12, 8.507059e+37 }
 0x43f   :  { %v1799_v17 = vadd.f32 %v8855_v10, %v1798_v42  ;;  %v6258_v21 = vpop.eup %6257  ;;  %v4425_v41 = vsel %vm4422_vm13, %v4424_v26, %v4420_v20  ;;  %6261 = vrcp.f32 %v8849_v37  ;;  %v4451_v53 = vand.u32 2147483647, %v8849_v37 }
 0x440   :  { %v5407_v46 = vperm.slane %v4425_v41, %v6967_v4  ;;  %v4428_v48 = vmul.f32 %v6258_v21, %v8831_v44  ;;  %vm4433_vm3 = vweird.f32 %v6258_v21  ;;  %v1071_v43 = vmax.f32 %v930_v60, 0.0 }
 0x441   :  { %v1978_v16 = vmax.f32 %v1799_v17, 0.0  ;;  %v2399_v27 = vpop.xlane.xlu0 %2398  ;;  %vm4434_vm6 = vmor %vm4432_vm7, %vm4433_vm3  ;;  %vm4452_vm7 = vcmp.eq.f32.partialorder %v4451_v53, 8.507059e+37 }
 0x442   :  { %v8864_v7 = vsel %vm9790_vm2, %v5407_v46, %v5406_v58  ;;  %v4429_v47 = vsub.f32 1.0, %v4428_v48  ;;  %v2614_v35 = vadd.f32 %v6836_v45, %v2399_v27  ;;  %vm4447_vm2 = vweird.f32 %v8849_v37 }
 0x443   :  { %5762 = vmatmul.msk.f32.gmra.mxu2 %vm1090_vm1, %v1069_v40  ;;  %v2110_v0 = vmul.f32 %v8843_v11, %v1978_v16  ;;  %v4453_v40 = vand.u32 2147483648, %v8849_v37  ;;  %v935_v16 = vpop.f32.mrf.mxu3 }
 0x444   :  { %v6260_v39 = vpop.eup %6259  ;;  %v4430_v6 = vmul.f32 %v6258_v21, %v4429_v47  ;;  %v5858_v13 = vmul.f32 -1.442695, %v2614_v35  ;;  %v933_v35 = vadd.f32 %v8731_v54, %v932_v14 }
 0x445   :  { %v6262_v34 = vpop.eup %6261  ;;  %v8871_v52 = vadd.f32 1.0, %v6260_v39  ;;  %v2442_v29 = vsel %vm164_vm0, %v2110_v0, 0.0  ;;  %v4454_v42 = vor.u32 1.1754944e-38, %v4453_v40 }
 0x446   :  { %v1801_v3 = vpop.f32.mrf.mxu2  ;;  %v4431_v8 = vadd.f32 %v6258_v21, %v4430_v6  ;;  %v4443_v61 = vmul.f32 %v6262_v34, %v8849_v37  ;;  %6263 = vpow2.f32 %v5858_v13  ;;  %2443 = vadd.xlane.f32.xlu2 %v2442_v29  ;;  %vm4448_vm13 = vweird.f32 %v6262_v34 }
 0x447   :  { %6265 = vrcp.f32 %v8871_v52  ;;  %v1802_v51 = vadd.f32 %v8855_v10, %v1801_v3  ;;  %vm4449_vm3 = vmor %vm4447_vm2, %vm4448_vm13  ;;  %v4468_v39 = vand.u32 2147483648, %v8871_v52  ;;  %v4466_v14 = vand.u32 2147483647, %v8871_v52 }
 0x448   :  { %v4435_v2 = vsel %vm4434_vm6, %v6258_v21, %v4431_v8  ;;  %v4444_v28 = vsub.f32 1.0, %v4443_v61 }
 0x449   :  { %v4440_v44 = vsel %vm4437_vm8, %v4439_v25, %v4435_v2  ;;  %v1979_v55 = vmax.f32 %v1802_v51, 0.0  ;;  %v2402_v18 = vpop.xlane.xlu1 %2401  ;;  %vm4462_vm8 = vweird.f32 %v8871_v52  ;;  %v4469_v60 = vor.u32 1.1754944e-38, %v4468_v39 }
 0x44a   :  { %v4445_v62 = vmul.f32 %v6262_v34, %v4444_v28  ;;  %v2615_v58 = vadd.f32 %v6836_v45, %v2402_v18  ;;  %v5409_v17 = vperm.slane %v4440_v44, %v6989_v32  ;;  %v1072_v2 = vmax.f32 %v933_v35, 0.0 }
 0x44b   :  { %5763 = vmatmul.msk.f32.gmra.mxu2 %vm1090_vm1, %v1070_v23  ;;  %v2111_v48 = vmul.f32 %v8843_v11, %v1979_v55  ;;  %vm4467_vm2 = vcmp.eq.f32.partialorder %v4466_v14, 8.507059e+37 }
 0x44c   :  { %v6264_v26 = vpop.eup %6263  ;;  %v4446_v15 = vadd.f32 %v6262_v34, %v4445_v62  ;;  %v5859_v41 = vmul.f32 -1.442695, %v2615_v58  ;;  %v5410_v13 = vsel %vm5232_vm12, %v5409_v17, %v8864_v7  ;;  %v938_v58 = vpop.f32.mrf.mxu3 }
 0x44d   :  { %v6266_v20 = vpop.eup %6265  ;;  %v8885_v21 = vadd.f32 1.0, %v6264_v26  ;;  %v2445_v12 = vsel %vm164_vm0, %v2111_v48, 0.0 }
 0x44e   :  { %v1804_v46 = vpop.f32.mrf.mxu2  ;;  %v4450_v27 = vsel %vm4449_vm3, %v6262_v34, %v4446_v15  ;;  %v4458_v49 = vmul.f32 %v6266_v20, %v8871_v52  ;;  %vm4463_vm6 = vweird.f32 %v6266_v20  ;;  %2446 = vadd.xlane.f32.xlu2 %v2445_v12 }
 0x44f   :  { %v1805_v47 = vadd.f32 %v8855_v10, %v1804_v46  ;;  %v4455_v37 = vsel %vm4452_vm7, %v4454_v42, %v4450_v27  ;;  %6267 = vrcp.f32 %v8885_v21  ;;  %vm4464_vm13 = vmor %vm4462_vm8, %vm4463_vm6  ;;  %v936_v42 = vadd.f32 %v8731_v54, %v935_v16 }
 0x450   :  { %v5411_v56 = vperm.slane %v4455_v37, %v7016_v1  ;;  %v4459_v0 = vsub.f32 1.0, %v4458_v49  ;;  %6269 = vpow2.f32 %v5859_v41  ;;  %v4483_v37 = vand.u32 2147483648, %v8885_v21 }
 0x451   :  { %v2405_v6 = vpop.xlane.xlu2 %2404  ;;  %v1980_v34 = vmax.f32 %v1805_v47, 0.0  ;;  %v1073_v35 = vmax.f32 %v936_v42, 0.0  ;;  %vm4477_vm7 = vweird.f32 %v8885_v21 }
 0x452   :  { %v2616_v23 = vadd.f32 %v6836_v45, %v2405_v6  ;;  %v5412_v3 = vsel %vm5236_vm4, %v5411_v56, %v5410_v13  ;;  %v4460_v29 = vmul.f32 %v6266_v20, %v4459_v0  ;;  %v4481_v0 = vand.u32 2147483647, %v8885_v21 }
 0x453   :  { %5764 = vmatmul.msk.f32.gmra.mxu2 %vm1090_vm1, %v1071_v43  ;;  %v2112_v61 = vmul.f32 %v8843_v11, %v1980_v34 }
 0x454   :  { %v5860_v8 = vmul.f32 -1.442695, %v2616_v23  ;;  %v4461_v25 = vadd.f32 %v6266_v20, %v4460_v29  ;;  %v939_v29 = vadd.f32 %v8731_v54, %v938_v58  ;;  %v941_v14 = vpop.f32.mrf.mxu3  ;;  %vm4482_vm8 = vcmp.eq.f32.partialorder %v4481_v0, 8.507059e+37 }
 0x455   :  { %v6268_v7 = vpop.eup %6267  ;;  %v2448_v18 = vsel %vm164_vm0, %v2112_v61, 0.0 }
 0x456   :  { %6271 = vpow2.f32 %v5860_v8  ;;  %v1807_v28 = vpop.f32.mrf.mxu2  ;;  %v6270_v40 = vpop.eup %6269  ;;  %v4465_v51 = vsel %vm4464_vm13, %v6266_v20, %v4461_v25  ;;  %v4473_v53 = vmul.f32 %v6268_v7, %v8885_v21  ;;  %2449 = vadd.xlane.f32.xlu2 %v2448_v18  ;;  %vm4478_vm3 = vweird.f32 %v6268_v7 }
 0x457   :  { %v1808_v44 = vadd.f32 %v8855_v10, %v1807_v28  ;;  %v4470_v62 = vsel %vm4467_vm2, %v4469_v60, %v4465_v51  ;;  %v8905_v55 = vadd.f32 1.0, %v6270_v40  ;;  %vm8925_vm6 = vmor %vm4477_vm7, %vm4478_vm3  ;;  %v4484_v8 = vor.u32 1.1754944e-38, %v4483_v37 }
 0x458   :  { %v5413_v52 = vperm.slane %v4470_v62, %v7038_v30  ;;  %v4474_v26 = vsub.f32 1.0, %v4473_v53 }
 0x459   :  { %v1981_v15 = vmax.f32 %v1808_v44, 0.0  ;;  %6273 = vrcp.f32 %v8905_v55  ;;  %v2408_v46 = vpop.xlane.xlu0 %2407  ;;  %v4496_v61 = vand.u32 2147483647, %v8905_v55  ;;  %v4498_v60 = vand.u32 2147483648, %v8905_v55 }
 0x45a   :  { %v8912_v43 = vsel %vm5240_vm11, %v5413_v52, %v5412_v3  ;;  %v4475_v20 = vmul.f32 %v6268_v7, %v4474_v26  ;;  %v2617_v27 = vadd.f32 %v6836_v45, %v2408_v46  ;;  %vm4492_vm2 = vweird.f32 %v8905_v55 }
 0x45b   :  { %5765 = vmatmul.msk.f32.gmra.mxu2 %vm1090_vm1, %v1072_v2  ;;  %v2113_v17 = vmul.f32 %v8843_v11, %v1981_v15  ;;  %v1074_v44 = vmax.f32 %v939_v29, 0.0  ;;  %vm4497_vm3 = vcmp.eq.f32.partialorder %v4496_v61, 8.507059e+37  ;;  %v4499_v42 = vor.u32 1.1754944e-38, %v4498_v60 }
 0x45c   :  { %v6272_v41 = vpop.eup %6271  ;;  %v4476_v47 = vadd.f32 %v6268_v7, %v4475_v20  ;;  %v5861_v39 = vmul.f32 -1.442695, %v2617_v27 }
 0x45d   :  { %v8916_v48 = vadd.f32 1.0, %v6272_v41  ;;  %v2451_v49 = vsel %vm164_vm0, %v2113_v17, 0.0 }
 0x45e   :  { %v1810_v16 = vpop.f32.mrf.mxu2  ;;  %2452 = vadd.xlane.f32.xlu1 %v2451_v49  ;;  %v4480_v12 = vsel %vm8925_vm6, %v6268_v7, %v4476_v47 }
 0x45f   :  { %6275 = vrcp.f32 %v8916_v48  ;;  %v6274_v56 = vpop.eup %6273  ;;  %v1811_v6 = vadd.f32 %v8855_v10, %v1810_v16  ;;  %v4485_v28 = vsel %vm4482_vm8, %v4484_v8, %v4480_v12  ;;  %v4513_v41 = vand.u32 2147483648, %v8916_v48 }
 0x460   :  { %v4488_v34 = vmul.f32 %v6274_v56, %v8905_v55  ;;  %6277 = vpow2.f32 %v5861_v39  ;;  %vm4493_vm13 = vweird.f32 %v6274_v56  ;;  %v5415_v15 = vperm.slane %v4485_v28, %v7060_v63 }
 0x461   :  { %v1982_v23 = vmax.f32 %v1811_v6, 0.0  ;;  %v2411_v3 = vpop.xlane.xlu1 %2410  ;;  %vm4494_vm7 = vmor %vm4492_vm2, %vm4493_vm13  ;;  %v4511_v55 = vand.u32 2147483647, %v8916_v48  ;;  %vm4507_vm8 = vweird.f32 %v8916_v48 }
 0x462   :  { %v4489_v21 = vsub.f32 1.0, %v4488_v34  ;;  %v2618_v25 = vadd.f32 %v6836_v45, %v2411_v3  ;;  %v5416_v0 = vsel %vm5244_vm5, %v5415_v15, %v8912_v43  ;;  %v944_v34 = vpop.f32.mrf.mxu3  ;;  %v4514_v3 = vor.u32 1.1754944e-38, %v4513_v41 }
 0x463   :  { %5766 = vmatmul.msk.f32.gmra.mxu2 %vm1090_vm1, %v1073_v35  ;;  %v2114_v2 = vmul.f32 %v8843_v11, %v1982_v23  ;;  %vm4512_vm2 = vcmp.eq.f32.partialorder %v4511_v55, 8.507059e+37 }
 0x464   :  { %v4490_v40 = vmul.f32 %v6274_v56, %v4489_v21  ;;  %v5862_v51 = vmul.f32 -1.442695, %v2618_v25 }
 0x465   :  { %v6276_v7 = vpop.eup %6275  ;;  %v2454_v18 = vsel %vm164_vm0, %v2114_v2, 0.0 }
 0x466   :  { %v4503_v53 = vmul.f32 %v6276_v7, %v8916_v48  ;;  %v1813_v62 = vpop.f32.mrf.mxu2  ;;  %v4491_v58 = vadd.f32 %v6274_v56, %v4490_v40  ;;  %6279 = vpow2.f32 %v5862_v51  ;;  %2455 = vadd.xlane.f32.xlu1 %v2454_v18  ;;  %v6278_v26 = vpop.eup %6277  ;;  %vm4508_vm6 = vweird.f32 %v6276_v7 }
 0x467   :  { %v1814_v52 = vadd.f32 %v8855_v10, %v1813_v62  ;;  %v8945_v46 = vadd.f32 1.0, %v6278_v26  ;;  %vm4509_vm13 = vmor %vm4507_vm8, %vm4508_vm6 }
 0x468   :  { %v4504_v20 = vsub.f32 1.0, %v4503_v53  ;;  %v4495_v17 = vsel %vm4494_vm7, %v6274_v56, %v4491_v58  ;;  %v942_v56 = vadd.f32 %v8731_v54, %v941_v14  ;;  %v945_v53 = vadd.f32 %v8731_v54, %v944_v34 }
 0x469   :  { %v1983_v27 = vmax.f32 %v1814_v52, 0.0  ;;  %v2414_v49 = vpop.xlane.xlu2 %2413  ;;  %v4500_v47 = vsel %vm4497_vm3, %v4499_v42, %v4495_v17  ;;  %6281 = vrcp.f32 %v8945_v46  ;;  %v4528_v58 = vand.u32 2147483648, %v8945_v46 }
 0x46a   :  { %v4505_v16 = vmul.f32 %v6276_v7, %v4504_v20  ;;  %v2619_v37 = vadd.f32 %v6836_v45, %v2414_v49  ;;  %v5417_v35 = vperm.slane %v4500_v47, %v7092_v31  ;;  %v1075_v14 = vmax.f32 %v942_v56, 0.0  ;;  %v947_v41 = vpop.f32.mrf.mxu3 }
 0x46b   :  { %5767 = vmatmul.msk.f32.gmra.mxu2 %vm1090_vm1, %v1074_v44  ;;  %v2115_v13 = vmul.f32 %v8843_v11, %v1983_v27  ;;  %v4526_v55 = vand.u32 2147483647, %v8945_v46  ;;  %v1076_v49 = vmax.f32 %v945_v53, 0.0  ;;  %vm4522_vm7 = vweird.f32 %v8945_v46 }
 0x46c   :  { %v4506_v39 = vadd.f32 %v6276_v7, %v4505_v16  ;;  %v5863_v6 = vmul.f32 -1.442695, %v2619_v37  ;;  %v6280_v12 = vpop.eup %6279  ;;  %v5418_v23 = vsel %vm9750_vm14, %v5417_v35, %v5416_v0  ;;  %v4529_v16 = vor.u32 1.1754944e-38, %v4528_v58 }
 0x46d   :  { %v3130_v29 = vadd.f32 1.0, %v6280_v12  ;;  %v2457_v43 = vsel %vm164_vm0, %v2115_v13, 0.0  ;;  %v948_v56 = vadd.f32 %v8731_v54, %v947_v41  ;;  %vm4527_vm8 = vcmp.eq.f32.partialorder %v4526_v55, 8.507059e+37 }
 0x46e   :  { %v4510_v48 = vsel %vm4509_vm13, %v6276_v7, %v4506_v39  ;;  %6283 = vpow2.f32 %v5863_v6  ;;  %v1816_v8 = vpop.f32.mrf.mxu2  ;;  %2458 = vadd.xlane.f32.xlu1 %v2457_v43 }
 0x46f   :  { %v4515_v21 = vsel %vm4512_vm2, %v4514_v3, %v4510_v48  ;;  %v1817_v61 = vadd.f32 %v8855_v10, %v1816_v8  ;;  %6285 = vrcp.f32 %v3130_v29  ;;  %v6282_v60 = vpop.eup %6281  ;;  %v4541_v39 = vand.u32 2147483647, %v3130_v29 }
 0x470   :  { %v5419_v25 = vperm.slane %v4515_v21, %v7114_v33  ;;  %v4518_v7 = vmul.f32 %v6282_v60, %v8945_v46  ;;  %vm4523_vm3 = vweird.f32 %v6282_v60  ;;  %v4543_v6 = vand.u32 2147483648, %v3130_v29 }
 0x471   :  { %v1984_v2 = vmax.f32 %v1817_v61, 0.0  ;;  %v2417_v28 = vpop.xlane.xlu0 %2416  ;;  %vm4524_vm6 = vmor %vm4522_vm7, %vm4523_vm3  ;;  %vm4537_vm2 = vweird.f32 %v3130_v29  ;;  %vm4542_vm7 = vcmp.eq.f32.partialorder %v4541_v39, 8.507059e+37  ;;  %v1077_v61 = vmax.f32 %v948_v56, 0.0 }
 0x472   :  { %v5420_v40 = vsel %vm9749_vm9, %v5419_v25, %v5418_v23  ;;  %v2620_v51 = vadd.f32 %v6836_v45, %v2417_v28  ;;  %v4519_v18 = vsub.f32 1.0, %v4518_v7  ;;  %v4544_v54 = vor.u32 1.1754944e-38, %v4543_v6 }
 0x473   :  { %5768 = vmatmul.msk.f32.gmra.mxu2 %vm1090_vm1, %v1075_v14  ;;  %v2116_v44 = vmul.f32 %v8843_v11, %v1984_v2 }
 0x474   :  { %v6284_v62 = vpop.eup %6283  ;;  %v5864_v26 = vmul.f32 -1.442695, %v2620_v51  ;;  %v4520_v20 = vmul.f32 %v6282_v60, %v4519_v18 }
 0x475   :  { %v8967_v52 = vadd.f32 1.0, %v6284_v62  ;;  %v2460_v15 = vsel %vm164_vm0, %v2116_v44, 0.0  ;;  %v6286_v42 = vpop.eup %6285 }
 0x476   :  { %v1819_v17 = vpop.f32.mrf.mxu2  ;;  %v4533_v27 = vmul.f32 %v6286_v42, %v3130_v29  ;;  %v4521_v47 = vadd.f32 %v6282_v60, %v4520_v20  ;;  %2461 = vadd.xlane.f32.xlu1 %v2460_v15  ;;  %vm4538_vm13 = vweird.f32 %v6286_v42 }
 0x477   :  { %6287 = vrcp.f32 %v8967_v52  ;;  %v1820_v35 = vadd.f32 %v8855_v10, %v1819_v17  ;;  %vm4539_vm3 = vmor %vm4537_vm2, %vm4538_vm13  ;;  %v4556_v51 = vand.u32 2147483647, %v8967_v52  ;;  %v4558_v18 = vand.u32 2147483648, %v8967_v52 }
 0x478   :  { %6289 = vpow2.f32 %v5864_v26  ;;  %v4534_v37 = vsub.f32 1.0, %v4533_v27  ;;  %v4525_v0 = vsel %vm4524_vm6, %v6282_v60, %v4521_v47  ;;  %vm9793_vm6 = vcmask 720512  }
 0x479   :  { %v4530_v13 = vsel %vm4527_vm8, %v4529_v16, %v4525_v0  ;;  %v1985_v12 = vmax.f32 %v1820_v35, 0.0  ;;  %v2420_v14 = vpop.xlane.xlu1 %2419  ;;  %vm9794_vm13 = vcmask 786112   ;;  %vm4552_vm2 = vweird.f32 %v8967_v52 }
 0x47a   :  { %v4535_v34 = vmul.f32 %v6286_v42, %v4534_v37  ;;  %v5421_v23 = vperm.slane %v4530_v13, %v7136_v36  ;;  %v2621_v2 = vadd.f32 %v6836_v45, %v2420_v14  ;;  %v4559_v41 = vor.u32 1.1754944e-38, %v4558_v18 }
 0x47b   :  { %5769 = vmatmul.msk.f32.gmra.mxu2 %vm1090_vm1, %v1076_v49  ;;  %v2117_v48 = vmul.f32 %v8843_v11, %v1985_v12 }
 0x47c   :  { %v4536_v3 = vadd.f32 %v6286_v42, %v4535_v34  ;;  %v5422_v44 = vsel %vm9793_vm6, %v5421_v23, %v5420_v40  ;;  %v5865_v26 = vmul.f32 -1.442695, %v2621_v2 }
 0x47d   :  { %v6288_v46 = vpop.eup %6287  ;;  %v2463_v53 = vsel %vm164_vm0, %v2117_v48, 0.0 }
 0x47e   :  { %v6290_v8 = vpop.eup %6289  ;;  %v4548_v21 = vmul.f32 %v6288_v46, %v8967_v52  ;;  %v1822_v43 = vpop.f32.mrf.mxu2  ;;  %v4540_v25 = vsel %vm4539_vm3, %v6286_v42, %v4536_v3  ;;  %2464 = vadd.xlane.f32.xlu1 %v2463_v53  ;;  %vm4553_vm8 = vweird.f32 %v6288_v46 }
 0x47f   :  { %v8979_v60 = vadd.f32 1.0, %v6290_v8  ;;  %v1823_v28 = vadd.f32 %v8855_v10, %v1822_v43  ;;  %v4545_v7 = vsel %vm4542_vm7, %v4544_v54, %v4540_v25  ;;  %vm4554_vm3 = vmor %vm4552_vm2, %vm4553_vm8  ;;  %vm4557_vm7 = vcmp.eq.f32.partialorder %v4556_v51, 8.507059e+37 }
 0x480   :  { %v4549_v29 = vsub.f32 1.0, %v4548_v21  ;;  %v5423_v62 = vperm.slane %v4545_v7, %v7162_v9 }
 0x481   :  { %6291 = vrcp.f32 %v8979_v60  ;;  %v1986_v15 = vmax.f32 %v1823_v28, 0.0  ;;  %v2423_v42 = vpop.xlane.xlu2 %2422  ;;  %v4573_v14 = vand.u32 2147483648, %v8979_v60  ;;  %vm4567_vm8 = vweird.f32 %v8979_v60 }
 0x482   :  { %v4550_v58 = vmul.f32 %v6288_v46, %v4549_v29  ;;  %v5424_v20 = vsel %vm9794_vm13, %v5423_v62, %v5422_v44  ;;  %v2622_v55 = vadd.f32 %v6836_v45, %v2423_v42  ;;  %6293 = vpow2.f32 %v5865_v26 }
 0x483   :  { %5770 = vmatmul.msk.f32.gmra.mxu2 %vm1090_vm1, %v1077_v61  ;;  %v2118_v40 = vmul.f32 %v8843_v11, %v1986_v15  ;;  %vm9795_vm1 = vcmask 851712   ;;  %v4571_v43 = vand.u32 2147483647, %v8979_v60  ;;  %v4574_v62 = vor.u32 1.1754944e-38, %v4573_v14 }
 0x484   :  { %v4551_v17 = vadd.f32 %v6288_v46, %v4550_v58  ;;  %v5866_v27 = vmul.f32 -1.442695, %v2622_v55 }
 0x485   :  { %v2466_v16 = vsel %vm164_vm0, %v2118_v40, 0.0  ;;  %vm4572_vm2 = vcmp.eq.f32.partialorder %v4571_v43, 8.507059e+37 }
 0x486   :  { %v4555_v49 = vsel %vm4554_vm3, %v6288_v46, %v4551_v17  ;;  %v8994_v47 = vpop.f32.mrf.mxu2  ;;  %6295 = vpow2.f32 %v5866_v27  ;;  %2467 = vadd.xlane.f32.xlu1 %v2466_v16 }
 0x487   :  { %v6292_v37 = vpop.eup %6291  ;;  %v4560_v35 = vsel %vm4557_vm7, %v4559_v41, %v4555_v49 }
 0x488   :  { %v5425_v56 = vperm.slane %v4560_v35, %v7188_v50  ;;  %v4563_v0 = vmul.f32 %v6292_v37, %v8979_v60  ;;  %v6294_v39 = vpop.eup %6293  ;;  %vm4568_vm6 = vweird.f32 %v6292_v37 }
 0x489   :  { %v2426_v52 = vpop.xlane.xlu0 %2425  ;;  %v3133_v12 = vadd.f32 1.0, %v6294_v39  ;;  %vm9007_vm13 = vmor %vm4567_vm8, %vm4568_vm6 }
 0x48a   :  { %v9000_v6 = vsel %vm9795_vm1, %v5425_v56, %v5424_v20  ;;  %v4564_v13 = vsub.f32 1.0, %v4563_v0  ;;  %v2623_v34 = vadd.f32 %v6836_v45, %v2426_v52 }
 0x48b   :  { %6297 = vrcp.f32 %v3133_v12  ;;  %v4588_v55 = vand.u32 2147483648, %v3133_v12  ;;  %v4586_v41 = vand.u32 2147483647, %v3133_v12  ;;  %vm4582_vm7 = vweird.f32 %v3133_v12 }
 0x48c   :  { %v4565_v46 = vmul.f32 %v6292_v37, %v4564_v13  ;;  %v5867_v23 = vmul.f32 -1.442695, %v2623_v34  ;;  %v6296_v3 = vpop.eup %6295 }
 0x48d   :  { %v3134_v48 = vadd.f32 1.0, %v6296_v3  ;;  %v4589_v0 = vor.u32 1.1754944e-38, %v4588_v55  ;;  %vm4587_vm8 = vcmp.eq.f32.partialorder %v4586_v41, 8.507059e+37 }
 0x48e   :  { %6299 = vpow2.f32 %v5867_v23  ;;  %v1828_v8 = vpop.f32.mrf.mxu2  ;;  %v4566_v21 = vadd.f32 %v6292_v37, %v4565_v46 }
 0x48f   :  { %v1829_v54 = vadd.f32 %v8855_v10, %v1828_v8  ;;  %6301 = vrcp.f32 %v3134_v48  ;;  %v4601_v49 = vand.u32 2147483647, %v3134_v48  ;;  %v4603_v56 = vand.u32 2147483648, %v3134_v48 }
 0x490   :  { %v4570_v53 = vsel %vm9007_vm13, %v6292_v37, %v4566_v21  ;;  %vm4597_vm13 = vweird.f32 %v3134_v48 }
 0x491   :  { %v1988_v61 = vmax.f32 %v1829_v54, 0.0  ;;  %v2429_v25 = vpop.xlane.xlu1 %2428  ;;  %v6298_v2 = vpop.eup %6297  ;;  %v4575_v20 = vsel %vm4572_vm2, %v4574_v62, %v4570_v53  ;;  %vm4602_vm2 = vcmp.eq.f32.partialorder %v4601_v49, 8.507059e+37 }
 0x492   :  { %v2624_v7 = vadd.f32 %v6836_v45, %v2429_v25  ;;  %v4578_v44 = vmul.f32 %v6298_v2, %v3133_v12  ;;  %vm4583_vm3 = vweird.f32 %v6298_v2  ;;  %v5427_v37 = vperm.slane %v4575_v20, %v7214_v19 }
 0x493   :  { %v2120_v29 = vmul.f32 %v8843_v11, %v1988_v61  ;;  %vm4584_vm1 = vmor %vm4582_vm7, %vm4583_vm3  ;;  %vm9798_vm3 = vcmask 917312   ;;  %v4604_v61 = vor.u32 1.1754944e-38, %v4603_v56 }
 0x494   :  { %v6300_v51 = vpop.eup %6299  ;;  %v5868_v58 = vmul.f32 -1.442695, %v2624_v7  ;;  %v4579_v15 = vsub.f32 1.0, %v4578_v44  ;;  %v5428_v21 = vsel %vm9798_vm3, %v5427_v37, %v9000_v6 }
 0x495   :  { %v9015_v18 = vadd.f32 1.0, %v6300_v51  ;;  %v2472_v60 = vsel %vm164_vm0, %v2120_v29, 0.0  ;;  %v6302_v26 = vpop.eup %6301 }
 0x496   :  { %v1831_v42 = vpop.f32.mrf.mxu2  ;;  %2473 = vadd.xlane.f32.xlu1 %v2472_v60  ;;  %v4593_v17 = vmul.f32 %v6302_v26, %v3134_v48  ;;  %v4580_v40 = vmul.f32 %v6298_v2, %v4579_v15  ;;  %vm4598_vm6 = vweird.f32 %v6302_v26 }
 0x497   :  { %6303 = vrcp.f32 %v9015_v18  ;;  %v1832_v16 = vadd.f32 %v8855_v10, %v1831_v42  ;;  %vm4599_vm7 = vmor %vm4597_vm13, %vm4598_vm6  ;;  %vm9800_vm6 = vcmask 1048512  }
 0x498   :  { %6305 = vpow2.f32 %v5868_v58  ;;  %v4594_v27 = vsub.f32 1.0, %v4593_v17  ;;  %v4581_v35 = vadd.f32 %v6298_v2, %v4580_v40 }
 0x499   :  { %v1989_v39 = vmax.f32 %v1832_v16, 0.0  ;;  %v2432_v13 = vpop.xlane.xlu2 %2431 }
 0x49a   :  { %v4595_v52 = vmul.f32 %v6302_v26, %v4594_v27  ;;  %v4585_v34 = vsel %vm4584_vm1, %v6298_v2, %v4581_v35  ;;  %v2625_v46 = vadd.f32 %v6836_v45, %v2432_v13  ;;  %vm9799_vm1 = vcmask 982912  }
 0x49b   :  { %v4590_v3 = vsel %vm4587_vm8, %v4589_v0, %v4585_v34  ;;  %v2121_v54 = vmul.f32 %v8843_v11, %v1989_v39  ;;  %vm5503_vm8 = vcmask 1045509  }
 0x49c   :  { %v4596_v8 = vadd.f32 %v6302_v26, %v4595_v52  ;;  %v5429_v14 = vperm.slane %v4590_v3, %v7240_v57  ;;  %v5869_v43 = vmul.f32 -1.442695, %v2625_v46  ;;  %v4616_v52 = vand.u32 2147483647, %v9015_v18 }
 0x49d   :  { %v9022_v23 = vpop.eup %6303  ;;  %v2475_v7 = vsel %vm164_vm0, %v2121_v54, 0.0 }
 0x49e   :  { %v6306_v12 = vpop.eup %6305  ;;  %v1834_v48 = vpop.f32.mrf.mxu2  ;;  %v4600_v25 = vsel %vm4599_vm7, %v6302_v26, %v4596_v8  ;;  %v5430_v29 = vsel %vm9799_vm1, %v5429_v14, %v5428_v21  ;;  %6307 = vpow2.f32 %v5869_v43  ;;  %2476 = vadd.xlane.f32.xlu2 %v2475_v7  ;;  %v4608_v53 = vmul.f32 %v9022_v23, %v9015_v18 }
 0x49f   :  { %v9029_v2 = vadd.f32 1.0, %v6306_v12  ;;  %v1835_v28 = vadd.f32 %v8855_v10, %v1834_v48  ;;  %v4605_v51 = vsel %vm4602_vm2, %v4604_v61, %v4600_v25  ;;  %vm4613_vm13 = vweird.f32 %v9022_v23 }
 0x4a0   :  { %v5431_v6 = vperm.slane %v4605_v51, %v7261_v24  ;;  %v4609_v42 = vsub.f32 1.0, %v4608_v53  ;;  %v4618_v48 = vand.u32 2147483648, %v9015_v18  ;;  %vm4612_vm1 = vweird.f32 %v9015_v18 }
 0x4a1   :  { %6309 = vrcp.f32 %v9029_v2  ;;  %v1990_v44 = vmax.f32 %v1835_v28, 0.0  ;;  %v2435_v62 = vpop.xlane.xlu0 %2434  ;;  %vm4627_vm3 = vweird.f32 %v9029_v2  ;;  %v4631_v8 = vand.u32 2147483647, %v9029_v2 }
 0x4a2   :  { %v5432_v58 = vsel %vm9800_vm6, %v5431_v6, %v5430_v29  ;;  %v2626_v60 = vadd.f32 %v6836_v45, %v2435_v62  ;;  %v4633_v54 = vand.u32 2147483648, %v9029_v2  ;;  %vm9080_vm6 = vcmp.eq.f32.partialorder %v4616_v52, 8.507059e+37 }
 0x4a3   :  { %v9041_v26 = vsel %vm5503_vm8, %v5432_v58, %v8761_v22  ;;  %v2122_v15 = vmul.f32 %v8843_v11, %v1990_v44  ;;  %v4610_v22 = vmul.f32 %v9022_v23, %v4609_v42  ;;  %vm9076_vm8 = vmor %vm4612_vm1, %vm4613_vm13  ;;  %v4619_v58 = vor.u32 1.1754944e-38, %v4618_v48 }
 0x4a4   :  { %v5870_v20 = vmul.f32 -1.442695, %v2626_v60  ;;  %v6308_v55 = vpop.eup %6307  ;;  %v4634_v6 = vor.u32 1.1754944e-38, %v4633_v54 }
 0x4a5   :  { %v2478_v40 = vsel %vm164_vm0, %v2122_v15, 0.0  ;;  %v9045_v27 = vadd.f32 1.0, %v6308_v55  ;;  %v4611_v3 = vadd.f32 %v9022_v23, %v4610_v22 }
 0x4a6   :  { %v1837_v17 = vpop.f32.mrf.mxu2  ;;  %6311 = vpow2.f32 %v5870_v20  ;;  %2479 = vadd.xlane.f32.xlu1 %v2478_v40 }
 0x4a7   :  { %v6310_v41 = vpop.eup %6309  ;;  %v1838_v49 = vadd.f32 %v8855_v10, %v1837_v17  ;;  %6313 = vrcp.f32 %v9045_v27  ;;  %v4615_v18 = vsel %vm9076_vm8, %v9022_v23, %v4611_v3  ;;  %v4648_v15 = vand.u32 2147483648, %v9045_v27 }
 0x4a8   :  { %v4623_v16 = vmul.f32 %v6310_v41, %v9029_v2  ;;  %vm4628_vm2 = vweird.f32 %v6310_v41  ;;  %v4646_v17 = vand.u32 2147483647, %v9045_v27  ;;  %v4620_v23 = vsel %vm9080_vm6, %v4619_v58, %v4615_v18 }
 0x4a9   :  { %v2438_v37 = vpop.xlane.xlu1 %2437  ;;  %v1991_v56 = vmax.f32 %v1838_v49, 0.0  ;;  %vm9064_vm7 = vmor %vm4627_vm3, %vm4628_vm2  ;;  %vm4632_vm2 = vcmp.eq.f32.partialorder %v4631_v8, 8.507059e+37  ;;  %vm4642_vm3 = vweird.f32 %v9045_v27 }
 0x4aa   :  { %v4624_v35 = vsub.f32 1.0, %v4623_v16  ;;  %v2627_v0 = vadd.f32 %v6836_v45, %v2438_v37  ;;  %vm4647_vm1 = vcmp.eq.f32.partialorder %v4646_v17, 8.507059e+37 }
 0x4ab   :  { %v2123_v34 = vmul.f32 %v8843_v11, %v1991_v56 }
 0x4ac   :  { %v4625_v39 = vmul.f32 %v6310_v41, %v4624_v35  ;;  %v5871_v13 = vmul.f32 -1.442695, %v2627_v0  ;;  %v6312_v46 = vpop.eup %6311  ;;  %v4649_v0 = vor.u32 1.1754944e-38, %v4648_v15 }
 0x4ad   :  { %v9059_v21 = vadd.f32 1.0, %v6312_v46  ;;  %v2481_v61 = vsel %vm164_vm0, %v2123_v34, 0.0  ;;  %v6314_v43 = vpop.eup %6313 }
 0x4ae   :  { %v4626_v12 = vadd.f32 %v6310_v41, %v4625_v39  ;;  %6315 = vpow2.f32 %v5871_v13  ;;  %v1840_v14 = vpop.f32.mrf.mxu2  ;;  %2482 = vadd.xlane.f32.xlu2 %v2481_v61  ;;  %v4638_v7 = vmul.f32 %v6314_v43, %v9045_v27  ;;  %vm4643_vm13 = vweird.f32 %v6314_v43 }
 0x4af   :  { %v1841_v28 = vadd.f32 %v8855_v10, %v1840_v14  ;;  %6317 = vrcp.f32 %v9059_v21  ;;  %v5433_v39 = vperm.slane %v4620_v23, %v6906_v59  ;;  %vm4657_vm6 = vweird.f32 %v9059_v21 }
 0x4b0   :  { %v4630_v2 = vsel %vm9064_vm7, %v6310_v41, %v4626_v12  ;;  %v4639_v53 = vsub.f32 1.0, %v4638_v7  ;;  %vm4644_vm7 = vmor %vm4642_vm3, %vm4643_vm13 }
 0x4b1   :  { %v1992_v44 = vmax.f32 %v1841_v28, 0.0  ;;  %v2441_v62 = vpop.xlane.xlu2 %2440  ;;  %v4635_v60 = vsel %vm4632_vm2, %v4634_v6, %v4630_v2  ;;  %v4661_v2 = vand.u32 2147483647, %v9059_v21 }
 0x4b2   :  { %v2628_v42 = vadd.f32 %v6836_v45, %v2441_v62  ;;  %v4640_v55 = vmul.f32 %v6314_v43, %v4639_v53  ;;  %v5434_v22 = vperm.slane %v4635_v60, %v6921_v5 }
 0x4b3   :  { %v2124_v40 = vmul.f32 %v8843_v11, %v1992_v44  ;;  %vm4662_vm13 = vcmp.eq.f32.partialorder %v4661_v2, 8.507059e+37 }
 0x4b4   :  { %v6316_v20 = vpop.eup %6315  ;;  %v5872_v49 = vmul.f32 -1.442695, %v2628_v42  ;;  %v4641_v37 = vadd.f32 %v6314_v43, %v4640_v55  ;;  %v5435_v27 = vsel %vm5220_vm10, %v5434_v22, %v5433_v39  ;;  %v9138_v39 = vld [vmem:[%s9738_s4] ss:$0 sm:$0xff] }
 0x4b5   :  { %v9093_v41 = vadd.f32 1.0, %v6316_v20  ;;  %v6318_v16 = vpop.eup %6317  ;;  %v2484_v56 = vsel %vm164_vm0, %v2124_v40, 0.0 }
 0x4b6   :  { %v1843_v35 = vpop.f32.mrf.mxu2  ;;  %v4653_v52 = vmul.f32 %v6318_v16, %v9059_v21  ;;  %2485 = vadd.xlane.f32.xlu1 %v2484_v56  ;;  %v4645_v13 = vsel %vm4644_vm7, %v6314_v43, %v4641_v37  ;;  %vm4658_vm8 = vweird.f32 %v6318_v16  ;;  %v4663_v43 = vand.u32 2147483648, %v9059_v21 }
 0x4b7   :  { %6319 = vrcp.f32 %v9093_v41  ;;  %v4650_v34 = vsel %vm4647_vm1, %v4649_v0, %v4645_v13  ;;  %v1844_v3 = vadd.f32 %v8855_v10, %v1843_v35  ;;  %vm9110_vm2 = vmor %vm4657_vm6, %vm4658_vm8  ;;  %v4676_v15 = vand.u32 2147483647, %v9093_v41 }
 0x4b8   :  { %6321 = vpow2.f32 %v5872_v49  ;;  %v4654_v46 = vsub.f32 1.0, %v4653_v52  ;;  %v5436_v8 = vperm.slane %v4650_v34, %v6945_v38  ;;  %v4664_v21 = vor.u32 1.1754944e-38, %v4663_v43 }
 0x4b9   :  { %v2444_v54 = vpop.xlane.xlu2 %2443  ;;  %v1993_v14 = vmax.f32 %v1844_v3, 0.0  ;;  %v4678_v42 = vand.u32 2147483648, %v9093_v41  ;;  %vm4672_vm7 = vweird.f32 %v9093_v41  ;;  %vm4677_vm8 = vcmp.eq.f32.partialorder %v4676_v15, 8.507059e+37 }
 0x4ba   :  { %v4655_v12 = vmul.f32 %v6318_v16, %v4654_v46  ;;  %v2629_v61 = vadd.f32 %v6836_v45, %v2444_v54  ;;  %v5437_v48 = vsel %vm5224_vm15, %v5436_v8, %v5435_v27  ;;  %v1826_v13 = vadd.f32 %v9138_v39, %v8994_v47 }
 0x4bb   :  { %v2125_v29 = vmul.f32 %v8843_v11, %v1993_v14  ;;  %v4679_v22 = vor.u32 1.1754944e-38, %v4678_v42  ;;  %vm9809_vm6 = vcmask 261312  }
 0x4bc   :  { %v4656_v28 = vadd.f32 %v6318_v16, %v4655_v12  ;;  %v5873_v7 = vmul.f32 -1.442695, %v2629_v61  ;;  %v1987_v47 = vmax.f32 %v1826_v13, 0.0 }
 0x4bd   :  { %v6320_v25 = vpop.eup %6319  ;;  %v2487_v11 = vsel %vm164_vm0, %v2125_v29, 0.0 }
 0x4be   :  { %v6322_v51 = vpop.eup %6321  ;;  %v4668_v18 = vmul.f32 %v6320_v25, %v9093_v41  ;;  %v1846_v53 = vpop.f32.mrf.mxu2  ;;  %v4660_v44 = vsel %vm9110_vm2, %v6318_v16, %v4656_v28  ;;  %6323 = vpow2.f32 %v5873_v7  ;;  %2488 = vadd.xlane.f32.xlu1 %v2487_v11  ;;  %vm4673_vm3 = vweird.f32 %v6320_v25 }
 0x4bf   :  { %v9117_v62 = vadd.f32 1.0, %v6322_v51  ;;  %v1847_v58 = vadd.f32 %v8855_v10, %v1846_v53  ;;  %v4665_v20 = vsel %vm4662_vm13, %v4664_v21, %v4660_v44  ;;  %v9128_v10 = vld [vmem:[%s9739_s5] ss:$0 sm:$0xff]  ;;  %vm4674_vm1 = vmor %vm4672_vm7, %vm4673_vm3 }
 0x4c0   :  { %v4669_v60 = vsub.f32 1.0, %v4668_v18  ;;  %v5438_v16 = vperm.slane %v4665_v20, %v6967_v4  ;;  %v2119_v15 = vmul.f32 %v9128_v10, %v1987_v47 }
 0x4c1   :  { %6325 = vrcp.f32 %v9117_v62  ;;  %v1994_v17 = vmax.f32 %v1847_v58, 0.0  ;;  %v2447_v56 = vpop.xlane.xlu2 %2446  ;;  %v4691_v2 = vand.u32 2147483647, %v9117_v62  ;;  %vm4687_vm13 = vweird.f32 %v9117_v62 }
 0x4c2   :  { %v4670_v55 = vmul.f32 %v6320_v25, %v4669_v60  ;;  %v2630_v46 = vadd.f32 %v6836_v45, %v2447_v56  ;;  %v5439_v54 = vsel %vm9809_vm6, %v5438_v16, %v5437_v48 }
 0x4c3   :  { %v2126_v23 = vmul.f32 %v9128_v10, %v1994_v17  ;;  %vm4692_vm7 = vcmp.eq.f32.partialorder %v4691_v2, 8.507059e+37 }
 0x4c4   :  { %v4671_v40 = vadd.f32 %v6320_v25, %v4670_v55  ;;  %v6324_v49 = vpop.eup %6323  ;;  %v5874_v12 = vmul.f32 -1.442695, %v2630_v46 }
 0x4c5   :  { %v9132_v35 = vadd.f32 1.0, %v6324_v49  ;;  %v2490_v41 = vsel %vm164_vm0, %v2126_v23, 0.0 }
 0x4c6   :  { %v4675_v37 = vsel %vm4674_vm1, %v6320_v25, %v4671_v40  ;;  %v1849_v0 = vpop.f32.mrf.mxu2  ;;  %2491 = vadd.xlane.f32.xlu1 %v2490_v41  ;;  %v4693_v25 = vand.u32 2147483648, %v9117_v62 }
 0x4c7   :  { %v6326_v52 = vpop.eup %6325  ;;  %v4680_v34 = vsel %vm4677_vm8, %v4679_v22, %v4675_v37  ;;  %v1850_v3 = vadd.f32 %v9138_v39, %v1849_v0  ;;  %6327 = vrcp.f32 %v9132_v35  ;;  %v4706_v11 = vand.u32 2147483647, %v9132_v35 }
 0x4c8   :  { %v5440_v27 = vperm.slane %v4680_v34, %v6989_v32  ;;  %v4683_v8 = vmul.f32 %v6326_v52, %v9117_v62  ;;  %6329 = vpow2.f32 %v5874_v12  ;;  %vm4688_vm2 = vweird.f32 %v6326_v52 }
 0x4c9   :  { %v1995_v43 = vmax.f32 %v1850_v3, 0.0  ;;  %v2450_v48 = vpop.xlane.xlu2 %2449  ;;  %vm4689_vm3 = vmor %vm4687_vm13, %vm4688_vm2  ;;  %v4694_v53 = vor.u32 1.1754944e-38, %v4693_v25  ;;  %v4708_v49 = vand.u32 2147483648, %v9132_v35  ;;  %vm4702_vm8 = vweird.f32 %v9132_v35 }
 0x4ca   :  { %v5441_v14 = vsel %vm5232_vm12, %v5440_v27, %v5439_v54  ;;  %v4684_v61 = vsub.f32 1.0, %v4683_v8  ;;  %v2631_v58 = vadd.f32 %v6836_v45, %v2450_v48  ;;  %v2469_v3 = vsel %vm164_vm0, %v2119_v15, 0.0 }
 0x4cb   :  { %v2127_v7 = vmul.f32 %v9128_v10, %v1995_v43  ;;  %v4709_v34 = vor.u32 1.1754944e-38, %v4708_v49  ;;  %vm4707_vm2 = vcmp.eq.f32.partialorder %v4706_v11, 8.507059e+37 }
 0x4cc   :  { %v4685_v28 = vmul.f32 %v6326_v52, %v4684_v61  ;;  %v5875_v55 = vmul.f32 -1.442695, %v2631_v58 }
 0x4cd   :  { %v6328_v29 = vpop.eup %6327  ;;  %v2493_v18 = vsel %vm164_vm0, %v2127_v7, 0.0 }
 0x4ce   :  { %v4686_v51 = vadd.f32 %v6326_v52, %v4685_v28  ;;  %v1852_v6 = vpop.f32.mrf.mxu2  ;;  %v4698_v44 = vmul.f32 %v6328_v29, %v9132_v35  ;;  %2494 = vadd.xlane.f32.xlu0 %v2493_v18  ;;  %v6330_v62 = vpop.eup %6329  ;;  %vm4703_vm1 = vweird.f32 %v6328_v29  ;;  %6331 = vpow2.f32 %v5875_v55 }
 0x4cf   :  { %v1853_v21 = vadd.f32 %v9138_v39, %v1852_v6  ;;  %v3142_v16 = vadd.f32 1.0, %v6330_v62  ;;  %vm4704_vm6 = vmor %vm4702_vm8, %vm4703_vm1 }
 0x4d0   :  { %v4690_v60 = vsel %vm4689_vm3, %v6326_v52, %v4686_v51  ;;  %v4699_v20 = vsub.f32 1.0, %v4698_v44 }
 0x4d1   :  { %v4695_v42 = vsel %vm4692_vm7, %v4694_v53, %v4690_v60  ;;  %v1996_v17 = vmax.f32 %v1853_v21, 0.0  ;;  %v2453_v40 = vpop.xlane.xlu1 %2452  ;;  %6333 = vrcp.f32 %v3142_v16  ;;  %v4721_v6 = vand.u32 2147483647, %v3142_v16 }
 0x4d2   :  { %v5442_v23 = vperm.slane %v4695_v42, %v7016_v1  ;;  %v2632_v22 = vadd.f32 %v6836_v45, %v2453_v40  ;;  %v4700_v37 = vmul.f32 %v6328_v29, %v4699_v20  ;;  %v4723_v18 = vand.u32 2147483648, %v3142_v16 }
 0x4d3   :  { %v2128_v56 = vmul.f32 %v9128_v10, %v1996_v17  ;;  %vm4717_vm3 = vweird.f32 %v3142_v16  ;;  %vm4722_vm1 = vcmp.eq.f32.partialorder %v4721_v6, 8.507059e+37 }
 0x4d4   :  { %v5443_v0 = vsel %vm5236_vm4, %v5442_v23, %v5441_v14  ;;  %v4701_v41 = vadd.f32 %v6328_v29, %v4700_v37  ;;  %v5876_v52 = vmul.f32 -1.442695, %v2632_v22  ;;  %v6332_v12 = vpop.eup %6331  ;;  %v4724_v42 = vor.u32 1.1754944e-38, %v4723_v18 }
 0x4d5   :  { %v2496_v13 = vsel %vm164_vm0, %v2128_v56, 0.0  ;;  %v3143_v43 = vadd.f32 1.0, %v6332_v12 }
 0x4d6   :  { %v1855_v46 = vpop.f32.mrf.mxu2  ;;  %2497 = vadd.xlane.f32.xlu2 %v2496_v13  ;;  %v4705_v27 = vsel %vm4704_vm6, %v6328_v29, %v4701_v41  ;;  %6335 = vpow2.f32 %v5876_v52  ;;  %2470 = vadd.xlane.f32.xlu0 %v2469_v3 }
 0x4d7   :  { %v1856_v8 = vadd.f32 %v9138_v39, %v1855_v46  ;;  %v4710_v54 = vsel %vm4707_vm2, %v4709_v34, %v4705_v27  ;;  %v6334_v61 = vpop.eup %6333  ;;  %6337 = vrcp.f32 %v3143_v43  ;;  %v4736_v41 = vand.u32 2147483647, %v3143_v43 }
 0x4d8   :  { %v5444_v14 = vperm.slane %v4710_v54, %v7038_v30  ;;  %v4713_v28 = vmul.f32 %v6334_v61, %v3142_v16  ;;  %vm4718_vm13 = vweird.f32 %v6334_v61  ;;  %v4738_v52 = vand.u32 2147483648, %v3143_v43 }
 0x4d9   :  { %v1997_v35 = vmax.f32 %v1856_v8, 0.0  ;;  %v2456_v47 = vpop.xlane.xlu1 %2455  ;;  %vm4719_vm7 = vmor %vm4717_vm3, %vm4718_vm13  ;;  %vm4732_vm6 = vweird.f32 %v3143_v43  ;;  %vm4737_vm13 = vcmp.eq.f32.partialorder %v4736_v41, 8.507059e+37 }
 0x4da   :  { %v5445_v25 = vsel %vm5240_vm11, %v5444_v14, %v5443_v0  ;;  %v2633_v2 = vadd.f32 %v6836_v45, %v2456_v47  ;;  %v4714_v29 = vsub.f32 1.0, %v4713_v28 }
 0x4db   :  { %v2129_v48 = vmul.f32 %v9128_v10, %v1997_v35  ;;  %v4739_v35 = vor.u32 1.1754944e-38, %v4738_v52 }
 0x4dc   :  { %v6336_v7 = vpop.eup %6335  ;;  %v5877_v51 = vmul.f32 -1.442695, %v2633_v2  ;;  %v4715_v58 = vmul.f32 %v6334_v61, %v4714_v29 }
 0x4dd   :  { %v9172_v53 = vadd.f32 1.0, %v6336_v7  ;;  %v2499_v60 = vsel %vm164_vm0, %v2129_v48, 0.0  ;;  %v6338_v62 = vpop.eup %6337 }
 0x4de   :  { %v1858_v44 = vpop.f32.mrf.mxu2  ;;  %6339 = vpow2.f32 %v5877_v51  ;;  %2500 = vadd.xlane.f32.xlu2 %v2499_v60  ;;  %v4716_v11 = vadd.f32 %v6334_v61, %v4715_v58  ;;  %v4728_v55 = vmul.f32 %v6338_v62, %v3143_v43  ;;  %vm4733_vm8 = vweird.f32 %v6338_v62 }
 0x4df   :  { %v1859_v21 = vadd.f32 %v9138_v39, %v1858_v44  ;;  %6341 = vrcp.f32 %v9172_v53  ;;  %vm4734_vm2 = vmor %vm4732_vm6, %vm4733_vm8  ;;  %v4753_v47 = vand.u32 2147483648, %v9172_v53 }
 0x4e0   :  { %v4720_v20 = vsel %vm4719_vm7, %v6334_v61, %v4716_v11  ;;  %v4729_v56 = vsub.f32 1.0, %v4728_v55  ;;  %v4751_v61 = vand.u32 2147483647, %v9172_v53  ;;  %vm4747_vm7 = vweird.f32 %v9172_v53 }
 0x4e1   :  { %v1998_v15 = vmax.f32 %v1859_v21, 0.0  ;;  %v2459_v17 = vpop.xlane.xlu1 %2458  ;;  %v4725_v23 = vsel %vm4722_vm1, %v4724_v42, %v4720_v20  ;;  %v4754_v6 = vor.u32 1.1754944e-38, %v4753_v47 }
 0x4e2   :  { %v2634_v49 = vadd.f32 %v6836_v45, %v2459_v17  ;;  %v5446_v37 = vperm.slane %v4725_v23, %v7060_v63  ;;  %v4730_v27 = vmul.f32 %v6338_v62, %v4729_v56  ;;  %vm4752_vm8 = vcmp.eq.f32.partialorder %v4751_v61, 8.507059e+37 }
 0x4e3   :  { %v2130_v40 = vmul.f32 %v9128_v10, %v1998_v15 }
 0x4e4   :  { %v6340_v22 = vpop.eup %6339  ;;  %v5878_v34 = vmul.f32 -1.442695, %v2634_v49  ;;  %v5447_v3 = vsel %vm5244_vm5, %v5446_v37, %v5445_v25  ;;  %v4731_v54 = vadd.f32 %v6338_v62, %v4730_v27 }
 0x4e5   :  { %v2502_v16 = vsel %vm164_vm0, %v2130_v40, 0.0  ;;  %v6342_v0 = vpop.eup %6341  ;;  %v3145_v13 = vadd.f32 1.0, %v6340_v22 }
 0x4e6   :  { %v1861_v46 = vpop.f32.mrf.mxu2  ;;  %v4743_v8 = vmul.f32 %v6342_v0, %v9172_v53  ;;  %2503 = vadd.xlane.f32.xlu2 %v2502_v16  ;;  %v4735_v25 = vsel %vm4734_vm2, %v6338_v62, %v4731_v54  ;;  %vm4748_vm3 = vweird.f32 %v6342_v0 }
 0x4e7   :  { %6343 = vrcp.f32 %v3145_v13  ;;  %v1862_v14 = vadd.f32 %v9138_v39, %v1861_v46  ;;  %v4740_v7 = vsel %vm4737_vm13, %v4739_v35, %v4735_v25  ;;  %vm4749_vm1 = vmor %vm4747_vm7, %vm4748_vm3  ;;  %v4766_v55 = vand.u32 2147483647, %v3145_v13 }
 0x4e8   :  { %v4744_v12 = vsub.f32 1.0, %v4743_v8  ;;  %6345 = vpow2.f32 %v5878_v34  ;;  %v5448_v43 = vperm.slane %v4740_v7, %v7092_v31  ;;  %v4768_v17 = vand.u32 2147483648, %v3145_v13 }
 0x4e9   :  { %v1999_v2 = vmax.f32 %v1862_v14, 0.0  ;;  %vm4762_vm2 = vweird.f32 %v3145_v13  ;;  %vm4767_vm3 = vcmp.eq.f32.partialorder %v4766_v55, 8.507059e+37  ;;  %vm9810_vm7 = vcmask 720512  }
 0x4ea   :  { %v4745_v28 = vmul.f32 %v6342_v0, %v4744_v12  ;;  %v5449_v58 = vsel %vm9750_vm14, %v5448_v43, %v5447_v3  ;;  %v4769_v56 = vor.u32 1.1754944e-38, %v4768_v17 }
 0x4eb   :  { %v2131_v51 = vmul.f32 %v9128_v10, %v1999_v2 }
 0x4ec   :  { %v4746_v29 = vadd.f32 %v6342_v0, %v4745_v28 }
 0x4ed   :  { %v6344_v48 = vpop.eup %6343  ;;  %v2505_v53 = vsel %vm164_vm0, %v2131_v51, 0.0 }
 0x4ee   :  { %v1864_v18 = vpop.f32.mrf.mxu2  ;;  %v6346_v44 = vpop.eup %6345  ;;  %v4750_v21 = vsel %vm4749_vm1, %v6342_v0, %v4746_v29  ;;  %v4758_v60 = vmul.f32 %v6344_v48, %v3145_v13  ;;  %2506 = vadd.xlane.f32.xlu2 %v2505_v53  ;;  %vm4763_vm6 = vweird.f32 %v6344_v48 }
 0x4ef   :  { %v4755_v11 = vsel %vm4752_vm8, %v4754_v6, %v4750_v21  ;;  %v3146_v15 = vadd.f32 1.0, %v6346_v44  ;;  %v1865_v62 = vadd.f32 %v9138_v39, %v1864_v18  ;;  %vm4764_vm13 = vmor %vm4762_vm2, %vm4763_vm6 }
 0x4f0   :  { %v5450_v42 = vperm.slane %v4755_v11, %v7114_v33  ;;  %v4759_v20 = vsub.f32 1.0, %v4758_v60 }
 0x4f1   :  { %6347 = vrcp.f32 %v3146_v15  ;;  %v2000_v49 = vmax.f32 %v1865_v62, 0.0  ;;  %v4783_v12 = vand.u32 2147483648, %v3146_v15  ;;  %v4781_v35 = vand.u32 2147483647, %v3146_v15  ;;  %v2462_v62 = vpop.xlane.xlu1 %2461 }
 0x4f2   :  { %v5451_v40 = vsel %vm9749_vm9, %v5450_v42, %v5449_v58  ;;  %v4760_v23 = vmul.f32 %v6344_v48, %v4759_v20  ;;  %vm4777_vm8 = vweird.f32 %v3146_v15  ;;  %v2635_v20 = vadd.f32 %v6836_v45, %v2462_v62 }
 0x4f3   :  { %v2132_v37 = vmul.f32 %v9128_v10, %v2000_v49  ;;  %v4784_v7 = vor.u32 1.1754944e-38, %v4783_v12  ;;  %vm4782_vm2 = vcmp.eq.f32.partialorder %v4781_v35, 8.507059e+37 }
 0x4f4   :  { %v4761_v22 = vadd.f32 %v6344_v48, %v4760_v23  ;;  %v5879_v17 = vmul.f32 -1.442695, %v2635_v20 }
 0x4f5   :  { %v2508_v46 = vsel %vm164_vm0, %v2132_v37, 0.0 }
 0x4f6   :  { %v1867_v16 = vpop.f32.mrf.mxu2  ;;  %v4765_v0 = vsel %vm4764_vm13, %v6344_v48, %v4761_v22  ;;  %2509 = vadd.xlane.f32.xlu2 %v2508_v46  ;;  %vm9811_vm13 = vcmask 786112   ;;  %6349 = vpow2.f32 %v5879_v17 }
 0x4f7   :  { %v1868_v41 = vadd.f32 %v9138_v39, %v1867_v16  ;;  %v6348_v52 = vpop.eup %6347  ;;  %v4770_v34 = vsel %vm4767_vm3, %v4769_v56, %v4765_v0 }
 0x4f8   :  { %v5452_v3 = vperm.slane %v4770_v34, %v7136_v36  ;;  %v4773_v27 = vmul.f32 %v6348_v52, %v3146_v15  ;;  %vm4778_vm1 = vweird.f32 %v6348_v52 }
 0x4f9   :  { %v2001_v54 = vmax.f32 %v1868_v41, 0.0  ;;  %vm4779_vm6 = vmor %vm4777_vm8, %vm4778_vm1  ;;  %v2465_v42 = vpop.xlane.xlu1 %2464 }
 0x4fa   :  { %v5453_v8 = vsel %vm9810_vm7, %v5452_v3, %v5451_v40  ;;  %v4774_v13 = vsub.f32 1.0, %v4773_v27  ;;  %v2636_v53 = vadd.f32 %v6836_v45, %v2465_v42 }
 0x4fb   :  { %v2133_v61 = vmul.f32 %v9128_v10, %v2001_v54 }
 0x4fc   :  { %v4775_v14 = vmul.f32 %v6348_v52, %v4774_v13  ;;  %v5880_v40 = vmul.f32 -1.442695, %v2636_v53  ;;  %v6350_v22 = vpop.eup %6349 }
 0x4fd   :  { %v2511_v2 = vsel %vm164_vm0, %v2133_v61, 0.0  ;;  %v9216_v56 = vadd.f32 1.0, %v6350_v22 }
 0x4fe   :  { %v1870_v47 = vpop.f32.mrf.mxu2  ;;  %v4776_v25 = vadd.f32 %v6348_v52, %v4775_v14  ;;  %2512 = vadd.xlane.f32.xlu2 %v2511_v2  ;;  %6351 = vpow2.f32 %v5880_v40 }
 0x4ff   :  { %v1871_v28 = vadd.f32 %v9138_v39, %v1870_v47  ;;  %vm4792_vm3 = vweird.f32 %v9216_v56 }
 0x500   :  { %v4780_v43 = vsel %vm4779_vm6, %v6348_v52, %v4776_v25 }
 0x501   :  { %v2002_v29 = vmax.f32 %v1871_v28, 0.0  ;;  %v4785_v51 = vsel %vm4782_vm2, %v4784_v7, %v4780_v43  ;;  %v2468_v55 = vpop.xlane.xlu1 %2467 }
 0x502   :  { %v5454_v48 = vperm.slane %v4785_v51, %v7162_v9  ;;  %v2637_v23 = vadd.f32 %v6836_v45, %v2468_v55 }
 0x503   :  { %v2134_v6 = vmul.f32 %v9128_v10, %v2002_v29 }
 0x504   :  { %v9206_v18 = vsel %vm9811_vm13, %v5454_v48, %v5453_v8  ;;  %v6352_v37 = vpop.eup %6351 }
 0x505   :  { %v2514_v58 = vsel %vm164_vm0, %v2134_v6, 0.0  ;;  %v9218_v52 = vadd.f32 1.0, %v6352_v37 }
 0x506   :  { %v1873_v44 = vpop.f32.mrf.mxu2  ;;  %2515 = vadd.xlane.f32.xlu1 %v2514_v58 }
 0x507   :  { %v1874_v21 = vadd.f32 %v9138_v39, %v1873_v44  ;;  %v5881_v39 = vmul.f32 -1.442695, %v2637_v23  ;;  %v4796_v23 = vand.u32 2147483647, %v9216_v56  ;;  %vm4807_vm6 = vweird.f32 %v9218_v52 }
 0x509   :  { %v2003_v60 = vmax.f32 %v1874_v21, 0.0  ;;  %v2474_v49 = vpop.xlane.xlu1 %2473  ;;  %6353 = vpow2.f32 %v5881_v39  ;;  %v4798_v39 = vand.u32 2147483648, %v9216_v56  ;;  %vm9277_vm8 = vcmp.eq.f32.partialorder %v4796_v23, 8.507059e+37 }
 0x50a   :  { %6355 = vrcp.f32 %v9216_v56 }
 0x50b   :  { %v2135_v11 = vmul.f32 %v9128_v10, %v2003_v60  ;;  %v2639_v10 = vadd.f32 %v6836_v45, %v2474_v49 }
 0x50d   :  { %v2517_v15 = vsel %vm164_vm0, %v2135_v11, 0.0  ;;  %v5883_v0 = vmul.f32 -1.442695, %v2639_v10 }
 0x50e   :  { %2518 = vadd.xlane.f32.xlu2 %v2517_v15 }
 0x50f   :  { %v6354_v34 = vpop.eup %6353  ;;  %6357 = vpow2.f32 %v5883_v0 }
 0x510   :  { %6359 = vrcp.f32 %v9218_v52  ;;  %v9222_v46 = vadd.f32 1.0, %v6354_v34  ;;  %v9226_v54 = vpop.eup %6355 }
 0x511   :  { %v2477_v16 = vpop.xlane.xlu2 %2476  ;;  %v4788_v25 = vmul.f32 %v9226_v54, %v9216_v56  ;;  %vm4793_vm0 = vweird.f32 %v9226_v54 }
 0x512   :  { %v2640_v3 = vadd.f32 %v6836_v45, %v2477_v16  ;;  %6361 = vrcp.f32 %v9222_v46  ;;  %vm9273_vm1 = vmor %vm4792_vm3, %vm4793_vm0  ;;  %vm4822_vm0 = vweird.f32 %v9222_v46 }
 0x513   :  { %v4789_v51 = vsub.f32 1.0, %v4788_v25 }
 0x514   :  { %v5884_v14 = vmul.f32 -1.442695, %v2640_v3 }
 0x515   :  { %v6358_v12 = vpop.eup %6357  ;;  %v4790_v60 = vmul.f32 %v9226_v54, %v4789_v51 }
 0x516   :  { %v9230_v61 = vpop.eup %6359  ;;  %v9234_v28 = vadd.f32 1.0, %v6358_v12  ;;  %6363 = vpow2.f32 %v5884_v14 }
 0x517   :  { %v4803_v2 = vmul.f32 %v9230_v61, %v9218_v52  ;;  %v4791_v22 = vadd.f32 %v9226_v54, %v4790_v60  ;;  %vm4808_vm7 = vweird.f32 %v9230_v61 }
 0x518   :  { %v9238_v43 = vpop.eup %6361  ;;  %vm9290_vm2 = vmor %vm4807_vm6, %vm4808_vm7 }
 0x519   :  { %v2480_v41 = vpop.xlane.xlu1 %2479  ;;  %v4804_v6 = vsub.f32 1.0, %v4803_v2  ;;  %v4818_v44 = vmul.f32 %v9238_v43, %v9222_v46  ;;  %vm4823_vm13 = vweird.f32 %v9238_v43 }
 0x51a   :  { %v2641_v8 = vadd.f32 %v6836_v45, %v2480_v41  ;;  %vm9310_vm7 = vmor %vm4822_vm0, %vm4823_vm13  ;;  %vm9823_vm0 = vcmask 917312  }
 0x51b   :  { %v4805_v62 = vmul.f32 %v9230_v61, %v4804_v6  ;;  %v4819_v42 = vsub.f32 1.0, %v4818_v44  ;;  %v4826_v44 = vand.u32 2147483647, %v9222_v46 }
 0x51c   :  { %v5885_v47 = vmul.f32 -1.442695, %v2641_v8  ;;  %v6364_v21 = vpop.eup %6363  ;;  %v4799_v8 = vor.u32 1.1754944e-38, %v4798_v39 }
 0x51d   :  { %v9252_v55 = vadd.f32 1.0, %v6364_v21  ;;  %v4806_v16 = vadd.f32 %v9230_v61, %v4805_v62  ;;  %v4820_v0 = vmul.f32 %v9238_v43, %v4819_v42 }
 0x51e   :  { %6365 = vpow2.f32 %v5885_v47  ;;  %v4811_v47 = vand.u32 2147483647, %v9218_v52 }
 0x51f   :  { %6367 = vrcp.f32 %v9234_v28  ;;  %v4821_v2 = vadd.f32 %v9238_v43, %v4820_v0 }
 0x520   :  { %vm4812_vm3 = vcmp.eq.f32.partialorder %v4811_v47, 8.507059e+37 }
 0x521   :  { %v2483_v27 = vpop.xlane.xlu2 %2482 }
 0x522   :  { %v2642_v35 = vadd.f32 %v6836_v45, %v2483_v27 }
 0x524   :  { %v5886_v7 = vmul.f32 -1.442695, %v2642_v35  ;;  %v6366_v15 = vpop.eup %6365  ;;  %v4795_v35 = vsel %vm9273_vm1, %v9226_v54, %v4791_v22  ;;  %vm4827_vm1 = vcmp.eq.f32.partialorder %v4826_v44, 8.507059e+37 }
 0x525   :  { %v9250_v53 = vpop.eup %6367  ;;  %v9259_v10 = vadd.f32 1.0, %v6366_v15  ;;  %v4800_v60 = vsel %vm9277_vm8, %v4799_v8, %v4795_v35  ;;  %vm4852_vm8 = vweird.f32 %v9234_v28  ;;  %v4858_v8 = vand.u32 2147483648, %v9234_v28 }
 0x526   :  { %6369 = vpow2.f32 %v5886_v7  ;;  %v4848_v41 = vmul.f32 %v9250_v53, %v9234_v28  ;;  %v4828_v7 = vand.u32 2147483648, %v9222_v46  ;;  %v4825_v46 = vsel %vm9310_vm7, %v9238_v43, %v4821_v2 }
 0x527   :  { %vm4853_vm6 = vweird.f32 %v9250_v53  ;;  %vm9824_vm7 = vcmask 982912  }
 0x528   :  { %v4849_v51 = vsub.f32 1.0, %v4848_v41  ;;  %v4856_v41 = vand.u32 2147483647, %v9234_v28  ;;  %vm9353_vm13 = vmor %vm4852_vm8, %vm4853_vm6  ;;  %v4871_v28 = vand.u32 2147483647, %v9252_v55 }
 0x529   :  { %v2486_v13 = vpop.xlane.xlu1 %2485 }
 0x52a   :  { %v2643_v48 = vadd.f32 %v6836_v45, %v2486_v13  ;;  %v4813_v13 = vand.u32 2147483648, %v9218_v52  ;;  %v4810_v52 = vsel %vm9290_vm2, %v9230_v61, %v4806_v16  ;;  %vm9820_vm2 = vcmask 851712  }
 0x52b   :  { %vm9379_vm6 = vcmp.eq.f32.partialorder %v4871_v28, 8.507059e+37 }
 0x52c   :  { %v5887_v11 = vmul.f32 -1.442695, %v2643_v48  ;;  %v6370_v40 = vpop.eup %6369  ;;  %v4814_v6 = vor.u32 1.1754944e-38, %v4813_v13 }
 0x52d   :  { %v9269_v34 = vadd.f32 1.0, %v6370_v40  ;;  %v4850_v40 = vmul.f32 %v9250_v53, %v4849_v51 }
 0x52e   :  { %6371 = vpow2.f32 %v5887_v11  ;;  %v4815_v15 = vsel %vm4812_vm3, %v4814_v6, %v4810_v52  ;;  %vm4857_vm3 = vcmp.eq.f32.partialorder %v4856_v41, 8.507059e+37  ;;  %v4859_v6 = vor.u32 1.1754944e-38, %v4858_v8 }
 0x52f   :  { %6373 = vrcp.f32 %v9252_v55  ;;  %v4851_v56 = vadd.f32 %v9250_v53, %v4850_v40  ;;  %v4901_v8 = vand.u32 2147483647, %v9269_v34  ;;  %vm4897_vm14 = vweird.f32 %v9269_v34 }
 0x530   :  { %6375 = vrcp.f32 %v9259_v10 }
 0x531   :  { %v2489_v58 = vpop.xlane.xlu1 %2488 }
 0x532   :  { %v2644_v49 = vadd.f32 %v6836_v45, %v2489_v58 }
 0x534   :  { %v5888_v12 = vmul.f32 -1.442695, %v2644_v49  ;;  %v6372_v54 = vpop.eup %6371  ;;  %v5456_v49 = vperm.slane %v4800_v60, %v7188_v50  ;;  %v4888_v60 = vand.u32 2147483648, %v9259_v10 }
 0x535   :  { %v9304_v21 = vpop.eup %6373  ;;  %v9319_v62 = vadd.f32 1.0, %v6372_v54  ;;  %v4873_v54 = vand.u32 2147483648, %v9252_v55 }
 0x536   :  { %v9321_v42 = vpop.eup %6375  ;;  %v5457_v2 = vsel %vm9820_vm2, %v5456_v49, %v9206_v18  ;;  %vm4868_vm8 = vweird.f32 %v9304_v21  ;;  %vm4882_vm2 = vweird.f32 %v9259_v10 }
 0x537   :  { %v4874_v40 = vor.u32 1.1754944e-38, %v4873_v54 }
 0x539   :  { %v2492_v14 = vpop.xlane.xlu1 %2491 }
 0x53a   :  { %v2645_v48 = vadd.f32 %v6836_v45, %v2492_v14  ;;  %v4878_v14 = vmul.f32 %v9321_v42, %v9259_v10 }
 0x53c   :  { %v5889_v23 = vmul.f32 -1.442695, %v2645_v48  ;;  %v4855_v48 = vsel %vm9353_vm13, %v9250_v53, %v4851_v56  ;;  %vm4883_vm13 = vweird.f32 %v9321_v42 }
 0x541   :  { %v9240_v29 = vpop.xlane.xlu0 %2494 }
 0x542   :  { %v2646_v11 = vadd.f32 %v6836_v45, %v9240_v29  ;;  %v4863_v29 = vmul.f32 %v9304_v21, %v9252_v55 }
 0x544   :  { %v5890_v16 = vmul.f32 -1.442695, %v2646_v11 }
 0x549   :  { %v9248_v20 = vpop.xlane.xlu2 %2497  ;;  %v2471_v17 = vpop.xlane.xlu0 %2470 }
 0x54a   :  { %v2638_v37 = vadd.f32 %v6836_v45, %v2471_v17  ;;  %v4829_v17 = vor.u32 1.1754944e-38, %v4828_v7 }
 0x54c   :  { %v5882_v3 = vmul.f32 -1.442695, %v2638_v37  ;;  %v5458_v37 = vperm.slane %v4815_v15, %v7214_v19  ;;  %v4830_v43 = vsel %vm4827_vm1, %v4829_v17, %v4825_v46  ;;  %v9371_v17 = vsel %vm4857_vm3, %v4859_v6, %v4855_v48 }
 0x54d   :  { %v5460_v13 = vperm.slane %v4830_v43, %v7240_v57  ;;  %vm4867_vm1 = vweird.f32 %v9252_v55 }
 0x54e   :  { %6377 = vpow2.f32 %v5882_v3  ;;  %v2647_v3 = vadd.f32 %v6836_v45, %v9248_v20  ;;  %v5459_v51 = vsel %vm9823_vm0, %v5458_v37, %v5457_v2  ;;  %vm9403_vm0 = vmor %vm4867_vm1, %vm4868_vm8 }
 0x54f   :  { %6379 = vrcp.f32 %v9269_v34  ;;  %v9368_v11 = vsel %vm9824_vm7, %v5460_v13, %v5459_v51 }
 0x550   :  { %6381 = vpow2.f32 %v5888_v12  ;;  %v4864_v12 = vsub.f32 1.0, %v4863_v29  ;;  %v5891_v52 = vmul.f32 -1.442695, %v2647_v3 }
 0x551   :  { %v2501_v58 = vpop.xlane.xlu2 %2500  ;;  %6383 = vrcp.f32 %v9319_v62 }
 0x552   :  { %6385 = vpow2.f32 %v5889_v23  ;;  %v2648_v25 = vadd.f32 %v6836_v45, %v2501_v58  ;;  %v4865_v18 = vmul.f32 %v9304_v21, %v4864_v12  ;;  %v4879_v58 = vsub.f32 1.0, %v4878_v14 }
 0x554   :  { %v6378_v39 = vpop.eup %6377  ;;  %v5892_v46 = vmul.f32 -1.442695, %v2648_v25  ;;  %v4866_v37 = vadd.f32 %v9304_v21, %v4865_v18 }
 0x555   :  { %v9327_v22 = vpop.eup %6379  ;;  %v9335_v27 = vadd.f32 1.0, %v6378_v39  ;;  %v4886_v39 = vand.u32 2147483647, %v9259_v10 }
 0x556   :  { %v6382_v0 = vpop.eup %6381  ;;  %v4893_v20 = vmul.f32 %v9327_v22, %v9269_v34  ;;  %v4870_v51 = vsel %vm9403_vm0, %v9304_v21, %v4866_v37  ;;  %vm4898_vm1 = vweird.f32 %v9327_v22 }
 0x557   :  { %6387 = vrcp.f32 %v9335_v27  ;;  %v9346_v47 = vadd.f32 1.0, %v6382_v0  ;;  %v9362_v44 = vpop.eup %6383  ;;  %v9386_v0 = vor.u32 1.1754944e-38, %v4888_v60  ;;  %v4843_v14 = vand.u32 2147483648, %v9335_v27 }
 0x558   :  { %6389 = vpow2.f32 %v5890_v16  ;;  %v6386_v61 = vpop.eup %6385  ;;  %v4894_v15 = vsub.f32 1.0, %v4893_v20  ;;  %v4880_v16 = vmul.f32 %v9321_v42, %v4879_v58  ;;  %v4908_v13 = vmul.f32 %v9362_v44, %v9319_v62 }
 0x559   :  { %v2504_v35 = vpop.xlane.xlu2 %2503  ;;  %6391 = vrcp.f32 %v9346_v47  ;;  %v9389_v3 = vadd.f32 1.0, %v6386_v61  ;;  %v4841_v7 = vand.u32 2147483647, %v9335_v27  ;;  %vm9412_vm7 = vcmp.eq.f32.partialorder %v4886_v39, 8.507059e+37 }
 0x55a   :  { %6393 = vpow2.f32 %v5891_v52  ;;  %v2649_v29 = vadd.f32 %v6836_v45, %v2504_v35  ;;  %v4895_v41 = vmul.f32 %v9327_v22, %v4894_v15  ;;  %v4881_v48 = vadd.f32 %v9321_v42, %v4880_v16 }
 0x55b   :  { %6395 = vpow2.f32 %v5892_v46  ;;  %vm4837_vm8 = vweird.f32 %v9335_v27  ;;  %v4909_v58 = vsub.f32 1.0, %v4908_v13  ;;  %v4844_v60 = vor.u32 1.1754944e-38, %v4843_v14 }
 0x55c   :  { %v5893_v54 = vmul.f32 -1.442695, %v2649_v29  ;;  %v4896_v18 = vadd.f32 %v9327_v22, %v4895_v41  ;;  %6397 = vrcp.f32 %v9389_v3  ;;  %vm4842_vm9 = vcmp.eq.f32.partialorder %v4841_v7, 8.507059e+37 }
 0x55d   :  { %v6388_v53 = vpop.eup %6387  ;;  %v4910_v10 = vmul.f32 %v9362_v44, %v4909_v58 }
 0x55e   :  { %v6390_v23 = vpop.eup %6389  ;;  %v4833_v49 = vmul.f32 %v6388_v53, %v9335_v27  ;;  %vm4838_vm3 = vweird.f32 %v6388_v53 }
 0x55f   :  { %v9394_v12 = vadd.f32 1.0, %v6390_v23  ;;  %v9397_v20 = vpop.eup %6391  ;;  %vm4839_vm0 = vmor %vm4837_vm8, %vm4838_vm3  ;;  %v4903_v23 = vand.u32 2147483648, %v9269_v34  ;;  %vm9439_vm8 = vcmp.eq.f32.partialorder %v4901_v8, 8.507059e+37 }
 0x560   :  { %v4834_v56 = vsub.f32 1.0, %v4833_v49  ;;  %v6394_v52 = vpop.eup %6393  ;;  %v4923_v21 = vmul.f32 %v9397_v20, %v9346_v47  ;;  %v4875_v49 = vsel %vm9379_vm6, %v4874_v40, %v4870_v51  ;;  %vm9435_vm3 = vmor %vm4882_vm2, %vm4883_vm13  ;;  %vm9837_vm6 = vcmask 1048512  }
 0x561   :  { %v2507_v35 = vpop.xlane.xlu2 %2506  ;;  %6399 = vrcp.f32 %v9394_v12  ;;  %v6396_v61 = vpop.eup %6395  ;;  %v9425_v15 = vadd.f32 1.0, %v6394_v52  ;;  %v4885_v37 = vsel %vm9435_vm3, %v9321_v42, %v4881_v48  ;;  %v4904_v25 = vor.u32 1.1754944e-38, %v4903_v23 }
 0x562   :  { %v4835_v2 = vmul.f32 %v6388_v53, %v4834_v56  ;;  %v2650_v55 = vadd.f32 %v6836_v45, %v2507_v35  ;;  %6401 = vpow2.f32 %v5893_v54  ;;  %v4924_v43 = vsub.f32 1.0, %v4923_v21  ;;  %v9456_v56 = vpop.eup %6397 }
 0x563   :  { %v9454_v16 = vadd.f32 1.0, %v6396_v61  ;;  %6403 = vrcp.f32 %v9425_v15  ;;  %v5465_v35 = vperm.slane %v4875_v49, %v6921_v5  ;;  %v4911_v5 = vadd.f32 %v9362_v44, %v4910_v10 }
 0x564   :  { %v4836_v28 = vadd.f32 %v6388_v53, %v4835_v2  ;;  %v5894_v39 = vmul.f32 -1.442695, %v2650_v55  ;;  %v4925_v51 = vmul.f32 %v9397_v20, %v4924_v43  ;;  %v4918_v48 = vand.u32 2147483648, %v9319_v62 }
 0x565   :  { %vm4912_vm2 = vweird.f32 %v9319_v62  ;;  %v4933_v23 = vand.u32 2147483648, %v9346_v47 }
 0x566   :  { %v4840_v46 = vsel %vm4839_vm0, %v6388_v53, %v4836_v28  ;;  %vm5505_vm0 = vcmask 1046534   ;;  %6405 = vpow2.f32 %v5894_v39 }
 0x567   :  { %v4845_v27 = vsel %vm4842_vm9, %v4844_v60, %v4840_v46  ;;  %vm9449_vm9 = vmor %vm4897_vm14, %vm4898_vm1  ;;  %v9465_v14 = vpop.eup %6399  ;;  %vm4913_vm14 = vweird.f32 %v9362_v44  ;;  %6407 = vrcp.f32 %v9454_v16  ;;  %v4926_v60 = vadd.f32 %v9397_v20, %v4925_v51 }
 0x568   :  { %v5462_v34 = vperm.slane %v4845_v27, %v7261_v24  ;;  %v4900_v8 = vsel %vm9449_vm9, %v9327_v22, %v4896_v18  ;;  %v6402_v7 = vpop.eup %6401  ;;  %v4890_v22 = vsel %vm9412_vm7, %v9386_v0, %v4885_v37  ;;  %v4938_v0 = vmul.f32 %v9456_v56, %v9389_v3  ;;  %vm9499_vm13 = vmor %vm4912_vm2, %vm4913_vm14 }
 0x569   :  { %v2510_v41 = vpop.xlane.xlu2 %2509  ;;  %v4905_v52 = vsel %vm9439_vm8, %v4904_v25, %v4900_v8  ;;  %v5467_v6 = vperm.slane %v4890_v22, %v6945_v38  ;;  %v4953_v55 = vmul.f32 %v9465_v14, %v9394_v12  ;;  %v9491_v18 = vadd.f32 1.0, %v6402_v7  ;;  %v9493_v28 = vpop.eup %6403 }
 0x56a   :  { %v5463_v42 = vsel %vm9837_vm6, %v5462_v34, %v9368_v11  ;;  %v2651_v13 = vadd.f32 %v6836_v45, %v2510_v41  ;;  %v4916_v11 = vand.u32 2147483647, %v9319_v62  ;;  %v4915_v21 = vsel %vm9499_vm13, %v9362_v44, %v4911_v5 }
 0x56b   :  { %v9470_v2 = vsel %vm5505_vm0, %v5463_v42, %v9041_v26  ;;  %v5464_v26 = vperm.slane %v9371_v17, %v6906_v59  ;;  %v5469_v59 = vperm.slane %v4905_v52, %v6967_v4  ;;  %v4931_v4 = vand.u32 2147483647, %v9346_v47 }
 0x56c   :  { %v5895_v54 = vmul.f32 -1.442695, %v2651_v13  ;;  %vm9503_vm7 = vcmp.eq.f32.partialorder %v4916_v11, 8.507059e+37  ;;  %v6406_v62 = vpop.eup %6405  ;;  %v4919_v46 = vor.u32 1.1754944e-38, %v4918_v48  ;;  %v4939_v27 = vsub.f32 1.0, %v4938_v0 }
 0x56d   :  { %v5466_v58 = vsel %vm5220_vm10, %v5465_v35, %v5464_v26  ;;  %vm4928_vm10 = vweird.f32 %v9397_v20  ;;  %v9515_v49 = vpop.eup %6407  ;;  %vm4927_vm1 = vweird.f32 %v9346_v47  ;;  %v4954_v44 = vsub.f32 1.0, %v4953_v55 }
 0x56e   :  { %6409 = vpow2.f32 %v5895_v54  ;;  %v5468_v29 = vsel %vm5224_vm15, %v5467_v6, %v5466_v58  ;;  %v4920_v34 = vsel %vm9503_vm7, %v4919_v46, %v4915_v21  ;;  %vm9522_vm3 = vmor %vm4927_vm1, %vm4928_vm10  ;;  %v4968_v40 = vmul.f32 %v9493_v28, %v9425_v15 }
 0x56f   :  { %6411 = vrcp.f32 %v9491_v18  ;;  %v9528_v10 = vadd.f32 1.0, %v6406_v62  ;;  %vm9844_vm15 = vcmask 261312   ;;  %v4930_v47 = vsel %vm9522_vm3, %v9397_v20, %v4926_v60 }
 0x570   :  { %v5470_v41 = vsel %vm9844_vm15, %v5469_v59, %v5468_v29  ;;  %vm4932_vm8 = vcmp.eq.f32.partialorder %v4931_v4, 8.507059e+37  ;;  %v4934_v8 = vor.u32 1.1754944e-38, %v4933_v23  ;;  %v4940_v42 = vmul.f32 %v9456_v56, %v4939_v27 }
 0x571   :  { %v2513_v61 = vpop.xlane.xlu2 %2512  ;;  %v5471_v25 = vperm.slane %v4920_v34, %v6989_v32  ;;  %vm4942_vm0 = vweird.f32 %v9389_v3  ;;  %v4955_v7 = vmul.f32 %v9465_v14, %v4954_v44  ;;  %v4983_v22 = vmul.f32 %v9515_v49, %v9454_v16 }
 0x572   :  { %v2652_v39 = vadd.f32 %v6836_v45, %v2513_v61  ;;  %v4935_v11 = vsel %vm4932_vm8, %v4934_v8, %v4930_v47  ;;  %v4969_v54 = vsub.f32 1.0, %v4968_v40  ;;  %v4946_v5 = vand.u32 2147483647, %v9389_v3 }
 0x573   :  { %v4948_v51 = vand.u32 2147483648, %v9389_v3  ;;  %v4961_v32 = vand.u32 2147483647, %v9394_v12  ;;  %v4963_v26 = vand.u32 2147483648, %v9394_v12  ;;  %v4941_v48 = vadd.f32 %v9456_v56, %v4940_v42 }
 0x574   :  { %v6410_v53 = vpop.eup %6409  ;;  %v5896_v43 = vmul.f32 -1.442695, %v2652_v39  ;;  %vm4943_vm9 = vweird.f32 %v9456_v56  ;;  %v5473_v6 = vperm.slane %v4935_v11, %v7016_v1  ;;  %v4956_v55 = vadd.f32 %v9465_v14, %v4955_v7 }
 0x575   :  { %v9535_v13 = vadd.f32 1.0, %v6410_v53  ;;  %v9544_v52 = vpop.eup %6411  ;;  %vm4958_vm6 = vweird.f32 %v9465_v14  ;;  %v4984_v58 = vsub.f32 1.0, %v4983_v22  ;;  %v5472_v17 = vsel %vm5232_vm12, %v5471_v25, %v5470_v41  ;;  %vm9562_vm14 = vmor %vm4942_vm0, %vm4943_vm9 }
 0x576   :  { %6413 = vpow2.f32 %v5896_v43  ;;  %v4970_v38 = vmul.f32 %v9493_v28, %v4969_v54  ;;  %v4998_v62 = vmul.f32 %v9544_v52, %v9491_v18  ;;  %vm9566_vm2 = vcmp.eq.f32.partialorder %v4946_v5, 8.507059e+37 }
 0x577   :  { %6415 = vrcp.f32 %v9528_v10  ;;  %v4949_v60 = vor.u32 1.1754944e-38, %v4948_v51  ;;  %vm4957_vm13 = vweird.f32 %v9394_v12  ;;  %v4945_v46 = vsel %vm9562_vm14, %v9456_v56, %v4941_v48 }
 0x578   :  { %6417 = vrcp.f32 %v9535_v13  ;;  %vm9578_vm12 = vmor %vm4957_vm13, %vm4958_vm6  ;;  %vm9582_vm7 = vcmp.eq.f32.partialorder %v4961_v32, 8.507059e+37  ;;  %v4964_v27 = vor.u32 1.1754944e-38, %v4963_v26  ;;  %v4978_v39 = vand.u32 2147483648, %v9425_v15 }
 0x579   :  { %v2516_v35 = vpop.xlane.xlu1 %2515  ;;  %v5474_v29 = vsel %vm5236_vm4, %v5473_v6, %v5472_v17  ;;  %v4960_v44 = vsel %vm9578_vm12, %v9465_v14, %v4956_v55  ;;  %v4985_v56 = vmul.f32 %v9515_v49, %v4984_v58  ;;  %v4971_v34 = vadd.f32 %v9493_v28, %v4970_v38 }
 0x57a   :  { %v2653_v20 = vadd.f32 %v6836_v45, %v2516_v35  ;;  %vm4973_vm10 = vweird.f32 %v9493_v28  ;;  %v4999_v37 = vsub.f32 1.0, %v4998_v62  ;;  %v4950_v43 = vsel %vm9566_vm2, %v4949_v60, %v4945_v46 }
 0x57b   :  { %vm4972_vm4 = vweird.f32 %v9425_v15  ;;  %v4976_v14 = vand.u32 2147483647, %v9425_v15  ;;  %v4965_v8 = vsel %vm9582_vm7, %v4964_v27, %v4960_v44  ;;  %v4979_v42 = vor.u32 1.1754944e-38, %v4978_v39 }
 0x57c   :  { %v5897_v0 = vmul.f32 -1.442695, %v2653_v20  ;;  %v6414_v59 = vpop.eup %6413  ;;  %v4993_v35 = vand.u32 2147483648, %v9454_v16  ;;  %vm9607_vm1 = vmor %vm4972_vm4, %vm4973_vm10  ;;  %v4986_v7 = vadd.f32 %v9515_v49, %v4985_v56  ;;  %vm4988_vm3 = vweird.f32 %v9515_v49 }
 0x57d   :  { %v9571_v4 = vadd.f32 1.0, %v6414_v59  ;;  %v9573_v61 = vpop.eup %6415  ;;  %v5475_v11 = vperm.slane %v4950_v43, %v7038_v30  ;;  %v4975_v54 = vsel %vm9607_vm1, %v9493_v28, %v4971_v34  ;;  %v5000_v20 = vmul.f32 %v9544_v52, %v4999_v37 }
 0x57e   :  { %6419 = vpow2.f32 %v5897_v0  ;;  %v9593_v53 = vpop.eup %6417  ;;  %v5013_v41 = vmul.f32 %v9573_v61, %v9528_v10  ;;  %vm4987_vm15 = vweird.f32 %v9454_v16  ;;  %v4991_v51 = vand.u32 2147483647, %v9454_v16 }
 0x57f   :  { %6421 = vrcp.f32 %v9571_v4  ;;  %v5028_v15 = vmul.f32 %v9593_v53, %v9535_v13  ;;  %v5477_v26 = vperm.slane %v4965_v8, %v7060_v63  ;;  %vm4977_vm8 = vcmp.eq.f32.partialorder %v4976_v14, 8.507059e+37  ;;  %vm9628_vm0 = vmor %vm4987_vm15, %vm4988_vm3 }
 0x580   :  { %v5014_v32 = vsub.f32 1.0, %v5013_v41  ;;  %v4994_v28 = vor.u32 1.1754944e-38, %v4993_v35  ;;  %v9634_v0 = vsel %vm4977_vm8, %v4979_v42, %v4975_v54  ;;  %v4990_v16 = vsel %vm9628_vm0, %v9515_v49, %v4986_v7 }
 0x581   :  { %v2519_v12 = vpop.xlane.xlu2 %2518  ;;  %v5006_v6 = vand.u32 2147483647, %v9491_v18  ;;  %v5029_v55 = vsub.f32 1.0, %v5028_v15  ;;  %v5001_v63 = vadd.f32 %v9544_v52, %v5000_v20  ;;  %vm5003_vm9 = vweird.f32 %v9544_v52 }
 0x582   :  { %v2654_v40 = vadd.f32 %v6836_v45, %v2519_v12  ;;  %v5008_v58 = vand.u32 2147483648, %v9491_v18  ;;  %v5476_v17 = vsel %vm5240_vm11, %v5475_v11, %v5474_v29  ;;  %vm4992_vm6 = vcmp.eq.f32.partialorder %v4991_v51, 8.507059e+37 }
 0x583   :  { %v5015_v38 = vmul.f32 %v9573_v61, %v5014_v32  ;;  %v9646_v21 = vsel %vm5244_vm5, %v5477_v26, %v5476_v17  ;;  %v9648_v49 = vsel %vm4992_vm6, %v4994_v28, %v4990_v16  ;;  %vm5002_vm14 = vweird.f32 %v9491_v18 }
 0x584   :  { %v6420_v47 = vpop.eup %6419  ;;  %v5898_v25 = vmul.f32 -1.442695, %v2654_v40  ;;  %v5023_v1 = vand.u32 2147483648, %v9528_v10  ;;  %v5479_v46 = vperm.slane %v9634_v0, %v7092_v31  ;;  %vm9654_vm2 = vmor %vm5002_vm14, %vm5003_vm9  ;;  %vm5007_vm11 = vcmp.eq.f32.partialorder %v5006_v6, 8.507059e+37 }
 0x585   :  { %v9615_v22 = vadd.f32 1.0, %v6420_v47  ;;  %v9622_v5 = vpop.eup %6421  ;;  %v5030_v23 = vmul.f32 %v9593_v53, %v5029_v55  ;;  %v5005_v39 = vsel %vm9654_vm2, %v9544_v52, %v5001_v63  ;;  %v5009_v18 = vor.u32 1.1754944e-38, %v5008_v58 }
 0x586   :  { %6423 = vpow2.f32 %v5898_v25  ;;  %v5043_v48 = vmul.f32 %v9622_v5, %v9571_v4  ;;  %v5481_v44 = vperm.slane %v9648_v49, %v7114_v33  ;;  %v5016_v56 = vadd.f32 %v9573_v61, %v5015_v38 }
 0x587   :  { %6425 = vrcp.f32 %v9615_v22  ;;  %vm5018_vm5 = vweird.f32 %v9573_v61  ;;  %vm5017_vm13 = vweird.f32 %v9528_v10  ;;  %v5021_v34 = vand.u32 2147483647, %v9528_v10 }
 0x588   :  { %v5044_v59 = vsub.f32 1.0, %v5043_v48  ;;  %v5024_v37 = vor.u32 1.1754944e-38, %v5023_v1  ;;  %v5010_v40 = vsel %vm5007_vm11, %v5009_v18, %v5005_v39  ;;  %v5031_v43 = vadd.f32 %v9593_v53, %v5030_v23  ;;  %vm9676_vm10 = vmor %vm5017_vm13, %vm5018_vm5 }
 0x589   :  { %vm5032_vm12 = vweird.f32 %v9535_v13  ;;  %vm5033_vm7 = vweird.f32 %v9593_v53  ;;  %v5038_v14 = vand.u32 2147483648, %v9535_v13  ;;  %vm5048_vm4 = vweird.f32 %v9622_v5 }
 0x58a   :  { %v5045_v12 = vmul.f32 %v9622_v5, %v5044_v59  ;;  %v5020_v47 = vsel %vm9676_vm10, %v9573_v61, %v5016_v56  ;;  %v5036_v8 = vand.u32 2147483647, %v9535_v13  ;;  %v5053_v42 = vand.u32 2147483648, %v9571_v4  ;;  %vm9688_vm3 = vmor %vm5032_vm12, %vm5033_vm7 }
 0x58b   :  { %vm5047_vm15 = vweird.f32 %v9571_v4  ;;  %v5051_v25 = vand.u32 2147483647, %v9571_v4  ;;  %v5068_v7 = vand.u32 2147483648, %v9615_v22  ;;  %vm5022_vm8 = vcmp.eq.f32.partialorder %v5021_v34, 8.507059e+37 }
 0x58c   :  { %v6424_v62 = vpop.eup %6423  ;;  %v5046_v41 = vadd.f32 %v9622_v5, %v5045_v12  ;;  %v5035_v13 = vsel %vm9688_vm3, %v9593_v53, %v5031_v43  ;;  %vm9698_vm0 = vmor %vm5047_vm15, %vm5048_vm4  ;;  %vm5062_vm9 = vweird.f32 %v9615_v22  ;;  %v5066_v11 = vand.u32 2147483647, %v9615_v22 }
 0x58d   :  { %v6426_v60 = vpop.eup %6425  ;;  %v9659_v27 = vadd.f32 1.0, %v6424_v62  ;;  %v5025_v54 = vsel %vm5022_vm8, %v5024_v37, %v5020_v47  ;;  %v5039_v20 = vor.u32 1.1754944e-38, %v5038_v14  ;;  %v5483_v53 = vperm.slane %v5010_v40, %v7136_v36 }
 0x58e   :  { %v5058_v29 = vmul.f32 %v6426_v60, %v9615_v22  ;;  %vm5063_vm1 = vweird.f32 %v6426_v60  ;;  %v5050_v4 = vsel %vm9698_vm0, %v9622_v5, %v5046_v41  ;;  %vm5037_vm14 = vcmp.eq.f32.partialorder %v5036_v8, 8.507059e+37 }
 0x58f   :  { %6427 = vrcp.f32 %v9659_v27  ;;  %vm5064_vm6 = vmor %vm5062_vm9, %vm5063_vm1  ;;  %v5054_v32 = vor.u32 1.1754944e-38, %v5053_v42  ;;  %v5040_v30 = vsel %vm5037_vm14, %v5039_v20, %v5035_v13  ;;  %vm5052_vm2 = vcmp.eq.f32.partialorder %v5051_v25, 8.507059e+37 }
 0x590   :  { %v5059_v52 = vsub.f32 1.0, %v5058_v29  ;;  %v5069_v28 = vor.u32 1.1754944e-38, %v5068_v7  ;;  %v5485_v22 = vperm.slane %v5025_v54, %v7162_v9  ;;  %vm5067_vm11 = vcmp.eq.f32.partialorder %v5066_v11, 8.507059e+37 }
 0x591   :  { %v5055_v16 = vsel %vm5052_vm2, %v5054_v32, %v5050_v4  ;;  %v5083_v6 = vand.u32 2147483648, %v9659_v27  ;;  %v5081_v63 = vand.u32 2147483647, %v9659_v27  ;;  %vm9865_vm13 = vcmask 589312  }
 0x592   :  { %v5060_v10 = vmul.f32 %v6426_v60, %v5059_v52  ;;  %v5480_v36 = vsel %vm9865_vm13, %v5479_v46, %v9646_v21  ;;  %v5487_v58 = vperm.slane %v5040_v30, %v7188_v50  ;;  %vm9866_vm12 = vcmask 654912  }
 0x593   :  { %v5482_v59 = vsel %vm9866_vm12, %v5481_v44, %v5480_v36  ;;  %v5489_v9 = vperm.slane %v5055_v16, %v7214_v19  ;;  %vm5077_vm7 = vweird.f32 %v9659_v27  ;;  %vm9867_vm10 = vcmask 720512  }
 0x594   :  { %v5061_v45 = vadd.f32 %v6426_v60, %v5060_v10  ;;  %v5484_v38 = vsel %vm9867_vm10, %v5483_v53, %v5482_v59  ;;  %v5084_v49 = vor.u32 1.1754944e-38, %v5083_v6  ;;  %vm9868_vm1 = vcmask 786112  }
 0x595   :  { %v6428_v15 = vpop.eup %6427  ;;  %v5486_v1 = vsel %vm9868_vm1, %v5485_v22, %v5484_v38  ;;  %vm5082_vm3 = vcmp.eq.f32.partialorder %v5081_v63, 8.507059e+37  ;;  %vm9869_vm15 = vcmask 851712   ;;  %vm9870_vm8 = vcmask 917312  }
 0x596   :  { %v5073_v51 = vmul.f32 %v6428_v15, %v9659_v27  ;;  %v5065_v26 = vsel %vm5064_vm6, %v6426_v60, %v5061_v45  ;;  %vm5078_vm5 = vweird.f32 %v6428_v15  ;;  %v5488_v0 = vsel %vm9869_vm15, %v5487_v58, %v5486_v1 }
 0x597   :  { %v5070_v5 = vsel %vm5067_vm11, %v5069_v28, %v5065_v26  ;;  %vm5079_vm4 = vmor %vm5077_vm7, %vm5078_vm5  ;;  %v5490_v21 = vsel %vm9870_vm8, %v5489_v9, %v5488_v0  ;;  %vm5507_vm0 = vcmask 1047559   ;;  %vm9871_vm9 = vcmask 982912  }
 0x598   :  { %v5074_v48 = vsub.f32 1.0, %v5073_v51  ;;  %v5491_v62 = vperm.slane %v5070_v5, %v7240_v57  ;;  %vm9872_vm6 = vcmask 1048512  }
 0x59a   :  { %v5075_v55 = vmul.f32 %v6428_v15, %v5074_v48  ;;  %v5492_v60 = vsel %vm9871_vm9, %v5491_v62, %v5490_v21 }
 0x59c   :  { %v5076_v17 = vadd.f32 %v6428_v15, %v5075_v55 }
 0x59e   :  { %v5080_v31 = vsel %vm5079_vm4, %v6428_v15, %v5076_v17 }
 0x59f   :  { %v5085_v50 = vsel %vm5082_vm3, %v5084_v49, %v5080_v31 }
 0x5a0   :  { %v5493_v19 = vperm.slane %v5085_v50, %v7261_v24 }
 0x5a2   :  { %v5494_v46 = vsel %vm9872_vm6, %v5493_v19, %v5492_v60 }
 0x5a3   :  { %v5508_v57 = vsel %vm5507_vm0, %v5494_v46, %v9470_v2 }
 0x5a4   :  { %5510 = vst [vmem:[%s9741_s7] sm:$0xff] %v5508_v57 }

</bundles_post_ra>
